<compile_context>
chip_gen: v7x
topology: tpu7x:2x2x1
jax: 0.10.0
libtpu: 0.0.40
codegen_flags: <defaults>
</compile_context>

<pallas_src>
import functools

import jax
import jax.numpy as jnp
from jax import lax
from jax.experimental import pallas as pl
from jax.experimental.pallas import tpu as pltpu

# Model hyperparameters (match the PyTorch module)
N_EMBD = 384
N_HEAD = 6
N_LAYER = 6
HEAD_SIZE = N_EMBD // N_HEAD
BLOCK_SIZE = 256          # max context length (positional table size)
EPS = 1e-5                # nn.LayerNorm default
NEG_INF = -1e30           # additive causal mask value


# ----------------------------- shared math helpers -----------------------------

def _layernorm(x, w, b):
    mu = jnp.mean(x, axis=-1, keepdims=True)
    var = jnp.mean((x - mu) ** 2, axis=-1, keepdims=True)
    return (x - mu) * lax.rsqrt(var + EPS) * w + b


def _softmax(x):
    m = jnp.max(x, axis=-1, keepdims=True)
    e = jnp.exp(x - m)
    return e / jnp.sum(e, axis=-1, keepdims=True)


# ----------------------------- Pallas kernels -----------------------------

def transformer_blocks_kernel(batch,
                              x_ref, ln1w_ref, ln1b_ref, wq_ref, wk_ref, wv_ref,
                              wo_ref, bo_ref, ln2w_ref, ln2b_ref,
                              w1_ref, b1_ref, w2_ref, b2_ref,
                              o_ref, mask_ref):
    """All N_LAYER pre-norm transformer blocks, one layer per grid step.

    Activations are a flattened (M=B*T, C) fp32 residual stream that lives in
    the output VMEM block across grid steps (accumulator pattern).
    """
    M, C = o_ref.shape
    T = M // batch

    @pl.when(pl.program_id(0) == 0)
    def _init():
        o_ref[...] = x_ref[...]
        # Build the additive causal mask once; reuse across layers/heads.
        row = lax.broadcasted_iota(jnp.int32, (T, T), 0)
        col = lax.broadcasted_iota(jnp.int32, (T, T), 1)
        mask_ref[...] = jnp.where(col <= row, 0.0, NEG_INF).astype(jnp.float32)

    x = o_ref[...]                                             # (M, C) fp32
    mask = mask_ref[...]                                       # (T, T) fp32

    # ---- x = x + MHA(LN1(x)) ----
    h = _layernorm(x, ln1w_ref[0, 0], ln1b_ref[0, 0]).astype(jnp.bfloat16)
    # attention scale is pre-folded into wq at init time
    q = jnp.dot(h, wq_ref[0], preferred_element_type=jnp.float32)
    k = jnp.dot(h, wk_ref[0], preferred_element_type=jnp.float32)
    v = jnp.dot(h, wv_ref[0], preferred_element_type=jnp.float32)
    qb = q.reshape(batch, T, C).astype(jnp.bfloat16)
    kb = k.reshape(batch, T, C).astype(jnp.bfloat16)
    vb = v.reshape(batch, T, C).astype(jnp.bfloat16)

    sa = None
    for hi in range(N_HEAD):                                   # static unroll
        s0 = hi * HEAD_SIZE
        qh = qb[:, :, s0:s0 + HEAD_SIZE]
        kh = kb[:, :, s0:s0 + HEAD_SIZE]
        vh = vb[:, :, s0:s0 + HEAD_SIZE]
        # batched q @ k^T without an explicit transpose
        att = jnp.einsum("bqd,bkd->bqk", qh, kh,
                         preferred_element_type=jnp.float32) + mask
        att = _softmax(att).astype(jnp.bfloat16)
        ho = jnp.einsum("bqk,bkd->bqd", att, vh,
                        preferred_element_type=jnp.float32)    # (B, T, HS)
        # project through this head's slice of W_o and accumulate (no concat)
        contrib = jnp.dot(ho.reshape(M, HEAD_SIZE).astype(jnp.bfloat16),
                          wo_ref[0, s0:s0 + HEAD_SIZE, :],
                          preferred_element_type=jnp.float32)
        sa = contrib if sa is None else sa + contrib
    x = x + sa + bo_ref[0, 0]

    # ---- x = x + MLP(LN2(x)) ----
    h2 = _layernorm(x, ln2w_ref[0, 0], ln2b_ref[0, 0]).astype(jnp.bfloat16)
    ff = jnp.dot(h2, w1_ref[0], preferred_element_type=jnp.float32) + b1_ref[0, 0]
    ff = jnp.maximum(ff, 0.0).astype(jnp.bfloat16)             # ReLU
    ff = jnp.dot(ff, w2_ref[0], preferred_element_type=jnp.float32) + b2_ref[0, 0]
    x = x + ff

    o_ref[...] = x


def lm_head_kernel(x_ref, wh_ref, bh_ref, o_ref):
    """logits tile = x @ W_head + b_head (no final LayerNorm; see note above)."""
    h = x_ref[...].astype(jnp.bfloat16)
    o_ref[...] = (jnp.dot(h, wh_ref[...], preferred_element_type=jnp.float32)
                  + bh_ref[0])


# ----------------------------- wrappers -----------------------------

def run_blocks(x2d, p, batch):
    """Run all N_LAYER blocks in a single fused pallas_call."""
    M, C = x2d.shape
    H = 4 * C
    T = M // batch

    def mat(r, c):
        return pl.BlockSpec((1, r, c), lambda l: (l, 0, 0))

    def vec(c):
        return pl.BlockSpec((1, 1, c), lambda l: (l, 0, 0))

    act = pl.BlockSpec((M, C), lambda l: (0, 0))   # resident across layers

    kernel = functools.partial(transformer_blocks_kernel, batch)
    return pl.pallas_call(
        kernel,
        out_shape=jax.ShapeDtypeStruct((M, C), jnp.float32),
        grid=(N_LAYER,),
        in_specs=[act,
                  vec(C), vec(C),                     # ln1 w, b
                  mat(C, C), mat(C, C), mat(C, C),    # wq, wk, wv
                  mat(C, C), vec(C),                  # wo, bo
                  vec(C), vec(C),                     # ln2 w, b
                  mat(C, H), vec(H),                  # w1, b1
                  mat(H, C), vec(C)],                 # w2, b2
        out_specs=act,
        scratch_shapes=[pltpu.VMEM((T, T), jnp.float32)],   # causal mask
        compiler_params=pltpu.CompilerParams(
            dimension_semantics=("arbitrary",)),
    )(x2d, p["ln1_w"], p["ln1_b"], p["wq"], p["wk"], p["wv"], p["wo"], p["bo"],
      p["ln2_w"], p["ln2_b"], p["w1"], p["b1"], p["w2"], p["b2"])


def run_lm_head(x2d, p):
    """Vocab-tiled final projection (lane-dense, multiple-of-128 tiles)."""
    M, C = x2d.shape
    V = p["w_head"].shape[1]
    bm = M if M <= 512 else 256
    bn = V if V <= 2048 else 512
    grid = (pl.cdiv(M, bm), pl.cdiv(V, bn))
    return pl.pallas_call(
        lm_head_kernel,
        out_shape=jax.ShapeDtypeStruct((M, V), jnp.float32),
        grid=grid,
        in_specs=[pl.BlockSpec((bm, C), lambda i, j: (i, 0)),
                  pl.BlockSpec((C, bn), lambda i, j: (0, j)),
                  pl.BlockSpec((1, bn), lambda i, j: (0, j))],
        out_specs=pl.BlockSpec((bm, bn), lambda i, j: (i, j)),
        compiler_params=pltpu.CompilerParams(
            dimension_semantics=("parallel", "parallel")),
    )(x2d, p["w_head"], p["b_head"])


def forward(idx, params):
    """BigramLanguageModel.forward(idx, targets=None) -> (logits, None)."""
    B, T = idx.shape
    # Embedding gathers are glue (plain JAX); the matmul/attention hot path is
    # in the Pallas kernels above.
    x = (params["tok_table"][idx] + params["pos_table"][:T]).reshape(B * T, N_EMBD)
    x = run_blocks(x, params, B)                      # (B*T, C)
    logits = run_lm_head(x, params)                   # (B*T, V)
    # TODO(synk): targets/cross-entropy loss path not implemented (targets=None).
    return logits.reshape(B, T, -1), None


# ----------------------------- parameter init -----------------------------

def init_params(key, vocab_size):
    def nrm(k, shape, std=0.02):
        return jax.random.normal(k, shape, jnp.float32) * std

    C, H = N_EMBD, 4 * N_EMBD
    k = jax.random.split(key, 13)
    scale = HEAD_SIZE ** -0.5   # attention scale folded into wq
    params = {
        "tok_table": nrm(k[0], (vocab_size, C)),
        "pos_table": nrm(k[1], (BLOCK_SIZE, C)),
        # Per-layer parameters stacked along a leading N_LAYER axis.
        # MXU weights stored in bf16; LayerNorm params and biases in fp32.
        "ln1_w": jnp.ones((N_LAYER, 1, C), jnp.float32),
        "ln1_b": jnp.zeros((N_LAYER, 1, C), jnp.float32),
        "wq": (nrm(k[2], (N_LAYER, C, C)) * scale).astype(jnp.bfloat16),
        "wk": nrm(k[3], (N_LAYER, C, C)).astype(jnp.bfloat16),
        "wv": nrm(k[4], (N_LAYER, C, C)).astype(jnp.bfloat16),
        "wo": nrm(k[5], (N_LAYER, C, C)).astype(jnp.bfloat16),
        "bo": nrm(k[6], (N_LAYER, 1, C)),
        "ln2_w": jnp.ones((N_LAYER, 1, C), jnp.float32),
        "ln2_b": jnp.zeros((N_LAYER, 1, C), jnp.float32),
        "w1": nrm(k[7], (N_LAYER, C, H)).astype(jnp.bfloat16),
        "b1": nrm(k[8], (N_LAYER, 1, H)),
        "w2": nrm(k[9], (N_LAYER, H, C)).astype(jnp.bfloat16),
        "b2": nrm(k[10], (N_LAYER, 1, C)),
        "w_head": nrm(k[11], (C, vocab_size)).astype(jnp.bfloat16),
        "b_head": nrm(k[12], (1, vocab_size)),
    }
    return params


# ----------------------------- pure-JAX reference -----------------------------

def ref_forward(idx, params):
    """Pure-JAX reference mirroring the kernel's bf16/fp32 mixed precision."""
    B, T = idx.shape
    C = N_EMBD
    x = (params["tok_table"][idx] + params["pos_table"][:T]).reshape(B * T, C)
    row = jnp.arange(T)[:, None]
    col = jnp.arange(T)[None, :]
    mask = jnp.where(col <= row, 0.0, NEG_INF).astype(jnp.float32)

    for l in range(N_LAYER):
        h = _layernorm(x, params["ln1_w"][l, 0], params["ln1_b"][l, 0]).astype(jnp.bfloat16)
        q = jnp.dot(h, params["wq"][l], preferred_element_type=jnp.float32)
        k = jnp.dot(h, params["wk"][l], preferred_element_type=jnp.float32)
        v = jnp.dot(h, params["wv"][l], preferred_element_type=jnp.float32)
        qb = q.reshape(B, T, C).astype(jnp.bfloat16)
        kb = k.reshape(B, T, C).astype(jnp.bfloat16)
        vb = v.reshape(B, T, C).astype(jnp.bfloat16)
        sa = None
        for hi in range(N_HEAD):
            s0 = hi * HEAD_SIZE
            att = jnp.einsum("bqd,bkd->bqk",
                             qb[..., s0:s0 + HEAD_SIZE], kb[..., s0:s0 + HEAD_SIZE],
                             preferred_element_type=jnp.float32) + mask
            att = _softmax(att).astype(jnp.bfloat16)
            ho = jnp.einsum("bqk,bkd->bqd", att, vb[..., s0:s0 + HEAD_SIZE],
                            preferred_element_type=jnp.float32)
            contrib = jnp.dot(ho.reshape(B * T, HEAD_SIZE).astype(jnp.bfloat16),
                              params["wo"][l, s0:s0 + HEAD_SIZE, :],
                              preferred_element_type=jnp.float32)
            sa = contrib if sa is None else sa + contrib
        x = x + sa + params["bo"][l, 0]

        h2 = _layernorm(x, params["ln2_w"][l, 0], params["ln2_b"][l, 0]).astype(jnp.bfloat16)
        ff = jnp.dot(h2, params["w1"][l], preferred_element_type=jnp.float32) + params["b1"][l, 0]
        ff = jnp.maximum(ff, 0.0).astype(jnp.bfloat16)
        ff = jnp.dot(ff, params["w2"][l], preferred_element_type=jnp.float32) + params["b2"][l, 0]
        x = x + ff

    logits = (jnp.dot(x.astype(jnp.bfloat16), params["w_head"],
                      preferred_element_type=jnp.float32) + params["b_head"][0])
    return logits.reshape(B, T, -1)


# ----------------------------- main -----------------------------

if __name__ == "__main__":
    VOCAB = 128
    B, T = 2, 16

    key = jax.random.PRNGKey(0)
    kp, ki = jax.random.split(key)
    params = init_params(kp, VOCAB)
    idx = jax.random.randint(ki, (B, T), 0, VOCAB, dtype=jnp.int32)

    logits, loss = forward(idx, params)
    logits = jax.block_until_ready(logits)

    assert logits.shape == (B, T, VOCAB), logits.shape
    assert loss is None

    ref = jax.block_until_ready(ref_forward(idx, params))
    max_err = float(jnp.max(jnp.abs(logits - ref)))
    assert jnp.allclose(logits, ref, atol=2e-3, rtol=2e-3), max_err

    print("KERNEL_OK")
</pallas_src>

<mosaic_0001>
module attributes {stable_mosaic.version = 11 : i64} {
  func.func @transformer_blocks_kernel(%arg0: i32, %arg1: memref<32x384xf32, #tpu.memory_space<vmem>>, %arg2: memref<1x1x384xf32, #tpu.memory_space<vmem>>, %arg3: memref<1x1x384xf32, #tpu.memory_space<vmem>>, %arg4: memref<1x384x384xbf16, #tpu.memory_space<vmem>>, %arg5: memref<1x384x384xbf16, #tpu.memory_space<vmem>>, %arg6: memref<1x384x384xbf16, #tpu.memory_space<vmem>>, %arg7: memref<1x384x384xbf16, #tpu.memory_space<vmem>>, %arg8: memref<1x1x384xf32, #tpu.memory_space<vmem>>, %arg9: memref<1x1x384xf32, #tpu.memory_space<vmem>>, %arg10: memref<1x1x384xf32, #tpu.memory_space<vmem>>, %arg11: memref<1x384x1536xbf16, #tpu.memory_space<vmem>>, %arg12: memref<1x1x1536xf32, #tpu.memory_space<vmem>>, %arg13: memref<1x1536x384xbf16, #tpu.memory_space<vmem>>, %arg14: memref<1x1x384xf32, #tpu.memory_space<vmem>>, %arg15: memref<32x384xf32, #tpu.memory_space<vmem>>, %arg16: memref<16x16xf32, #tpu.memory_space<vmem>>) attributes {dimension_semantics = [#tpu.dimension_semantics<arbitrary>], iteration_bounds = array<i64: 6>, scalar_prefetch = 0 : i64, scratch_operands = 1 : i64, tpu.core_type = #tpu.core_type<tc>, window_params = [{pipeline_mode = #tpu.pipeline_mode<synchronous>, transform_indices = @transform_0, window_bounds = array<i64: 32, 384>}, {transform_indices = @transform_1, window_bounds = array<i64: 1, 1, 384>}, {transform_indices = @transform_2, window_bounds = array<i64: 1, 1, 384>}, {transform_indices = @transform_3, window_bounds = array<i64: 1, 384, 384>}, {transform_indices = @transform_4, window_bounds = array<i64: 1, 384, 384>}, {transform_indices = @transform_5, window_bounds = array<i64: 1, 384, 384>}, {transform_indices = @transform_6, window_bounds = array<i64: 1, 384, 384>}, {transform_indices = @transform_7, window_bounds = array<i64: 1, 1, 384>}, {transform_indices = @transform_8, window_bounds = array<i64: 1, 1, 384>}, {transform_indices = @transform_9, window_bounds = array<i64: 1, 1, 384>}, {transform_indices = @transform_10, window_bounds = array<i64: 1, 384, 1536>}, {transform_indices = @transform_11, window_bounds = array<i64: 1, 1, 1536>}, {transform_indices = @transform_12, window_bounds = array<i64: 1, 1536, 384>}, {transform_indices = @transform_13, window_bounds = array<i64: 1, 1, 384>}, {pipeline_mode = #tpu.pipeline_mode<synchronous>, transform_indices = @transform_14, window_bounds = array<i64: 32, 384>}]} {
    %c0_i32 = arith.constant 0 : i32
    %0 = arith.cmpi eq, %arg0, %c0_i32 : i32
    %1 = arith.extui %0 : i1 to i32
    %c0_i32_0 = arith.constant 0 : i32
    %2 = arith.cmpi ne, %1, %c0_i32_0 : i32
    scf.if %2 {
      %c0_100 = arith.constant 0 : index
      %c0_101 = arith.constant 0 : index
      %248 = vector.load %arg1[%c0_100, %c0_101] : memref<32x384xf32, #tpu.memory_space<vmem>>, vector<32x384xf32>
      %c0_102 = arith.constant 0 : index
      %c0_103 = arith.constant 0 : index
      %249 = vector.load %arg15[%c0_102, %c0_103] : memref<32x384xf32, #tpu.memory_space<vmem>>, vector<32x384xf32>
      tpu.vector_store %arg15[%c0_102, %c0_103], %248 {strides = array<i32>} : memref<32x384xf32, #tpu.memory_space<vmem>>, vector<32x384xf32>,
      %250 = tpu.iota {dimensions = array<i32: 0>} : vector<16x16xi32>
      %251 = tpu.iota {dimensions = array<i32: 1>} : vector<16x16xi32>
      %252 = arith.cmpi sle, %251, %250 : vector<16x16xi32>
      %cst_104 = arith.constant 0.000000e+00 : f32
      %cst_105 = arith.constant -1.000000e+30 : f32
      %253 = vector.broadcast %cst_104 : f32 to vector<16x16xf32>
      %254 = vector.broadcast %cst_105 : f32 to vector<16x16xf32>
      %255 = arith.select %252, %253, %254 : vector<16x16xi1>, vector<16x16xf32>
      %c0_106 = arith.constant 0 : index
      %c0_107 = arith.constant 0 : index
      %256 = vector.load %arg16[%c0_106, %c0_107] : memref<16x16xf32, #tpu.memory_space<vmem>>, vector<16x16xf32>
      tpu.vector_store %arg16[%c0_106, %c0_107], %255 {strides = array<i32>} : memref<16x16xf32, #tpu.memory_space<vmem>>, vector<16x16xf32>,
    } else {
    }
    %c0 = arith.constant 0 : index
    %c0_1 = arith.constant 0 : index
    %3 = vector.load %arg15[%c0, %c0_1] : memref<32x384xf32, #tpu.memory_space<vmem>>, vector<32x384xf32>
    %c0_2 = arith.constant 0 : index
    %c0_3 = arith.constant 0 : index
    %4 = vector.load %arg16[%c0_2, %c0_3] : memref<16x16xf32, #tpu.memory_space<vmem>>, vector<16x16xf32>
    %c0_4 = arith.constant 0 : index
    %c0_5 = arith.constant 0 : index
    %c0_6 = arith.constant 0 : index
    %5 = vector.load %arg2[%c0_4, %c0_5, %c0_6] : memref<1x1x384xf32, #tpu.memory_space<vmem>>, vector<1x1x384xf32>
    %6 = vector.shape_cast %5 : vector<1x1x384xf32> to vector<384xf32>
    %c0_7 = arith.constant 0 : index
    %c0_8 = arith.constant 0 : index
    %c0_9 = arith.constant 0 : index
    %7 = vector.load %arg3[%c0_7, %c0_8, %c0_9] : memref<1x1x384xf32, #tpu.memory_space<vmem>>, vector<1x1x384xf32>
    %8 = vector.shape_cast %7 : vector<1x1x384xf32> to vector<384xf32>
    %cst = arith.constant dense<0.000000e+00> : vector<32xf32>
    %9 = vector.multi_reduction <add>, %3, %cst [1] : vector<32x384xf32> to vector<32xf32>
    %10 = vector.shape_cast %9 : vector<32xf32> to vector<32x1xf32>
    %cst_10 = arith.constant 3.840000e+02 : f32
    %11 = vector.broadcast %cst_10 : f32 to vector<32x1xf32>
    %12 = arith.divf %10, %11 : vector<32x1xf32>
    %13 = vector.broadcast %12 : vector<32x1xf32> to vector<32x384xf32>
    %14 = arith.subf %3, %13 : vector<32x384xf32>
    %15 = arith.mulf %14, %14 : vector<32x384xf32>
    %cst_11 = arith.constant dense<0.000000e+00> : vector<32xf32>
    %16 = vector.multi_reduction <add>, %15, %cst_11 [1] : vector<32x384xf32> to vector<32xf32>
    %17 = vector.shape_cast %16 : vector<32xf32> to vector<32x1xf32>
    %cst_12 = arith.constant 3.840000e+02 : f32
    %18 = vector.broadcast %cst_12 : f32 to vector<32x1xf32>
    %19 = arith.divf %17, %18 : vector<32x1xf32>
    %20 = vector.broadcast %12 : vector<32x1xf32> to vector<32x384xf32>
    %21 = arith.subf %3, %20 : vector<32x384xf32>
    %cst_13 = arith.constant 9.99999974E-6 : f32
    %22 = vector.broadcast %cst_13 : f32 to vector<32x1xf32>
    %23 = arith.addf %19, %22 : vector<32x1xf32>
    %24 = math.rsqrt %23 : vector<32x1xf32>
    %25 = vector.broadcast %24 : vector<32x1xf32> to vector<32x384xf32>
    %26 = arith.mulf %21, %25 : vector<32x384xf32>
    %27 = vector.shape_cast %6 : vector<384xf32> to vector<1x384xf32>
    %28 = vector.broadcast %27 : vector<1x384xf32> to vector<32x384xf32>
    %29 = arith.mulf %26, %28 : vector<32x384xf32>
    %30 = vector.shape_cast %8 : vector<384xf32> to vector<1x384xf32>
    %31 = vector.broadcast %30 : vector<1x384xf32> to vector<32x384xf32>
    %32 = arith.addf %29, %31 : vector<32x384xf32>
    %33 = arith.truncf %32 : vector<32x384xf32> to vector<32x384xbf16>
    %c0_14 = arith.constant 0 : index
    %c0_15 = arith.constant 0 : index
    %c0_16 = arith.constant 0 : index
    %34 = vector.load %arg4[%c0_14, %c0_15, %c0_16] : memref<1x384x384xbf16, #tpu.memory_space<vmem>>, vector<1x384x384xbf16>
    %35 = vector.shape_cast %34 : vector<1x384x384xbf16> to vector<384x384xbf16>
    %cst_17 = arith.constant dense<0.000000e+00> : vector<32x384xf32>
    %36 = tpu.matmul %33, %35, %cst_17 {dimension_numbers = #tpu.dot_dimension_numbers<[1], [0], [0], [1], [0, 0, 1, 1], [], []>} : vector<32x384xbf16>, vector<384x384xbf16>, vector<32x384xf32> -> vector<32x384xf32>
    %c0_18 = arith.constant 0 : index
    %c0_19 = arith.constant 0 : index
    %c0_20 = arith.constant 0 : index
    %37 = vector.load %arg5[%c0_18, %c0_19, %c0_20] : memref<1x384x384xbf16, #tpu.memory_space<vmem>>, vector<1x384x384xbf16>
    %38 = vector.shape_cast %37 : vector<1x384x384xbf16> to vector<384x384xbf16>
    %cst_21 = arith.constant dense<0.000000e+00> : vector<32x384xf32>
    %39 = tpu.matmul %33, %38, %cst_21 {dimension_numbers = #tpu.dot_dimension_numbers<[1], [0], [0], [1], [0, 0, 1, 1], [], []>} : vector<32x384xbf16>, vector<384x384xbf16>, vector<32x384xf32> -> vector<32x384xf32>
    %c0_22 = arith.constant 0 : index
    %c0_23 = arith.constant 0 : index
    %c0_24 = arith.constant 0 : index
    %40 = vector.load %arg6[%c0_22, %c0_23, %c0_24] : memref<1x384x384xbf16, #tpu.memory_space<vmem>>, vector<1x384x384xbf16>
    %41 = vector.shape_cast %40 : vector<1x384x384xbf16> to vector<384x384xbf16>
    %cst_25 = arith.constant dense<0.000000e+00> : vector<32x384xf32>
    %42 = tpu.matmul %33, %41, %cst_25 {dimension_numbers = #tpu.dot_dimension_numbers<[1], [0], [0], [1], [0, 0, 1, 1], [], []>} : vector<32x384xbf16>, vector<384x384xbf16>, vector<32x384xf32> -> vector<32x384xf32>
    %43 = vector.shape_cast %36 : vector<32x384xf32> to vector<2x16x384xf32>
    %44 = arith.truncf %43 : vector<2x16x384xf32> to vector<2x16x384xbf16>
    %45 = vector.shape_cast %39 : vector<32x384xf32> to vector<2x16x384xf32>
    %46 = arith.truncf %45 : vector<2x16x384xf32> to vector<2x16x384xbf16>
    %47 = vector.shape_cast %42 : vector<32x384xf32> to vector<2x16x384xf32>
    %48 = arith.truncf %47 : vector<2x16x384xf32> to vector<2x16x384xbf16>
    %49 = vector.extract_strided_slice %44 {offsets = [0, 0, 0], sizes = [2, 16, 64], strides = [1, 1, 1]} : vector<2x16x384xbf16> to vector<2x16x64xbf16>
    %50 = vector.extract_strided_slice %46 {offsets = [0, 0, 0], sizes = [2, 16, 64], strides = [1, 1, 1]} : vector<2x16x384xbf16> to vector<2x16x64xbf16>
    %51 = vector.extract_strided_slice %48 {offsets = [0, 0, 0], sizes = [2, 16, 64], strides = [1, 1, 1]} : vector<2x16x384xbf16> to vector<2x16x64xbf16>
    "tpu.trace_start"() <{level = 10 : i32, message = "bqd,bkd->bqk"}> : () -> ()
    %cst_26 = arith.constant dense<0.000000e+00> : vector<2x16x16xf32>
    %52 = tpu.matmul %49, %50, %cst_26 {dimension_numbers = #tpu.dot_dimension_numbers<[2], [2], [1], [1], [0, 0, 0, 1, 1, 1], [0], [0]>} : vector<2x16x64xbf16>, vector<2x16x64xbf16>, vector<2x16x16xf32> -> vector<2x16x16xf32>
    "tpu.trace_stop"() : () -> ()
    %53 = vector.shape_cast %4 : vector<16x16xf32> to vector<1x16x16xf32>
    %54 = vector.broadcast %53 : vector<1x16x16xf32> to vector<2x16x16xf32>
    %55 = arith.addf %52, %54 : vector<2x16x16xf32>
    %cst_27 = arith.constant dense<0xFF800000> : vector<2x16xf32>
    %56 = vector.multi_reduction <maximumf>, %55, %cst_27 [2] : vector<2x16x16xf32> to vector<2x16xf32>
    %57 = vector.shape_cast %56 : vector<2x16xf32> to vector<2x16x1xf32>
    %58 = vector.broadcast %57 : vector<2x16x1xf32> to vector<2x16x16xf32>
    %59 = arith.subf %55, %58 : vector<2x16x16xf32>
    %60 = math.exp %59 : vector<2x16x16xf32>
    %cst_28 = arith.constant dense<0.000000e+00> : vector<2x16xf32>
    %61 = vector.multi_reduction <add>, %60, %cst_28 [2] : vector<2x16x16xf32> to vector<2x16xf32>
    %62 = vector.shape_cast %61 : vector<2x16xf32> to vector<2x16x1xf32>
    %63 = vector.broadcast %62 : vector<2x16x1xf32> to vector<2x16x16xf32>
    %64 = arith.divf %60, %63 : vector<2x16x16xf32>
    %65 = arith.truncf %64 : vector<2x16x16xf32> to vector<2x16x16xbf16>
    "tpu.trace_start"() <{level = 10 : i32, message = "bqk,bkd->bqd"}> : () -> ()
    %cst_29 = arith.constant dense<0.000000e+00> : vector<2x16x64xf32>
    %66 = tpu.matmul %65, %51, %cst_29 {dimension_numbers = #tpu.dot_dimension_numbers<[2], [1], [1], [2], [0, 0, 0, 1, 1, 2], [0], [0]>} : vector<2x16x16xbf16>, vector<2x16x64xbf16>, vector<2x16x64xf32> -> vector<2x16x64xf32>
    "tpu.trace_stop"() : () -> ()
    %67 = vector.shape_cast %66 : vector<2x16x64xf32> to vector<32x64xf32>
    %68 = arith.truncf %67 : vector<32x64xf32> to vector<32x64xbf16>
    %c0_30 = arith.constant 0 : index
    %c0_31 = arith.constant 0 : index
    %c0_32 = arith.constant 0 : index
    %69 = vector.load %arg7[%c0_30, %c0_31, %c0_32] : memref<1x384x384xbf16, #tpu.memory_space<vmem>>, vector<1x64x384xbf16>
    %70 = vector.shape_cast %69 : vector<1x64x384xbf16> to vector<64x384xbf16>
    %cst_33 = arith.constant dense<0.000000e+00> : vector<32x384xf32>
    %71 = tpu.matmul %68, %70, %cst_33 {dimension_numbers = #tpu.dot_dimension_numbers<[1], [0], [0], [1], [0, 0, 1, 1], [], []>} : vector<32x64xbf16>, vector<64x384xbf16>, vector<32x384xf32> -> vector<32x384xf32>
    %72 = vector.extract_strided_slice %44 {offsets = [0, 0, 64], sizes = [2, 16, 64], strides = [1, 1, 1]} : vector<2x16x384xbf16> to vector<2x16x64xbf16>
    %73 = vector.extract_strided_slice %46 {offsets = [0, 0, 64], sizes = [2, 16, 64], strides = [1, 1, 1]} : vector<2x16x384xbf16> to vector<2x16x64xbf16>
    %74 = vector.extract_strided_slice %48 {offsets = [0, 0, 64], sizes = [2, 16, 64], strides = [1, 1, 1]} : vector<2x16x384xbf16> to vector<2x16x64xbf16>
    "tpu.trace_start"() <{level = 10 : i32, message = "bqd,bkd->bqk"}> : () -> ()
    %cst_34 = arith.constant dense<0.000000e+00> : vector<2x16x16xf32>
    %75 = tpu.matmul %72, %73, %cst_34 {dimension_numbers = #tpu.dot_dimension_numbers<[2], [2], [1], [1], [0, 0, 0, 1, 1, 1], [0], [0]>} : vector<2x16x64xbf16>, vector<2x16x64xbf16>, vector<2x16x16xf32> -> vector<2x16x16xf32>
    "tpu.trace_stop"() : () -> ()
    %76 = vector.shape_cast %4 : vector<16x16xf32> to vector<1x16x16xf32>
    %77 = vector.broadcast %76 : vector<1x16x16xf32> to vector<2x16x16xf32>
    %78 = arith.addf %75, %77 : vector<2x16x16xf32>
    %cst_35 = arith.constant dense<0xFF800000> : vector<2x16xf32>
    %79 = vector.multi_reduction <maximumf>, %78, %cst_35 [2] : vector<2x16x16xf32> to vector<2x16xf32>
    %80 = vector.shape_cast %79 : vector<2x16xf32> to vector<2x16x1xf32>
    %81 = vector.broadcast %80 : vector<2x16x1xf32> to vector<2x16x16xf32>
    %82 = arith.subf %78, %81 : vector<2x16x16xf32>
    %83 = math.exp %82 : vector<2x16x16xf32>
    %cst_36 = arith.constant dense<0.000000e+00> : vector<2x16xf32>
    %84 = vector.multi_reduction <add>, %83, %cst_36 [2] : vector<2x16x16xf32> to vector<2x16xf32>
    %85 = vector.shape_cast %84 : vector<2x16xf32> to vector<2x16x1xf32>
    %86 = vector.broadcast %85 : vector<2x16x1xf32> to vector<2x16x16xf32>
    %87 = arith.divf %83, %86 : vector<2x16x16xf32>
    %88 = arith.truncf %87 : vector<2x16x16xf32> to vector<2x16x16xbf16>
    "tpu.trace_start"() <{level = 10 : i32, message = "bqk,bkd->bqd"}> : () -> ()
    %cst_37 = arith.constant dense<0.000000e+00> : vector<2x16x64xf32>
    %89 = tpu.matmul %88, %74, %cst_37 {dimension_numbers = #tpu.dot_dimension_numbers<[2], [1], [1], [2], [0, 0, 0, 1, 1, 2], [0], [0]>} : vector<2x16x16xbf16>, vector<2x16x64xbf16>, vector<2x16x64xf32> -> vector<2x16x64xf32>
    "tpu.trace_stop"() : () -> ()
    %90 = vector.shape_cast %89 : vector<2x16x64xf32> to vector<32x64xf32>
    %91 = arith.truncf %90 : vector<32x64xf32> to vector<32x64xbf16>
    %c0_38 = arith.constant 0 : index
    %c64 = arith.constant 64 : index
    %c0_39 = arith.constant 0 : index
    %92 = vector.load %arg7[%c0_38, %c64, %c0_39] : memref<1x384x384xbf16, #tpu.memory_space<vmem>>, vector<1x64x384xbf16>
    %93 = vector.shape_cast %92 : vector<1x64x384xbf16> to vector<64x384xbf16>
    %cst_40 = arith.constant dense<0.000000e+00> : vector<32x384xf32>
    %94 = tpu.matmul %91, %93, %cst_40 {dimension_numbers = #tpu.dot_dimension_numbers<[1], [0], [0], [1], [0, 0, 1, 1], [], []>} : vector<32x64xbf16>, vector<64x384xbf16>, vector<32x384xf32> -> vector<32x384xf32>
    %95 = arith.addf %71, %94 : vector<32x384xf32>
    %96 = vector.extract_strided_slice %44 {offsets = [0, 0, 128], sizes = [2, 16, 64], strides = [1, 1, 1]} : vector<2x16x384xbf16> to vector<2x16x64xbf16>
    %97 = vector.extract_strided_slice %46 {offsets = [0, 0, 128], sizes = [2, 16, 64], strides = [1, 1, 1]} : vector<2x16x384xbf16> to vector<2x16x64xbf16>
    %98 = vector.extract_strided_slice %48 {offsets = [0, 0, 128], sizes = [2, 16, 64], strides = [1, 1, 1]} : vector<2x16x384xbf16> to vector<2x16x64xbf16>
    "tpu.trace_start"() <{level = 10 : i32, message = "bqd,bkd->bqk"}> : () -> ()
    %cst_41 = arith.constant dense<0.000000e+00> : vector<2x16x16xf32>
    %99 = tpu.matmul %96, %97, %cst_41 {dimension_numbers = #tpu.dot_dimension_numbers<[2], [2], [1], [1], [0, 0, 0, 1, 1, 1], [0], [0]>} : vector<2x16x64xbf16>, vector<2x16x64xbf16>, vector<2x16x16xf32> -> vector<2x16x16xf32>
    "tpu.trace_stop"() : () -> ()
    %100 = vector.shape_cast %4 : vector<16x16xf32> to vector<1x16x16xf32>
    %101 = vector.broadcast %100 : vector<1x16x16xf32> to vector<2x16x16xf32>
    %102 = arith.addf %99, %101 : vector<2x16x16xf32>
    %cst_42 = arith.constant dense<0xFF800000> : vector<2x16xf32>
    %103 = vector.multi_reduction <maximumf>, %102, %cst_42 [2] : vector<2x16x16xf32> to vector<2x16xf32>
    %104 = vector.shape_cast %103 : vector<2x16xf32> to vector<2x16x1xf32>
    %105 = vector.broadcast %104 : vector<2x16x1xf32> to vector<2x16x16xf32>
    %106 = arith.subf %102, %105 : vector<2x16x16xf32>
    %107 = math.exp %106 : vector<2x16x16xf32>
    %cst_43 = arith.constant dense<0.000000e+00> : vector<2x16xf32>
    %108 = vector.multi_reduction <add>, %107, %cst_43 [2] : vector<2x16x16xf32> to vector<2x16xf32>
    %109 = vector.shape_cast %108 : vector<2x16xf32> to vector<2x16x1xf32>
    %110 = vector.broadcast %109 : vector<2x16x1xf32> to vector<2x16x16xf32>
    %111 = arith.divf %107, %110 : vector<2x16x16xf32>
    %112 = arith.truncf %111 : vector<2x16x16xf32> to vector<2x16x16xbf16>
    "tpu.trace_start"() <{level = 10 : i32, message = "bqk,bkd->bqd"}> : () -> ()
    %cst_44 = arith.constant dense<0.000000e+00> : vector<2x16x64xf32>
    %113 = tpu.matmul %112, %98, %cst_44 {dimension_numbers = #tpu.dot_dimension_numbers<[2], [1], [1], [2], [0, 0, 0, 1, 1, 2], [0], [0]>} : vector<2x16x16xbf16>, vector<2x16x64xbf16>, vector<2x16x64xf32> -> vector<2x16x64xf32>
    "tpu.trace_stop"() : () -> ()
    %114 = vector.shape_cast %113 : vector<2x16x64xf32> to vector<32x64xf32>
    %115 = arith.truncf %114 : vector<32x64xf32> to vector<32x64xbf16>
    %c0_45 = arith.constant 0 : index
    %c128 = arith.constant 128 : index
    %c0_46 = arith.constant 0 : index
    %116 = vector.load %arg7[%c0_45, %c128, %c0_46] : memref<1x384x384xbf16, #tpu.memory_space<vmem>>, vector<1x64x384xbf16>
    %117 = vector.shape_cast %116 : vector<1x64x384xbf16> to vector<64x384xbf16>
    %cst_47 = arith.constant dense<0.000000e+00> : vector<32x384xf32>
    %118 = tpu.matmul %115, %117, %cst_47 {dimension_numbers = #tpu.dot_dimension_numbers<[1], [0], [0], [1], [0, 0, 1, 1], [], []>} : vector<32x64xbf16>, vector<64x384xbf16>, vector<32x384xf32> -> vector<32x384xf32>
    %119 = arith.addf %95, %118 : vector<32x384xf32>
    %120 = vector.extract_strided_slice %44 {offsets = [0, 0, 192], sizes = [2, 16, 64], strides = [1, 1, 1]} : vector<2x16x384xbf16> to vector<2x16x64xbf16>
    %121 = vector.extract_strided_slice %46 {offsets = [0, 0, 192], sizes = [2, 16, 64], strides = [1, 1, 1]} : vector<2x16x384xbf16> to vector<2x16x64xbf16>
    %122 = vector.extract_strided_slice %48 {offsets = [0, 0, 192], sizes = [2, 16, 64], strides = [1, 1, 1]} : vector<2x16x384xbf16> to vector<2x16x64xbf16>
    "tpu.trace_start"() <{level = 10 : i32, message = "bqd,bkd->bqk"}> : () -> ()
    %cst_48 = arith.constant dense<0.000000e+00> : vector<2x16x16xf32>
    %123 = tpu.matmul %120, %121, %cst_48 {dimension_numbers = #tpu.dot_dimension_numbers<[2], [2], [1], [1], [0, 0, 0, 1, 1, 1], [0], [0]>} : vector<2x16x64xbf16>, vector<2x16x64xbf16>, vector<2x16x16xf32> -> vector<2x16x16xf32>
    "tpu.trace_stop"() : () -> ()
    %124 = vector.shape_cast %4 : vector<16x16xf32> to vector<1x16x16xf32>
    %125 = vector.broadcast %124 : vector<1x16x16xf32> to vector<2x16x16xf32>
    %126 = arith.addf %123, %125 : vector<2x16x16xf32>
    %cst_49 = arith.constant dense<0xFF800000> : vector<2x16xf32>
    %127 = vector.multi_reduction <maximumf>, %126, %cst_49 [2] : vector<2x16x16xf32> to vector<2x16xf32>
    %128 = vector.shape_cast %127 : vector<2x16xf32> to vector<2x16x1xf32>
    %129 = vector.broadcast %128 : vector<2x16x1xf32> to vector<2x16x16xf32>
    %130 = arith.subf %126, %129 : vector<2x16x16xf32>
    %131 = math.exp %130 : vector<2x16x16xf32>
    %cst_50 = arith.constant dense<0.000000e+00> : vector<2x16xf32>
    %132 = vector.multi_reduction <add>, %131, %cst_50 [2] : vector<2x16x16xf32> to vector<2x16xf32>
    %133 = vector.shape_cast %132 : vector<2x16xf32> to vector<2x16x1xf32>
    %134 = vector.broadcast %133 : vector<2x16x1xf32> to vector<2x16x16xf32>
    %135 = arith.divf %131, %134 : vector<2x16x16xf32>
    %136 = arith.truncf %135 : vector<2x16x16xf32> to vector<2x16x16xbf16>
    "tpu.trace_start"() <{level = 10 : i32, message = "bqk,bkd->bqd"}> : () -> ()
    %cst_51 = arith.constant dense<0.000000e+00> : vector<2x16x64xf32>
    %137 = tpu.matmul %136, %122, %cst_51 {dimension_numbers = #tpu.dot_dimension_numbers<[2], [1], [1], [2], [0, 0, 0, 1, 1, 2], [0], [0]>} : vector<2x16x16xbf16>, vector<2x16x64xbf16>, vector<2x16x64xf32> -> vector<2x16x64xf32>
    "tpu.trace_stop"() : () -> ()
    %138 = vector.shape_cast %137 : vector<2x16x64xf32> to vector<32x64xf32>
    %139 = arith.truncf %138 : vector<32x64xf32> to vector<32x64xbf16>
    %c0_52 = arith.constant 0 : index
    %c192 = arith.constant 192 : index
    %c0_53 = arith.constant 0 : index
    %140 = vector.load %arg7[%c0_52, %c192, %c0_53] : memref<1x384x384xbf16, #tpu.memory_space<vmem>>, vector<1x64x384xbf16>
    %141 = vector.shape_cast %140 : vector<1x64x384xbf16> to vector<64x384xbf16>
    %cst_54 = arith.constant dense<0.000000e+00> : vector<32x384xf32>
    %142 = tpu.matmul %139, %141, %cst_54 {dimension_numbers = #tpu.dot_dimension_numbers<[1], [0], [0], [1], [0, 0, 1, 1], [], []>} : vector<32x64xbf16>, vector<64x384xbf16>, vector<32x384xf32> -> vector<32x384xf32>
    %143 = arith.addf %119, %142 : vector<32x384xf32>
    %144 = vector.extract_strided_slice %44 {offsets = [0, 0, 256], sizes = [2, 16, 64], strides = [1, 1, 1]} : vector<2x16x384xbf16> to vector<2x16x64xbf16>
    %145 = vector.extract_strided_slice %46 {offsets = [0, 0, 256], sizes = [2, 16, 64], strides = [1, 1, 1]} : vector<2x16x384xbf16> to vector<2x16x64xbf16>
    %146 = vector.extract_strided_slice %48 {offsets = [0, 0, 256], sizes = [2, 16, 64], strides = [1, 1, 1]} : vector<2x16x384xbf16> to vector<2x16x64xbf16>
    "tpu.trace_start"() <{level = 10 : i32, message = "bqd,bkd->bqk"}> : () -> ()
    %cst_55 = arith.constant dense<0.000000e+00> : vector<2x16x16xf32>
    %147 = tpu.matmul %144, %145, %cst_55 {dimension_numbers = #tpu.dot_dimension_numbers<[2], [2], [1], [1], [0, 0, 0, 1, 1, 1], [0], [0]>} : vector<2x16x64xbf16>, vector<2x16x64xbf16>, vector<2x16x16xf32> -> vector<2x16x16xf32>
    "tpu.trace_stop"() : () -> ()
    %148 = vector.shape_cast %4 : vector<16x16xf32> to vector<1x16x16xf32>
    %149 = vector.broadcast %148 : vector<1x16x16xf32> to vector<2x16x16xf32>
    %150 = arith.addf %147, %149 : vector<2x16x16xf32>
    %cst_56 = arith.constant dense<0xFF800000> : vector<2x16xf32>
    %151 = vector.multi_reduction <maximumf>, %150, %cst_56 [2] : vector<2x16x16xf32> to vector<2x16xf32>
    %152 = vector.shape_cast %151 : vector<2x16xf32> to vector<2x16x1xf32>
    %153 = vector.broadcast %152 : vector<2x16x1xf32> to vector<2x16x16xf32>
    %154 = arith.subf %150, %153 : vector<2x16x16xf32>
    %155 = math.exp %154 : vector<2x16x16xf32>
    %cst_57 = arith.constant dense<0.000000e+00> : vector<2x16xf32>
    %156 = vector.multi_reduction <add>, %155, %cst_57 [2] : vector<2x16x16xf32> to vector<2x16xf32>
    %157 = vector.shape_cast %156 : vector<2x16xf32> to vector<2x16x1xf32>
    %158 = vector.broadcast %157 : vector<2x16x1xf32> to vector<2x16x16xf32>
    %159 = arith.divf %155, %158 : vector<2x16x16xf32>
    %160 = arith.truncf %159 : vector<2x16x16xf32> to vector<2x16x16xbf16>
    "tpu.trace_start"() <{level = 10 : i32, message = "bqk,bkd->bqd"}> : () -> ()
    %cst_58 = arith.constant dense<0.000000e+00> : vector<2x16x64xf32>
    %161 = tpu.matmul %160, %146, %cst_58 {dimension_numbers = #tpu.dot_dimension_numbers<[2], [1], [1], [2], [0, 0, 0, 1, 1, 2], [0], [0]>} : vector<2x16x16xbf16>, vector<2x16x64xbf16>, vector<2x16x64xf32> -> vector<2x16x64xf32>
    "tpu.trace_stop"() : () -> ()
    %162 = vector.shape_cast %161 : vector<2x16x64xf32> to vector<32x64xf32>
    %163 = arith.truncf %162 : vector<32x64xf32> to vector<32x64xbf16>
    %c0_59 = arith.constant 0 : index
    %c256 = arith.constant 256 : index
    %c0_60 = arith.constant 0 : index
    %164 = vector.load %arg7[%c0_59, %c256, %c0_60] : memref<1x384x384xbf16, #tpu.memory_space<vmem>>, vector<1x64x384xbf16>
    %165 = vector.shape_cast %164 : vector<1x64x384xbf16> to vector<64x384xbf16>
    %cst_61 = arith.constant dense<0.000000e+00> : vector<32x384xf32>
    %166 = tpu.matmul %163, %165, %cst_61 {dimension_numbers = #tpu.dot_dimension_numbers<[1], [0], [0], [1], [0, 0, 1, 1], [], []>} : vector<32x64xbf16>, vector<64x384xbf16>, vector<32x384xf32> -> vector<32x384xf32>
    %167 = arith.addf %143, %166 : vector<32x384xf32>
    %168 = vector.extract_strided_slice %44 {offsets = [0, 0, 320], sizes = [2, 16, 64], strides = [1, 1, 1]} : vector<2x16x384xbf16> to vector<2x16x64xbf16>
    %169 = vector.extract_strided_slice %46 {offsets = [0, 0, 320], sizes = [2, 16, 64], strides = [1, 1, 1]} : vector<2x16x384xbf16> to vector<2x16x64xbf16>
    %170 = vector.extract_strided_slice %48 {offsets = [0, 0, 320], sizes = [2, 16, 64], strides = [1, 1, 1]} : vector<2x16x384xbf16> to vector<2x16x64xbf16>
    "tpu.trace_start"() <{level = 10 : i32, message = "bqd,bkd->bqk"}> : () -> ()
    %cst_62 = arith.constant dense<0.000000e+00> : vector<2x16x16xf32>
    %171 = tpu.matmul %168, %169, %cst_62 {dimension_numbers = #tpu.dot_dimension_numbers<[2], [2], [1], [1], [0, 0, 0, 1, 1, 1], [0], [0]>} : vector<2x16x64xbf16>, vector<2x16x64xbf16>, vector<2x16x16xf32> -> vector<2x16x16xf32>
    "tpu.trace_stop"() : () -> ()
    %172 = vector.shape_cast %4 : vector<16x16xf32> to vector<1x16x16xf32>
    %173 = vector.broadcast %172 : vector<1x16x16xf32> to vector<2x16x16xf32>
    %174 = arith.addf %171, %173 : vector<2x16x16xf32>
    %cst_63 = arith.constant dense<0xFF800000> : vector<2x16xf32>
    %175 = vector.multi_reduction <maximumf>, %174, %cst_63 [2] : vector<2x16x16xf32> to vector<2x16xf32>
    %176 = vector.shape_cast %175 : vector<2x16xf32> to vector<2x16x1xf32>
    %177 = vector.broadcast %176 : vector<2x16x1xf32> to vector<2x16x16xf32>
    %178 = arith.subf %174, %177 : vector<2x16x16xf32>
    %179 = math.exp %178 : vector<2x16x16xf32>
    %cst_64 = arith.constant dense<0.000000e+00> : vector<2x16xf32>
    %180 = vector.multi_reduction <add>, %179, %cst_64 [2] : vector<2x16x16xf32> to vector<2x16xf32>
    %181 = vector.shape_cast %180 : vector<2x16xf32> to vector<2x16x1xf32>
    %182 = vector.broadcast %181 : vector<2x16x1xf32> to vector<2x16x16xf32>
    %183 = arith.divf %179, %182 : vector<2x16x16xf32>
    %184 = arith.truncf %183 : vector<2x16x16xf32> to vector<2x16x16xbf16>
    "tpu.trace_start"() <{level = 10 : i32, message = "bqk,bkd->bqd"}> : () -> ()
    %cst_65 = arith.constant dense<0.000000e+00> : vector<2x16x64xf32>
    %185 = tpu.matmul %184, %170, %cst_65 {dimension_numbers = #tpu.dot_dimension_numbers<[2], [1], [1], [2], [0, 0, 0, 1, 1, 2], [0], [0]>} : vector<2x16x16xbf16>, vector<2x16x64xbf16>, vector<2x16x64xf32> -> vector<2x16x64xf32>
    "tpu.trace_stop"() : () -> ()
    %186 = vector.shape_cast %185 : vector<2x16x64xf32> to vector<32x64xf32>
    %187 = arith.truncf %186 : vector<32x64xf32> to vector<32x64xbf16>
    %c0_66 = arith.constant 0 : index
    %c320 = arith.constant 320 : index
    %c0_67 = arith.constant 0 : index
    %188 = vector.load %arg7[%c0_66, %c320, %c0_67] : memref<1x384x384xbf16, #tpu.memory_space<vmem>>, vector<1x64x384xbf16>
    %189 = vector.shape_cast %188 : vector<1x64x384xbf16> to vector<64x384xbf16>
    %cst_68 = arith.constant dense<0.000000e+00> : vector<32x384xf32>
    %190 = tpu.matmul %187, %189, %cst_68 {dimension_numbers = #tpu.dot_dimension_numbers<[1], [0], [0], [1], [0, 0, 1, 1], [], []>} : vector<32x64xbf16>, vector<64x384xbf16>, vector<32x384xf32> -> vector<32x384xf32>
    %191 = arith.addf %167, %190 : vector<32x384xf32>
    %192 = arith.addf %3, %191 : vector<32x384xf32>
    %c0_69 = arith.constant 0 : index
    %c0_70 = arith.constant 0 : index
    %c0_71 = arith.constant 0 : index
    %193 = vector.load %arg8[%c0_69, %c0_70, %c0_71] : memref<1x1x384xf32, #tpu.memory_space<vmem>>, vector<1x1x384xf32>
    %194 = vector.shape_cast %193 : vector<1x1x384xf32> to vector<384xf32>
    %195 = vector.shape_cast %194 : vector<384xf32> to vector<1x384xf32>
    %196 = vector.broadcast %195 : vector<1x384xf32> to vector<32x384xf32>
    %197 = arith.addf %192, %196 : vector<32x384xf32>
    %c0_72 = arith.constant 0 : index
    %c0_73 = arith.constant 0 : index
    %c0_74 = arith.constant 0 : index
    %198 = vector.load %arg9[%c0_72, %c0_73, %c0_74] : memref<1x1x384xf32, #tpu.memory_space<vmem>>, vector<1x1x384xf32>
    %199 = vector.shape_cast %198 : vector<1x1x384xf32> to vector<384xf32>
    %c0_75 = arith.constant 0 : index
    %c0_76 = arith.constant 0 : index
    %c0_77 = arith.constant 0 : index
    %200 = vector.load %arg10[%c0_75, %c0_76, %c0_77] : memref<1x1x384xf32, #tpu.memory_space<vmem>>, vector<1x1x384xf32>
    %201 = vector.shape_cast %200 : vector<1x1x384xf32> to vector<384xf32>
    %cst_78 = arith.constant dense<0.000000e+00> : vector<32xf32>
    %202 = vector.multi_reduction <add>, %197, %cst_78 [1] : vector<32x384xf32> to vector<32xf32>
    %203 = vector.shape_cast %202 : vector<32xf32> to vector<32x1xf32>
    %cst_79 = arith.constant 3.840000e+02 : f32
    %204 = vector.broadcast %cst_79 : f32 to vector<32x1xf32>
    %205 = arith.divf %203, %204 : vector<32x1xf32>
    %206 = vector.broadcast %205 : vector<32x1xf32> to vector<32x384xf32>
    %207 = arith.subf %197, %206 : vector<32x384xf32>
    %208 = arith.mulf %207, %207 : vector<32x384xf32>
    %cst_80 = arith.constant dense<0.000000e+00> : vector<32xf32>
    %209 = vector.multi_reduction <add>, %208, %cst_80 [1] : vector<32x384xf32> to vector<32xf32>
    %210 = vector.shape_cast %209 : vector<32xf32> to vector<32x1xf32>
    %cst_81 = arith.constant 3.840000e+02 : f32
    %211 = vector.broadcast %cst_81 : f32 to vector<32x1xf32>
    %212 = arith.divf %210, %211 : vector<32x1xf32>
    %213 = vector.broadcast %205 : vector<32x1xf32> to vector<32x384xf32>
    %214 = arith.subf %197, %213 : vector<32x384xf32>
    %cst_82 = arith.constant 9.99999974E-6 : f32
    %215 = vector.broadcast %cst_82 : f32 to vector<32x1xf32>
    %216 = arith.addf %212, %215 : vector<32x1xf32>
    %217 = math.rsqrt %216 : vector<32x1xf32>
    %218 = vector.broadcast %217 : vector<32x1xf32> to vector<32x384xf32>
    %219 = arith.mulf %214, %218 : vector<32x384xf32>
    %220 = vector.shape_cast %199 : vector<384xf32> to vector<1x384xf32>
    %221 = vector.broadcast %220 : vector<1x384xf32> to vector<32x384xf32>
    %222 = arith.mulf %219, %221 : vector<32x384xf32>
    %223 = vector.shape_cast %201 : vector<384xf32> to vector<1x384xf32>
    %224 = vector.broadcast %223 : vector<1x384xf32> to vector<32x384xf32>
    %225 = arith.addf %222, %224 : vector<32x384xf32>
    %226 = arith.truncf %225 : vector<32x384xf32> to vector<32x384xbf16>
    %c0_83 = arith.constant 0 : index
    %c0_84 = arith.constant 0 : index
    %c0_85 = arith.constant 0 : index
    %227 = vector.load %arg11[%c0_83, %c0_84, %c0_85] : memref<1x384x1536xbf16, #tpu.memory_space<vmem>>, vector<1x384x1536xbf16>
    %228 = vector.shape_cast %227 : vector<1x384x1536xbf16> to vector<384x1536xbf16>
    %cst_86 = arith.constant dense<0.000000e+00> : vector<32x1536xf32>
    %229 = tpu.matmul %226, %228, %cst_86 {dimension_numbers = #tpu.dot_dimension_numbers<[1], [0], [0], [1], [0, 0, 1, 1], [], []>} : vector<32x384xbf16>, vector<384x1536xbf16>, vector<32x1536xf32> -> vector<32x1536xf32>
    %c0_87 = arith.constant 0 : index
    %c0_88 = arith.constant 0 : index
    %c0_89 = arith.constant 0 : index
    %230 = vector.load %arg12[%c0_87, %c0_88, %c0_89] : memref<1x1x1536xf32, #tpu.memory_space<vmem>>, vector<1x1x1536xf32>
    %231 = vector.shape_cast %230 : vector<1x1x1536xf32> to vector<1536xf32>
    %232 = vector.shape_cast %231 : vector<1536xf32> to vector<1x1536xf32>
    %233 = vector.broadcast %232 : vector<1x1536xf32> to vector<32x1536xf32>
    %234 = arith.addf %229, %233 : vector<32x1536xf32>
    %cst_90 = arith.constant 0.000000e+00 : f32
    %235 = vector.broadcast %cst_90 : f32 to vector<32x1536xf32>
    %236 = arith.maximumf %234, %235 : vector<32x1536xf32>
    %237 = arith.truncf %236 : vector<32x1536xf32> to vector<32x1536xbf16>
    %c0_91 = arith.constant 0 : index
    %c0_92 = arith.constant 0 : index
    %c0_93 = arith.constant 0 : index
    %238 = vector.load %arg13[%c0_91, %c0_92, %c0_93] : memref<1x1536x384xbf16, #tpu.memory_space<vmem>>, vector<1x1536x384xbf16>
    %239 = vector.shape_cast %238 : vector<1x1536x384xbf16> to vector<1536x384xbf16>
    %cst_94 = arith.constant dense<0.000000e+00> : vector<32x384xf32>
    %240 = tpu.matmul %237, %239, %cst_94 {dimension_numbers = #tpu.dot_dimension_numbers<[1], [0], [0], [1], [0, 0, 1, 1], [], []>} : vector<32x1536xbf16>, vector<1536x384xbf16>, vector<32x384xf32> -> vector<32x384xf32>
    %c0_95 = arith.constant 0 : index
    %c0_96 = arith.constant 0 : index
    %c0_97 = arith.constant 0 : index
    %241 = vector.load %arg14[%c0_95, %c0_96, %c0_97] : memref<1x1x384xf32, #tpu.memory_space<vmem>>, vector<1x1x384xf32>
    %242 = vector.shape_cast %241 : vector<1x1x384xf32> to vector<384xf32>
    %243 = vector.shape_cast %242 : vector<384xf32> to vector<1x384xf32>
    %244 = vector.broadcast %243 : vector<1x384xf32> to vector<32x384xf32>
    %245 = arith.addf %240, %244 : vector<32x384xf32>
    %246 = arith.addf %197, %245 : vector<32x384xf32>
    %c0_98 = arith.constant 0 : index
    %c0_99 = arith.constant 0 : index
    %247 = vector.load %arg15[%c0_98, %c0_99] : memref<32x384xf32, #tpu.memory_space<vmem>>, vector<32x384xf32>
    tpu.vector_store %arg15[%c0_98, %c0_99], %246 {strides = array<i32>} : memref<32x384xf32, #tpu.memory_space<vmem>>, vector<32x384xf32>,
    return
  }
  func.func @transform_0(%arg0: i32) -> (i32, i32) {
    %c0_i32 = arith.constant 0 : i32
    %c0_i32_0 = arith.constant 0 : i32
    %c0_i32_1 = arith.constant 0 : i32
    return %c0_i32, %c0_i32_0 : i32, i32
  }
  func.func @transform_1(%arg0: i32) -> (i32, i32, i32) {
    %c0_i32 = arith.constant 0 : i32
    %c0_i32_0 = arith.constant 0 : i32
    %c0_i32_1 = arith.constant 0 : i32
    return %arg0, %c0_i32, %c0_i32_0 : i32, i32, i32
  }
  func.func @transform_2(%arg0: i32) -> (i32, i32, i32) {
    %c0_i32 = arith.constant 0 : i32
    %c0_i32_0 = arith.constant 0 : i32
    %c0_i32_1 = arith.constant 0 : i32
    return %arg0, %c0_i32, %c0_i32_0 : i32, i32, i32
  }
  func.func @transform_3(%arg0: i32) -> (i32, i32, i32) {
    %c0_i32 = arith.constant 0 : i32
    %c0_i32_0 = arith.constant 0 : i32
    %c0_i32_1 = arith.constant 0 : i32
    return %arg0, %c0_i32, %c0_i32_0 : i32, i32, i32
  }
  func.func @transform_4(%arg0: i32) -> (i32, i32, i32) {
    %c0_i32 = arith.constant 0 : i32
    %c0_i32_0 = arith.constant 0 : i32
    %c0_i32_1 = arith.constant 0 : i32
    return %arg0, %c0_i32, %c0_i32_0 : i32, i32, i32
  }
  func.func @transform_5(%arg0: i32) -> (i32, i32, i32) {
    %c0_i32 = arith.constant 0 : i32
    %c0_i32_0 = arith.constant 0 : i32
    %c0_i32_1 = arith.constant 0 : i32
    return %arg0, %c0_i32, %c0_i32_0 : i32, i32, i32
  }
  func.func @transform_6(%arg0: i32) -> (i32, i32, i32) {
    %c0_i32 = arith.constant 0 : i32
    %c0_i32_0 = arith.constant 0 : i32
    %c0_i32_1 = arith.constant 0 : i32
    return %arg0, %c0_i32, %c0_i32_0 : i32, i32, i32
  }
  func.func @transform_7(%arg0: i32) -> (i32, i32, i32) {
    %c0_i32 = arith.constant 0 : i32
    %c0_i32_0 = arith.constant 0 : i32
    %c0_i32_1 = arith.constant 0 : i32
    return %arg0, %c0_i32, %c0_i32_0 : i32, i32, i32
  }
  func.func @transform_8(%arg0: i32) -> (i32, i32, i32) {
    %c0_i32 = arith.constant 0 : i32
    %c0_i32_0 = arith.constant 0 : i32
    %c0_i32_1 = arith.constant 0 : i32
    return %arg0, %c0_i32, %c0_i32_0 : i32, i32, i32
  }
  func.func @transform_9(%arg0: i32) -> (i32, i32, i32) {
    %c0_i32 = arith.constant 0 : i32
    %c0_i32_0 = arith.constant 0 : i32
    %c0_i32_1 = arith.constant 0 : i32
    return %arg0, %c0_i32, %c0_i32_0 : i32, i32, i32
  }
  func.func @transform_10(%arg0: i32) -> (i32, i32, i32) {
    %c0_i32 = arith.constant 0 : i32
    %c0_i32_0 = arith.constant 0 : i32
    %c0_i32_1 = arith.constant 0 : i32
    return %arg0, %c0_i32, %c0_i32_0 : i32, i32, i32
  }
  func.func @transform_11(%arg0: i32) -> (i32, i32, i32) {
    %c0_i32 = arith.constant 0 : i32
    %c0_i32_0 = arith.constant 0 : i32
    %c0_i32_1 = arith.constant 0 : i32
    return %arg0, %c0_i32, %c0_i32_0 : i32, i32, i32
  }
  func.func @transform_12(%arg0: i32) -> (i32, i32, i32) {
    %c0_i32 = arith.constant 0 : i32
    %c0_i32_0 = arith.constant 0 : i32
    %c0_i32_1 = arith.constant 0 : i32
    return %arg0, %c0_i32, %c0_i32_0 : i32, i32, i32
  }
  func.func @transform_13(%arg0: i32) -> (i32, i32, i32) {
    %c0_i32 = arith.constant 0 : i32
    %c0_i32_0 = arith.constant 0 : i32
    %c0_i32_1 = arith.constant 0 : i32
    return %arg0, %c0_i32, %c0_i32_0 : i32, i32, i32
  }
  func.func @transform_14(%arg0: i32) -> (i32, i32) {
    %c0_i32 = arith.constant 0 : i32
    %c0_i32_0 = arith.constant 0 : i32
    %c0_i32_1 = arith.constant 0 : i32
    return %c0_i32, %c0_i32_0 : i32, i32
  }
}

</mosaic_0001>

<bundles_post_ra>
// kernel: tpu_custom_call.1
= control target key start
LH: loop header
LB: loop body
LE: loop exit
PB: predicated region body
PF: predicated region fallthrough
CT: control target
= control target key end

     0   :  { %s17685_s0 = inlined_call_operand.hbm [shape: f32[32,384], index: 0, kind: input, shape index: {}]   ;;  %s17686_s1 = inlined_call_operand.hbm [shape: f32[6,1,384], index: 1, kind: input, shape index: {}]   ;;  %s17687_s2 = inlined_call_operand.hbm [shape: f32[6,1,384], index: 2, kind: input, shape index: {}]   ;;  %s17688_s3 = inlined_call_operand.hbm [shape: bf16[6,384,384], index: 3, kind: input, shape index: {}]   ;;  %s17689_s4 = inlined_call_operand.hbm [shape: bf16[6,384,384], index: 4, kind: input, shape index: {}]   ;;  %s17690_s5 = inlined_call_operand.hbm [shape: bf16[6,384,384], index: 5, kind: input, shape index: {}]   ;;  %s17691_s6 = inlined_call_operand.hbm [shape: bf16[6,384,384], index: 6, kind: input, shape index: {}]   ;;  %s17692_s7 = inlined_call_operand.hbm [shape: f32[6,1,384], index: 7, kind: input, shape index: {}]   ;;  %s17693_s8 = inlined_call_operand.hbm [shape: f32[6,1,384], index: 8, kind: input, shape index: {}]   ;;  %s17694_s9 = inlined_call_operand.hbm [shape: f32[6,1,384], index: 9, kind: input, shape index: {}]   ;;  %s17695_s10 = inlined_call_operand.hbm [shape: bf16[6,384,1536], index: 10, kind: input, shape index: {}]   ;;  %s17696_s11 = inlined_call_operand.hbm [shape: f32[6,1,1536], index: 11, kind: input, shape index: {}]   ;;  %s17697_s12 = inlined_call_operand.hbm [shape: bf16[6,1536,384], index: 12, kind: input, shape index: {}]   ;;  %s17698_s13 = inlined_call_operand.hbm [shape: f32[6,1,384], index: 13, kind: input, shape index: {}]   ;;  %s17699_s14 = inlined_call_operand.hbm [shape: f32[32,384], index: 14, kind: output, shape index: {}]  }
   0x1   :  { %17724 = sst [smem:[#allocation43_spill]] %s17685_s0 }
   0x2   :  { %17725 = sst [smem:[#allocation44_spill]] %s17686_s1 }
   0x3   :  { %17726 = sst [smem:[#allocation45_spill]] %s17687_s2 }
   0x4   :  { %17727 = sst [smem:[#allocation46_spill]] %s17688_s3 }
   0x5   :  { %17728 = sst [smem:[#allocation47_spill]] %s17690_s5 }
   0x6   :  { %17729 = sst [smem:[#allocation48_spill]] %s17692_s7 }
   0x7   :  { %17730 = sst [smem:[#allocation49_spill]] %s17699_s14 }
   0x8   :  { %19 = vsyncpa [#allocation4], 0 }
   0x9   :  { %20 = vsyncpa [#allocation7], 0 }
   0xa   :  { %22 = vsyncpa [#allocation7 + $0x1], 0 }
   0xb   :  { %23 = vsyncpa [#allocation10], 0 }
   0xc   :  { %25 = vsyncpa [#allocation10 + $0x1], 0 }
   0xd   :  { %26 = vsyncpa [#allocation13], 0 }
   0xe   :  { %28 = vsyncpa [#allocation13 + $0x1], 0 }
   0xf   :  { %29 = vsyncpa [#allocation16], 0 }
  0x10   :  { %31 = vsyncpa [#allocation16 + $0x1], 0 }
  0x11   :  { %32 = vsyncpa [#allocation19], 0 }
  0x12   :  { %34 = vsyncpa [#allocation19 + $0x1], 0 }
  0x13   :  { %35 = vsyncpa [#allocation22], 0 }
  0x14   :  { %37 = vsyncpa [#allocation22 + $0x1], 0 }
  0x15   :  { %38 = vsyncpa [#allocation25], 0 }
  0x16   :  { %40 = vsyncpa [#allocation25 + $0x1], 0 }
  0x17   :  { %41 = vsyncpa [#allocation5], 0  ;;  %s15260_s29 = smov 0   ;;  %s15262_s30 = smov 0  }
  0x18   :  { %s15264_s15 = smov 0   ;;  %s15266_s16 = smov 0  }
  0x19 LB: > { %17731 = sst [smem:[#allocation36_spill]] %s15147_s30  ;;  %s15279_s17 = sadd.s32 4294967295, %s15155_s16   ;;  %s15155_s16 = sphi %s15266_s16, %s17769_s16   ;;  %s15151_s15 = sphi %s15264_s15, %s17772_s15   ;;  %s15147_s30 = sphi %s15262_s30, %s17771_s30   ;;  %s15143_s29 = sphi %s15260_s29, %s17770_s29  }
  0x1a   : > { %17732 = sst [smem:[#allocation37_spill]] %s15151_s15  ;;  %s15282_s18 = sadd.s32 1, %s15155_s16  }
  0x1b   : > { %17733 = sst [smem:[#allocation38_spill]] %s15279_s17  ;;  %s72_s19 = ssub.s32 %s15155_s16, %s15282_s18 }
  0x1c   : > { %17734 = sst [smem:[#allocation39_spill]] %s15282_s18  ;;  %s75_s20 = sadd.s32 1, %s15151_s15 }
  0x1d   : > { %p73_p0 = scmp.eq.s32.totalorder %s72_s19, 0  ;;  %p82_p1 = scmp.ne.s32.totalorder %s15151_s15, %s15147_s30 }
  0x1e   : > { %p83_p2 = scmp.eq.s32.totalorder %s15155_s16, 0  ;;  %p88_p3 = scmp.ne.s32.totalorder %s15147_s30, %s15143_s29 }
  0x1f   : > { %s15292_s21 = scalar_select %p73_p0, %s15151_s15, %s75_s20  }
  0x20   : > { %p15294_p4 = por %p83_p2, %p82_p1  ;;  %p17703_p5 = scmp.eq.s32.totalorder %s15279_s17, 0 }
  0x21   : > { %17735 = sst [smem:[#allocation40_spill]] %s15292_s21  ;;  %p11421_p6 = scmp.ge.s32.totalorder %s15155_s16, 1 }
  0x22   : > { %s17736_s22 = scalar_select %p15294_p4, 1, 0 }
  0x23   : > { %p432_p7 = scmp.lt.s32.totalorder %s15155_s16, 7  ;;  %p15303_p8 = por %p17703_p5, %p88_p3 }
  0x24   : > { %s15157_s25 = smov [#allocation3]   ;;  %s17742_s0 = sld [smem:[#allocation43_spill]] }
  0x25   : > { %s17737_s23 = scalar_select %p15303_p8, 1, 0 }
  0x26   : > { %p15308_p10 = pnand %p11421_p6, %p432_p7  ;;  %s444_s26 = sshll.u32 %s15157_s25, 4  ;;  %s445_s26 = int_to_ptr.vmem [resolvable:$true] %s444_s26 }
  0x27   : > { %17738 = sst [smem:[#allocation41_spill]] %s17737_s23 }
  0x28   : > { %s17739_s24 = scalar_select %p15308_p10, 1, 0 }
  0x29   : > { %p13290_p11 = pneg %p15308_p10 }
  0x2a   : > { %17740 = sst [smem:[#allocation42_spill]] %s17739_s24  ;;  %s14671_s19 = scalar_lea.hbm %s17742_s0, 1536 }
  0x2b   : > { %p15316_p12 = pnand %p13290_p11, %p17703_p5  ;;  %p14672_p13 = scmp.ne.s32.totalorder %s17742_s0, %s14671_s19 }
  0x2c   : > { %p14678_p3 = scmp.lt.u32.totalorder %s14671_s19, %s17742_s0 }
  0x2d   : > { %p14673_p0 = pneg %p15316_p12 }
  0x2f   : > { %p14674_p1 = pnand %p14673_p0, %p14672_p13 }
  0x31   : > { %p14675_p2 = pneg %p14674_p1 }
  0x33   : > { %p14680_p6 = pnand %p14678_p3, %p14675_p2 }
  0x35   : > { %14683 = shalt.err (!%p14680_p6)
}
  0x36   : > { %s14684_s14 = scalar_lea.vmem %s445_s26, 1536  ;;  %p14692_p5 = scmp.lt.s32.totalorder %s445_s26, %s445_s26 }
  0x37   : > { %p14685_p7 = scmp.ne.s32.totalorder %s445_s26, %s14684_s14  ;;  %p14693_p8 = scmp.lt.s32.totalorder %s14684_s14, %s14684_s14 }
  0x39   : > { %p14687_p11 = pnand %p14685_p7, %p14673_p0  ;;  %p14694_p10 = por %p14693_p8, %p14692_p5 }
  0x3b   : > { %p14688_p9 = pneg %p14687_p11 }
  0x3d   : > { %p14695_p4 = pnand %p14694_p10, %p14688_p9 }
  0x3f   : > { %14698 = shalt.err (!%p14695_p4)
}
  0x40   : > { %s15158_s21 = smov 384   ;;  %s15159_s28 = smov 24  }
  0x41   : > { %13293 = dma.hbm_to_vmem [thread:$0]  (!%p15316_p12), %s17742_s0, 1536, %s445_s26, [#allocation4], %s15158_s21, %s15158_s21, %s15159_s28  }
  0x42   : > { %p11423_p13 = scmp.ge.s32.totalorder %s15155_s16, 6 }
  0x43   : > { %s15338_s18 = sand.u32 (!%p11423_p13), 1, %s15155_s16   ;;  %s15341_s14 = sand.u32 (!%p11423_p13), 1, %s15151_s15  }
  0x44   : > { %454 = sbr.rel (%p11423_p13) target bundleno = 401 (0x191), region = 20  ;;  %s17743_s1 = sld [smem:[#allocation44_spill]] (!%p11423_p13) }
  0x45   : > { %s15344_s19 = smul.u32 (!%p11423_p13), 3, %s15341_s14  ;;  %p17744_p5 = scmp.ne.s32.totalorder (!%p11423_p13), %s17736_s22, 0 }
  0x46   : > { %s15347_s27 = smul.u32 (!%p11423_p13), 48, %s15155_s16 }
  0x47   : > { %s15350_s26 = smul.u32 (!%p11423_p13), 576, %s15341_s14  ;;  %s462_s29 = scalar_lea.vmem (!%p11423_p13), [#allocation6], %s15344_s19 }
  0x48   : > { %s470_s20 = sshll.u32 (!%p11423_p13), %s462_s29, 4  ;;  %s471_s20 = int_to_ptr.vmem [resolvable:$true] %s470_s20 }
  0x4a   : > { %s15356_s28 = scalar_lea.hbm (!%p11423_p13), %s17743_s1, %s15347_s27  ;;  %s14703_s17 = scalar_lea.hbm (!%p11423_p13), %s17743_s1, 288 }
  0x4b   : > { %s14699_s15 = scalar_lea.hbm %s15356_s28, 48  ;;  %p14704_p10 = scmp.lt.u32.totalorder %s15356_s28, %s17743_s1 }
  0x4c   : > { %p14700_p4 = scmp.ne.s32.totalorder %s15356_s28, %s14699_s15  ;;  %p14705_p12 = scmp.lt.u32.totalorder %s14703_s17, %s14699_s15 }
  0x4d   : > { %p14707_p1 = scmp.lt.u32.totalorder %s14699_s15, %s15356_s28 }
  0x4e   : > { %p14701_p8 = pnand %p14700_p4, %p17744_p5  ;;  %p14706_p0 = por %p14705_p12, %p14704_p10 }
  0x50   : > { %p14702_p9 = pneg %p14701_p8  ;;  %p14708_p2 = por %p14707_p1, %p14706_p0 }
  0x52   : > { %p14709_p3 = pnand %p14708_p2, %p14702_p9 }
  0x54   : > { %14712 = shalt.err (!%p14709_p3)
}
  0x55   : > { %s14713_s29 = scalar_lea.vmem %s471_s20, 48  ;;  %s15160_s0 = smov [#allocation6]  }
  0x56   : > { %p14714_p6 = scmp.ne.s32.totalorder %s471_s20, %s14713_s29  ;;  %s14717_s24 = sshll.u32 %s15160_s0, 4  ;;  %s14718_s24 = int_to_ptr.vmem [resolvable:$false] %s14717_s24 }
  0x57   : > { %s14719_s30 = scalar_lea.vmem %s14718_s24, 96  ;;  %p14720_p13 = scmp.lt.s32.totalorder %s471_s20, %s14718_s24 }
  0x58   : > { %p14715_p7 = pnand %p14714_p6, %p17744_p5  ;;  %p14721_p4 = scmp.lt.s32.totalorder %s14719_s30, %s14713_s29 }
  0x5a   : > { %p14716_p11 = pneg %p14715_p7  ;;  %p14722_p8 = por %p14721_p4, %p14720_p13 }
  0x5c   : > { %p14723_p10 = pnand %p14722_p8, %p14716_p11 }
  0x5e   : > { %14726 = shalt.err (!%p14723_p10)
}
  0x5f   : > { %s17745_s15 = scalar_lea.sflag [#allocation7], %s15338_s18  ;;  %s15380_s17 = smul.u32 9216, %s15155_s16 }
  0x60   : > { %13258 = dma.hbm_to_vmem [thread:$0]  (%p17744_p5), %s15356_s28, 48, %s471_s20, %s17745_s15  }
  0x61   : > { %s500_s0 = scalar_lea.vmem [#allocation9], %s15350_s26  ;;  %s17746_s3 = sld [smem:[#allocation46_spill]] }
  0x62   : > { %s507_s23 = sshll.u32 %s500_s0, 4  ;;  %s17715_s29 = scalar_lea.sflag [#allocation10], %s15338_s18  ;;  %s15383_s23 = int_to_ptr.vmem [resolvable:$true] %s507_s23 }
  0x67   : > { %s15389_s21 = scalar_lea.hbm %s17746_s3, %s15380_s17  ;;  %s14731_s15 = scalar_lea.hbm %s17746_s3, 55296 }
  0x68   : > { %s14727_s30 = scalar_lea.hbm %s15389_s21, 9216  ;;  %p14732_p1 = scmp.lt.u32.totalorder %s15389_s21, %s17746_s3 }
  0x69   : > { %p14728_p9 = scmp.ne.s32.totalorder %s15389_s21, %s14727_s30  ;;  %p14733_p2 = scmp.lt.u32.totalorder %s14731_s15, %s14727_s30 }
  0x6a   : > { %p14735_p6 = scmp.lt.u32.totalorder %s14727_s30, %s15389_s21 }
  0x6b   : > { %p14729_p12 = pnand %p14728_p9, %p17744_p5  ;;  %p14734_p3 = por %p14733_p2, %p14732_p1 }
  0x6d   : > { %p14730_p0 = pneg %p14729_p12  ;;  %p14736_p7 = por %p14735_p6, %p14734_p3 }
  0x6f   : > { %p14737_p11 = pnand %p14736_p7, %p14730_p0 }
  0x71   : > { %14740 = shalt.err (!%p14737_p11)
}
  0x72   : > { %s14741_s24 = scalar_lea.vmem %s15383_s23, 9216  ;;  %s15161_s25 = smov [#allocation9]  }
  0x73   : > { %p14742_p13 = scmp.ne.s32.totalorder %s15383_s23, %s14741_s24  ;;  %s14745_s28 = sshll.u32 %s15161_s25, 4  ;;  %s14746_s28 = int_to_ptr.vmem [resolvable:$false] %s14745_s28 }
  0x74   : > { %s14747_s1 = scalar_lea.vmem %s14746_s28, 18432  ;;  %p14748_p10 = scmp.lt.s32.totalorder %s15383_s23, %s14746_s28 }
  0x75   : > { %p14743_p4 = pnand %p14742_p13, %p17744_p5  ;;  %p14749_p9 = scmp.lt.s32.totalorder %s14747_s1, %s14741_s24 }
  0x77   : > { %p14744_p8 = pneg %p14743_p4  ;;  %p14750_p12 = por %p14749_p9, %p14748_p10 }
  0x79   : > { %p14751_p1 = pnand %p14750_p12, %p14744_p8 }
  0x7b   : > { %14754 = shalt.err (!%p14751_p1)
}
  0x7c   : > { %s17717_s30 = smov 192   ;;  %s17720_s20 = smov 12  }
  0x7d   : > { %13260 = dma.hbm_to_vmem [thread:$0]  (%p17744_p5), %s15389_s21, 9216, %s15383_s23, %s17715_s29, %s17717_s30, %s17717_s30, %s17720_s20  }
  0x7e   : > { %s17747_s5 = sld [smem:[#allocation47_spill]]  ;;  %s542_s25 = scalar_lea.vmem [#allocation12], %s15350_s26 }
  0x7f   : > { %s549_s28 = sshll.u32 %s542_s25, 4  ;;  %s17716_s1 = scalar_lea.sflag [#allocation13], %s15338_s18  ;;  %s15425_s28 = int_to_ptr.vmem [resolvable:$true] %s549_s28 }
  0x84   : > { %s15422_s24 = scalar_lea.hbm %s17747_s5, %s15380_s17  ;;  %s14759_s15 = scalar_lea.hbm %s17747_s5, 55296 }
  0x85   : > { %s14755_s3 = scalar_lea.hbm %s15422_s24, 9216  ;;  %p14760_p6 = scmp.lt.u32.totalorder %s15422_s24, %s17747_s5 }
  0x86   : > { %p14756_p0 = scmp.ne.s32.totalorder %s15422_s24, %s14755_s3  ;;  %p14761_p7 = scmp.lt.u32.totalorder %s14759_s15, %s14755_s3 }
  0x87   : > { %p14763_p13 = scmp.lt.u32.totalorder %s14755_s3, %s15422_s24 }
  0x88   : > { %p14757_p2 = pnand %p14756_p0, %p17744_p5  ;;  %p14762_p11 = por %p14761_p7, %p14760_p6 }
  0x8a   : > { %p14758_p3 = pneg %p14757_p2  ;;  %p14764_p4 = por %p14763_p13, %p14762_p11 }
  0x8c   : > { %p14765_p8 = pnand %p14764_p4, %p14758_p3 }
  0x8e   : > { %14768 = shalt.err (!%p14765_p8)
}
  0x8f   : > { %s14769_s25 = scalar_lea.vmem %s15425_s28, 9216  ;;  %s15164_s23 = smov [#allocation12]  }
  0x90   : > { %p14770_p10 = scmp.ne.s32.totalorder %s15425_s28, %s14769_s25  ;;  %s14773_s21 = sshll.u32 %s15164_s23, 4  ;;  %s14774_s21 = int_to_ptr.vmem [resolvable:$false] %s14773_s21 }
  0x91   : > { %s14775_s29 = scalar_lea.vmem %s14774_s21, 18432  ;;  %p14776_p1 = scmp.lt.s32.totalorder %s15425_s28, %s14774_s21 }
  0x92   : > { %p14771_p9 = pnand %p14770_p10, %p17744_p5  ;;  %p14777_p0 = scmp.lt.s32.totalorder %s14775_s29, %s14769_s25 }
  0x94   : > { %p14772_p12 = pneg %p14771_p9  ;;  %p14778_p2 = por %p14777_p0, %p14776_p1 }
  0x96   : > { %p14779_p6 = pnand %p14778_p2, %p14772_p12 }
  0x98   : > { %14782 = shalt.err (!%p14779_p6)
}
  0x99   : > { %13262 = dma.hbm_to_vmem [thread:$0]  (%p17744_p5), %s15422_s24, 9216, %s15425_s28, %s17716_s1, %s17717_s30, %s17717_s30, %s17720_s20  }
  0x9a   : > { %s17748_s7 = sld [smem:[#allocation48_spill]]  ;;  %s584_s25 = scalar_lea.vmem [#allocation15], %s15344_s19 }
  0x9b   : > { %s592_s23 = sshll.u32 %s584_s25, 4  ;;  %s17719_s21 = scalar_lea.sflag [#allocation16], %s15338_s18  ;;  %s593_s23 = int_to_ptr.vmem [resolvable:$true] %s592_s23 }
  0xa0   : > { %s15458_s0 = scalar_lea.hbm %s17748_s7, %s15347_s27  ;;  %s14787_s28 = scalar_lea.hbm %s17748_s7, 288 }
  0xa1   : > { %s14783_s29 = scalar_lea.hbm %s15458_s0, 48  ;;  %p14788_p13 = scmp.lt.u32.totalorder %s15458_s0, %s17748_s7 }
  0xa2   : > { %p14784_p3 = scmp.ne.s32.totalorder %s15458_s0, %s14783_s29  ;;  %p14789_p4 = scmp.lt.u32.totalorder %s14787_s28, %s14783_s29 }
  0xa3   : > { %p14791_p10 = scmp.lt.u32.totalorder %s14783_s29, %s15458_s0 }
  0xa4   : > { %p14785_p7 = pnand %p14784_p3, %p17744_p5  ;;  %p14790_p8 = por %p14789_p4, %p14788_p13 }
  0xa6   : > { %p14786_p11 = pneg %p14785_p7  ;;  %p14792_p9 = por %p14791_p10, %p14790_p8 }
  0xa8   : > { %p14793_p12 = pnand %p14792_p9, %p14786_p11 }
  0xaa   : > { %14796 = shalt.err (!%p14793_p12)
}
  0xab   : > { %s14797_s25 = scalar_lea.vmem %s593_s23, 48  ;;  %s15165_s1 = smov [#allocation15]  }
  0xac   : > { %p14798_p1 = scmp.ne.s32.totalorder %s593_s23, %s14797_s25  ;;  %s14801_s30 = sshll.u32 %s15165_s1, 4  ;;  %s14802_s30 = int_to_ptr.vmem [resolvable:$false] %s14801_s30 }
  0xad   : > { %s14803_s5 = scalar_lea.vmem %s14802_s30, 96  ;;  %p14804_p6 = scmp.lt.s32.totalorder %s593_s23, %s14802_s30 }
  0xae   : > { %p14799_p0 = pnand %p14798_p1, %p17744_p5  ;;  %p14805_p3 = scmp.lt.s32.totalorder %s14803_s5, %s14797_s25 }
  0xb0   : > { %p14800_p2 = pneg %p14799_p0  ;;  %p14806_p7 = por %p14805_p3, %p14804_p6 }
  0xb2   : > { %p14807_p4 = pnand %p14806_p7, %p14800_p2 }
  0xb4   : > { %14810 = shalt.err (!%p14807_p4)
}
  0xb5   : > { %13264 = dma.hbm_to_vmem [thread:$0]  (%p17744_p5), %s15458_s0, 48, %s593_s23, %s17719_s21  }
  0xb6   : > { %s15485_s1 = scalar_lea.hbm %s17694_s9, %s15347_s27  ;;  %s622_s30 = scalar_lea.vmem [#allocation18], %s15344_s19 }
  0xb7   : > { %s630_s28 = sshll.u32 %s622_s30, 4  ;;  %s17723_s3 = scalar_lea.sflag [#allocation19], %s15338_s18  ;;  %s631_s28 = int_to_ptr.vmem [resolvable:$true] %s630_s28 }
  0xb8   : > { %s14811_s15 = scalar_lea.hbm %s15485_s1, 48  ;;  %s14815_s23 = scalar_lea.hbm %s17694_s9, 288 }
  0xb9   : > { %p14812_p11 = scmp.ne.s32.totalorder %s15485_s1, %s14811_s15  ;;  %p14816_p10 = scmp.lt.u32.totalorder %s15485_s1, %s17694_s9 }
  0xba   : > { %p14817_p9 = scmp.lt.u32.totalorder %s14815_s23, %s14811_s15  ;;  %p14819_p1 = scmp.lt.u32.totalorder %s14811_s15, %s15485_s1 }
  0xbb   : > { %p14813_p13 = pnand %p14812_p11, %p17744_p5 }
  0xbc   : > { %p14818_p12 = por %p14817_p9, %p14816_p10 }
  0xbd   : > { %p14814_p8 = pneg %p14813_p13 }
  0xbe   : > { %p14820_p0 = por %p14819_p1, %p14818_p12 }
  0xc0   : > { %p14821_p2 = pnand %p14820_p0, %p14814_p8 }
  0xc2   : > { %14824 = shalt.err (!%p14821_p2)
}
  0xc3   : > { %s14825_s24 = scalar_lea.vmem %s631_s28, 48  ;;  %s15166_s30 = smov [#allocation18]  }
  0xc4   : > { %p14826_p6 = scmp.ne.s32.totalorder %s631_s28, %s14825_s24  ;;  %s14829_s21 = sshll.u32 %s15166_s30, 4  ;;  %s14830_s21 = int_to_ptr.vmem [resolvable:$false] %s14829_s21 }
  0xc5   : > { %s14831_s25 = scalar_lea.vmem %s14830_s21, 96  ;;  %p14832_p4 = scmp.lt.s32.totalorder %s631_s28, %s14830_s21 }
  0xc6   : > { %p14827_p3 = pnand %p14826_p6, %p17744_p5  ;;  %p14833_p11 = scmp.lt.s32.totalorder %s14831_s25, %s14825_s24 }
  0xc8   : > { %p14828_p7 = pneg %p14827_p3  ;;  %p14834_p13 = por %p14833_p11, %p14832_p4 }
  0xca   : > { %p14835_p9 = pnand %p14834_p13, %p14828_p7 }
  0xcc   : > { %14838 = shalt.err (!%p14835_p9)
}
  0xcd   : > { %13266 = dma.hbm_to_vmem [thread:$0]  (%p17744_p5), %s15485_s1, 48, %s631_s28, %s17723_s3  }
  0xce   : > { %s13246_s15 = smul.u32 12, %s15341_s14  ;;  %s17749_s2 = sld [smem:[#allocation45_spill]] }
  0xcf   : > { %s13247_s0 = smul.u32 192, %s15155_s16  ;;  %s481_s29 = scalar_lea.vmem [#allocation8], %s15344_s19 }
  0xd0   : > { %s489_s24 = sshll.u32 %s481_s29, 4  ;;  %s662_s7 = scalar_lea.vmem [#allocation21], %s13246_s15  ;;  %s15524_s24 = int_to_ptr.vmem [resolvable:$true] %s489_s24 }
  0xd1   : > { %s15520_s20 = scalar_lea.hbm %s17696_s11, %s13247_s0  ;;  %s670_s1 = sshll.u32 %s662_s7, 4  ;;  %s15522_s1 = int_to_ptr.vmem [resolvable:$true] %s670_s1 }
  0xd2   : > { %s17722_s28 = scalar_lea.sflag [#allocation22], %s15338_s18  ;;  %s14839_s23 = scalar_lea.hbm %s15520_s20, 192 }
  0xd3   : > { %p14840_p8 = scmp.ne.s32.totalorder %s15520_s20, %s14839_s23  ;;  %s14843_s0 = scalar_lea.hbm %s17696_s11, 1152 }
  0xd4   : > { %s15514_s5 = scalar_lea.hbm %s17749_s2, %s15347_s27  ;;  %p14844_p1 = scmp.lt.u32.totalorder %s15520_s20, %s17696_s11 }
  0xd5   : > { %p14841_p10 = pnand %p14840_p8, %p17744_p5  ;;  %p14845_p0 = scmp.lt.u32.totalorder %s14843_s0, %s14839_s23 }
  0xd6   : > { %p14847_p6 = scmp.lt.u32.totalorder %s14839_s23, %s15520_s20 }
  0xd7   : > { %p14842_p12 = pneg %p14841_p10  ;;  %p14846_p2 = por %p14845_p0, %p14844_p1 }
  0xd9   : > { %p14848_p3 = por %p14847_p6, %p14846_p2 }
  0xdb   : > { %p14849_p7 = pnand %p14848_p3, %p14842_p12 }
  0xdd   : > { %14852 = shalt.err (!%p14849_p7)
}
  0xde   : > { %s14853_s7 = scalar_lea.vmem %s15522_s1, 192  ;;  %s15167_s15 = smov [#allocation21]  }
  0xdf   : > { %p14854_p4 = scmp.ne.s32.totalorder %s15522_s1, %s14853_s7  ;;  %s14857_s21 = sshll.u32 %s15167_s15, 4  ;;  %s14858_s21 = int_to_ptr.vmem [resolvable:$false] %s14857_s21 }
  0xe0   : > { %s14859_s29 = scalar_lea.vmem %s14858_s21, 384  ;;  %p14860_p9 = scmp.lt.s32.totalorder %s15522_s1, %s14858_s21 }
  0xe1   : > { %p14855_p11 = pnand %p14854_p4, %p17744_p5  ;;  %p14861_p8 = scmp.lt.s32.totalorder %s14859_s29, %s14853_s7 }
  0xe3   : > { %p14856_p13 = pneg %p14855_p11  ;;  %p14862_p10 = por %p14861_p8, %p14860_p9 }
  0xe5   : > { %p14863_p1 = pnand %p14862_p10, %p14856_p13 }
  0xe7   : > { %14866 = shalt.err (!%p14863_p1)
}
  0xe8   : > { %13268 = dma.hbm_to_vmem [thread:$0]  (%p17744_p5), %s15520_s20, 192, %s15522_s1, %s17722_s28  }
  0xe9   : > { %s14867_s23 = scalar_lea.hbm %s15514_s5, 48  ;;  %s14871_s25 = scalar_lea.hbm %s17749_s2, 288 }
  0xea   : > { %p14868_p12 = scmp.ne.s32.totalorder %s15514_s5, %s14867_s23  ;;  %p14872_p6 = scmp.lt.u32.totalorder %s15514_s5, %s17749_s2 }
  0xeb   : > { %p14873_p3 = scmp.lt.u32.totalorder %s14871_s25, %s14867_s23  ;;  %p14875_p4 = scmp.lt.u32.totalorder %s14867_s23, %s15514_s5 }
  0xec   : > { %p14869_p0 = pnand %p14868_p12, %p17744_p5 }
  0xed   : > { %p14874_p7 = por %p14873_p3, %p14872_p6 }
  0xee   : > { %p14870_p2 = pneg %p14869_p0 }
  0xef   : > { %p14876_p11 = por %p14875_p4, %p14874_p7 }
  0xf1   : > { %p14877_p13 = pnand %p14876_p11, %p14870_p2 }
  0xf3   : > { %14880 = shalt.err (!%p14877_p13)
}
  0xf4   : > { %s14881_s20 = scalar_lea.vmem %s15524_s24, 48  ;;  %s15168_s1 = smov [#allocation8]  }
  0xf5   : > { %p14882_p9 = scmp.ne.s32.totalorder %s15524_s24, %s14881_s20  ;;  %s14885_s21 = sshll.u32 %s15168_s1, 4  ;;  %s14886_s21 = int_to_ptr.vmem [resolvable:$false] %s14885_s21 }
  0xf6   : > { %s14887_s29 = scalar_lea.vmem %s14886_s21, 96  ;;  %p14888_p1 = scmp.lt.s32.totalorder %s15524_s24, %s14886_s21 }
  0xf7   : > { %p14883_p8 = pnand %p14882_p9, %p17744_p5  ;;  %p14889_p12 = scmp.lt.s32.totalorder %s14887_s29, %s14881_s20 }
  0xf9   : > { %p14884_p10 = pneg %p14883_p8  ;;  %p14890_p0 = por %p14889_p12, %p14888_p1 }
  0xfb   : > { %p14891_p6 = pnand %p14890_p0, %p14884_p10 }
  0xfd   : > { %14894 = shalt.err (!%p14891_p6)
}
  0xfe   : > { %s17750_s23 = scalar_lea.sflag [#allocation7], %s15338_s18  ;;  %s15577_s25 = scalar_lea.hbm %s17689_s4, %s15380_s17 }
  0xff   : > { %13259 = dma.hbm_to_vmem [thread:$0]  (%p17744_p5), %s15514_s5, 48, %s15524_s24, %s17750_s23  }
 0x100   : > { %s521_s7 = scalar_lea.vmem [#allocation11], %s15350_s26  ;;  %s15586_s21 = scalar_lea.hbm %s17691_s6, %s15380_s17 }
 0x101   : > { %s528_s15 = sshll.u32 %s521_s7, 4  ;;  %s14895_s29 = scalar_lea.hbm %s15577_s25, 9216  ;;  %s15580_s15 = int_to_ptr.vmem [resolvable:$true] %s528_s15 }
 0x102   : > { %p14896_p2 = scmp.ne.s32.totalorder %s15577_s25, %s14895_s29  ;;  %s14899_s23 = scalar_lea.hbm %s17689_s4, 55296 }
 0x103   : > { %p14900_p4 = scmp.lt.u32.totalorder %s15577_s25, %s17689_s4  ;;  %p14901_p11 = scmp.lt.u32.totalorder %s14899_s23, %s14895_s29 }
 0x104   : > { %p14897_p3 = pnand %p14896_p2, %p17744_p5  ;;  %p14903_p9 = scmp.lt.u32.totalorder %s14895_s29, %s15577_s25 }
 0x105   : > { %p14902_p13 = por %p14901_p11, %p14900_p4 }
 0x106   : > { %p14898_p7 = pneg %p14897_p3 }
 0x107   : > { %p14904_p8 = por %p14903_p9, %p14902_p13 }
 0x109   : > { %p14905_p10 = pnand %p14904_p8, %p14898_p7 }
 0x10b   : > { %14908 = shalt.err (!%p14905_p10)
}
 0x10c   : > { %s14909_s17 = scalar_lea.vmem %s15580_s15, 9216  ;;  %s15169_s7 = smov [#allocation11]  }
 0x10d   : > { %p14910_p1 = scmp.ne.s32.totalorder %s15580_s15, %s14909_s17  ;;  %s14913_s20 = sshll.u32 %s15169_s7, 4  ;;  %s14914_s20 = int_to_ptr.vmem [resolvable:$false] %s14913_s20 }
 0x10e   : > { %s14915_s1 = scalar_lea.vmem %s14914_s20, 18432  ;;  %p14916_p6 = scmp.lt.s32.totalorder %s15580_s15, %s14914_s20 }
 0x10f   : > { %p14911_p12 = pnand %p14910_p1, %p17744_p5  ;;  %p14917_p2 = scmp.lt.s32.totalorder %s14915_s1, %s14909_s17 }
 0x111   : > { %p14912_p0 = pneg %p14911_p12  ;;  %p14918_p3 = por %p14917_p2, %p14916_p6 }
 0x113   : > { %p14919_p4 = pnand %p14918_p3, %p14912_p0 }
 0x115   : > { %14922 = shalt.err (!%p14919_p4)
}
 0x116   : > { %s17751_s29 = smov 12   ;;  %s17752_s5 = smov 192  }
 0x117   : > { %s17753_s24 = scalar_lea.sflag [#allocation10], %s15338_s18  ;;  %s563_s23 = scalar_lea.vmem [#allocation14], %s15350_s26 }
 0x118   : > { %13261 = dma.hbm_to_vmem [thread:$0]  (%p17744_p5), %s15577_s25, 9216, %s15580_s15, %s17753_s24, %s17752_s5, %s17752_s5, %s17751_s29  }
 0x119   : > { %s570_s0 = sshll.u32 %s563_s23, 4  ;;  %s15621_s7 = scalar_lea.hbm %s17693_s8, %s15347_s27  ;;  %s15615_s0 = int_to_ptr.vmem [resolvable:$true] %s570_s0 }
 0x11a   : > { %s14923_s20 = scalar_lea.hbm %s15586_s21, 9216  ;;  %s14927_s3 = scalar_lea.hbm %s17691_s6, 55296 }
 0x11b   : > { %p14924_p7 = scmp.ne.s32.totalorder %s15586_s21, %s14923_s20  ;;  %p14928_p9 = scmp.lt.u32.totalorder %s15586_s21, %s17691_s6 }
 0x11c   : > { %p14929_p8 = scmp.lt.u32.totalorder %s14927_s3, %s14923_s20  ;;  %p14931_p1 = scmp.lt.u32.totalorder %s14923_s20, %s15586_s21 }
 0x11d   : > { %p14925_p11 = pnand %p14924_p7, %p17744_p5 }
 0x11e   : > { %p14930_p10 = por %p14929_p8, %p14928_p9 }
 0x11f   : > { %p14926_p13 = pneg %p14925_p11 }
 0x120   : > { %p14932_p12 = por %p14931_p1, %p14930_p10 }
 0x122   : > { %p14933_p0 = pnand %p14932_p12, %p14926_p13 }
 0x124   : > { %14936 = shalt.err (!%p14933_p0)
}
 0x125   : > { %s14937_s26 = scalar_lea.vmem %s15615_s0, 9216  ;;  %s15170_s28 = smov [#allocation14]  }
 0x126   : > { %p14938_p6 = scmp.ne.s32.totalorder %s15615_s0, %s14937_s26  ;;  %s14941_s15 = sshll.u32 %s15170_s28, 4  ;;  %s14942_s15 = int_to_ptr.vmem [resolvable:$false] %s14941_s15 }
 0x127   : > { %s14943_s2 = scalar_lea.vmem %s14942_s15, 18432  ;;  %p14944_p4 = scmp.lt.s32.totalorder %s15615_s0, %s14942_s15 }
 0x128   : > { %p14939_p2 = pnand %p14938_p6, %p17744_p5  ;;  %p14945_p7 = scmp.lt.s32.totalorder %s14943_s2, %s14937_s26 }
 0x12a   : > { %p14940_p3 = pneg %p14939_p2  ;;  %p14946_p11 = por %p14945_p7, %p14944_p4 }
 0x12c   : > { %p14947_p9 = pnand %p14946_p11, %p14940_p3 }
 0x12e   : > { %14950 = shalt.err (!%p14947_p9)
}
 0x12f   : > { %s17754_s3 = scalar_lea.sflag [#allocation13], %s15338_s18  ;;  %s603_s24 = scalar_lea.vmem [#allocation17], %s15344_s19 }
 0x130   : > { %13263 = dma.hbm_to_vmem [thread:$0]  (%p17744_p5), %s15586_s21, 9216, %s15615_s0, %s17754_s3, %s17752_s5, %s17752_s5, %s17751_s29  }
 0x131   : > { %s611_s23 = sshll.u32 %s603_s24, 4  ;;  %s13244_s30 = smul.u32 2304, %s15341_s14  ;;  %s612_s23 = int_to_ptr.vmem [resolvable:$true] %s611_s23 }
 0x132   : > { %s13245_s17 = smul.u32 36864, %s15155_s16  ;;  %s14951_s20 = scalar_lea.hbm %s15621_s7, 48 }
 0x133   : > { %p14952_p13 = scmp.ne.s32.totalorder %s15621_s7, %s14951_s20  ;;  %s14955_s26 = scalar_lea.hbm %s17693_s8, 288 }
 0x134   : > { %p14956_p1 = scmp.lt.u32.totalorder %s15621_s7, %s17693_s8  ;;  %p14957_p12 = scmp.lt.u32.totalorder %s14955_s26, %s14951_s20 }
 0x135   : > { %p14953_p8 = pnand %p14952_p13, %p17744_p5  ;;  %p14959_p6 = scmp.lt.u32.totalorder %s14951_s20, %s15621_s7 }
 0x136   : > { %p14958_p0 = por %p14957_p12, %p14956_p1 }
 0x137   : > { %p14954_p10 = pneg %p14953_p8 }
 0x138   : > { %p14960_p2 = por %p14959_p6, %p14958_p0 }
 0x13a   : > { %p14961_p3 = pnand %p14960_p2, %p14954_p10 }
 0x13c   : > { %14964 = shalt.err (!%p14961_p3)
}
 0x13d   : > { %s14965_s21 = scalar_lea.vmem %s612_s23, 48  ;;  %s15171_s0 = smov [#allocation17]  }
 0x13e   : > { %p14966_p4 = scmp.ne.s32.totalorder %s612_s23, %s14965_s21  ;;  %s14969_s2 = sshll.u32 %s15171_s0, 4  ;;  %s14970_s2 = int_to_ptr.vmem [resolvable:$false] %s14969_s2 }
 0x13f   : > { %s14971_s3 = scalar_lea.vmem %s14970_s2, 96  ;;  %p14972_p9 = scmp.lt.s32.totalorder %s612_s23, %s14970_s2 }
 0x140   : > { %p14967_p7 = pnand %p14966_p4, %p17744_p5  ;;  %p14973_p13 = scmp.lt.s32.totalorder %s14971_s3, %s14965_s21 }
 0x142   : > { %p14968_p11 = pneg %p14967_p7  ;;  %p14974_p8 = por %p14973_p13, %p14972_p9 }
 0x144   : > { %p14975_p1 = pnand %p14974_p8, %p14968_p11 }
 0x146   : > { %14978 = shalt.err (!%p14975_p1)
}
 0x147   : > { %s17755_s24 = scalar_lea.sflag [#allocation16], %s15338_s18  ;;  %s15676_s25 = scalar_lea.hbm %s17695_s10, %s13245_s17 }
 0x148   : > { %13265 = dma.hbm_to_vmem [thread:$0]  (%p17744_p5), %s15621_s7, 48, %s612_s23, %s17755_s24  }
 0x149   : > { %s641_s26 = scalar_lea.vmem [#allocation20], %s13244_s30  ;;  %s14979_s15 = scalar_lea.hbm %s15676_s25, 36864 }
 0x14a   : > { %s648_s28 = sshll.u32 %s641_s26, 4  ;;  %p14980_p10 = scmp.ne.s32.totalorder %s15676_s25, %s14979_s15  ;;  %s15680_s28 = int_to_ptr.vmem [resolvable:$true] %s648_s28 }
 0x14b   : > { %s14983_s21 = scalar_lea.hbm %s17695_s10, 221184  ;;  %p14984_p6 = scmp.lt.u32.totalorder %s15676_s25, %s17695_s10 }
 0x14c   : > { %p14981_p12 = pnand %p14980_p10, %p17744_p5  ;;  %p14985_p2 = scmp.lt.u32.totalorder %s14983_s21, %s14979_s15 }
 0x14d   : > { %p14987_p4 = scmp.lt.u32.totalorder %s14979_s15, %s15676_s25 }
 0x14e   : > { %p14982_p0 = pneg %p14981_p12  ;;  %p14986_p3 = por %p14985_p2, %p14984_p6 }
 0x150   : > { %p14988_p7 = por %p14987_p4, %p14986_p3 }
 0x152   : > { %p14989_p11 = pnand %p14988_p7, %p14982_p0 }
 0x154   : > { %14992 = shalt.err (!%p14989_p11)
}
 0x155   : > { %s14993_s3 = scalar_lea.vmem %s15680_s28, 36864  ;;  %s15172_s24 = smov [#allocation20]  }
 0x156   : > { %p14994_p9 = scmp.ne.s32.totalorder %s15680_s28, %s14993_s3  ;;  %s14997_s20 = sshll.u32 %s15172_s24, 4  ;;  %s14998_s20 = int_to_ptr.vmem [resolvable:$false] %s14997_s20 }
 0x157   : > { %s14999_s1 = scalar_lea.vmem %s14998_s20, 73728  ;;  %p15000_p1 = scmp.lt.s32.totalorder %s15680_s28, %s14998_s20 }
 0x158   : > { %p14995_p13 = pnand %p14994_p9, %p17744_p5  ;;  %p15001_p10 = scmp.lt.s32.totalorder %s14999_s1, %s14993_s3 }
 0x15a   : > { %p14996_p8 = pneg %p14995_p13  ;;  %p15002_p12 = por %p15001_p10, %p15000_p1 }
 0x15c   : > { %p15003_p6 = pnand %p15002_p12, %p14996_p8 }
 0x15e   : > { %15006 = shalt.err (!%p15003_p6)
}
 0x15f   : > { %s15173_s26 = smov 768   ;;  %s15174_s15 = smov 48  }
 0x160   : > { %s17756_s7 = scalar_lea.sflag [#allocation19], %s15338_s18  ;;  %s15710_s0 = scalar_lea.hbm %s17697_s12, %s13245_s17 }
 0x161   : > { %13267 = dma.hbm_to_vmem [thread:$0]  (%p17744_p5), %s15676_s25, 36864, %s15680_s28, %s17756_s7, %s15173_s26, %s15173_s26, %s15174_s15  }
 0x162   : > { %s681_s2 = scalar_lea.vmem [#allocation23], %s13244_s30  ;;  %s15007_s24 = scalar_lea.hbm %s15710_s0, 36864 }
 0x163   : > { %s688_s3 = sshll.u32 %s681_s2, 4  ;;  %p15008_p0 = scmp.ne.s32.totalorder %s15710_s0, %s15007_s24  ;;  %s15714_s3 = int_to_ptr.vmem [resolvable:$true] %s688_s3 }
 0x164   : > { %s15011_s28 = scalar_lea.hbm %s17697_s12, 221184  ;;  %p15012_p4 = scmp.lt.u32.totalorder %s15710_s0, %s17697_s12 }
 0x165   : > { %p15009_p2 = pnand %p15008_p0, %p17744_p5  ;;  %p15013_p7 = scmp.lt.u32.totalorder %s15011_s28, %s15007_s24 }
 0x166   : > { %p15015_p9 = scmp.lt.u32.totalorder %s15007_s24, %s15710_s0 }
 0x167   : > { %p15010_p3 = pneg %p15009_p2  ;;  %p15014_p11 = por %p15013_p7, %p15012_p4 }
 0x169   : > { %p15016_p13 = por %p15015_p9, %p15014_p11 }
 0x16b   : > { %p15017_p8 = pnand %p15016_p13, %p15010_p3 }
 0x16d   : > { %15020 = shalt.err (!%p15017_p8)
}
 0x16e   : > { %s15021_s30 = scalar_lea.vmem %s15714_s3, 36864  ;;  %s15175_s1 = smov [#allocation23]  }
 0x16f   : > { %p15022_p1 = scmp.ne.s32.totalorder %s15714_s3, %s15021_s30  ;;  %s15025_s26 = sshll.u32 %s15175_s1, 4  ;;  %s15026_s26 = int_to_ptr.vmem [resolvable:$false] %s15025_s26 }
 0x170   : > { %s15027_s15 = scalar_lea.vmem %s15026_s26, 73728  ;;  %p15028_p6 = scmp.lt.s32.totalorder %s15714_s3, %s15026_s26 }
 0x171   : > { %p15023_p10 = pnand %p15022_p1, %p17744_p5  ;;  %p15029_p0 = scmp.lt.s32.totalorder %s15027_s15, %s15021_s30 }
 0x173   : > { %p15024_p12 = pneg %p15023_p10  ;;  %p15030_p2 = por %p15029_p0, %p15028_p6 }
 0x175   : > { %p15031_p4 = pnand %p15030_p2, %p15024_p12 }
 0x177   : > { %15034 = shalt.err (!%p15031_p4)
}
 0x178   : > { %s17757_s7 = scalar_lea.sflag [#allocation22], %s15338_s18  ;;  %s15746_s2 = scalar_lea.hbm %s17698_s13, %s15347_s27 }
 0x179   : > { %13269 = dma.hbm_to_vmem [thread:$0]  (%p17744_p5), %s15710_s0, 36864, %s15714_s3, %s17757_s7, %s17752_s5, %s17752_s5, %s17751_s29  }
 0x17a   : > { %s702_s24 = scalar_lea.vmem [#allocation24], %s15344_s19  ;;  %s699_s18 = scalar_lea.sflag [#allocation25], %s15341_s14 }
 0x17b   : > { %s710_s16 = sshll.u32 %s702_s24, 4  ;;  %s15035_s25 = scalar_lea.hbm %s15746_s2, 48  ;;  %s711_s16 = int_to_ptr.vmem [resolvable:$true] %s710_s16 }
 0x17c   : > { %p15036_p3 = scmp.ne.s32.totalorder %s15746_s2, %s15035_s25  ;;  %s15039_s5 = scalar_lea.hbm %s17698_s13, 288 }
 0x17d   : > { %p15040_p9 = scmp.lt.u32.totalorder %s15746_s2, %s17698_s13  ;;  %p15041_p13 = scmp.lt.u32.totalorder %s15039_s5, %s15035_s25 }
 0x17e   : > { %p15037_p7 = pnand %p15036_p3, %p17744_p5  ;;  %p15043_p1 = scmp.lt.u32.totalorder %s15035_s25, %s15746_s2 }
 0x17f   : > { %p15042_p8 = por %p15041_p13, %p15040_p9 }
 0x180   : > { %p15038_p11 = pneg %p15037_p7 }
 0x181   : > { %p15044_p10 = por %p15043_p1, %p15042_p8 }
 0x183   : > { %p15045_p12 = pnand %p15044_p10, %p15038_p11 }
 0x185   : > { %15048 = shalt.err (!%p15045_p12)
}
 0x186   : > { %s15049_s14 = scalar_lea.vmem %s711_s16, 48  ;;  %s15176_s19 = smov [#allocation24]  }
 0x187   : > { %p15050_p6 = scmp.ne.s32.totalorder %s711_s16, %s15049_s14  ;;  %s15053_s3 = sshll.u32 %s15176_s19, 4  ;;  %s15054_s3 = int_to_ptr.vmem [resolvable:$false] %s15053_s3 }
 0x188   : > { %s15055_s17 = scalar_lea.vmem %s15054_s3, 96  ;;  %p15056_p4 = scmp.lt.s32.totalorder %s711_s16, %s15054_s3 }
 0x189   : > { %p15051_p0 = pnand %p15050_p6, %p17744_p5  ;;  %p15057_p3 = scmp.lt.s32.totalorder %s15055_s17, %s15049_s14 }
 0x18b   : > { %p15052_p2 = pneg %p15051_p0  ;;  %p15058_p7 = por %p15057_p3, %p15056_p4 }
 0x18d   : > { %p15059_p9 = pnand %p15058_p7, %p15052_p2 }
 0x18f   : > { %15062 = shalt.err (!%p15059_p9)
}
 0x190   : > { %13270 = dma.hbm_to_vmem [thread:$0]  (%p17744_p5), %s15746_s2, 48, %s711_s16, %s699_s18  }
 0x191 PF: > { %s17758_s20 = sld [smem:[#allocation42_spill]] }
 0x197   : > { %p17759_p11 = scmp.ne.s32.totalorder %s17758_s20, 0 }
 0x198   : > { %s17760_s30 = sld [smem:[#allocation38_spill]] (!%p17759_p11) }
 0x199   : > { %719 = sbr.rel (%p17759_p11) target bundleno = 6967 (0x1b37), region = 76 }
 0x19e   : > { %p17761_p13 = scmp.eq.s32.totalorder (!%p17759_p11), %s17760_s30, 0 }
 0x1a0   : > { %15106 = dma.done.wait (%p17761_p13), [#allocation4], 1536   ;;  %p17762_p8 = pmov %p17761_p13 }
 0x1a1   : > { %s17763_s1 = sld [smem:[#allocation36_spill]]  ;;  %s17764_s26 = sld [smem:[#allocation41_spill]] }
 0x1a2   : > { %15108 = vsyncadd (%p17762_p8), [#allocation4], 4294965760  ;;  %s15774_s15 = sand.u32 1, %s17760_s30  }
 0x1a3   : > { %s726_s23 = scalar_lea.sflag [#allocation7], %s15774_s15 }
 0x1a7   : > { %s15777_s7 = sand.u32 1, %s17763_s1   ;;  %p17765_p5 = scmp.ne.s32.totalorder %s17764_s26, 0 }
 0x1a8   : > { %s15780_s22 = smul.u32 3, %s15777_s7 }
 0x1aa   : > { %s729_s21 = scalar_lea.vmem [#allocation6], %s15780_s22 }
 0x1ab   : > { %15110 = dma.done.wait (%p17765_p5), %s726_s23, 96  }
 0x1ac   : > { %15112 = vsyncadd (%p17765_p5), %s726_s23, 4294967200  ;;  %s13253_s2 = smul.u32 576, %s15777_s7  ;;  %s738_s24 = scalar_lea.vmem [#allocation8], %s15780_s22 }
 0x1ad   : > { %s744_s16 = scalar_lea.sflag [#allocation10], %s15774_s15 }
 0x1ae   : > { %s15791_s18 = scalar_lea.vmem [#allocation9], %s13253_s2 }
 0x1af   : > { %15114 = dma.done.wait (%p17765_p5), %s744_s16, 18432  }
 0x1b0   : > { %15116 = vsyncadd (%p17765_p5), %s744_s16, 4294948864  ;;  %s15797_s25 = scalar_lea.vmem [#allocation11], %s13253_s2  ;;  %s762_s28 = scalar_lea.sflag [#allocation13], %s15774_s15 }
 0x1b1   : > { %s15800_s29 = scalar_lea.vmem [#allocation12], %s13253_s2 }
 0x1b2   : > { %15118 = dma.done.wait (%p17765_p5), %s762_s28, 18432  }
 0x1b3   : > { %15120 = vsyncadd (%p17765_p5), %s762_s28, 4294948864  ;;  %s15806_s5 = scalar_lea.vmem [#allocation14], %s13253_s2  ;;  %s780_s0 = scalar_lea.sflag [#allocation16], %s15774_s15 }
 0x1b4   : > { %s783_s27 = scalar_lea.vmem [#allocation15], %s15780_s22 }
 0x1b5   : > { %15122 = dma.done.wait (%p17765_p5), %s780_s0, 96  }
 0x1b6   : > { %15124 = vsyncadd (%p17765_p5), %s780_s0, 4294967200  ;;  %s792_s14 = scalar_lea.vmem [#allocation17], %s15780_s22  ;;  %s798_s19 = scalar_lea.sflag [#allocation19], %s15774_s15 }
 0x1b7   : > { %s801_s3 = scalar_lea.vmem [#allocation18], %s15780_s22 }
 0x1b8   : > { %15126 = dma.done.wait (%p17765_p5), %s798_s19, 36912  }
 0x1b9   : > { %15128 = vsyncadd (%p17765_p5), %s798_s19, 4294930384  ;;  %s13254_s17 = smul.u32 2304, %s15777_s7  ;;  %s816_s23 = scalar_lea.sflag [#allocation22], %s15774_s15 }
 0x1ba   : > { %s13255_s20 = smul.u32 12, %s15777_s7 }
 0x1bb   : > { %s15823_s1 = scalar_lea.vmem [#allocation20], %s13254_s17 }
 0x1bc   : > { %s15826_s2 = scalar_lea.vmem [#allocation21], %s13255_s20 }
 0x1bd   : > { %15130 = dma.done.wait (%p17765_p5), %s816_s23, 37056  }
 0x1be   : > { %15132 = vsyncadd (%p17765_p5), %s816_s23, 4294930240  ;;  %s15832_s16 = scalar_lea.vmem [#allocation23], %s13254_s17  ;;  %s834_s28 = scalar_lea.sflag [#allocation25], %s15777_s7 }
 0x1bf   : > { %s837_s0 = scalar_lea.vmem [#allocation24], %s15780_s22 }
 0x1c0   : > { %15134 = dma.done.wait (%p17765_p5), %s834_s28, 48  }
 0x1c1   : > { %15136 = vsyncadd (%p17765_p5), %s834_s28, 4294967248  ;;  %p17766_p1 = scmp.ne.s32.totalorder %s17760_s30, 0 }
 0x1c2   : > { %v942_v0 = vld [vmem:[#allocation3] sm:$0xff] (!%p17766_p1)  ;;  %v943_v1 = vld [vmem:[#allocation3 + $0x8] sm:$0xff] (!%p17766_p1)  ;;  %v944_v2 = vld [vmem:[#allocation3 + $0x10] sm:$0xff] (!%p17766_p1)  ;;  %v966_v3 = vlaneseq (!%p17766_p1)  ;;  %vm975_vm0 = vcmask (!%p17766_p1), 130048   ;;  %v15177_v16 = vmov (!%p17766_p1), -1e+30  }
 0x1c3   : > { %941 = sbr.rel (%p17766_p1) target bundleno = 459 (0x1cb), region = 136  ;;  %954 = vst [vmem:[#allocation26] sm:$0xff] (!%p17766_p1), %v942_v0  ;;  %955 = vst [vmem:[#allocation26 + $0x8] sm:$0xff] (!%p17766_p1), %v943_v1  ;;  %v945_v4 = vld [vmem:[#allocation3 + $0x18] sm:$0xff] (!%p17766_p1)  ;;  %v946_v5 = vld [vmem:[#allocation3 + $0x20] sm:$0xff] (!%p17766_p1) }
 0x1c4   : > { %956 = vst [vmem:[#allocation26 + $0x10] sm:$0xff] (!%p17766_p1), %v944_v2  ;;  %v947_v6 = vld [vmem:[#allocation3 + $0x28] sm:$0xff] (!%p17766_p1)  ;;  %957 = vst [vmem:[#allocation26 + $0x18] sm:$0xff] (!%p17766_p1), %v945_v4  ;;  %v948_v7 = vld [vmem:[#allocation3 + $0x30] sm:$0xff] (!%p17766_p1)  ;;  %v967_v10 = vshrl.u32 (!%p17766_p1), %v966_v3, 7  ;;  %v970_v11 = vand.u32 (!%p17766_p1), 127, %v966_v3 }
 0x1c5   : > { %958 = vst [vmem:[#allocation26 + $0x20] sm:$0xff] (!%p17766_p1), %v946_v5  ;;  %959 = vst [vmem:[#allocation26 + $0x28] sm:$0xff] (!%p17766_p1), %v947_v6  ;;  %v949_v8 = vld [vmem:[#allocation3 + $0x38] sm:$0xff] (!%p17766_p1)  ;;  %v950_v9 = vld [vmem:[#allocation3 + $0x40] sm:$0xff] (!%p17766_p1) }
 0x1c6   : > { %960 = vst [vmem:[#allocation26 + $0x30] sm:$0xff] (!%p17766_p1), %v948_v7  ;;  %961 = vst [vmem:[#allocation26 + $0x38] sm:$0xff] (!%p17766_p1), %v949_v8  ;;  %v951_v12 = vld [vmem:[#allocation3 + $0x48] sm:$0xff] (!%p17766_p1)  ;;  %v952_v13 = vld [vmem:[#allocation3 + $0x50] sm:$0xff] (!%p17766_p1)  ;;  %vm971_vm1 = vcmp.le.s32.totalorder (!%p17766_p1), %v970_v11, %v967_v10  ;;  %v968_v15 = vadd.s32 (!%p17766_p1), 8, %v967_v10 }
 0x1c7   : > { %962 = vst [vmem:[#allocation26 + $0x40] sm:$0xff] (!%p17766_p1), %v950_v9  ;;  %v953_v14 = vld [vmem:[#allocation3 + $0x58] sm:$0xff] (!%p17766_p1)  ;;  %963 = vst [vmem:[#allocation26 + $0x48] sm:$0xff] (!%p17766_p1), %v951_v12  ;;  %v973_v17 = vsel (!%p17766_p1), %vm971_vm1, 0.0, %v15177_v16 }
 0x1c8   : > { %964 = vst [vmem:[#allocation26 + $0x50] sm:$0xff] (!%p17766_p1), %v952_v13  ;;  %965 = vst [vmem:[#allocation26 + $0x58] sm:$0xff] (!%p17766_p1), %v953_v14  ;;  %vm972_vm2 = vcmp.le.s32.totalorder (!%p17766_p1), %v970_v11, %v968_v15 }
 0x1c9   : > { %976 = vst.msk [vmem:[#allocation2] sm:$0xff] (!%p17766_p1), %vm975_vm0, %v973_v17  ;;  %v974_v18 = vsel (!%p17766_p1), %vm972_vm2, 0.0, %v15177_v16 }
 0x1ca   : > { %977 = vst.msk [vmem:[#allocation2 + $0x8] sm:$0xff] %vm975_vm0, %v974_v18 }
 0x1cb PF: > { %v15842_v19 = vld [vmem:[#allocation26] sm:$0xff]  ;;  %v15844_v20 = vld [vmem:[#allocation26 + $0x8] sm:$0xff]  ;;  %v13347_v40 = vld [vmem:[%s15791_s18] ss:$12 sps:$4 sm:$0xff]   ;;  %vm15180_vm3 = vmmov 0   ;;  %vm3211_vm4 = vcmask 523264  }
 0x1cc   : > { %v15846_v21 = vld [vmem:[#allocation26 + $0x10] sm:$0xff]  ;;  %v994_v22 = vadd.f32 %v15844_v20, %v15842_v19  ;;  %v15858_v27 = vld [vmem:[#allocation26 + $0x18] sm:$0xff]  ;;  %v13353_v44 = vld [vmem:[%s15791_s18 + $0x30] ss:$12 sps:$4 sm:$0xff]   ;;  %vm3306_vm5 = vcmask 130048   ;;  %s15181_s30 = smov 64  }
 0x1cd   : > { %v15860_v28 = vld [vmem:[#allocation26 + $0x20] sm:$0xff]  ;;  %v15862_v29 = vld [vmem:[#allocation26 + $0x28] sm:$0xff]  ;;  %v13359_v49 = vld [vmem:[%s15791_s18 + $0x60] ss:$12 sps:$4 sm:$0xff]   ;;  %s17767_s26 = sld [smem:[#allocation38_spill]]  ;;  %s15182_s15 = smov [#allocation26]  }
 0x1ce   : > { %v15850_v23 = vld [vmem:[#allocation26 + $0x30] sm:$0xff]  ;;  %v15852_v24 = vld [vmem:[#allocation26 + $0x38] sm:$0xff]  ;;  %v995_v30 = vadd.f32 %v994_v22, %v15846_v21  ;;  %v998_v31 = vadd.f32 %v15860_v28, %v15858_v27  ;;  %v13365_v53 = vld [vmem:[%s15791_s18 + $0x90] ss:$12 sps:$4 sm:$0xff]   ;;  %s11097_s7 = sshll.u32 %s15182_s15, 4  ;;  %s11098_s7 = int_to_ptr.vmem [resolvable:$true] %s11097_s7 }
 0x1cf   : > { %v15854_v25 = vld [vmem:[#allocation26 + $0x40] sm:$0xff]  ;;  %v1002_v26 = vadd.f32 %v15852_v24, %v15850_v23  ;;  %v15867_v32 = vld [vmem:[#allocation26 + $0x48] sm:$0xff]  ;;  %v13371_v57 = vld [vmem:[%s15791_s18 + $0xc0] ss:$12 sps:$4 sm:$0xff]   ;;  %s15063_s22 = scalar_lea.vmem %s11098_s7, 1536  ;;  %p15070_p2 = scmp.lt.s32.totalorder %s11098_s7, %s11098_s7 }
 0x1d0   : > { %v15869_v33 = vld [vmem:[#allocation26 + $0x50] sm:$0xff]  ;;  %v15871_v34 = vld [vmem:[#allocation26 + $0x58] sm:$0xff]  ;;  %996 = vadd.xlane.f32.xlu0 %v995_v30  ;;  %v999_v37 = vadd.f32 %v998_v31, %v15862_v29  ;;  %p15064_p12 = scmp.ne.s32.totalorder %s11098_s7, %s15063_s22  ;;  %p15071_p4 = scmp.lt.s32.totalorder %s15063_s22, %s15063_s22 }
 0x1d1   : > { %v1003_v35 = vadd.f32 %v1002_v26, %v15854_v25  ;;  %v1006_v36 = vadd.f32 %v15869_v33, %v15867_v32  ;;  %v13345_v39 = vld [vmem:[%s15791_s18 + $0x4] ss:$12 sps:$4 sm:$0xff]   ;;  %v13348_v41 = vld [vmem:[%s15791_s18 + $0x1c] ss:$12 sps:$4 sm:$0xff]   ;;  %v13351_v43 = vld [vmem:[%s15791_s18 + $0x34] ss:$12 sps:$4 sm:$0xff]  }
 0x1d2   : > { %1621 = vmatprep.subr.bf16.mxu0 %v13345_v39  ;;  %v13350_v42 = vld [vmem:[%s15791_s18 + $0x18] ss:$12 sps:$4 sm:$0xff]   ;;  %v13372_v46 = vld [vmem:[%s15791_s18 + $0x188] ss:$12 sps:$4 sm:$0xff]   ;;  %p15072_p3 = por %p15071_p4, %p15070_p2 }
 0x1d3   : > { %1004 = vadd.xlane.f32.xlu1 %v1003_v35  ;;  %v1007_v38 = vadd.f32 %v1006_v36, %v15871_v34  ;;  %1622 = vmatpush1.bf16.msra.mxu0 %v13347_v40  ;;  %v13354_v45 = vld [vmem:[%s15791_s18 + $0x4c] ss:$12 sps:$4 sm:$0xff]   ;;  %v13356_v47 = vld [vmem:[%s15791_s18 + $0x48] ss:$12 sps:$4 sm:$0xff]   ;;  %v13357_v48 = vld [vmem:[%s15791_s18 + $0x64] ss:$12 sps:$4 sm:$0xff]  }
 0x1d4   : > { %1000 = vadd.xlane.f32.xlu0 %v999_v37  ;;  %1623 = vmatprep.subr.bf16.mxu0 %v13348_v41  ;;  %v13360_v50 = vld [vmem:[%s15791_s18 + $0x7c] ss:$12 sps:$4 sm:$0xff]   ;;  %v13362_v51 = vld [vmem:[%s15791_s18 + $0x78] ss:$12 sps:$4 sm:$0xff]   ;;  %v13363_v52 = vld [vmem:[%s15791_s18 + $0x94] ss:$12 sps:$4 sm:$0xff]  }
 0x1d5   : > { %12722 = vmatprep.subr.bf16.mxu1 %v13372_v46  ;;  %v13366_v54 = vld [vmem:[%s15791_s18 + $0xac] ss:$12 sps:$4 sm:$0xff]   ;;  %v13368_v55 = vld [vmem:[%s15791_s18 + $0xa8] ss:$12 sps:$4 sm:$0xff]   ;;  %v13369_v56 = vld [vmem:[%s15791_s18 + $0xc4] ss:$12 sps:$4 sm:$0xff]  }
 0x1d6   : > { %12723 = vmatpush3.bf16.msra.mxu1 %v13372_v46  ;;  %v13373_v58 = vld [vmem:[%s15791_s18 + $0xdc] ss:$12 sps:$4 sm:$0xff]   ;;  %v13375_v35 = vld [vmem:[%s15791_s18 + $0xd8] ss:$12 sps:$4 sm:$0xff]   ;;  %v13376_v36 = vld [vmem:[%s15791_s18 + $0x1a0] ss:$12 sps:$4 sm:$0xff]  }
 0x1d7   : > { %1008 = vadd.xlane.f32.xlu1 %v1007_v38  ;;  %1624 = vmatpush1.bf16.msra.mxu0 %v13350_v42  ;;  %v13377_v37 = vld [vmem:[%s15791_s18 + $0xf4] ss:$12 sps:$4 sm:$0xff]   ;;  %v13379_v38 = vld [vmem:[%s15791_s18 + $0xf0] ss:$12 sps:$4 sm:$0xff]   ;;  %v13380_v39 = vld [vmem:[%s15791_s18 + $0x1b8] ss:$12 sps:$4 sm:$0xff]  }
 0x1d8   : > { %1625 = vmatprep.subr.bf16.mxu0 %v13351_v43  ;;  %12724 = vmatprep.subr.bf16.mxu1 %v13376_v36  ;;  %v13381_v40 = vld [vmem:[%s15791_s18 + $0x10c] ss:$12 sps:$4 sm:$0xff]   ;;  %v13383_v41 = vld [vmem:[%s15791_s18 + $0x108] ss:$12 sps:$4 sm:$0xff]   ;;  %v13384_v42 = vld [vmem:[%s15791_s18 + $0x1d0] ss:$12 sps:$4 sm:$0xff]  }
 0x1d9   : > { %v13385_v43 = vld [vmem:[%s15791_s18 + $0x124] ss:$12 sps:$4 sm:$0xff]   ;;  %v13389_v46 = vld [vmem:[%s15791_s18 + $0x13c] ss:$12 sps:$4 sm:$0xff]   ;;  %p13296_p10 = scmp.eq.s32.totalorder %s17767_s26, 5 }
 0x1da   : > { %12725 = vmatpush3.bf16.msra.mxu1 %v13376_v36 }
 0x1db   : > { %1626 = vmatpush1.bf16.msra.mxu0 %v13353_v44  ;;  %12726 = vmatprep.subr.bf16.mxu1 %v13380_v39  ;;  %v13387_v44 = vld [vmem:[%s15791_s18 + $0x120] ss:$12 sps:$4 sm:$0xff]   ;;  %p15065_p6 = pnand %p15064_p12, %p13296_p10 }
 0x1dc   : > { %1627 = vmatprep.subr.bf16.mxu0 %v13354_v45  ;;  %v13388_v45 = vld [vmem:[%s15791_s18 + $0x1e8] ss:$12 sps:$4 sm:$0xff]  }
 0x1dd   : > { %p15066_p0 = pneg %p15065_p6 }
 0x1de   : > { %12727 = vmatpush3.bf16.msra.mxu1 %v13380_v39 }
 0x1df   : > { %1628 = vmatpush1.bf16.msra.mxu0 %v13356_v47  ;;  %12728 = vmatprep.subr.bf16.mxu1 %v13384_v42  ;;  %v13391_v47 = vld [vmem:[%s15791_s18 + $0x138] ss:$12 sps:$4 sm:$0xff]   ;;  %p15073_p7 = pnand %p15072_p3, %p15066_p0 }
 0x1e0   : > { %1629 = vmatprep.subr.bf16.mxu0 %v13357_v48  ;;  %v13392_v48 = vld [vmem:[%s15791_s18 + $0x200] ss:$12 sps:$4 sm:$0xff]  }
 0x1e2   : > { %12729 = vmatpush3.bf16.msra.mxu1 %v13384_v42 }
 0x1e3   : > { %1630 = vmatpush1.bf16.msra.mxu0 %v13359_v49  ;;  %12730 = vmatprep.subr.bf16.mxu1 %v13388_v45  ;;  %v13393_v49 = vld [vmem:[%s15791_s18 + $0x154] ss:$12 sps:$4 sm:$0xff]  }
 0x1e4   : > { %1631 = vmatprep.subr.bf16.mxu0 %v13360_v50  ;;  %v13395_v50 = vld [vmem:[%s15791_s18 + $0x150] ss:$12 sps:$4 sm:$0xff]  }
 0x1e6   : > { %12731 = vmatpush3.bf16.msra.mxu1 %v13388_v45 }
 0x1e7   : > { %1632 = vmatpush1.bf16.msra.mxu0 %v13362_v51  ;;  %v13396_v51 = vld [vmem:[%s15791_s18 + $0x218] ss:$12 sps:$4 sm:$0xff]   ;;  %12732 = vmatprep.subr.bf16.mxu1 %v13392_v48 }
 0x1e8   : > { %1633 = vmatprep.subr.bf16.mxu0 %v13363_v52  ;;  %v13397_v52 = vld [vmem:[%s15791_s18 + $0x16c] ss:$12 sps:$4 sm:$0xff]  }
 0x1ea   : > { %12733 = vmatpush3.bf16.msra.mxu1 %v13392_v48 }
 0x1eb   : > { %1634 = vmatpush1.bf16.msra.mxu0 %v13365_v53  ;;  %v13399_v53 = vld [vmem:[%s15791_s18 + $0x168] ss:$12 sps:$4 sm:$0xff]   ;;  %12734 = vmatprep.subr.bf16.mxu1 %v13396_v51 }
 0x1ec   : > { %1635 = vmatprep.subr.bf16.mxu0 %v13366_v54  ;;  %v13400_v54 = vld [vmem:[%s15791_s18 + $0x230] ss:$12 sps:$4 sm:$0xff]  }
 0x1ee   : > { %12735 = vmatpush3.bf16.msra.mxu1 %v13396_v51 }
 0x1ef   : > { %1636 = vmatpush1.bf16.msra.mxu0 %v13368_v55  ;;  %12736 = vmatprep.subr.bf16.mxu1 %v13400_v54  ;;  %v13403_v55 = vld [vmem:[%s15791_s18 + $0x184] ss:$12 sps:$4 sm:$0xff]  }
 0x1f0   : > { %1637 = vmatprep.subr.bf16.mxu0 %v13369_v56  ;;  %v13406_v56 = vld [vmem:[%s15797_s25 + $0x184] ss:$12 sps:$4 sm:$0xff]  }
 0x1f2   : > { %12737 = vmatpush3.bf16.msra.mxu1 %v13400_v54 }
 0x1f3   : > { %1638 = vmatpush1.bf16.msra.mxu0 %v13371_v57  ;;  %2358 = vmatprep.subr.bf16.mxu1 %v13406_v56 }
 0x1f4   : > { %1639 = vmatprep.subr.bf16.mxu0 %v13373_v58 }
 0x1f7   : > { %1640 = vmatpush1.bf16.msra.mxu0 %v13375_v35 }
 0x1f8   : > { %1641 = vmatprep.subr.bf16.mxu0 %v13377_v37 }
 0x1fb   : > { %1642 = vmatpush1.bf16.msra.mxu0 %v13379_v38 }
 0x1fc   : > { %1643 = vmatprep.subr.bf16.mxu0 %v13381_v40 }
 0x1ff   : > { %1644 = vmatpush1.bf16.msra.mxu0 %v13383_v41 }
 0x200   : > { %1645 = vmatprep.subr.bf16.mxu0 %v13385_v43 }
 0x203   : > { %1646 = vmatpush1.bf16.msra.mxu0 %v13387_v44 }
 0x204   : > { %1647 = vmatprep.subr.bf16.mxu0 %v13389_v46 }
 0x207   : > { %1648 = vmatpush1.bf16.msra.mxu0 %v13391_v47 }
 0x208   : > { %1649 = vmatprep.subr.bf16.mxu0 %v13393_v49 }
 0x20b   : > { %1650 = vmatpush1.bf16.msra.mxu0 %v13395_v50 }
 0x20c   : > { %1651 = vmatprep.subr.bf16.mxu0 %v13397_v52  ;;  %v13409_v52 = vld [vmem:[%s15791_s18 + $0x19c] ss:$12 sps:$4 sm:$0xff]  }
 0x20f   : > { %1652 = vmatpush1.bf16.msra.mxu0 %v13399_v53 }
 0x210   : > { %1674 = vmatprep.subr.bf16.mxu0 %v13403_v55 }
 0x25d   : > { %v997_v59 = vpop.xlane.xlu0 %996 }
 0x25e   : > { %v1011_v60 = vmul.f32 0.0026041667, %v997_v59  ;;  %v1080_v59 = vlaneseq }
 0x260   : > { %v1005_v61 = vpop.xlane.xlu1 %1004  ;;  %v15899_v63 = vsub.f32 %v15842_v19, %v1011_v60  ;;  %v15902_v0 = vsub.f32 %v15844_v20, %v1011_v60  ;;  %v15905_v1 = vsub.f32 %v15846_v21, %v1011_v60 }
 0x261   : > { %v1013_v62 = vmul.f32 0.0026041667, %v1005_v61  ;;  %v1001_v5 = vpop.xlane.xlu0 %1000 }
 0x262   : > { %v1012_v6 = vmul.f32 0.0026041667, %v1001_v5  ;;  %v1027_v8 = vmul.f32 %v15899_v63, %v15899_v63  ;;  %v1028_v9 = vmul.f32 %v15902_v0, %v15902_v0  ;;  %v1029_v10 = vmul.f32 %v15905_v1, %v15905_v1 }
 0x263   : > { %v15908_v2 = vsub.f32 %v15850_v23, %v1013_v62  ;;  %v15911_v3 = vsub.f32 %v15852_v24, %v1013_v62  ;;  %v15914_v4 = vsub.f32 %v15854_v25, %v1013_v62 }
 0x264   : > { %v1009_v7 = vpop.xlane.xlu1 %1008  ;;  %v15929_v15 = vsub.f32 %v15858_v27, %v1012_v6  ;;  %v15932_v16 = vsub.f32 %v15860_v28, %v1012_v6  ;;  %v15935_v17 = vsub.f32 %v15862_v29, %v1012_v6  ;;  %v1039_v18 = vadd.f32 %v1028_v9, %v1027_v8 }
 0x265   : > { %v1014_v11 = vmul.f32 0.0026041667, %v1009_v7  ;;  %v1033_v12 = vmul.f32 %v15908_v2, %v15908_v2  ;;  %v1034_v13 = vmul.f32 %v15911_v3, %v15911_v3  ;;  %v1035_v14 = vmul.f32 %v15914_v4, %v15914_v4 }
 0x266   : > { %v1040_v23 = vadd.f32 %v1039_v18, %v1029_v10  ;;  %v1030_v24 = vmul.f32 %v15929_v15, %v15929_v15  ;;  %v1031_v25 = vmul.f32 %v15932_v16, %v15932_v16  ;;  %v1032_v29 = vmul.f32 %v15935_v17, %v15935_v17 }
 0x267   : > { %v15938_v19 = vsub.f32 %v15867_v32, %v1014_v11  ;;  %v15941_v20 = vsub.f32 %v15869_v33, %v1014_v11  ;;  %v15944_v21 = vsub.f32 %v15871_v34, %v1014_v11  ;;  %v1047_v22 = vadd.f32 %v1034_v13, %v1033_v12  ;;  %v992_v12 = vld [vmem:[%s729_s21] sm:$0x7] }
 0x268   : > { %1041 = vadd.xlane.f32.xlu0 %v1040_v23  ;;  %v1043_v30 = vadd.f32 %v1031_v25, %v1030_v24  ;;  %v15980_v7 = vshrl.u32 %v1080_v59, 7  ;;  %v993_v23 = vld [vmem:[%s738_s24] sm:$0x7] }
 0x269   : > { %v1036_v26 = vmul.f32 %v15938_v19, %v15938_v19  ;;  %v1037_v27 = vmul.f32 %v15941_v20, %v15941_v20  ;;  %v1048_v28 = vadd.f32 %v1047_v22, %v1035_v14  ;;  %v1038_v31 = vmul.f32 %v15944_v21, %v15944_v21 }
 0x26a   : > { %v1044_v33 = vadd.f32 %v1043_v30, %v1032_v29  ;;  %v15985_v13 = vsub.s32 1, %v15980_v7  ;;  %v15988_v18 = vsub.s32 2, %v15980_v7  ;;  %v15991_v22 = vsub.s32 0, %v15980_v7 }
 0x26b   : > { %v1051_v32 = vadd.f32 %v1037_v27, %v1036_v26 }
 0x26c   : > { %1049 = vadd.xlane.f32.xlu0 %v1048_v28  ;;  %1045 = vadd.xlane.f32.xlu1 %v1044_v33  ;;  %v1087_v24 = vrot.slane %v992_v12, %v15985_v13  ;;  %v1091_v26 = vrot.slane %v992_v12, %v15988_v18  ;;  %v1083_v30 = vrot.slane %v992_v12, %v15991_v22  ;;  %v13413_v12 = vld [vmem:[%s15791_s18 + $0x1b0] ss:$12 sps:$4 sm:$0xff]  }
 0x26d   : > { %v1052_v34 = vadd.f32 %v1051_v32, %v1038_v31  ;;  %v1115_v32 = vrot.slane %v993_v23, %v15985_v13  ;;  %v1119_v35 = vrot.slane %v993_v23, %v15988_v18 }
 0x270   : > { %1053 = vadd.xlane.f32.xlu1 %v1052_v34 }
 0x2f5   : > { %v1042_v57 = vpop.xlane.xlu0 %1041 }
 0x2f6   : > { %v1055_v58 = vmul.f32 0.0026041667, %v1042_v57 }
 0x2f8   : > { %v1059_v60 = vadd.f32 1e-05, %v1055_v58 }
 0x2f9   : > { %v1046_v61 = vpop.xlane.xlu1 %1045  ;;  %v1050_v62 = vpop.xlane.xlu0 %1049 }
 0x2fa   : > { %14545 = vrsqrt.f32 %v1059_v60  ;;  %v1056_v5 = vmul.f32 0.0026041667, %v1046_v61  ;;  %v1057_v6 = vmul.f32 0.0026041667, %v1050_v62  ;;  %v13404_v60 = vld [vmem:[%s15797_s25 + $0x180] ss:$12 sps:$4 sm:$0xff]  }
 0x2fc   : > { %v1060_v8 = vadd.f32 1e-05, %v1056_v5  ;;  %v1061_v9 = vadd.f32 1e-05, %v1057_v6  ;;  %v13407_v5 = vld [vmem:[%s15791_s18 + $0x198] ss:$12 sps:$4 sm:$0xff]  }
 0x2fd   : > { %v1054_v10 = vpop.xlane.xlu1 %1053 }
 0x2fe   : > { %14547 = vrsqrt.f32 %v1060_v8  ;;  %v1058_v11 = vmul.f32 0.0026041667, %v1054_v10  ;;  %v13412_v8 = vld [vmem:[%s15797_s25 + $0x19c] ss:$12 sps:$4 sm:$0xff]   ;;  %v13415_v10 = vld [vmem:[%s15791_s18 + $0x1b4] ss:$12 sps:$4 sm:$0xff]  }
 0x2ff   : > { %14549 = vrsqrt.f32 %v1061_v9  ;;  %v13410_v9 = vld [vmem:[%s15797_s25 + $0x198] ss:$12 sps:$4 sm:$0xff]  }
 0x300   : > { %v1062_v14 = vadd.f32 1e-05, %v1058_v11 }
 0x302   : > { %14551 = vrsqrt.f32 %v1062_v14  ;;  %v13418_v14 = vld [vmem:[%s15797_s25 + $0x1b4] ss:$12 sps:$4 sm:$0xff]  }
 0x304   : > { %v14546_v25 = vpop.eup %14545 }
 0x305   : > { %v1068_v27 = vmul.f32 %v14546_v25, %v15902_v0  ;;  %v1069_v28 = vmul.f32 %v14546_v25, %v15905_v1  ;;  %v1067_v29 = vmul.f32 %v14546_v25, %v15899_v63  ;;  %v1111_v0 = vrot.slane %v993_v23, %v15991_v22 }
 0x306   : > { %v15178_v25 = vmov 0  }
 0x307   : > { %v1096_v31 = vmul.f32 %v1087_v24, %v1068_v27  ;;  %v1097_v34 = vmul.f32 %v1091_v26, %v1069_v28  ;;  %v1095_v63 = vmul.f32 %v1083_v30, %v1067_v29  ;;  %v13416_v27 = vld [vmem:[%s15797_s25 + $0x1b0] ss:$12 sps:$4 sm:$0xff]   ;;  %v13419_v28 = vld [vmem:[%s15791_s18 + $0x1c8] ss:$12 sps:$4 sm:$0xff]   ;;  %v13424_v29 = vld [vmem:[%s15797_s25 + $0x1cc] ss:$12 sps:$4 sm:$0xff]  }
 0x308   : > { %v14548_v33 = vpop.eup %14547 }
 0x309   : > { %v14550_v36 = vpop.eup %14549  ;;  %v1071_v37 = vmul.f32 %v14548_v33, %v15932_v16  ;;  %v1072_v38 = vmul.f32 %v14548_v33, %v15935_v17  ;;  %v1070_v1 = vmul.f32 %v14548_v33, %v15929_v15  ;;  %v1124_v42 = vadd.f32 %v1115_v32, %v1096_v31  ;;  %v13401_v17 = vld [vmem:[%s15791_s18 + $0x180] ss:$12 sps:$4 sm:$0xff]   ;;  %v13427_v31 = vld [vmem:[%s15791_s18 + $0x1e4] ss:$12 sps:$4 sm:$0xff]  }
 0x30a   : > { %v1074_v39 = vmul.f32 %v14550_v36, %v15911_v3  ;;  %v1075_v40 = vmul.f32 %v14550_v36, %v15914_v4  ;;  %v1125_v45 = vadd.f32 %v1119_v35, %v1097_v34  ;;  %v1123_v51 = vadd.f32 %v1111_v0, %v1095_v63  ;;  %v13430_v33 = vld [vmem:[%s15797_s25 + $0x1e4] ss:$12 sps:$4 sm:$0xff]   ;;  %v13428_v34 = vld [vmem:[%s15797_s25 + $0x1e0] ss:$12 sps:$4 sm:$0xff]  }
 0x30b   : > { %v1099_v41 = vmul.f32 %v1087_v24, %v1071_v37  ;;  %v1100_v43 = vmul.f32 %v1091_v26, %v1072_v38  ;;  %v1098_v46 = vmul.f32 %v1083_v30, %v1070_v1  ;;  %v1073_v4 = vmul.f32 %v14550_v36, %v15908_v2  ;;  %v13431_v36 = vld [vmem:[%s15791_s18 + $0x1f8] ss:$12 sps:$4 sm:$0xff]   ;;  %v13436_v37 = vld [vmem:[%s15797_s25 + $0x1fc] ss:$12 sps:$4 sm:$0xff]   ;;  %v13442_v63 = vld [vmem:[%s15797_s25 + $0x214] ss:$12 sps:$4 sm:$0xff]  }
 0x30c   : > { %v14552_v44 = vpop.eup %14551  ;;  %v1102_v16 = vmul.f32 %v1087_v24, %v1074_v39  ;;  %v1103_v47 = vmul.f32 %v1091_v26, %v1075_v40  ;;  %v13434_v38 = vld [vmem:[%s15797_s25 + $0x1f8] ss:$12 sps:$4 sm:$0xff]   ;;  %v13437_v1 = vld [vmem:[%s15791_s18 + $0x210] ss:$12 sps:$4 sm:$0xff]  }
 0x30d   : > { %v1127_v48 = vadd.f32 %v1115_v32, %v1099_v41  ;;  %v1128_v49 = vadd.f32 %v1119_v35, %v1100_v43  ;;  %v1077_v50 = vmul.f32 %v14552_v44, %v15941_v20  ;;  %v1078_v15 = vmul.f32 %v14552_v44, %v15944_v21  ;;  %v13440_v39 = vld [vmem:[%s15797_s25 + $0x210] ss:$12 sps:$4 sm:$0xff]   ;;  %v13445_v40 = vld [vmem:[%s15791_s18 + $0x22c] ss:$12 sps:$4 sm:$0xff]   ;;  %v13443_v41 = vld [vmem:[%s15791_s18 + $0x228] ss:$12 sps:$4 sm:$0xff]  }
 0x30e   : > { %v1126_v3 = vadd.f32 %v1111_v0, %v1098_v46  ;;  %v1076_v53 = vmul.f32 %v14552_v44, %v15938_v19  ;;  %v1130_v20 = vadd.f32 %v1115_v32, %v1102_v16  ;;  %v1131_v19 = vadd.f32 %v1119_v35, %v1103_v47  ;;  %v13446_v43 = vld [vmem:[%s15797_s25 + $0x228] ss:$12 sps:$4 sm:$0xff]   ;;  %v13452_v16 = vld [vmem:[%s15791_s18 + $0xe0] ss:$12 sps:$4 sm:$0xff]  }
 0x30f   : > { %v16015_v54 = vpack.c.bf16 %v1127_v48, %v1124_v42  ;;  %v16017_v55 = vpack.c.bf16 %v1128_v49, %v1125_v45  ;;  %v1105_v56 = vmul.f32 %v1087_v24, %v1077_v50  ;;  %v1106_v57 = vmul.f32 %v1091_v26, %v1078_v15  ;;  %v13421_v24 = vld [vmem:[%s15791_s18 + $0x1cc] ss:$12 sps:$4 sm:$0xff]   ;;  %v13449_v44 = vld [vmem:[%s15791_s18 + $0xc8] ss:$12 sps:$4 sm:$0xff]  }
 0x310   : > { %v16019_v58 = vpack.c.bf16 %v1126_v3, %v1123_v51  ;;  %v1104_v21 = vmul.f32 %v1083_v30, %v1076_v53  ;;  %v1101_v61 = vmul.f32 %v1083_v30, %v1073_v4  ;;  %v13422_v30 = vld [vmem:[%s15797_s25 + $0x1c8] ss:$12 sps:$4 sm:$0xff]   ;;  %v13448_v42 = vld [vmem:[%s15797_s25 + $0x22c] ss:$12 sps:$4 sm:$0xff]   ;;  %v13460_v3 = vld [vmem:[%s15791_s18 + $0x110] ss:$12 sps:$4 sm:$0xff]  }
 0x311   : > { %1653 = vmatprep.mubr.bf16.mxu0 %v16015_v54  ;;  %12738 = vmatprep.mubr.bf16.mxu1 %v16017_v55  ;;  %v1133_v2 = vadd.f32 %v1115_v32, %v1105_v56  ;;  %v1134_v59 = vadd.f32 %v1119_v35, %v1106_v57  ;;  %v13425_v32 = vld [vmem:[%s15791_s18 + $0x1e0] ss:$12 sps:$4 sm:$0xff]   ;;  %v13433_v35 = vld [vmem:[%s15791_s18 + $0x1fc] ss:$12 sps:$4 sm:$0xff]   ;;  %v13456_v49 = vld [vmem:[%s15791_s18 + $0xf8] ss:$12 sps:$4 sm:$0xff]  }
 0x312   : > { %1654 = vmatmul.mubr.bf16.vlgmr.msra.gmra.mrb[0].mxu0 %v16019_v58  ;;  %v1132_v11 = vadd.f32 %v1111_v0, %v1104_v21  ;;  %v1129_v23 = vadd.f32 %v1111_v0, %v1101_v61  ;;  %v13439_v0 = vld [vmem:[%s15791_s18 + $0x214] ss:$12 sps:$4 sm:$0xff]   ;;  %v13458_v15 = vld [vmem:[%s15791_s18 + $0x38] ss:$12 sps:$4 sm:$0xff]   ;;  %v13462_v4 = vld [vmem:[%s15791_s18 + $0x50] ss:$12 sps:$4 sm:$0xff]  }
 0x313   : > { %1675 = vmatpush1.bf16.msra.mxu0 %v13401_v17  ;;  %v16025_v62 = vpack.c.bf16 %v1133_v2, %v1130_v20  ;;  %v16028_v6 = vpack.c.bf16 %v1134_v59, %v1131_v19  ;;  %v13450_v45 = vld [vmem:[%s15791_s18 + $0x8] ss:$12 sps:$4 sm:$0xff]   ;;  %v13454_v48 = vld [vmem:[%s15791_s18 + $0x20] ss:$12 sps:$4 sm:$0xff]   ;;  %v13459_v51 = vld [vmem:[%s15800_s29 + $0xf8] ss:$12 sps:$4 sm:$0xff]  }
 0x314   : > { %1676 = vmatprep.subr.bf16.mxu0 %v13409_v52  ;;  %v16039_v26 = vpack.c.bf16 %v1132_v11, %v1129_v23  ;;  %v13451_v46 = vld [vmem:[%s15800_s29 + $0xc8] ss:$12 sps:$4 sm:$0xff]   ;;  %v13455_v17 = vld [vmem:[%s15800_s29 + $0xe0] ss:$12 sps:$4 sm:$0xff]   ;;  %v13461_v52 = vld [vmem:[%s15800_s29 + $0x38] ss:$12 sps:$4 sm:$0xff]  }
 0x315   : > { %1663 = vmatprep.mubr.bf16.mxu0 %v16025_v62  ;;  %12739 = vmatmul.mubr.bf16.vlgmr.msra.gmra.mrb[0].mxu1 %v16028_v6  ;;  %v13453_v47 = vld [vmem:[%s15800_s29 + $0x8] ss:$12 sps:$4 sm:$0xff]   ;;  %v13457_v50 = vld [vmem:[%s15800_s29 + $0x20] ss:$12 sps:$4 sm:$0xff]   ;;  %v13463_v53 = vld [vmem:[%s15800_s29 + $0x110] ss:$12 sps:$4 sm:$0xff]  }
 0x316   : > { %2359 = vmatpush1.bf16.msra.mxu1 %v13404_v60  ;;  %2390 = vmatprep.mubr.bf16.mxu1 %v15178_v25  ;;  %v13464_v56 = vld [vmem:[%s15791_s18 + $0x128] ss:$12 sps:$4 sm:$0xff]   ;;  %v13465_v57 = vld [vmem:[%s15800_s29 + $0x50] ss:$12 sps:$4 sm:$0xff]   ;;  %v13468_v2 = vld [vmem:[%s15791_s18 + $0x140] ss:$12 sps:$4 sm:$0xff]  }
 0x317   : > { %1677 = vmatpush1.bf16.msra.mxu0 %v13407_v5  ;;  %2360 = vmatprep.subr.bf16.mxu1 %v13412_v8  ;;  %v13466_v20 = vld [vmem:[%s15791_s18 + $0x68] ss:$12 sps:$4 sm:$0xff]   ;;  %v13470_v59 = vld [vmem:[%s15791_s18 + $0x80] ss:$12 sps:$4 sm:$0xff]   ;;  %v13472_v61 = vld [vmem:[%s15791_s18 + $0x158] ss:$12 sps:$4 sm:$0xff]  }
 0x318   : > { %1678 = vmatprep.subr.bf16.mxu0 %v13415_v10  ;;  %v13467_v21 = vld [vmem:[%s15800_s29 + $0x128] ss:$12 sps:$4 sm:$0xff]   ;;  %v13471_v60 = vld [vmem:[%s15800_s29 + $0x140] ss:$12 sps:$4 sm:$0xff]   ;;  %v13474_v8 = vld [vmem:[%s15791_s18 + $0x98] ss:$12 sps:$4 sm:$0xff]  }
 0x319   : > { %v13469_v19 = vld [vmem:[%s15800_s29 + $0x68] ss:$12 sps:$4 sm:$0xff]   ;;  %v13473_v5 = vld [vmem:[%s15800_s29 + $0x80] ss:$12 sps:$4 sm:$0xff]   ;;  %v13476_v10 = vld [vmem:[%s15791_s18 + $0x170] ss:$12 sps:$4 sm:$0xff]  }
 0x31a   : > { %2361 = vmatpush1.bf16.msra.mxu1 %v13410_v9  ;;  %1664 = vmatmul.mubr.bf16.gmra.mrb[4].mxu0 %v16039_v26  ;;  %v13475_v9 = vld [vmem:[%s15800_s29 + $0x158] ss:$12 sps:$4 sm:$0xff]  }
 0x31b   : > { %1679 = vmatpush1.bf16.msra.mxu0 %v13413_v12  ;;  %2362 = vmatprep.subr.bf16.mxu1 %v13418_v14  ;;  %v13477_v11 = vld [vmem:[%s15800_s29 + $0x98] ss:$12 sps:$4 sm:$0xff]   ;;  %v13478_v12 = vld [vmem:[%s15791_s18 + $0xb0] ss:$12 sps:$4 sm:$0xff]  }
 0x31c   : > { %1680 = vmatprep.subr.bf16.mxu0 %v13421_v24  ;;  %1706 = vmatprep.mubr.bf16.mxu0 %v15178_v25  ;;  %v13479_v14 = vld [vmem:[%s15800_s29 + $0x170] ss:$12 sps:$4 sm:$0xff]  }
 0x31d   : > { %v13482_v23 = vld [vmem:[%s15797_s25 + $0x4] ss:$12 sps:$4 sm:$0xff]  }
 0x31e   : > { %2363 = vmatpush1.bf16.msra.mxu1 %v13416_v27  ;;  %v13483_v24 = vld [vmem:[%s15800_s29 + $0xb0] ss:$12 sps:$4 sm:$0xff]   ;;  %v13480_v27 = vld [vmem:[%s15797_s25] ss:$12 sps:$4 sm:$0xff]  }
 0x31f   : > { %1681 = vmatpush1.bf16.msra.mxu0 %v13419_v28  ;;  %2364 = vmatprep.subr.bf16.mxu1 %v13424_v29  ;;  %v13484_v28 = vld [vmem:[%s15800_s29 + $0x188] ss:$12 sps:$4 sm:$0xff]  }
 0x320   : > { %1682 = vmatprep.subr.bf16.mxu0 %v13427_v31  ;;  %v13487_v29 = vld [vmem:[%s15797_s25 + $0x1c] ss:$12 sps:$4 sm:$0xff]   ;;  %v13488_v31 = vld [vmem:[%s15800_s29 + $0x1a0] ss:$12 sps:$4 sm:$0xff]  }
 0x322   : > { %2365 = vmatpush1.bf16.msra.mxu1 %v13422_v30  ;;  %v13485_v30 = vld [vmem:[%s15797_s25 + $0x18] ss:$12 sps:$4 sm:$0xff]  }
 0x323   : > { %1683 = vmatpush1.bf16.msra.mxu0 %v13425_v32  ;;  %2366 = vmatprep.subr.bf16.mxu1 %v13430_v33  ;;  %v13491_v32 = vld [vmem:[%s15797_s25 + $0x34] ss:$12 sps:$4 sm:$0xff]   ;;  %v13489_v33 = vld [vmem:[%s15797_s25 + $0x30] ss:$12 sps:$4 sm:$0xff]  }
 0x324   : > { %1684 = vmatprep.subr.bf16.mxu0 %v13433_v35  ;;  %v13495_v35 = vld [vmem:[%s15797_s25 + $0x4c] ss:$12 sps:$4 sm:$0xff]  }
 0x326   : > { %2367 = vmatpush1.bf16.msra.mxu1 %v13428_v34  ;;  %v13492_v34 = vld [vmem:[%s15800_s29 + $0x1b8] ss:$12 sps:$4 sm:$0xff]  }
 0x327   : > { %1685 = vmatpush1.bf16.msra.mxu0 %v13431_v36  ;;  %2368 = vmatprep.subr.bf16.mxu1 %v13436_v37  ;;  %v13493_v36 = vld [vmem:[%s15797_s25 + $0x48] ss:$12 sps:$4 sm:$0xff]   ;;  %v13496_v37 = vld [vmem:[%s15800_s29 + $0x1d0] ss:$12 sps:$4 sm:$0xff]  }
 0x328   : > { %1686 = vmatprep.subr.bf16.mxu0 %v13439_v0  ;;  %v13497_v0 = vld [vmem:[%s15797_s25 + $0x60] ss:$12 sps:$4 sm:$0xff]  }
 0x32a   : > { %2369 = vmatpush1.bf16.msra.mxu1 %v13434_v38  ;;  %v13499_v38 = vld [vmem:[%s15797_s25 + $0x64] ss:$12 sps:$4 sm:$0xff]  }
 0x32b   : > { %1687 = vmatpush1.bf16.msra.mxu0 %v13437_v1  ;;  %2370 = vmatprep.subr.bf16.mxu1 %v13442_v63  ;;  %v13500_v1 = vld [vmem:[%s15800_s29 + $0x1e8] ss:$12 sps:$4 sm:$0xff]  }
 0x32c   : > { %1688 = vmatprep.subr.bf16.mxu0 %v13445_v40  ;;  %v13503_v63 = vld [vmem:[%s15797_s25 + $0x7c] ss:$12 sps:$4 sm:$0xff]   ;;  %v13504_v40 = vld [vmem:[%s15800_s29 + $0x200] ss:$12 sps:$4 sm:$0xff]  }
 0x32e   : > { %2371 = vmatpush1.bf16.msra.mxu1 %v13440_v39  ;;  %v13501_v39 = vld [vmem:[%s15797_s25 + $0x78] ss:$12 sps:$4 sm:$0xff]  }
 0x32f   : > { %1689 = vmatpush1.bf16.msra.mxu0 %v13443_v41  ;;  %2372 = vmatprep.subr.bf16.mxu1 %v13448_v42  ;;  %v13507_v41 = vld [vmem:[%s15797_s25 + $0x94] ss:$12 sps:$4 sm:$0xff]   ;;  %v13505_v42 = vld [vmem:[%s15797_s25 + $0x90] ss:$12 sps:$4 sm:$0xff]  }
 0x330   : > { %12356 = vmatprep.subr.bf16.mxu0 %v13449_v44  ;;  %v13511_v44 = vld [vmem:[%s15797_s25 + $0xac] ss:$12 sps:$4 sm:$0xff]  }
 0x332   : > { %1707 = vmatmul.mubr.bf16.vlgmr.msra.gmra.mrb[0].mxu0 %v16017_v55  ;;  %2373 = vmatpush1.bf16.msra.mxu1 %v13446_v43  ;;  %v13508_v43 = vld [vmem:[%s15800_s29 + $0x218] ss:$12 sps:$4 sm:$0xff]  }
 0x333   : > { %12357 = vmatpush3.bf16.msra.mxu0 %v13450_v45  ;;  %12432 = vmatprep.subr.bf16.mxu1 %v13451_v46  ;;  %v13509_v45 = vld [vmem:[%s15797_s25 + $0xa8] ss:$12 sps:$4 sm:$0xff]   ;;  %v13512_v46 = vld [vmem:[%s15800_s29 + $0x230] ss:$12 sps:$4 sm:$0xff]  }
 0x334   : > { %12358 = vmatprep.subr.bf16.mxu0 %v13452_v16  ;;  %1716 = vmatprep.mubr.bf16.mxu0 %v15178_v25  ;;  %v13515_v16 = vld [vmem:[%s15797_s25 + $0xc4] ss:$12 sps:$4 sm:$0xff]  }
 0x335   : > { %2391 = vmatmul.mubr.bf16.vlgmr.msra.gmra.mrb[4].mxu1 %v16017_v55 }
 0x336   : > { %12433 = vmatpush3.bf16.msra.mxu1 %v13453_v47  ;;  %2400 = vmatprep.mubr.bf16.mxu1 %v15178_v25  ;;  %v13513_v47 = vld [vmem:[%s15797_s25 + $0xc0] ss:$12 sps:$4 sm:$0xff]  }
 0x337   : > { %12359 = vmatpush3.bf16.msra.mxu0 %v13454_v48  ;;  %12434 = vmatprep.subr.bf16.mxu1 %v13455_v17  ;;  %v13518_v48 = vld [vmem:[%s15797_s25 + $0xdc] ss:$12 sps:$4 sm:$0xff]   ;;  %v13516_v17 = vld [vmem:[%s15797_s25 + $0xd8] ss:$12 sps:$4 sm:$0xff]  }
 0x338   : > { %12360 = vmatprep.subr.bf16.mxu0 %v13456_v49  ;;  %v13521_v49 = vld [vmem:[%s15797_s25 + $0xf4] ss:$12 sps:$4 sm:$0xff]  }
 0x33a   : > { %1717 = vmatmul.mubr.bf16.gmra.mrb[4].mxu0 %v16028_v6  ;;  %12435 = vmatpush3.bf16.msra.mxu1 %v13457_v50  ;;  %v13519_v50 = vld [vmem:[%s15797_s25 + $0xf0] ss:$12 sps:$4 sm:$0xff]  }
 0x33b   : > { %12361 = vmatpush3.bf16.msra.mxu0 %v13458_v15  ;;  %1759 = vmatprep.mubr.bf16.mxu0 %v16015_v54  ;;  %v13524_v15 = vld [vmem:[%s15797_s25 + $0x10c] ss:$12 sps:$4 sm:$0xff]  }
 0x33c   : > { %12436 = vmatprep.subr.bf16.mxu1 %v13459_v51  ;;  %12362 = vmatprep.subr.bf16.mxu0 %v13460_v3  ;;  %v13522_v51 = vld [vmem:[%s15797_s25 + $0x108] ss:$12 sps:$4 sm:$0xff]   ;;  %v13527_v3 = vld [vmem:[%s15797_s25 + $0x124] ss:$12 sps:$4 sm:$0xff]  }
 0x33d   : > { %2401 = vmatmul.mubr.bf16.gmra.mrb[8].mxu1 %v16028_v6 }
 0x33e   : > { %12437 = vmatpush3.bf16.msra.mxu1 %v13461_v52  ;;  %3127 = vmatprep.mubr.bf16.mxu1 %v16015_v54  ;;  %v13525_v52 = vld [vmem:[%s15797_s25 + $0x120] ss:$12 sps:$4 sm:$0xff]  }
 0x33f   : > { %12363 = vmatpush3.bf16.msra.mxu0 %v13462_v4  ;;  %12438 = vmatprep.subr.bf16.mxu1 %v13463_v53  ;;  %v13530_v4 = vld [vmem:[%s15797_s25 + $0x13c] ss:$12 sps:$4 sm:$0xff]   ;;  %v13528_v53 = vld [vmem:[%s15797_s25 + $0x138] ss:$12 sps:$4 sm:$0xff]  }
 0x340   : > { %12364 = vmatprep.subr.bf16.mxu0 %v13464_v56  ;;  %v13533_v56 = vld [vmem:[%s15797_s25 + $0x154] ss:$12 sps:$4 sm:$0xff]  }
 0x342   : > { %12439 = vmatpush3.bf16.msra.mxu1 %v13465_v57  ;;  %v13531_v57 = vld [vmem:[%s15797_s25 + $0x150] ss:$12 sps:$4 sm:$0xff]  }
 0x343   : > { %12365 = vmatpush3.bf16.msra.mxu0 %v13466_v20  ;;  %12440 = vmatprep.subr.bf16.mxu1 %v13467_v21  ;;  %v13536_v20 = vld [vmem:[%s15797_s25 + $0x16c] ss:$12 sps:$4 sm:$0xff]   ;;  %v13534_v21 = vld [vmem:[%s15797_s25 + $0x168] ss:$12 sps:$4 sm:$0xff]  }
 0x344   : > { %12366 = vmatprep.subr.bf16.mxu0 %v13468_v2  ;;  %v13537_v2 = vld [vmem:[%s15797_s25 + $0xc8] ss:$12 sps:$4 sm:$0xff]  }
 0x346   : > { %12441 = vmatpush3.bf16.msra.mxu1 %v13469_v19  ;;  %v13538_v19 = vld [vmem:[%s15797_s25 + $0x8] ss:$12 sps:$4 sm:$0xff]  }
 0x347   : > { %12367 = vmatpush3.bf16.msra.mxu0 %v13470_v59  ;;  %12442 = vmatprep.subr.bf16.mxu1 %v13471_v60  ;;  %v13539_v59 = vld [vmem:[%s15797_s25 + $0xe0] ss:$12 sps:$4 sm:$0xff]  }
 0x348   : > { %12368 = vmatprep.subr.bf16.mxu0 %v13472_v61  ;;  %v13540_v60 = vld [vmem:[%s15797_s25 + $0x20] ss:$12 sps:$4 sm:$0xff]   ;;  %v13541_v61 = vld [vmem:[%s15797_s25 + $0xf8] ss:$12 sps:$4 sm:$0xff]  }
 0x34a   : > { %12443 = vmatpush3.bf16.msra.mxu1 %v13473_v5  ;;  %v13542_v5 = vld [vmem:[%s15797_s25 + $0x38] ss:$12 sps:$4 sm:$0xff]  }
 0x34b   : > { %12369 = vmatpush3.bf16.msra.mxu0 %v13474_v8  ;;  %12444 = vmatprep.subr.bf16.mxu1 %v13475_v9  ;;  %v13543_v8 = vld [vmem:[%s15797_s25 + $0x110] ss:$12 sps:$4 sm:$0xff]  }
 0x34c   : > { %12370 = vmatprep.subr.bf16.mxu0 %v13476_v10  ;;  %v13544_v9 = vld [vmem:[%s15797_s25 + $0x50] ss:$12 sps:$4 sm:$0xff]   ;;  %v13545_v10 = vld [vmem:[%s15797_s25 + $0x128] ss:$12 sps:$4 sm:$0xff]  }
 0x34e   : > { %12445 = vmatpush3.bf16.msra.mxu1 %v13477_v11  ;;  %v13546_v11 = vld [vmem:[%s15797_s25 + $0x68] ss:$12 sps:$4 sm:$0xff]  }
 0x34f   : > { %12371 = vmatpush3.bf16.msra.mxu0 %v13478_v12  ;;  %12446 = vmatprep.subr.bf16.mxu1 %v13479_v14  ;;  %v13547_v12 = vld [vmem:[%s15797_s25 + $0x140] ss:$12 sps:$4 sm:$0xff]  }
 0x350   : > { %2305 = vmatprep.subr.bf16.mxu0 %v13482_v23  ;;  %v13548_v14 = vld [vmem:[%s15797_s25 + $0x80] ss:$12 sps:$4 sm:$0xff]   ;;  %v13549_v23 = vld [vmem:[%s15797_s25 + $0x158] ss:$12 sps:$4 sm:$0xff]  }
 0x352   : > { %1760 = vmatmul.mubr.bf16.vlgmr.msra.gmra.mrb[8].mxu0 %v16019_v58  ;;  %12447 = vmatpush3.bf16.msra.mxu1 %v13483_v24  ;;  %v13550_v24 = vld [vmem:[%s15797_s25 + $0x98] ss:$12 sps:$4 sm:$0xff]  }
 0x353   : > { %1767 = vmatprep.mubr.bf16.mxu0 %v16025_v62  ;;  %2306 = vmatpush1.bf16.msra.mxu0 %v13480_v27  ;;  %v13551_v27 = vld [vmem:[%s15797_s25 + $0x170] ss:$12 sps:$4 sm:$0xff]  }
 0x354   : > { %12762 = vmatprep.subr.bf16.mxu1 %v13484_v28  ;;  %2307 = vmatprep.subr.bf16.mxu0 %v13487_v29  ;;  %v13553_v29 = vld [vmem:[%s15797_s25 + $0x188] ss:$12 sps:$4 sm:$0xff]  }
 0x355   : > { %3128 = vmatmul.mubr.bf16.vlgmr.msra.gmra.mrb[12].mxu1 %v16019_v58 }
 0x356   : > { %3135 = vmatprep.mubr.bf16.mxu1 %v16025_v62  ;;  %12763 = vmatpush3.bf16.msra.mxu1 %v13484_v28  ;;  %v13552_v28 = vld [vmem:[%s15797_s25 + $0xb0] ss:$12 sps:$4 sm:$0xff]  }
 0x357   : > { %2308 = vmatpush1.bf16.msra.mxu0 %v13485_v30  ;;  %12764 = vmatprep.subr.bf16.mxu1 %v13488_v31  ;;  %v13554_v30 = vld [vmem:[%s15797_s25 + $0x1a0] ss:$12 sps:$4 sm:$0xff]  }
 0x358   : > { %2309 = vmatprep.subr.bf16.mxu0 %v13491_v32  ;;  %v13556_v32 = vld [vmem:[%s15797_s25 + $0x1d0] ss:$12 sps:$4 sm:$0xff]  }
 0x35a   : > { %1768 = vmatmul.mubr.bf16.gmra.mrb[12].mxu0 %v16039_v26  ;;  %12765 = vmatpush3.bf16.msra.mxu1 %v13488_v31  ;;  %v13555_v31 = vld [vmem:[%s15797_s25 + $0x1b8] ss:$12 sps:$4 sm:$0xff]  }
 0x35b   : > { %2310 = vmatpush1.bf16.msra.mxu0 %v13489_v33  ;;  %2337 = vmatprep.mubr.bf16.mxu0 %v16015_v54  ;;  %v13557_v33 = vld [vmem:[%s15797_s25 + $0x1e8] ss:$12 sps:$4 sm:$0xff]  }
 0x35c   : > { %12766 = vmatprep.subr.bf16.mxu1 %v13492_v34  ;;  %2311 = vmatprep.subr.bf16.mxu0 %v13495_v35  ;;  %v13559_v35 = vld [vmem:[%s15797_s25 + $0x218] ss:$12 sps:$4 sm:$0xff]  }
 0x35d   : > { %3136 = vmatmul.mubr.bf16.gmra.mrb[16].mxu1 %v16039_v26 }
 0x35e   : > { %12767 = vmatpush3.bf16.msra.mxu1 %v13492_v34  ;;  %12778 = vmatprep.mubr.bf16.mxu1 %v16017_v55  ;;  %v13558_v34 = vld [vmem:[%s15797_s25 + $0x200] ss:$12 sps:$4 sm:$0xff]  }
 0x35f   : > { %2312 = vmatpush1.bf16.msra.mxu0 %v13493_v36  ;;  %12768 = vmatprep.subr.bf16.mxu1 %v13496_v37  ;;  %v13560_v36 = vld [vmem:[%s15797_s25 + $0x230] ss:$12 sps:$4 sm:$0xff]  }
 0x360   : > { %2313 = vmatprep.subr.bf16.mxu0 %v13499_v38  ;;  %v13561_v38 = vld [vmem:[%s15800_s29] ss:$12 sps:$4 sm:$0xff]  }
 0x362   : > { %12769 = vmatpush3.bf16.msra.mxu1 %v13496_v37  ;;  %v13563_v37 = vld [vmem:[%s15800_s29 + $0x4] ss:$12 sps:$4 sm:$0xff]  }
 0x363   : > { %2314 = vmatpush1.bf16.msra.mxu0 %v13497_v0  ;;  %12770 = vmatprep.subr.bf16.mxu1 %v13500_v1  ;;  %v13566_v0 = vld [vmem:[%s15800_s29 + $0x1c] ss:$12 sps:$4 sm:$0xff]  }
 0x364   : > { %2315 = vmatprep.subr.bf16.mxu0 %v13503_v63  ;;  %v13569_v63 = vld [vmem:[%s15800_s29 + $0x34] ss:$12 sps:$4 sm:$0xff]  }
 0x366   : > { %12771 = vmatpush3.bf16.msra.mxu1 %v13500_v1  ;;  %v13564_v1 = vld [vmem:[%s15800_s29 + $0x18] ss:$12 sps:$4 sm:$0xff]  }
 0x367   : > { %2316 = vmatpush1.bf16.msra.mxu0 %v13501_v39  ;;  %12772 = vmatprep.subr.bf16.mxu1 %v13504_v40  ;;  %v13567_v39 = vld [vmem:[%s15800_s29 + $0x30] ss:$12 sps:$4 sm:$0xff]  }
 0x368   : > { %2317 = vmatprep.subr.bf16.mxu0 %v13507_v41  ;;  %v13570_v41 = vld [vmem:[%s15800_s29 + $0x48] ss:$12 sps:$4 sm:$0xff]  }
 0x36a   : > { %12773 = vmatpush3.bf16.msra.mxu1 %v13504_v40  ;;  %v13572_v40 = vld [vmem:[%s15800_s29 + $0x4c] ss:$12 sps:$4 sm:$0xff]  }
 0x36b   : > { %2318 = vmatpush1.bf16.msra.mxu0 %v13505_v42  ;;  %12774 = vmatprep.subr.bf16.mxu1 %v13508_v43  ;;  %v13575_v42 = vld [vmem:[%s15800_s29 + $0x64] ss:$12 sps:$4 sm:$0xff]  }
 0x36c   : > { %2319 = vmatprep.subr.bf16.mxu0 %v13511_v44  ;;  %v13576_v44 = vld [vmem:[%s15800_s29 + $0x78] ss:$12 sps:$4 sm:$0xff]  }
 0x36e   : > { %12775 = vmatpush3.bf16.msra.mxu1 %v13508_v43  ;;  %v13573_v43 = vld [vmem:[%s15800_s29 + $0x60] ss:$12 sps:$4 sm:$0xff]  }
 0x36f   : > { %2320 = vmatpush1.bf16.msra.mxu0 %v13509_v45  ;;  %12776 = vmatprep.subr.bf16.mxu1 %v13512_v46  ;;  %v13581_v45 = vld [vmem:[%s15800_s29 + $0x94] ss:$12 sps:$4 sm:$0xff]  }
 0x370   : > { %2321 = vmatprep.subr.bf16.mxu0 %v13515_v16 }
 0x372   : > { %12777 = vmatpush3.bf16.msra.mxu1 %v13512_v46  ;;  %v13579_v46 = vld [vmem:[%s15800_s29 + $0x90] ss:$12 sps:$4 sm:$0xff]  }
 0x373   : > { %2322 = vmatpush1.bf16.msra.mxu0 %v13513_v47  ;;  %v13584_v47 = vld [vmem:[%s15800_s29 + $0xac] ss:$12 sps:$4 sm:$0xff]  }
 0x374   : > { %2323 = vmatprep.subr.bf16.mxu0 %v13518_v48 }
 0x375   : > { %12779 = vmatmul.mubr.bf16.vlgmr.msra.gmra.mrb[20].mxu1 %v16028_v6 }
 0x377   : > { %2324 = vmatpush1.bf16.msra.mxu0 %v13516_v17 }
 0x378   : > { %2325 = vmatprep.subr.bf16.mxu0 %v13521_v49 }
 0x37b   : > { %2326 = vmatpush1.bf16.msra.mxu0 %v13519_v50  ;;  %v13582_v50 = vld [vmem:[%s15800_s29 + $0xa8] ss:$12 sps:$4 sm:$0xff]  }
 0x37c   : > { %2327 = vmatprep.subr.bf16.mxu0 %v13524_v15  ;;  %v13587_v15 = vld [vmem:[%s15800_s29 + $0xc4] ss:$12 sps:$4 sm:$0xff]  }
 0x37f   : > { %2328 = vmatpush1.bf16.msra.mxu0 %v13522_v51  ;;  %v15179_v51 = vmov 0.0  }
 0x380   : > { %2329 = vmatprep.subr.bf16.mxu0 %v13527_v3  ;;  %12782 = vmatprep.subr.bf16.mxu1 %v15179_v51  ;;  %v13585_v3 = vld [vmem:[%s15800_s29 + $0xc0] ss:$12 sps:$4 sm:$0xff]  }
 0x381   : > { %12784 = vmatprep.mubr.msk.bf16.mxu1 %vm15180_vm3, %v15179_v51 }
 0x383   : > { %2330 = vmatpush1.bf16.msra.mxu0 %v13525_v52  ;;  %v13590_v52 = vld [vmem:[%s15800_s29 + $0xdc] ss:$12 sps:$4 sm:$0xff]  }
 0x384   : > { %2331 = vmatprep.subr.bf16.mxu0 %v13530_v4  ;;  %v13588_v4 = vld [vmem:[%s15800_s29 + $0xd8] ss:$12 sps:$4 sm:$0xff]  }
 0x387   : > { %2332 = vmatpush1.bf16.msra.mxu0 %v13528_v53  ;;  %v13593_v53 = vld [vmem:[%s15800_s29 + $0xf4] ss:$12 sps:$4 sm:$0xff]  }
 0x388   : > { %2333 = vmatprep.subr.bf16.mxu0 %v13533_v56  ;;  %v13591_v56 = vld [vmem:[%s15800_s29 + $0xf0] ss:$12 sps:$4 sm:$0xff]  }
 0x38b   : > { %2334 = vmatpush1.bf16.msra.mxu0 %v13531_v57  ;;  %v13596_v57 = vld [vmem:[%s15800_s29 + $0x10c] ss:$12 sps:$4 sm:$0xff]  }
 0x38c   : > { %2335 = vmatprep.subr.bf16.mxu0 %v13536_v20  ;;  %v13594_v20 = vld [vmem:[%s15800_s29 + $0x108] ss:$12 sps:$4 sm:$0xff]  }
 0x38f   : > { %2336 = vmatpush1.bf16.msra.mxu0 %v13534_v21  ;;  %v13599_v21 = vld [vmem:[%s15800_s29 + $0x124] ss:$12 sps:$4 sm:$0xff]  }
 0x390   : > { %12394 = vmatprep.subr.bf16.mxu0 %v13537_v2  ;;  %v13597_v2 = vld [vmem:[%s15800_s29 + $0x120] ss:$12 sps:$4 sm:$0xff]  }
 0x392   : > { %2338 = vmatmul.mubr.bf16.vlgmr.msra.gmra.mrb[16].mxu0 %v16019_v58 }
 0x393   : > { %2347 = vmatprep.mubr.bf16.mxu0 %v16025_v62  ;;  %12395 = vmatpush3.bf16.msra.mxu0 %v13538_v19  ;;  %v13602_v19 = vld [vmem:[%s15800_s29 + $0x13c] ss:$12 sps:$4 sm:$0xff]  }
 0x394   : > { %12396 = vmatprep.subr.bf16.mxu0 %v13539_v59  ;;  %v13600_v59 = vld [vmem:[%s15800_s29 + $0x138] ss:$12 sps:$4 sm:$0xff]  }
 0x397   : > { %12397 = vmatpush3.bf16.msra.mxu0 %v13540_v60  ;;  %v13605_v60 = vld [vmem:[%s15800_s29 + $0x154] ss:$12 sps:$4 sm:$0xff]  }
 0x398   : > { %12398 = vmatprep.subr.bf16.mxu0 %v13541_v61 }
 0x39a   : > { %2348 = vmatmul.mubr.bf16.gmra.mrb[20].mxu0 %v16039_v26 }
 0x39b   : > { %12399 = vmatpush3.bf16.msra.mxu0 %v13542_v5  ;;  %2443 = vmatprep.mubr.bf16.mxu0 %v16015_v54 }
 0x39c   : > { %12400 = vmatprep.subr.bf16.mxu0 %v13543_v8 }
 0x39f   : > { %12401 = vmatpush3.bf16.msra.mxu0 %v13544_v9  ;;  %v13603_v9 = vld [vmem:[%s15800_s29 + $0x150] ss:$12 sps:$4 sm:$0xff]  }
 0x3a0   : > { %12402 = vmatprep.subr.bf16.mxu0 %v13545_v10 }
 0x3a3   : > { %12403 = vmatpush3.bf16.msra.mxu0 %v13546_v11 }
 0x3a4   : > { %12404 = vmatprep.subr.bf16.mxu0 %v13547_v12 }
 0x3a7   : > { %12405 = vmatpush3.bf16.msra.mxu0 %v13548_v14  ;;  %v13608_v14 = vld [vmem:[%s15800_s29 + $0x16c] ss:$12 sps:$4 sm:$0xff]  }
 0x3a8   : > { %12406 = vmatprep.subr.bf16.mxu0 %v13549_v23 }
 0x3ab   : > { %12407 = vmatpush3.bf16.msra.mxu0 %v13550_v24 }
 0x3ac   : > { %12408 = vmatprep.subr.bf16.mxu0 %v13551_v27 }
 0x3af   : > { %12409 = vmatpush3.bf16.msra.mxu0 %v13552_v28 }
 0x3b0   : > { %12742 = vmatprep.subr.bf16.mxu0 %v13553_v29 }
 0x3b2   : > { %2444 = vmatmul.mubr.bf16.vlgmr.msra.gmra.mrb[24].mxu0 %v16019_v58 }
 0x3b3   : > { %2451 = vmatprep.mubr.bf16.mxu0 %v16025_v62  ;;  %12743 = vmatpush3.bf16.msra.mxu0 %v13553_v29  ;;  %v13606_v29 = vld [vmem:[%s15800_s29 + $0x168] ss:$12 sps:$4 sm:$0xff]  }
 0x3b4   : > { %12744 = vmatprep.subr.bf16.mxu0 %v13554_v30 }
 0x3b7   : > { %12745 = vmatpush3.bf16.msra.mxu0 %v13554_v30  ;;  %v13611_v30 = vld [vmem:[%s15800_s29 + $0x184] ss:$12 sps:$4 sm:$0xff]  }
 0x3b8   : > { %12746 = vmatprep.subr.bf16.mxu0 %v13555_v31 }
 0x3ba   : > { %2452 = vmatmul.mubr.bf16.gmra.mrb[28].mxu0 %v16039_v26 }
 0x3bb   : > { %12747 = vmatpush3.bf16.msra.mxu0 %v13555_v31  ;;  %12758 = vmatprep.mubr.bf16.mxu0 %v16017_v55 }
 0x3bc   : > { %12748 = vmatprep.subr.bf16.mxu0 %v13556_v32 }
 0x3bf   : > { %12749 = vmatpush3.bf16.msra.mxu0 %v13556_v32 }
 0x3c0   : > { %12750 = vmatprep.subr.bf16.mxu0 %v13557_v33 }
 0x3c3   : > { %12751 = vmatpush3.bf16.msra.mxu0 %v13557_v33 }
 0x3c4   : > { %12752 = vmatprep.subr.bf16.mxu0 %v13558_v34 }
 0x3c7   : > { %12753 = vmatpush3.bf16.msra.mxu0 %v13558_v34  ;;  %v13609_v34 = vld [vmem:[%s15800_s29 + $0x180] ss:$12 sps:$4 sm:$0xff]  }
 0x3c8   : > { %12754 = vmatprep.subr.bf16.mxu0 %v13559_v35 }
 0x3cb   : > { %12755 = vmatpush3.bf16.msra.mxu0 %v13559_v35 }
 0x3cc   : > { %12756 = vmatprep.subr.bf16.mxu0 %v13560_v36 }
 0x3cf   : > { %12757 = vmatpush3.bf16.msra.mxu0 %v13560_v36 }
 0x3d0   : > { %2989 = vmatprep.subr.bf16.mxu0 %v13563_v37 }
 0x3d2   : > { %12759 = vmatmul.mubr.bf16.vlgmr.msra.gmra.mrb[32].mxu0 %v16028_v6 }
 0x3d3   : > { %2990 = vmatpush1.bf16.msra.mxu0 %v13561_v38  ;;  %3021 = vmatprep.mubr.bf16.mxu0 %v16015_v54  ;;  %v13578_v54 = vld [vmem:[%s15800_s29 + $0x7c] ss:$12 sps:$4 sm:$0xff]  }
 0x3d4   : > { %2991 = vmatprep.subr.bf16.mxu0 %v13566_v0  ;;  %v13614_v38 = vld [vmem:[%s15800_s29 + $0x19c] ss:$12 sps:$4 sm:$0xff]  }
 0x3d7   : > { %2992 = vmatpush1.bf16.msra.mxu0 %v13564_v1 }
 0x3d8   : > { %2993 = vmatprep.subr.bf16.mxu0 %v13569_v63 }
 0x3db   : > { %2994 = vmatpush1.bf16.msra.mxu0 %v13567_v39 }
 0x3dc   : > { %2995 = vmatprep.subr.bf16.mxu0 %v13572_v40  ;;  %v13612_v40 = vld [vmem:[%s15800_s29 + $0x198] ss:$12 sps:$4 sm:$0xff]  }
 0x3df   : > { %2996 = vmatpush1.bf16.msra.mxu0 %v13570_v41  ;;  %v13617_v41 = vld [vmem:[%s15800_s29 + $0x1b4] ss:$12 sps:$4 sm:$0xff]  }
 0x3e0   : > { %2997 = vmatprep.subr.bf16.mxu0 %v13575_v42  ;;  %v13615_v42 = vld [vmem:[%s15800_s29 + $0x1b0] ss:$12 sps:$4 sm:$0xff]  }
 0x3e3   : > { %2998 = vmatpush1.bf16.msra.mxu0 %v13573_v43  ;;  %v13620_v43 = vld [vmem:[%s15800_s29 + $0x1cc] ss:$12 sps:$4 sm:$0xff]  }
 0x3e4   : > { %2999 = vmatprep.subr.bf16.mxu0 %v13578_v54  ;;  %v13621_v54 = vld [vmem:[%s15800_s29 + $0x1e0] ss:$12 sps:$4 sm:$0xff]  }
 0x3e7   : > { %3000 = vmatpush1.bf16.msra.mxu0 %v13576_v44  ;;  %v13626_v44 = vld [vmem:[%s15800_s29 + $0x1fc] ss:$12 sps:$4 sm:$0xff]  }
 0x3e8   : > { %v16200_v16 = vpop.f32.mrb[0].mxu1  ;;  %3001 = vmatprep.subr.bf16.mxu0 %v13581_v45  ;;  %v13624_v45 = vld [vmem:[%s15800_s29 + $0x1f8] ss:$12 sps:$4 sm:$0xff]  }
 0x3e9   : > { %v16203_v48 = vpop.f32.mrb[1].mxu1 }
 0x3ea   : > { %v16205_v17 = vpop.f32.mrb[2].mxu1 }
 0x3eb   : > { %3002 = vmatpush1.bf16.msra.mxu0 %v13579_v46  ;;  %v16207_v49 = vpop.f32.mrb[3].mxu1  ;;  %v13629_v46 = vld [vmem:[%s15800_s29 + $0x214] ss:$12 sps:$4 sm:$0xff]  }
 0x3ec   : > { %3003 = vmatprep.subr.bf16.mxu0 %v13584_v47 }
 0x3ef   : > { %3004 = vmatpush1.bf16.msra.mxu0 %v13582_v50 }
 0x3f0   : > { %3005 = vmatprep.subr.bf16.mxu0 %v13587_v15 }
 0x3f3   : > { %3006 = vmatpush1.bf16.msra.mxu0 %v13585_v3  ;;  %v13627_v3 = vld [vmem:[%s15800_s29 + $0x210] ss:$12 sps:$4 sm:$0xff]  }
 0x3f4   : > { %3007 = vmatprep.subr.bf16.mxu0 %v13590_v52 }
 0x3f7   : > { %3008 = vmatpush1.bf16.msra.mxu0 %v13588_v4 }
 0x3f8   : > { %3009 = vmatprep.subr.bf16.mxu0 %v13593_v53  ;;  %v13632_v53 = vld [vmem:[%s15800_s29 + $0x22c] ss:$12 sps:$4 sm:$0xff]  }
 0x3fb   : > { %3010 = vmatpush1.bf16.msra.mxu0 %v13591_v56 }
 0x3fc   : > { %3011 = vmatprep.subr.bf16.mxu0 %v13596_v57 }
 0x3ff   : > { %3012 = vmatpush1.bf16.msra.mxu0 %v13594_v20 }
 0x400   : > { %3013 = vmatprep.subr.bf16.mxu0 %v13599_v21 }
 0x403   : > { %3014 = vmatpush1.bf16.msra.mxu0 %v13597_v2 }
 0x404   : > { %3015 = vmatprep.subr.bf16.mxu0 %v13602_v19 }
 0x405   : > { %v1708_v61 = vpop.f32.mrb[0].mxu0 }
 0x406   : > { %v1710_v5 = vpop.f32.mrb[1].mxu0 }
 0x407   : > { %v1712_v8 = vpop.f32.mrb[2].mxu0  ;;  %3016 = vmatpush1.bf16.msra.mxu0 %v13600_v59 }
 0x408   : > { %v16227_v10 = vpack.c.bf16 %v1712_v8, %v1708_v61  ;;  %v1714_v11 = vpop.f32.mrb[3].mxu0  ;;  %v16229_v12 = vpop.f32.mrb[4].mxu1  ;;  %3017 = vmatprep.subr.bf16.mxu0 %v13605_v60  ;;  %v13630_v60 = vld [vmem:[%s15800_s29 + $0x228] ss:$12 sps:$4 sm:$0xff]  }
 0x409   : > { %v16232_v23 = vpack.c.bf16 %v1714_v11, %v1710_v5  ;;  %v16234_v24 = vpop.f32.mrb[5].mxu1 }
 0x40a   : > { %v16236_v27 = vpop.f32.mrb[6].mxu1 }
 0x40b   : > { %v16238_v28 = vpop.f32.mrb[7].mxu1  ;;  %3018 = vmatpush1.bf16.msra.mxu0 %v13603_v9 }
 0x40c   : > { %3019 = vmatprep.subr.bf16.mxu0 %v13608_v14 }
 0x40d   : > { %v1718_v31 = vpop.f32.mrb[4].mxu0 }
 0x40e   : > { %v1720_v32 = vpop.f32.mrb[5].mxu0 }
 0x40f   : > { %v1722_v33 = vpop.f32.mrb[6].mxu0  ;;  %3020 = vmatpush1.bf16.msra.mxu0 %v13606_v29 }
 0x410   : > { %v16243_v35 = vpack.c.bf16 %v1722_v33, %v1718_v31  ;;  %v1724_v36 = vpop.f32.mrb[7].mxu0  ;;  %v16245_v37 = vpop.f32.mrb[8].mxu1  ;;  %3042 = vmatprep.subr.bf16.mxu0 %v13611_v30 }
 0x411   : > { %v16248_v0 = vpack.c.bf16 %v1724_v36, %v1720_v32  ;;  %v16250_v1 = vpop.f32.mrb[9].mxu1 }
 0x412   : > { %v16252_v63 = vpop.f32.mrb[10].mxu1  ;;  %3022 = vmatmul.mubr.bf16.vlgmr.msra.gmra.mrb[36].mxu0 %v16019_v58  ;;  %v13618_v58 = vld [vmem:[%s15800_s29 + $0x1c8] ss:$12 sps:$4 sm:$0xff]  }
 0x413   : > { %v16255_v39 = vpop.f32.mrb[11].mxu1  ;;  %3031 = vmatprep.mubr.bf16.mxu0 %v16025_v62  ;;  %3043 = vmatpush1.bf16.msra.mxu0 %v13609_v34  ;;  %v13623_v62 = vld [vmem:[%s15800_s29 + $0x1e4] ss:$12 sps:$4 sm:$0xff]  }
 0x414   : > { %3044 = vmatprep.subr.bf16.mxu0 %v13614_v38 }
 0x417   : > { %3045 = vmatpush1.bf16.msra.mxu0 %v13612_v40 }
 0x418   : > { %3046 = vmatprep.subr.bf16.mxu0 %v13617_v41 }
 0x41a   : > { %3032 = vmatmul.mubr.bf16.gmra.mrb[40].mxu0 %v16039_v26 }
 0x41b   : > { %3047 = vmatpush1.bf16.msra.mxu0 %v13615_v42  ;;  %3074 = vmatprep.mubr.bf16.mxu0 %v15178_v25 }
 0x41c   : > { %3048 = vmatprep.subr.bf16.mxu0 %v13620_v43 }
 0x41f   : > { %3049 = vmatpush1.bf16.msra.mxu0 %v13618_v58 }
 0x420   : > { %3050 = vmatprep.subr.bf16.mxu0 %v13623_v62 }
 0x423   : > { %3051 = vmatpush1.bf16.msra.mxu0 %v13621_v54 }
 0x424   : > { %3052 = vmatprep.subr.bf16.mxu0 %v13626_v44 }
 0x425   : > { %v12372_v47 = vpop.f32.mrb[8].mxu0 }
 0x426   : > { %v12373_v50 = vpop.f32.mrb[9].mxu0 }
 0x427   : > { %v12374_v15 = vadd.f32 %v12373_v50, %v12372_v47  ;;  %v12375_v26 = vpop.f32.mrb[10].mxu0  ;;  %3053 = vmatpush1.bf16.msra.mxu0 %v13624_v45 }
 0x428   : > { %v12376_v52 = vpop.f32.mrb[11].mxu0  ;;  %v12448_v4 = vpop.f32.mrb[12].mxu1  ;;  %3054 = vmatprep.subr.bf16.mxu0 %v13629_v46 }
 0x429   : > { %v1811_v56 = vadd.f32 %v12374_v15, %v16203_v48  ;;  %v12377_v57 = vadd.f32 %v12376_v52, %v12375_v26  ;;  %v12449_v20 = vpop.f32.mrb[13].mxu1 }
 0x42a   : > { %v12450_v21 = vadd.f32 %v12449_v20, %v12448_v4  ;;  %v12451_v2 = vpop.f32.mrb[14].mxu1 }
 0x42b   : > { %v1814_v19 = vadd.f32 %v12377_v57, %v16207_v49  ;;  %3055 = vmatpush1.bf16.msra.mxu0 %v13627_v3  ;;  %v12452_v59 = vpop.f32.mrb[15].mxu1 }
 0x42c   : > { %v12453_v61 = vadd.f32 %v12452_v59, %v12451_v2  ;;  %3056 = vmatprep.subr.bf16.mxu0 %v13632_v53 }
 0x42d   : > { %v16275_v5 = vpack.c.bf16 %v1814_v19, %v1811_v56  ;;  %v12378_v8 = vpop.f32.mrb[12].mxu0 }
 0x42e   : > { %v12379_v9 = vpop.f32.mrb[13].mxu0 }
 0x42f   : > { %v12380_v11 = vadd.f32 %v12379_v9, %v12378_v8  ;;  %v12381_v14 = vpop.f32.mrb[14].mxu0  ;;  %3057 = vmatpush1.bf16.msra.mxu0 %v13630_v60 }
 0x430   : > { %v12382_v29 = vpop.f32.mrb[15].mxu0  ;;  %v12454_v48 = vpop.f32.mrb[16].mxu1  ;;  %12812 = vmatprep.subr.bf16.mxu0 %v15179_v51 }
 0x431   : > { %v1819_v30 = vadd.f32 %v16200_v16, %v12380_v11  ;;  %v12383_v31 = vadd.f32 %v12382_v29, %v12381_v14  ;;  %v12455_v49 = vpop.f32.mrb[17].mxu1 }
 0x432   : > { %v12456_v32 = vadd.f32 %v12455_v49, %v12454_v48  ;;  %3075 = vmatmul.mubr.bf16.vlgmr.msra.gmra.mrb[36].mxu0 %v16017_v55  ;;  %v12457_v33 = vpop.f32.mrb[18].mxu1 }
 0x433   : > { %v1822_v34 = vadd.f32 %v16205_v17, %v12383_v31  ;;  %v12458_v36 = vpop.f32.mrb[19].mxu1  ;;  %3084 = vmatprep.mubr.bf16.mxu0 %v15178_v25 }
 0x434   : > { %v12459_v38 = vadd.f32 %v12458_v36, %v12457_v33 }
 0x435   : > { %v16282_v40 = vpack.c.bf16 %v1822_v34, %v1819_v30 }
 0x43a   : > { %3085 = vmatmul.mubr.bf16.gmra.mrb[40].mxu0 %v16028_v6 }
 0x43b   : > { %12814 = vmatprep.mubr.msk.bf16.mxu0 %vm15180_vm3, %v15179_v51 }
 0x448   : > { %v12780_v16 = vpop.f32.mrb[20].mxu1 }
 0x449   : > { %v3187_v41 = vadd.f32 %v12780_v16, %v12456_v32  ;;  %v3178_v42 = vpop.f32.mrb[21].mxu1 }
 0x44a   : > { %v3179_v43 = vadd.f32 %v12450_v21, %v3178_v42  ;;  %v12781_v58 = vpop.f32.mrb[22].mxu1 }
 0x44b   : > { %v3190_v55 = vadd.f32 %v12781_v58, %v12459_v38  ;;  %v3181_v62 = vpop.f32.mrb[23].mxu1 }
 0x44c   : > { %v3182_v54 = vadd.f32 %v12453_v61, %v3181_v62 }
 0x44d   : > { %v16287_v17 = vpack.c.bf16 %v3190_v55, %v3187_v41 }
 0x44e   : > { %v16289_v44 = vpack.c.bf16 %v3182_v54, %v3179_v43 }
 0x465   : > { %v2339_v45 = vpop.f32.mrb[16].mxu0 }
 0x466   : > { %v2393_v46 = vadd.f32 %v16229_v12, %v2339_v45  ;;  %v2341_v47 = vpop.f32.mrb[17].mxu0 }
 0x467   : > { %v2395_v6 = vadd.f32 %v16234_v24, %v2341_v47  ;;  %v2343_v50 = vpop.f32.mrb[18].mxu0 }
 0x468   : > { %v2397_v15 = vadd.f32 %v16236_v27, %v2343_v50  ;;  %v2345_v26 = vpop.f32.mrb[19].mxu0 }
 0x469   : > { %v2399_v3 = vadd.f32 %v16238_v28, %v2345_v26  ;;  %v16335_v26 = vld [vmem:[#allocation2] sm:$0xff] }
 0x46a   : > { %v16295_v52 = vpack.c.bf16 %v2397_v15, %v2393_v46 }
 0x46b   : > { %v16297_v4 = vpack.c.bf16 %v2399_v3, %v2395_v6 }
 0x46c   : > { %v3216_v53 = vsel %vm3211_vm4, %v16295_v52, 0 }
 0x46d   : > { %v2349_v56 = vpop.f32.mrb[20].mxu0  ;;  %12783 = vmatpush3.bf16.xpose.msra.mxu1 %v3216_v53  ;;  %v16337_v53 = vld [vmem:[#allocation2 + $0x8] sm:$0xff] }
 0x46e   : > { %v2403_v12 = vadd.f32 %v16245_v37, %v2349_v56  ;;  %v2351_v57 = vpop.f32.mrb[21].mxu0  ;;  %12788 = vmatprep.subr.bf16.mxu1 %v15179_v51 }
 0x46f   : > { %v2405_v24 = vadd.f32 %v16250_v1, %v2351_v57  ;;  %v2353_v27 = vpop.f32.mrb[22].mxu0 }
 0x470   : > { %v2407_v28 = vadd.f32 %v16252_v63, %v2353_v27  ;;  %v2355_v20 = vpop.f32.mrb[23].mxu0 }
 0x471   : > { %v2409_v21 = vadd.f32 %v16255_v39, %v2355_v20 }
 0x472   : > { %v16306_v2 = vpack.c.bf16 %v2407_v28, %v2403_v12 }
 0x473   : > { %v16308_v19 = vpack.c.bf16 %v2409_v21, %v2405_v24 }
 0x474   : > { %12785 = vmatmul.mubr.msk.bf16.vlgmr.msra.gmra.mrb[24].mxu1 %vm3211_vm4, %v16227_v10  ;;  %v3263_v37 = vsel %vm3211_vm4, %v16306_v2, 0 }
 0x475   : > { %12789 = vmatpush3.bf16.xpose.msra.mxu1 %v3263_v37  ;;  %12790 = vmatprep.mubr.msk.bf16.mxu1 %vm15180_vm3, %v15179_v51 }
 0x476   : > { %12794 = vmatprep.subr.bf16.mxu1 %v15179_v51 }
 0x47c   : > { %12791 = vmatmul.mubr.msk.bf16.vlgmr.msra.gmra.mrb[28].mxu1 %vm3211_vm4, %v16243_v35 }
 0x47d   : > { %12796 = vmatprep.mubr.msk.bf16.mxu1 %vm15180_vm3, %v15179_v51 }
 0x485   : > { %v12410_v1 = vpop.f32.mrb[24].mxu0 }
 0x486   : > { %v12411_v63 = vpop.f32.mrb[25].mxu0 }
 0x487   : > { %v12412_v39 = vadd.f32 %v12411_v63, %v12410_v1  ;;  %v12413_v59 = vpop.f32.mrb[26].mxu0 }
 0x488   : > { %v12414_v60 = vpop.f32.mrb[27].mxu0 }
 0x489   : > { %v12415_v61 = vadd.f32 %v12414_v60, %v12413_v59 }
 0x48d   : > { %v12416_v8 = vpop.f32.mrb[28].mxu0 }
 0x48e   : > { %v12417_v9 = vpop.f32.mrb[29].mxu0 }
 0x48f   : > { %v12418_v11 = vadd.f32 %v12417_v9, %v12416_v8  ;;  %v12419_v14 = vpop.f32.mrb[30].mxu0 }
 0x490   : > { %v12420_v29 = vpop.f32.mrb[31].mxu0 }
 0x491   : > { %v12421_v48 = vadd.f32 %v12420_v29, %v12419_v14 }
 0x4a5   : > { %v12760_v30 = vpop.f32.mrb[32].mxu0 }
 0x4a6   : > { %v2503_v31 = vadd.f32 %v12760_v30, %v12418_v11  ;;  %v2494_v49 = vpop.f32.mrb[33].mxu0 }
 0x4a7   : > { %v2495_v32 = vadd.f32 %v12412_v39, %v2494_v49  ;;  %v12761_v33 = vpop.f32.mrb[34].mxu0 }
 0x4a8   : > { %v2506_v34 = vadd.f32 %v12761_v33, %v12421_v48  ;;  %v2497_v36 = vpop.f32.mrb[35].mxu0 }
 0x4a9   : > { %v2498_v38 = vadd.f32 %v12415_v61, %v2497_v36 }
 0x4aa   : > { %v16321_v16 = vpack.c.bf16 %v2506_v34, %v2503_v31 }
 0x4ab   : > { %v16323_v41 = vpack.c.bf16 %v2498_v38, %v2495_v32 }
 0x505   : > { %v3076_v42 = vpop.f32.mrb[36].mxu0 }
 0x506   : > { %v3078_v43 = vpop.f32.mrb[37].mxu0 }
 0x507   : > { %v3080_v58 = vpop.f32.mrb[38].mxu0 }
 0x508   : > { %v16325_v55 = vpack.c.bf16 %v3080_v58, %v3076_v42  ;;  %v3082_v62 = vpop.f32.mrb[39].mxu0 }
 0x509   : > { %v16327_v54 = vpack.c.bf16 %v3082_v62, %v3078_v43 }
 0x50a   : > { %12795 = vmatpush3.bf16.msra.mxu1 %v16325_v55 }
 0x50b   : > { %12800 = vmatprep.subr.bf16.mxu1 %v15179_v51 }
 0x50d   : > { %v3086_v45 = vpop.f32.mrb[40].mxu0 }
 0x50e   : > { %v3088_v46 = vpop.f32.mrb[41].mxu0 }
 0x50f   : > { %v3090_v47 = vpop.f32.mrb[42].mxu0 }
 0x510   : > { %v16331_v6 = vpack.c.bf16 %v3090_v47, %v3086_v45  ;;  %v3092_v50 = vpop.f32.mrb[43].mxu0 }
 0x511   : > { %v16333_v15 = vpack.c.bf16 %v3092_v50, %v3088_v46 }
 0x547   : > { %v3252_v3 = vpop.f32.mrb[24].mxu1 }
 0x548   : > { %v3253_v56 = vadd.f32 %v3252_v3, %v16335_v26  ;;  %v12786_v12 = vpop.f32.mrb[25].mxu1 }
 0x549   : > { %v3255_v57 = vpop.f32.mrb[26].mxu1 }
 0x54a   : > { %v3256_v24 = vadd.f32 %v3255_v57, %v16337_v53  ;;  %v12787_v27 = vpop.f32.mrb[27].mxu1  ;;  %v3307_v28 = vsel %vm3306_vm5, %v3253_v56, -inf }
 0x54b   : > { %3308 = vmax.xlane.f32.xlu0 %v3307_v28 }
 0x54c   : > { %v3310_v20 = vsel %vm3306_vm5, %v3256_v24, -inf }
 0x54d   : > { %3311 = vmax.xlane.f32.xlu1 %v3310_v20 }
 0x54f   : > { %v3299_v21 = vpop.f32.mrb[28].mxu1 }
 0x550   : > { %v3300_v37 = vadd.f32 %v3299_v21, %v16335_v26  ;;  %v12792_v1 = vpop.f32.mrb[29].mxu1 }
 0x551   : > { %v3302_v63 = vpop.f32.mrb[30].mxu1 }
 0x552   : > { %v3303_v39 = vadd.f32 %v3302_v63, %v16337_v53  ;;  %v12793_v59 = vpop.f32.mrb[31].mxu1  ;;  %v3313_v60 = vsel %vm3306_vm5, %v3300_v37, -inf }
 0x553   : > { %3314 = vmax.xlane.f32.xlu0 %v3313_v60 }
 0x554   : > { %v3316_v61 = vsel %vm3306_vm5, %v3303_v39, -inf }
 0x555   : > { %3317 = vmax.xlane.f32.xlu1 %v3316_v61 }
 0x5d8   : > { %v3309_v8 = vpop.xlane.xlu0 %3308 }
 0x5d9   : > { %v3319_v9 = vsub.f32 %v3253_v56, %v3309_v8 }
 0x5da   : > { %v3312_v11 = vpop.xlane.xlu1 %3311 }
 0x5db   : > { %v3323_v14 = vmul.f32 1.442695, %v3319_v9  ;;  %v3320_v29 = vsub.f32 %v3256_v24, %v3312_v11 }
 0x5dd   : > { %14553 = vpow2.f32 %v3323_v14  ;;  %v3325_v48 = vmul.f32 1.442695, %v3320_v29 }
 0x5df   : > { %14555 = vpow2.f32 %v3325_v48 }
 0x5e0   : > { %v3315_v30 = vpop.xlane.xlu0 %3314 }
 0x5e1   : > { %v3321_v31 = vsub.f32 %v3300_v37, %v3315_v30 }
 0x5e2   : > { %v3318_v43 = vpop.xlane.xlu1 %3317 }
 0x5e3   : > { %v3327_v49 = vmul.f32 1.442695, %v3321_v31  ;;  %v3322_v58 = vsub.f32 %v3303_v39, %v3318_v43 }
 0x5e5   : > { %14557 = vpow2.f32 %v3327_v49  ;;  %v3329_v62 = vmul.f32 1.442695, %v3322_v58 }
 0x5e7   : > { %v14554_v32 = vpop.eup %14553  ;;  %14559 = vpow2.f32 %v3329_v62 }
 0x5e8   : > { %v3331_v33 = vsel %vm3306_vm5, %v14554_v32, 0.0 }
 0x5e9   : > { %v14556_v34 = vpop.eup %14555  ;;  %3332 = vadd.xlane.f32.xlu0 %v3331_v33 }
 0x5ea   : > { %v3334_v36 = vsel %vm3306_vm5, %v14556_v34, 0.0 }
 0x5eb   : > { %3335 = vadd.xlane.f32.xlu1 %v3334_v36 }
 0x5ef   : > { %v14558_v38 = vpop.eup %14557 }
 0x5f0   : > { %v3337_v42 = vsel %vm3306_vm5, %v14558_v38, 0.0 }
 0x5f1   : > { %3338 = vadd.xlane.f32.xlu0 %v3337_v42  ;;  %v14560_v45 = vpop.eup %14559 }
 0x5f2   : > { %v3340_v46 = vsel %vm3306_vm5, %v14560_v45, 0.0 }
 0x5fc   : > { %3516 = vrot.lane.b32.xlu1 %v16306_v2, %s15181_s30 }
 0x607   : > { %3463 = vrot.lane.b32.xlu0 %v16295_v52, %s15181_s30 }
 0x620   : > { %3341 = vadd.xlane.f32.xlu1 %v3340_v46 }
 0x631   : > { %3460 = vrot.lane.b32.xlu1 %v16227_v10, %s15181_s30 }
 0x635   : > { %3513 = vrot.lane.b32.xlu1 %v16243_v35, %s15181_s30 }
 0x676   : > { %v3333_v47 = vpop.xlane.xlu0 %3332 }
 0x677   : > { %14561 = vrcp.f32 %v3333_v47 }
 0x678   : > { %v3336_v2 = vpop.xlane.xlu1 %3335 }
 0x679   : > { %14563 = vrcp.f32 %v3336_v2 }
 0x67c   : > { %v3517_v50 = vpop.permute.xlu1 %3516 }
 0x67d   : > { %v3522_v52 = vsel %vm3211_vm4, %v3517_v50, 0 }
 0x67e   : > { %12813 = vmatpush3.bf16.xpose.msra.mxu0 %v3522_v52  ;;  %v3339_v10 = vpop.xlane.xlu0 %3338 }
 0x67f   : > { %12824 = vmatprep.subr.bf16.mxu0 %v15179_v51  ;;  %14565 = vrcp.f32 %v3339_v10 }
 0x681   : > { %v14562_v3 = vpop.eup %14561 }
 0x682   : > { %v3344_v12 = vmul.f32 %v14562_v3, %v14554_v32  ;;  %v3464_v63 = vpop.permute.xlu0 %3463 }
 0x683   : > { %v14564_v56 = vpop.eup %14563  ;;  %v3469_v59 = vsel %vm3211_vm4, %v3464_v63, 0 }
 0x684   : > { %v3346_v57 = vmul.f32 %v14564_v56, %v14556_v34 }
 0x686   : > { %v3351_v24 = vpack.c.bf16 %v3346_v57, %v3344_v12 }
 0x688   : > { %12797 = vmatmul.mubr.msk.bf16.vlgmr.msra.gmra.mrb[32].mxu1 %vm3306_vm5, %v3351_v24 }
 0x689   : > { %12801 = vmatpush3.bf16.msra.mxu1 %v16331_v6  ;;  %12802 = vmatprep.mubr.msk.bf16.mxu1 %vm15180_vm3, %v15179_v51  ;;  %v14566_v20 = vpop.eup %14565 }
 0x68a   : > { %12806 = vmatprep.subr.bf16.mxu1 %v15179_v51  ;;  %v3348_v37 = vmul.f32 %v14566_v20, %v14558_v38 }
 0x6ad   : > { %v3342_v35 = vpop.xlane.xlu1 %3341 }
 0x6ae   : > { %14567 = vrcp.f32 %v3342_v35 }
 0x6b1   : > { %v3461_v27 = vpop.permute.xlu1 %3460 }
 0x6b5   : > { %v3514_v28 = vpop.permute.xlu1 %3513 }
 0x6b6   : > { %12815 = vmatmul.mubr.msk.bf16.vlgmr.msra.gmra.mrb[44].mxu0 %vm3211_vm4, %v3514_v28 }
 0x6b7   : > { %12826 = vmatprep.mubr.msk.bf16.mxu0 %vm15180_vm3, %v15179_v51 }
 0x6b8   : > { %v14568_v21 = vpop.eup %14567 }
 0x6b9   : > { %v3350_v1 = vmul.f32 %v14568_v21, %v14560_v45 }
 0x6bb   : > { %v3352_v39 = vpack.c.bf16 %v3350_v1, %v3348_v37 }
 0x6bd   : > { %12803 = vmatmul.mubr.msk.bf16.vlgmr.msra.gmra.mrb[36].mxu1 %vm3306_vm5, %v3352_v39 }
 0x6be   : > { %12807 = vmatpush3.bf16.xpose.msra.mxu1 %v3469_v59  ;;  %12808 = vmatprep.mubr.msk.bf16.mxu1 %vm15180_vm3, %v15179_v51 }
 0x6bf   : > { %12818 = vmatprep.subr.bf16.mxu1 %v15179_v51 }
 0x6c5   : > { %12809 = vmatmul.mubr.msk.bf16.vlgmr.msra.gmra.mrb[40].mxu1 %vm3211_vm4, %v3461_v27 }
 0x6c6   : > { %12820 = vmatprep.mubr.msk.bf16.mxu1 %vm15180_vm3, %v15179_v51 }
 0x75b   : > { %v3390_v60 = vpop.f32.mrb[32].mxu1 }
 0x75c   : > { %v12798_v61 = vpop.f32.mrb[33].mxu1 }
 0x75d   : > { %v3393_v8 = vpop.f32.mrb[34].mxu1 }
 0x75e   : > { %v16377_v9 = vpack.c.bf16 %v3393_v8, %v3390_v60  ;;  %v12799_v11 = vpop.f32.mrb[35].mxu1 }
 0x789   : > { %v3558_v14 = vpop.f32.mrb[44].mxu0 }
 0x78a   : > { %v12816_v29 = vpop.f32.mrb[45].mxu0  ;;  %v3559_v58 = vadd.f32 %v3558_v14, %v16335_v26 }
 0x78b   : > { %v3561_v48 = vpop.f32.mrb[46].mxu0 }
 0x78c   : > { %v12817_v30 = vpop.f32.mrb[47].mxu0  ;;  %v3562_v2 = vadd.f32 %v3561_v48, %v16337_v53  ;;  %v3571_v50 = vsel %vm3306_vm5, %v3559_v58, -inf }
 0x78d   : > { %v13635_v30 = vld [vmem:[%s15806_s5 + $0x64] ss:$12 sps:$4 sm:$0xff]  }
 0x78e   : > { %v3574_v52 = vsel %vm3306_vm5, %v3562_v2, -inf }
 0x790   : > { %v3434_v31 = vpop.f32.mrb[36].mxu1 }
 0x791   : > { %v12804_v49 = vpop.f32.mrb[37].mxu1 }
 0x792   : > { %v3437_v32 = vpop.f32.mrb[38].mxu1 }
 0x793   : > { %v16379_v33 = vpack.c.bf16 %v3437_v32, %v3434_v31  ;;  %v12805_v34 = vpop.f32.mrb[39].mxu1  ;;  %v13636_v32 = vld [vmem:[%s15806_s5 + $0x68] ss:$12 sps:$4 sm:$0xff]  }
 0x798   : > { %v3505_v36 = vpop.f32.mrb[40].mxu1 }
 0x799   : > { %v3506_v38 = vadd.f32 %v3505_v36, %v16335_v26  ;;  %v12810_v42 = vpop.f32.mrb[41].mxu1 }
 0x79a   : > { %v3508_v43 = vpop.f32.mrb[42].mxu1 }
 0x79b   : > { %v3509_v62 = vadd.f32 %v3508_v43, %v16337_v53  ;;  %v12811_v45 = vpop.f32.mrb[43].mxu1  ;;  %v3565_v46 = vsel %vm3306_vm5, %v3506_v38, -inf }
 0x79c   : > { %3566 = vmax.xlane.f32.xlu0 %v3565_v46 }
 0x79d   : > { %v3568_v47 = vsel %vm3306_vm5, %v3509_v62, -inf }
 0x79e   : > { %3569 = vmax.xlane.f32.xlu1 %v3568_v47  ;;  %v13633_v47 = vld [vmem:[%s15806_s5 + $0x60] ss:$12 sps:$4 sm:$0xff]  }
 0x7a0   : > { %3572 = vmax.xlane.f32.xlu0 %v3571_v50  ;;  %v13639_v50 = vld [vmem:[%s15806_s5 + $0x7c] ss:$12 sps:$4 sm:$0xff]  }
 0x7a4   : > { %3575 = vmax.xlane.f32.xlu0 %v3574_v52  ;;  %v13637_v52 = vld [vmem:[%s15806_s5 + $0x78] ss:$12 sps:$4 sm:$0xff]  }
 0x829   : > { %v3567_v3 = vpop.xlane.xlu0 %3566 }
 0x82a   : > { %v3577_v56 = vsub.f32 %v3506_v38, %v3567_v3  ;;  %v13641_v3 = vld [vmem:[%s15806_s5 + $0x90] ss:$12 sps:$4 sm:$0xff]  }
 0x82b   : > { %v3570_v12 = vpop.xlane.xlu1 %3569 }
 0x82c   : > { %v3581_v10 = vmul.f32 1.442695, %v3577_v56  ;;  %v3578_v35 = vsub.f32 %v3509_v62, %v3570_v12  ;;  %v13643_v56 = vld [vmem:[%s15806_s5 + $0x94] ss:$12 sps:$4 sm:$0xff]   ;;  %v13644_v12 = vld [vmem:[%s15806_s5 + $0x98] ss:$12 sps:$4 sm:$0xff]  }
 0x82d   : > { %v3573_v57 = vpop.xlane.xlu0 %3572 }
 0x82e   : > { %v3579_v24 = vsub.f32 %v3559_v58, %v3573_v57  ;;  %v3583_v21 = vmul.f32 1.442695, %v3578_v35  ;;  %v13640_v58 = vld [vmem:[%s15806_s5 + $0x80] ss:$12 sps:$4 sm:$0xff]   ;;  %v13645_v57 = vld [vmem:[%s15806_s5 + $0xa8] ss:$12 sps:$4 sm:$0xff]  }
 0x82f   : > { %v13651_v35 = vld [vmem:[%s15806_s5 + $0x4] ss:$12 sps:$4 sm:$0xff]  }
 0x830   : > { %v3585_v27 = vmul.f32 1.442695, %v3579_v24  ;;  %v13647_v24 = vld [vmem:[%s15806_s5 + $0xac] ss:$12 sps:$4 sm:$0xff]  }
 0x831   : > { %v3576_v28 = vpop.xlane.xlu0 %3575 }
 0x832   : > { %14569 = vpow2.f32 %v3585_v27  ;;  %v3580_v20 = vsub.f32 %v3562_v2, %v3576_v28  ;;  %v13652_v27 = vld [vmem:[%s15806_s5 + $0x8] ss:$12 sps:$4 sm:$0xff]  }
 0x833   : > { %14571 = vpow2.f32 %v3581_v10  ;;  %v13648_v10 = vld [vmem:[%s15806_s5 + $0xb0] ss:$12 sps:$4 sm:$0xff]  }
 0x834   : > { %v3587_v37 = vmul.f32 1.442695, %v3580_v20 }
 0x836   : > { %14573 = vpow2.f32 %v3587_v37 }
 0x837   : > { %14575 = vpow2.f32 %v3583_v21 }
 0x83c   : > { %v14570_v1 = vpop.eup %14569 }
 0x83d   : > { %v3595_v63 = vsel %vm3306_vm5, %v14570_v1, 0.0  ;;  %v14572_v39 = vpop.eup %14571 }
 0x83e   : > { %3596 = vadd.xlane.f32.xlu0 %v3595_v63  ;;  %v3589_v60 = vsel %vm3306_vm5, %v14572_v39, 0.0 }
 0x840   : > { %v14574_v59 = vpop.eup %14573 }
 0x841   : > { %v3598_v61 = vsel %vm3306_vm5, %v14574_v59, 0.0  ;;  %v14576_v8 = vpop.eup %14575 }
 0x842   : > { %3590 = vadd.xlane.f32.xlu0 %v3589_v60  ;;  %3599 = vadd.xlane.f32.xlu1 %v3598_v61  ;;  %v3592_v11 = vsel %vm3306_vm5, %v14576_v8, 0.0  ;;  %v13649_v60 = vld [vmem:[%s15806_s5] ss:$12 sps:$4 sm:$0xff]  }
 0x846   : > { %3593 = vadd.xlane.f32.xlu1 %v3592_v11  ;;  %v13655_v11 = vld [vmem:[%s15806_s5 + $0x1c] ss:$12 sps:$4 sm:$0xff]  }
 0x857   : > { %3660 = vrot.lane.b32.xlu1 %v16331_v6, %s15181_s30 }
 0x858   : > { %3612 = vrot.lane.b32.xlu0 %v16325_v55, %s15181_s30 }
 0x8cb   : > { %v3597_v14 = vpop.xlane.xlu0 %3596 }
 0x8cc   : > { %14577 = vrcp.f32 %v3597_v14  ;;  %v13656_v14 = vld [vmem:[%s15806_s5 + $0x20] ss:$12 sps:$4 sm:$0xff]  }
 0x8cf   : > { %v3600_v29 = vpop.xlane.xlu1 %3599  ;;  %v3591_v48 = vpop.xlane.xlu0 %3590 }
 0x8d0   : > { %14579 = vrcp.f32 %v3600_v29  ;;  %v13653_v29 = vld [vmem:[%s15806_s5 + $0x18] ss:$12 sps:$4 sm:$0xff]  }
 0x8d1   : > { %14581 = vrcp.f32 %v3591_v48  ;;  %v13659_v48 = vld [vmem:[%s15806_s5 + $0x34] ss:$12 sps:$4 sm:$0xff]  }
 0x8d3   : > { %v3594_v31 = vpop.xlane.xlu1 %3593  ;;  %v3613_v49 = vpop.permute.xlu0 %3612 }
 0x8d4   : > { %14583 = vrcp.f32 %v3594_v31  ;;  %12819 = vmatpush3.bf16.msra.mxu1 %v3613_v49  ;;  %v13657_v31 = vld [vmem:[%s15806_s5 + $0x30] ss:$12 sps:$4 sm:$0xff]   ;;  %v13663_v49 = vld [vmem:[%s15806_s5 + $0x4c] ss:$12 sps:$4 sm:$0xff]  }
 0x8d5   : > { %3795 = vmatprep.subr.bf16.mxu1 %v13635_v30  ;;  %v13660_v30 = vld [vmem:[%s15806_s5 + $0x38] ss:$12 sps:$4 sm:$0xff]  }
 0x8d6   : > { %v14578_v6 = vpop.eup %14577 }
 0x8d7   : > { %v3661_v34 = vpop.permute.xlu1 %3660  ;;  %v3606_v36 = vmul.f32 %v14578_v6, %v14570_v1  ;;  %v4120_v6 = vsel %vm3211_vm4, %v16308_v19, 0 }
 0x8d8   : > { %12825 = vmatpush3.bf16.msra.mxu0 %v3661_v34  ;;  %v13661_v34 = vld [vmem:[%s15806_s5 + $0x48] ss:$12 sps:$4 sm:$0xff]  }
 0x8d9   : > { %12830 = vmatprep.subr.bf16.mxu0 %v13636_v32 }
 0x8da   : > { %v14580_v55 = vpop.eup %14579 }
 0x8db   : > { %v3608_v38 = vmul.f32 %v14580_v55, %v14574_v59  ;;  %v14582_v42 = vpop.eup %14581  ;;  %v4073_v55 = vsel %vm3211_vm4, %v16297_v4, 0 }
 0x8dc   : > { %v3602_v45 = vmul.f32 %v14582_v42, %v14572_v39 }
 0x8dd   : > { %v3610_v43 = vpack.c.bf16 %v3608_v38, %v3606_v36 }
 0x8de   : > { %v14584_v62 = vpop.eup %14583 }
 0x8df   : > { %v3604_v46 = vmul.f32 %v14584_v62, %v14576_v8  ;;  %12827 = vmatmul.mubr.msk.bf16.vlgmr.msra.gmra.mrb[48].mxu0 %vm3306_vm5, %v3610_v43 }
 0x8e0   : > { %12831 = vmatpush3.bf16.msra.mxu0 %v13636_v32  ;;  %v13664_v32 = vld [vmem:[%s15806_s5 + $0x50] ss:$12 sps:$4 sm:$0xff]  }
 0x8e1   : > { %v3609_v2 = vpack.c.bf16 %v3604_v46, %v3602_v45  ;;  %12832 = vmatprep.subr.bf16.mxu0 %v13640_v58 }
 0x8e3   : > { %12821 = vmatmul.mubr.msk.bf16.vlgmr.msra.gmra.mrb[44].mxu1 %vm3306_vm5, %v3609_v2 }
 0x8e4   : > { %3796 = vmatpush1.bf16.msra.mxu1 %v13633_v47  ;;  %12833 = vmatpush3.bf16.msra.mxu0 %v13640_v58 }
 0x8e5   : > { %3797 = vmatprep.subr.bf16.mxu1 %v13639_v50  ;;  %3827 = vmatprep.mubr.bf16.mxu1 %v15178_v25 }
 0x8e6   : > { %12834 = vmatprep.subr.bf16.mxu0 %v13644_v12 }
 0x8e8   : > { %3798 = vmatpush1.bf16.msra.mxu1 %v13637_v52  ;;  %12835 = vmatpush3.bf16.msra.mxu0 %v13644_v12 }
 0x8e9   : > { %3799 = vmatprep.subr.bf16.mxu1 %v13643_v56  ;;  %12836 = vmatprep.subr.bf16.mxu0 %v13648_v10 }
 0x8ec   : > { %3800 = vmatpush1.bf16.msra.mxu1 %v13641_v3  ;;  %12837 = vmatpush3.bf16.msra.mxu0 %v13648_v10 }
 0x8ed   : > { %3801 = vmatprep.subr.bf16.mxu1 %v13647_v24  ;;  %12842 = vmatprep.subr.bf16.mxu0 %v13652_v27 }
 0x8f0   : > { %3802 = vmatpush1.bf16.msra.mxu1 %v13645_v57 }
 0x8f1   : > { %3967 = vmatprep.subr.bf16.mxu1 %v13651_v35 }
 0x9b2   : > { %v3700_v28 = vpop.f32.mrb[48].mxu0 }
 0x9b3   : > { %v12828_v20 = vpop.f32.mrb[49].mxu0 }
 0x9b4   : > { %v3703_v21 = vpop.f32.mrb[50].mxu0 }
 0x9b5   : > { %v3708_v37 = vpack.c.bf16 %v3703_v21, %v3700_v28  ;;  %v12829_v1 = vpop.f32.mrb[51].mxu0 }
 0x9b6   : > { %v3652_v63 = vpop.f32.mrb[44].mxu1 }
 0x9b7   : > { %v12822_v39 = vpop.f32.mrb[45].mxu1 }
 0x9b8   : > { %v3655_v59 = vpop.f32.mrb[46].mxu1 }
 0x9b9   : > { %v3707_v61 = vpack.c.bf16 %v3655_v59, %v3652_v63  ;;  %v12823_v8 = vpop.f32.mrb[47].mxu1 }
 0x9bb   : > { %11676 = vmatmul.mubr.msk.bf16.vlgmr.msra.gmra.mrb[48].mxu1 %vm3211_vm4, %v3707_v61  ;;  %12838 = vmatprep.mubr.msk.bf16.mxu0 %vm3211_vm4, %v3707_v61 }
 0x9bc   : > { %3968 = vmatpush1.bf16.msra.mxu1 %v13649_v60  ;;  %12839 = vmatmul.mubr.msk.bf16.vlgmr.msra.gmra.mrb[52].mxu0 %vm3211_vm4, %v3708_v37 }
 0x9bd   : > { %12843 = vmatpush3.bf16.msra.mxu0 %v13652_v27  ;;  %12850 = vmatprep.mubr.msk.bf16.mxu0 %vm3211_vm4, %v16377_v9 }
 0x9be   : > { %3969 = vmatprep.subr.bf16.mxu1 %v13655_v11  ;;  %12844 = vmatprep.subr.bf16.mxu0 %v13656_v14 }
 0x9bf   : > { %3837 = vmatprep.mubr.bf16.mxu1 %v15178_v25 }
 0x9c0   : > { %3970 = vmatpush1.bf16.msra.mxu1 %v13653_v29 }
 0x9c1   : > { %12845 = vmatpush3.bf16.msra.mxu0 %v13656_v14  ;;  %3971 = vmatprep.subr.bf16.mxu1 %v13659_v48  ;;  %v13665_v48 = vld [vmem:[%s15806_s5 + $0xc8] ss:$12 sps:$4 sm:$0xff]  }
 0x9c2   : > { %12846 = vmatprep.subr.bf16.mxu0 %v13660_v30 }
 0x9c3   : > { %11677 = vmatmul.mubr.msk.bf16.gmra.mrb[52].mxu1 %vm3211_vm4, %v3708_v37 }
 0x9c4   : > { %3972 = vmatpush1.bf16.msra.mxu1 %v13657_v31  ;;  %3999 = vmatprep.mubr.bf16.mxu1 %v15178_v25 }
 0x9c5   : > { %12847 = vmatpush3.bf16.msra.mxu0 %v13660_v30  ;;  %3973 = vmatprep.subr.bf16.mxu1 %v13663_v49  ;;  %v13668_v30 = vld [vmem:[%s15806_s5 + $0xc4] ss:$12 sps:$4 sm:$0xff]  }
 0x9c6   : > { %12848 = vmatprep.subr.bf16.mxu0 %v13664_v32 }
 0x9c8   : > { %3974 = vmatpush1.bf16.msra.mxu1 %v13661_v34 }
 0x9c9   : > { %12849 = vmatpush3.bf16.msra.mxu0 %v13664_v32  ;;  %12860 = vmatprep.subr.bf16.mxu1 %v15179_v51 }
 0x9ca   : > { %12854 = vmatprep.subr.bf16.mxu0 %v15179_v51 }
 0x9cb   : > { %11692 = vmatmul.mubr.msk.bf16.vlgmr.msra.gmra.mrb[48].mxu1 %vm3211_vm4, %v16377_v9 }
 0x9cc   : > { %12851 = vmatmul.mubr.msk.bf16.vlgmr.msra.gmra.mrb[52].mxu0 %vm3211_vm4, %v16379_v33  ;;  %4009 = vmatprep.mubr.bf16.mxu1 %v15178_v25 }
 0x9cd   : > { %12856 = vmatprep.mubr.msk.bf16.mxu0 %vm15180_vm3, %v15179_v51 }
 0x9d1   : > { %12861 = vmatpush3.bf16.xpose.msra.mxu1 %v4120_v6 }
 0x9d2   : > { %12855 = vmatpush3.bf16.xpose.msra.mxu0 %v4073_v55  ;;  %12872 = vmatprep.subr.bf16.mxu1 %v15179_v51  ;;  %v13669_v55 = vld [vmem:[%s15806_s5 + $0xe0] ss:$12 sps:$4 sm:$0xff]  }
 0x9d3   : > { %11693 = vmatmul.mubr.msk.bf16.gmra.mrb[52].mxu1 %vm3211_vm4, %v16379_v33  ;;  %12866 = vmatprep.subr.bf16.mxu0 %v15179_v51 }
 0x9d4   : > { %12862 = vmatprep.mubr.msk.bf16.mxu1 %vm15180_vm3, %v15179_v51 }
 0x9d9   : > { %12857 = vmatmul.mubr.msk.bf16.vlgmr.msra.gmra.mrb[56].mxu0 %vm3211_vm4, %v16232_v23 }
 0x9da   : > { %12867 = vmatpush3.bf16.msra.mxu0 %v16327_v54  ;;  %12868 = vmatprep.mubr.msk.bf16.mxu0 %vm15180_vm3, %v15179_v51 }
 0x9db   : > { %12863 = vmatmul.mubr.msk.bf16.vlgmr.msra.gmra.mrb[56].mxu1 %vm3211_vm4, %v16248_v0  ;;  %12878 = vmatprep.subr.bf16.mxu0 %v13665_v48 }
 0x9dc   : > { %12873 = vmatpush3.bf16.msra.mxu1 %v16333_v15  ;;  %12874 = vmatprep.mubr.msk.bf16.mxu1 %vm15180_vm3, %v15179_v51 }
 0x9dd   : > { %4385 = vmatprep.subr.bf16.mxu1 %v13668_v30 }
 0xaac   : > { %v4109_v9 = vpop.f32.mrb[56].mxu0 }
 0xaad   : > { %v4110_v33 = vadd.f32 %v4109_v9, %v16335_v26  ;;  %v12858_v36 = vpop.f32.mrb[57].mxu0 }
 0xaae   : > { %v4112_v38 = vpop.f32.mrb[58].mxu0  ;;  %v4156_v42 = vpop.f32.mrb[56].mxu1 }
 0xaaf   : > { %v4113_v43 = vadd.f32 %v4112_v38, %v16337_v53  ;;  %v12859_v58 = vpop.f32.mrb[59].mxu0  ;;  %v4163_v62 = vsel %vm3306_vm5, %v4110_v33, -inf  ;;  %v12864_v45 = vpop.f32.mrb[57].mxu1  ;;  %v4157_v47 = vadd.f32 %v4156_v42, %v16335_v26  ;;  %v13666_v42 = vld [vmem:[%s15806_s5 + $0xc0] ss:$12 sps:$4 sm:$0xff]  }
 0xab0   : > { %4164 = vmax.xlane.f32.xlu1 %v4163_v62  ;;  %v4159_v46 = vpop.f32.mrb[58].mxu1  ;;  %v13672_v62 = vld [vmem:[%s15806_s5 + $0xdc] ss:$12 sps:$4 sm:$0xff]   ;;  %v13670_v45 = vld [vmem:[%s15806_s5 + $0xd8] ss:$12 sps:$4 sm:$0xff]  }
 0xab1   : > { %v4160_v2 = vadd.f32 %v4159_v46, %v16337_v53  ;;  %v4166_v50 = vsel %vm3306_vm5, %v4113_v43, -inf  ;;  %v12865_v52 = vpop.f32.mrb[59].mxu1  ;;  %v4169_v56 = vsel %vm3306_vm5, %v4157_v47, -inf  ;;  %v13677_v46 = vld [vmem:[%s15806_s5 + $0x110] ss:$12 sps:$4 sm:$0xff]  }
 0xab2   : > { %4167 = vmax.xlane.f32.xlu0 %v4166_v50  ;;  %v13678_v50 = vld [vmem:[%s15806_s5 + $0x108] ss:$12 sps:$4 sm:$0xff]   ;;  %v13680_v52 = vld [vmem:[%s15806_s5 + $0x10c] ss:$12 sps:$4 sm:$0xff]  }
 0xab3   : > { %v4172_v3 = vsel %vm3306_vm5, %v4160_v2, -inf }
 0xab4   : > { %4173 = vmax.xlane.f32.xlu1 %v4172_v3 }
 0xab6   : > { %4170 = vmax.xlane.f32.xlu0 %v4169_v56 }
 0xb3d   : > { %v4165_v12 = vpop.xlane.xlu1 %4164 }
 0xb3e   : > { %v4175_v57 = vsub.f32 %v4110_v33, %v4165_v12 }
 0xb3f   : > { %v4168_v24 = vpop.xlane.xlu0 %4167 }
 0xb40   : > { %v4179_v10 = vmul.f32 1.442695, %v4175_v57  ;;  %v4176_v35 = vsub.f32 %v4113_v43, %v4168_v24  ;;  %v13673_v43 = vld [vmem:[%s15806_s5 + $0xf8] ss:$12 sps:$4 sm:$0xff]  }
 0xb41   : > { %v4174_v27 = vpop.xlane.xlu1 %4173 }
 0xb42   : > { %14585 = vpow2.f32 %v4179_v10  ;;  %v4181_v28 = vmul.f32 1.442695, %v4176_v35  ;;  %v4178_v20 = vsub.f32 %v4160_v2, %v4174_v27  ;;  %v13674_v2 = vld [vmem:[%s15806_s5 + $0xf0] ss:$12 sps:$4 sm:$0xff]  }
 0xb43   : > { %v4171_v21 = vpop.xlane.xlu0 %4170 }
 0xb44   : > { %14587 = vpow2.f32 %v4181_v28  ;;  %v4185_v37 = vmul.f32 1.442695, %v4178_v20  ;;  %v4177_v1 = vsub.f32 %v4157_v47, %v4171_v21  ;;  %v13676_v47 = vld [vmem:[%s15806_s5 + $0xf4] ss:$12 sps:$4 sm:$0xff]  }
 0xb46   : > { %14589 = vpow2.f32 %v4185_v37  ;;  %v4183_v63 = vmul.f32 1.442695, %v4177_v1 }
 0xb48   : > { %14591 = vpow2.f32 %v4183_v63 }
 0xb4c   : > { %v14586_v39 = vpop.eup %14585 }
 0xb4d   : > { %v4187_v59 = vsel %vm3306_vm5, %v14586_v39, 0.0 }
 0xb4e   : > { %v14588_v60 = vpop.eup %14587  ;;  %4188 = vadd.xlane.f32.xlu0 %v4187_v59 }
 0xb4f   : > { %v4190_v61 = vsel %vm3306_vm5, %v14588_v60, 0.0 }
 0xb50   : > { %v14590_v8 = vpop.eup %14589  ;;  %4191 = vadd.xlane.f32.xlu1 %v4190_v61 }
 0xb51   : > { %v4196_v11 = vsel %vm3306_vm5, %v14590_v8, 0.0 }
 0xb52   : > { %v14592_v14 = vpop.eup %14591 }
 0xb53   : > { %v4193_v29 = vsel %vm3306_vm5, %v14592_v14, 0.0 }
 0xb54   : > { %4194 = vadd.xlane.f32.xlu0 %v4193_v29  ;;  %4197 = vadd.xlane.f32.xlu1 %v4196_v11 }
 0xb65   : > { %4500 = vrot.lane.b32.xlu1 %v16232_v23, %s15181_s30 }
 0xb69   : > { %4556 = vrot.lane.b32.xlu1 %v16308_v19, %s15181_s30 }
 0xb6a   : > { %4503 = vrot.lane.b32.xlu0 %v16297_v4, %s15181_s30 }
 0xb6d   : > { %4553 = vrot.lane.b32.xlu1 %v16248_v0, %s15181_s30 }
 0xbdb   : > { %v4189_v31 = vpop.xlane.xlu0 %4188 }
 0xbdc   : > { %14593 = vrcp.f32 %v4189_v31 }
 0xbdd   : > { %v4192_v49 = vpop.xlane.xlu1 %4191 }
 0xbde   : > { %14595 = vrcp.f32 %v4192_v49 }
 0xbe1   : > { %v4195_v32 = vpop.xlane.xlu0 %4194  ;;  %v4198_v23 = vpop.xlane.xlu1 %4197 }
 0xbe2   : > { %14597 = vrcp.f32 %v4195_v32 }
 0xbe3   : > { %14599 = vrcp.f32 %v4198_v23 }
 0xbe5   : > { %v4504_v27 = vpop.permute.xlu0 %4503  ;;  %v4501_v37 = vpop.permute.xlu1 %4500 }
 0xbe6   : > { %v14594_v19 = vpop.eup %14593  ;;  %v4509_v1 = vsel %vm3211_vm4, %v4504_v27, 0 }
 0xbe7   : > { %v4200_v34 = vmul.f32 %v14594_v19, %v14586_v39 }
 0xbe8   : > { %v14596_v4 = vpop.eup %14595 }
 0xbe9   : > { %v4202_v0 = vmul.f32 %v14596_v4, %v14588_v60  ;;  %v4557_v63 = vpop.permute.xlu1 %4556 }
 0xbea   : > { %v4562_v39 = vsel %vm3211_vm4, %v4557_v63, 0 }
 0xbeb   : > { %v4207_v6 = vpack.c.bf16 %v4202_v0, %v4200_v34 }
 0xbec   : > { %v14598_v9 = vpop.eup %14597 }
 0xbed   : > { %v14600_v33 = vpop.eup %14599  ;;  %v4204_v36 = vmul.f32 %v14598_v9, %v14592_v14  ;;  %12869 = vmatmul.mubr.msk.bf16.vlgmr.msra.gmra.mrb[60].mxu0 %vm3306_vm5, %v4207_v6  ;;  %v4554_v59 = vpop.permute.xlu1 %4553 }
 0xbee   : > { %v4206_v38 = vmul.f32 %v14600_v33, %v14590_v8  ;;  %12879 = vmatpush3.bf16.msra.mxu0 %v13665_v48 }
 0xbef   : > { %12880 = vmatprep.subr.bf16.mxu0 %v13669_v55 }
 0xbf0   : > { %v4208_v58 = vpack.c.bf16 %v4206_v38, %v4204_v36 }
 0xbf2   : > { %12875 = vmatmul.mubr.msk.bf16.vlgmr.msra.gmra.mrb[60].mxu1 %vm3306_vm5, %v4208_v58  ;;  %12881 = vmatpush3.bf16.msra.mxu0 %v13669_v55 }
 0xbf3   : > { %4386 = vmatpush1.bf16.msra.mxu1 %v13666_v42  ;;  %12882 = vmatprep.subr.bf16.mxu0 %v13673_v43 }
 0xbf4   : > { %4387 = vmatprep.subr.bf16.mxu1 %v13672_v62  ;;  %4417 = vmatprep.mubr.bf16.mxu1 %v15178_v25 }
 0xbf6   : > { %12883 = vmatpush3.bf16.msra.mxu0 %v13673_v43 }
 0xbf7   : > { %4388 = vmatpush1.bf16.msra.mxu1 %v13670_v45  ;;  %12884 = vmatprep.subr.bf16.mxu0 %v13677_v46 }
 0xbf8   : > { %4389 = vmatprep.subr.bf16.mxu1 %v13676_v47 }
 0xbfa   : > { %12885 = vmatpush3.bf16.msra.mxu0 %v13677_v46 }
 0xbfb   : > { %4390 = vmatpush1.bf16.msra.mxu1 %v13674_v2  ;;  %12890 = vmatprep.subr.bf16.mxu0 %v15179_v51 }
 0xbfc   : > { %4391 = vmatprep.subr.bf16.mxu1 %v13680_v52 }
 0xbff   : > { %4392 = vmatpush1.bf16.msra.mxu1 %v13678_v50 }
 0xc00   : > { %12902 = vmatprep.subr.bf16.mxu1 %v15179_v51 }
 0xcc0   : > { %v4246_v3 = vpop.f32.mrb[60].mxu0 }
 0xcc1   : > { %v12870_v56 = vpop.f32.mrb[61].mxu0 }
 0xcc2   : > { %v4249_v12 = vpop.f32.mrb[62].mxu0 }
 0xcc3   : > { %v4297_v57 = vpack.c.bf16 %v4249_v12, %v4246_v3  ;;  %v12871_v24 = vpop.f32.mrb[63].mxu0 }
 0xcc5   : > { %v4290_v10 = vpop.f32.mrb[60].mxu1  ;;  %11712 = vmatmul.mubr.msk.bf16.vlgmr.msra.gmra.mrb[48].mxu1 %vm3211_vm4, %v4297_v57  ;;  %12886 = vmatprep.mubr.msk.bf16.mxu0 %vm3211_vm4, %v4297_v57 }
 0xcc6   : > { %v12876_v35 = vpop.f32.mrb[61].mxu1  ;;  %4427 = vmatprep.mubr.bf16.mxu1 %v15178_v25 }
 0xcc7   : > { %v4293_v28 = vpop.f32.mrb[62].mxu1 }
 0xcc8   : > { %v4298_v20 = vpack.c.bf16 %v4293_v28, %v4290_v10  ;;  %v12877_v21 = vpop.f32.mrb[63].mxu1  ;;  %v13683_v10 = vld [vmem:[%s15806_s5 + $0x124] ss:$12 sps:$4 sm:$0xff]  }
 0xcc9   : > { %v13690_v21 = vld [vmem:[%s15806_s5 + $0x128] ss:$12 sps:$4 sm:$0xff]  }
 0xcca   : > { %12887 = vmatmul.mubr.msk.bf16.vlgmr.msra.gmra.mrb[52].mxu0 %vm3211_vm4, %v4298_v20 }
 0xccb   : > { %12891 = vmatpush3.bf16.xpose.msra.mxu0 %v4509_v1  ;;  %12892 = vmatprep.mubr.msk.bf16.mxu0 %vm15180_vm3, %v15179_v51 }
 0xccc   : > { %12896 = vmatprep.subr.bf16.mxu0 %v15179_v51 }
 0xccd   : > { %11713 = vmatmul.mubr.msk.bf16.gmra.mrb[52].mxu1 %vm3211_vm4, %v4298_v20 }
 0xcce   : > { %12904 = vmatprep.mubr.msk.bf16.mxu1 %vm15180_vm3, %v15179_v51 }
 0xcd2   : > { %12893 = vmatmul.mubr.msk.bf16.vlgmr.msra.gmra.mrb[64].mxu0 %vm3211_vm4, %v4501_v37  ;;  %v13681_v37 = vld [vmem:[%s15806_s5 + $0x120] ss:$12 sps:$4 sm:$0xff]  }
 0xcd3   : > { %12897 = vmatpush3.bf16.xpose.msra.mxu0 %v4562_v39  ;;  %12898 = vmatprep.mubr.msk.bf16.mxu0 %vm15180_vm3, %v15179_v51  ;;  %v13686_v39 = vld [vmem:[%s15806_s5 + $0x13c] ss:$12 sps:$4 sm:$0xff]  }
 0xcd4   : > { %12908 = vmatprep.subr.bf16.mxu0 %v15179_v51 }
 0xcda   : > { %12899 = vmatmul.mubr.msk.bf16.vlgmr.msra.gmra.mrb[68].mxu0 %vm3211_vm4, %v4554_v59  ;;  %v13684_v59 = vld [vmem:[%s15806_s5 + $0x138] ss:$12 sps:$4 sm:$0xff]  }
 0xcdb   : > { %12910 = vmatprep.mubr.msk.bf16.mxu0 %vm15180_vm3, %v15179_v51 }
 0xda5   : > { %v4545_v60 = vpop.f32.mrb[64].mxu0 }
 0xda6   : > { %v4546_v61 = vadd.f32 %v4545_v60, %v16335_v26  ;;  %v12894_v8 = vpop.f32.mrb[65].mxu0  ;;  %v13689_v60 = vld [vmem:[%s15806_s5 + $0x154] ss:$12 sps:$4 sm:$0xff]  }
 0xda7   : > { %v4548_v11 = vpop.f32.mrb[66].mxu0 }
 0xda8   : > { %v4549_v14 = vadd.f32 %v4548_v11, %v16337_v53  ;;  %v12895_v29 = vpop.f32.mrb[67].mxu0  ;;  %v4605_v48 = vsel %vm3306_vm5, %v4546_v61, -inf  ;;  %v13687_v11 = vld [vmem:[%s15806_s5 + $0x150] ss:$12 sps:$4 sm:$0xff]  }
 0xda9   : > { %4606 = vmax.xlane.f32.xlu0 %v4605_v48  ;;  %v13693_v48 = vld [vmem:[%s15806_s5 + $0x16c] ss:$12 sps:$4 sm:$0xff]  }
 0xdaa   : > { %v4608_v30 = vsel %vm3306_vm5, %v4549_v14, -inf }
 0xdab   : > { %4609 = vmax.xlane.f32.xlu1 %v4608_v30 }
 0xdad   : > { %v4598_v31 = vpop.f32.mrb[68].mxu0 }
 0xdae   : > { %v4599_v49 = vadd.f32 %v4598_v31, %v16335_v26  ;;  %v12900_v32 = vpop.f32.mrb[69].mxu0  ;;  %v13694_v31 = vld [vmem:[%s15806_s5 + $0x140] ss:$12 sps:$4 sm:$0xff]  }
 0xdaf   : > { %v4601_v23 = vpop.f32.mrb[70].mxu0  ;;  %v13695_v32 = vld [vmem:[%s15806_s5 + $0x158] ss:$12 sps:$4 sm:$0xff]  }
 0xdb0   : > { %v4602_v19 = vadd.f32 %v4601_v23, %v16337_v53  ;;  %v12901_v4 = vpop.f32.mrb[71].mxu0  ;;  %v4611_v34 = vsel %vm3306_vm5, %v4599_v49, -inf  ;;  %v13696_v23 = vld [vmem:[%s15806_s5 + $0x170] ss:$12 sps:$4 sm:$0xff]  }
 0xdb1   : > { %4612 = vmax.xlane.f32.xlu0 %v4611_v34 }
 0xdb2   : > { %v4614_v0 = vsel %vm3306_vm5, %v4602_v19, -inf }
 0xdb5   : > { %4615 = vmax.xlane.f32.xlu0 %v4614_v0 }
 0xe36   : > { %v4607_v6 = vpop.xlane.xlu0 %4606 }
 0xe37   : > { %v4617_v55 = vsub.f32 %v4546_v61, %v4607_v6 }
 0xe38   : > { %v4610_v9 = vpop.xlane.xlu1 %4609 }
 0xe39   : > { %v4621_v33 = vmul.f32 1.442695, %v4617_v55  ;;  %v4618_v36 = vsub.f32 %v4549_v14, %v4610_v9  ;;  %v5000_v55 = vsel %vm3211_vm4, %v16321_v16, 0 }
 0xe3b   : > { %14601 = vpow2.f32 %v4621_v33  ;;  %v4623_v38 = vmul.f32 1.442695, %v4618_v36 }
 0xe3d   : > { %14603 = vpow2.f32 %v4623_v38 }
 0xe3e   : > { %v4613_v26 = vpop.xlane.xlu0 %4612 }
 0xe3f   : > { %v4619_v42 = vsub.f32 %v4599_v49, %v4613_v26  ;;  %v13691_v49 = vld [vmem:[%s15806_s5 + $0x168] ss:$12 sps:$4 sm:$0xff]  }
 0xe41   : > { %v4625_v43 = vmul.f32 1.442695, %v4619_v42  ;;  %v4953_v42 = vsel %vm3211_vm4, %v16323_v41, 0 }
 0xe42   : > { %v4616_v58 = vpop.xlane.xlu0 %4615 }
 0xe43   : > { %14605 = vpow2.f32 %v4625_v43  ;;  %v4620_v53 = vsub.f32 %v4602_v19, %v4616_v58 }
 0xe45   : > { %v14602_v62 = vpop.eup %14601  ;;  %v4627_v45 = vmul.f32 1.442695, %v4620_v53  ;;  %v16575_v53 = vld [vmem:[#allocation2] sm:$0xff] }
 0xe46   : > { %v4629_v46 = vsel %vm3306_vm5, %v14602_v62, 0.0 }
 0xe47   : > { %v14604_v47 = vpop.eup %14603  ;;  %14607 = vpow2.f32 %v4627_v45  ;;  %4630 = vadd.xlane.f32.xlu0 %v4629_v46 }
 0xe48   : > { %v4632_v2 = vsel %vm3306_vm5, %v14604_v47, 0.0 }
 0xe49   : > { %4633 = vadd.xlane.f32.xlu1 %v4632_v2 }
 0xe4d   : > { %v14606_v50 = vpop.eup %14605 }
 0xe4e   : > { %v4635_v52 = vsel %vm3306_vm5, %v14606_v50, 0.0 }
 0xe4f   : > { %4636 = vadd.xlane.f32.xlu0 %v4635_v52 }
 0xe51   : > { %v14608_v3 = vpop.eup %14607 }
 0xe52   : > { %v4638_v56 = vsel %vm3306_vm5, %v14608_v3, 0.0 }
 0xe53   : > { %4639 = vadd.xlane.f32.xlu1 %v4638_v56 }
 0xe64   : > { %4700 = vrot.lane.b32.xlu1 %v16333_v15, %s15181_s30 }
 0xe65   : > { %4652 = vrot.lane.b32.xlu0 %v16327_v54, %s15181_s30 }
 0xed4   : > { %v4631_v12 = vpop.xlane.xlu0 %4630 }
 0xed5   : > { %14609 = vrcp.f32 %v4631_v12 }
 0xed6   : > { %v4634_v57 = vpop.xlane.xlu1 %4633 }
 0xed7   : > { %14611 = vrcp.f32 %v4634_v57 }
 0xedc   : > { %v4637_v24 = vpop.xlane.xlu0 %4636 }
 0xedd   : > { %14613 = vrcp.f32 %v4637_v24 }
 0xedf   : > { %v14610_v35 = vpop.eup %14609 }
 0xee0   : > { %v4640_v27 = vpop.xlane.xlu1 %4639  ;;  %v4653_v28 = vpop.permute.xlu0 %4652  ;;  %v4642_v15 = vmul.f32 %v14610_v35, %v14602_v62 }
 0xee1   : > { %v14612_v20 = vpop.eup %14611  ;;  %14615 = vrcp.f32 %v4640_v27  ;;  %12903 = vmatpush3.bf16.msra.mxu1 %v4653_v28 }
 0xee2   : > { %v4644_v54 = vmul.f32 %v14612_v20, %v14604_v47  ;;  %4835 = vmatprep.subr.bf16.mxu1 %v13683_v10 }
 0xee4   : > { %v4649_v1 = vpack.c.bf16 %v4644_v54, %v4642_v15  ;;  %v4701_v63 = vpop.permute.xlu1 %4700 }
 0xee5   : > { %12909 = vmatpush3.bf16.msra.mxu0 %v4701_v63 }
 0xee6   : > { %12905 = vmatmul.mubr.msk.bf16.vlgmr.msra.gmra.mrb[64].mxu1 %vm3306_vm5, %v4649_v1  ;;  %12914 = vmatprep.subr.bf16.mxu0 %v13690_v21 }
 0xee7   : > { %4836 = vmatpush1.bf16.msra.mxu1 %v13681_v37  ;;  %4867 = vmatprep.mubr.bf16.mxu1 %v15178_v25  ;;  %v14614_v61 = vpop.eup %14613 }
 0xee8   : > { %4837 = vmatprep.subr.bf16.mxu1 %v13686_v39  ;;  %v4646_v14 = vmul.f32 %v14614_v61, %v14606_v50  ;;  %v16578_v50 = vld [vmem:[#allocation2 + $0x8] sm:$0xff] }
 0xeeb   : > { %v14616_v8 = vpop.eup %14615  ;;  %4838 = vmatpush1.bf16.msra.mxu1 %v13684_v59 }
 0xeec   : > { %v4648_v29 = vmul.f32 %v14616_v8, %v14608_v3  ;;  %4839 = vmatprep.subr.bf16.mxu1 %v13689_v60 }
 0xeee   : > { %v4650_v30 = vpack.c.bf16 %v4648_v29, %v4646_v14 }
 0xeef   : > { %4840 = vmatpush1.bf16.msra.mxu1 %v13687_v11 }
 0xef0   : > { %12911 = vmatmul.mubr.msk.bf16.vlgmr.msra.gmra.mrb[72].mxu0 %vm3306_vm5, %v4650_v30  ;;  %4841 = vmatprep.subr.bf16.mxu1 %v13693_v48 }
 0xef1   : > { %12915 = vmatpush3.bf16.msra.mxu0 %v13690_v21 }
 0xef2   : > { %12916 = vmatprep.subr.bf16.mxu0 %v13694_v31 }
 0xef3   : > { %4842 = vmatpush1.bf16.msra.mxu1 %v13691_v49 }
 0xef4   : > { %12932 = vmatprep.subr.bf16.mxu1 %v15179_v51 }
 0xef5   : > { %12917 = vmatpush3.bf16.msra.mxu0 %v13694_v31 }
 0xef6   : > { %12918 = vmatprep.subr.bf16.mxu0 %v13695_v32 }
 0xef9   : > { %12919 = vmatpush3.bf16.msra.mxu0 %v13695_v32  ;;  %v13697_v32 = vld [vmem:[%s15806_s5 + $0x188] ss:$12 sps:$4 sm:$0xff]  }
 0xefa   : > { %12920 = vmatprep.subr.bf16.mxu0 %v13696_v23 }
 0xefd   : > { %12921 = vmatpush3.bf16.msra.mxu0 %v13696_v23  ;;  %v13700_v23 = vld [vmem:[%s15806_s5 + $0x184] ss:$12 sps:$4 sm:$0xff]  }
 0xefe   : > { %12926 = vmatprep.subr.bf16.mxu0 %v15179_v51 }
 0xfb9   : > { %v4692_v19 = vpop.f32.mrb[64].mxu1 }
 0xfba   : > { %v12906_v4 = vpop.f32.mrb[65].mxu1 }
 0xfbb   : > { %v4695_v34 = vpop.f32.mrb[66].mxu1 }
 0xfbc   : > { %v4747_v0 = vpack.c.bf16 %v4695_v34, %v4692_v19  ;;  %v12907_v6 = vpop.f32.mrb[67].mxu1 }
 0xfbe   : > { %11732 = vmatmul.mubr.msk.bf16.vlgmr.msra.gmra.mrb[48].mxu1 %vm3211_vm4, %v4747_v0  ;;  %12922 = vmatprep.mubr.msk.bf16.mxu0 %vm3211_vm4, %v4747_v0 }
 0xfbf   : > { %12933 = vmatpush3.bf16.xpose.msra.mxu1 %v5000_v55  ;;  %4877 = vmatprep.mubr.bf16.mxu1 %v15178_v25  ;;  %v13701_v55 = vld [vmem:[%s15806_s5 + $0x1a0] ss:$12 sps:$4 sm:$0xff]  }
 0xfc0   : > { %12944 = vmatprep.subr.bf16.mxu1 %v15179_v51 }
 0xfc3   : > { %v4740_v9 = vpop.f32.mrb[72].mxu0 }
 0xfc4   : > { %v12912_v33 = vpop.f32.mrb[73].mxu0 }
 0xfc5   : > { %v4743_v36 = vpop.f32.mrb[74].mxu0 }
 0xfc6   : > { %v4748_v38 = vpack.c.bf16 %v4743_v36, %v4740_v9  ;;  %v12913_v26 = vpop.f32.mrb[75].mxu0 }
 0xfc7   : > { %v13698_v26 = vld [vmem:[%s15806_s5 + $0x180] ss:$12 sps:$4 sm:$0xff]  }
 0xfc8   : > { %11733 = vmatmul.mubr.msk.bf16.gmra.mrb[52].mxu1 %vm3211_vm4, %v4748_v38  ;;  %12923 = vmatmul.mubr.msk.bf16.vlgmr.msra.gmra.mrb[52].mxu0 %vm3211_vm4, %v4748_v38 }
 0xfc9   : > { %12927 = vmatpush3.bf16.xpose.msra.mxu0 %v4953_v42  ;;  %12928 = vmatprep.mubr.msk.bf16.mxu0 %vm15180_vm3, %v15179_v51  ;;  %v13705_v42 = vld [vmem:[%s15806_s5 + $0x1b8] ss:$12 sps:$4 sm:$0xff]  }
 0xfca   : > { %12934 = vmatprep.mubr.msk.bf16.mxu1 %vm15180_vm3, %v15179_v51  ;;  %12938 = vmatprep.subr.bf16.mxu0 %v15179_v51 }
 0xfd0   : > { %12929 = vmatmul.mubr.msk.bf16.vlgmr.msra.gmra.mrb[76].mxu0 %vm3211_vm4, %v16275_v5  ;;  %12935 = vmatmul.mubr.msk.bf16.vlgmr.msra.gmra.mrb[68].mxu1 %vm3211_vm4, %v16282_v40 }
 0xfd1   : > { %12939 = vmatpush3.bf16.msra.mxu0 %v16289_v44  ;;  %12945 = vmatpush3.bf16.msra.mxu1 %v16287_v17 }
 0xfd2   : > { %12940 = vmatprep.mubr.msk.bf16.mxu0 %vm15180_vm3, %v15179_v51  ;;  %12946 = vmatprep.mubr.msk.bf16.mxu1 %vm15180_vm3, %v15179_v51 }
 0xfd3   : > { %12950 = vmatprep.subr.bf16.mxu0 %v13697_v32  ;;  %5265 = vmatprep.subr.bf16.mxu1 %v13700_v23 }
0x10a3   : > { %v4989_v43 = vpop.f32.mrb[76].mxu0  ;;  %v5036_v58 = vpop.f32.mrb[68].mxu1 }
0x10a4   : > { %v4990_v62 = vadd.f32 %v16575_v53, %v4989_v43  ;;  %v12930_v45 = vpop.f32.mrb[77].mxu0  ;;  %v12936_v46 = vpop.f32.mrb[69].mxu1  ;;  %v5037_v24 = vadd.f32 %v16575_v53, %v5036_v58  ;;  %v13704_v58 = vld [vmem:[%s15806_s5 + $0x19c] ss:$12 sps:$4 sm:$0xff]  }
0x10a5   : > { %v4992_v47 = vpop.f32.mrb[78].mxu0  ;;  %v5039_v2 = vpop.f32.mrb[70].mxu1  ;;  %v13709_v45 = vld [vmem:[%s15806_s5 + $0x1d0] ss:$12 sps:$4 sm:$0xff]   ;;  %v13708_v46 = vld [vmem:[%s15806_s5 + $0x1b4] ss:$12 sps:$4 sm:$0xff]  }
0x10a6   : > { %v4993_v52 = vadd.f32 %v16578_v50, %v4992_v47  ;;  %v5040_v3 = vadd.f32 %v16578_v50, %v5039_v2  ;;  %v12931_v56 = vpop.f32.mrb[79].mxu0  ;;  %v12937_v12 = vpop.f32.mrb[71].mxu1  ;;  %v5043_v57 = vsel %vm3306_vm5, %v4990_v62, -inf  ;;  %v5049_v27 = vsel %vm3306_vm5, %v5037_v24, -inf  ;;  %v13706_v47 = vld [vmem:[%s15806_s5 + $0x1b0] ss:$12 sps:$4 sm:$0xff]  }
0x10a7   : > { %5044 = vmax.xlane.f32.xlu1 %v5043_v57  ;;  %v13710_v2 = vld [vmem:[%s15806_s5 + $0x1c8] ss:$12 sps:$4 sm:$0xff]  }
0x10a8   : > { %v5046_v10 = vsel %vm3306_vm5, %v4993_v52, -inf  ;;  %v5052_v35 = vsel %vm3306_vm5, %v5040_v3, -inf }
0x10a9   : > { %5047 = vmax.xlane.f32.xlu0 %v5046_v10 }
0x10ab   : > { %5053 = vmax.xlane.f32.xlu1 %v5052_v35 }
0x10ad   : > { %5050 = vmax.xlane.f32.xlu0 %v5049_v27 }
0x1134   : > { %v5045_v28 = vpop.xlane.xlu1 %5044 }
0x1135   : > { %v5055_v20 = vsub.f32 %v4990_v62, %v5045_v28  ;;  %v13702_v62 = vld [vmem:[%s15806_s5 + $0x198] ss:$12 sps:$4 sm:$0xff]  }
0x1136   : > { %v5048_v15 = vpop.xlane.xlu0 %5047 }
0x1137   : > { %v5059_v54 = vmul.f32 1.442695, %v5055_v20  ;;  %v5056_v21 = vsub.f32 %v4993_v52, %v5048_v15  ;;  %v13712_v52 = vld [vmem:[%s15806_s5 + $0x1cc] ss:$12 sps:$4 sm:$0xff]  }
0x1138   : > { %v5054_v37 = vpop.xlane.xlu1 %5053 }
0x1139   : > { %14617 = vpow2.f32 %v5059_v54  ;;  %v5061_v1 = vmul.f32 1.442695, %v5056_v21  ;;  %v5058_v63 = vsub.f32 %v5040_v3, %v5054_v37 }
0x113a   : > { %v5051_v39 = vpop.xlane.xlu0 %5050 }
0x113b   : > { %14619 = vpow2.f32 %v5061_v1  ;;  %v5065_v59 = vmul.f32 1.442695, %v5058_v63  ;;  %v5057_v60 = vsub.f32 %v5037_v24, %v5051_v39 }
0x113d   : > { %14621 = vpow2.f32 %v5065_v59  ;;  %v5063_v61 = vmul.f32 1.442695, %v5057_v60 }
0x113f   : > { %14623 = vpow2.f32 %v5063_v61 }
0x1143   : > { %v14618_v8 = vpop.eup %14617 }
0x1144   : > { %v5067_v11 = vsel %vm3306_vm5, %v14618_v8, 0.0 }
0x1145   : > { %v14620_v14 = vpop.eup %14619  ;;  %5068 = vadd.xlane.f32.xlu0 %v5067_v11 }
0x1146   : > { %v5070_v29 = vsel %vm3306_vm5, %v14620_v14, 0.0 }
0x1147   : > { %v14622_v48 = vpop.eup %14621  ;;  %5071 = vadd.xlane.f32.xlu1 %v5070_v29 }
0x1148   : > { %v5076_v31 = vsel %vm3306_vm5, %v14622_v48, 0.0 }
0x1149   : > { %v14624_v30 = vpop.eup %14623 }
0x114a   : > { %v5073_v49 = vsel %vm3306_vm5, %v14624_v30, 0.0 }
0x114b   : > { %5077 = vadd.xlane.f32.xlu1 %v5076_v31  ;;  %5074 = vadd.xlane.f32.xlu0 %v5073_v49 }
0x115c   : > { %5380 = vrot.lane.b32.xlu1 %v16275_v5, %s15181_s30 }
0x1160   : > { %5436 = vrot.lane.b32.xlu1 %v16321_v16, %s15181_s30 }
0x1161   : > { %5383 = vrot.lane.b32.xlu0 %v16323_v41, %s15181_s30 }
0x1164   : > { %5433 = vrot.lane.b32.xlu1 %v16282_v40, %s15181_s30 }
0x11d2   : > { %v5069_v19 = vpop.xlane.xlu0 %5068 }
0x11d3   : > { %14625 = vrcp.f32 %v5069_v19 }
0x11d4   : > { %v5072_v4 = vpop.xlane.xlu1 %5071 }
0x11d5   : > { %14627 = vrcp.f32 %v5072_v4 }
0x11d8   : > { %v5078_v34 = vpop.xlane.xlu1 %5077  ;;  %v5075_v5 = vpop.xlane.xlu0 %5074 }
0x11d9   : > { %14629 = vrcp.f32 %v5078_v34 }
0x11da   : > { %14631 = vrcp.f32 %v5075_v5 }
0x11dc   : > { %v5384_v27 = vpop.permute.xlu0 %5383  ;;  %v5381_v54 = vpop.permute.xlu1 %5380 }
0x11dd   : > { %v14626_v16 = vpop.eup %14625  ;;  %v5389_v21 = vsel %vm3211_vm4, %v5384_v27, 0  ;;  %v13718_v27 = vld [vmem:[%s15806_s5 + $0x1fc] ss:$12 sps:$4 sm:$0xff]  }
0x11de   : > { %v5080_v0 = vmul.f32 %v14626_v16, %v14618_v8 }
0x11df   : > { %v14628_v41 = vpop.eup %14627 }
0x11e0   : > { %v5082_v40 = vmul.f32 %v14628_v41, %v14620_v14  ;;  %v5437_v37 = vpop.permute.xlu1 %5436 }
0x11e1   : > { %v5442_v1 = vsel %vm3211_vm4, %v5437_v37, 0 }
0x11e2   : > { %v5087_v6 = vpack.c.bf16 %v5082_v40, %v5080_v0 }
0x11e3   : > { %v14630_v9 = vpop.eup %14629 }
0x11e4   : > { %v14632_v33 = vpop.eup %14631  ;;  %v5086_v36 = vmul.f32 %v14630_v9, %v14622_v48  ;;  %12941 = vmatmul.mubr.msk.bf16.vlgmr.msra.gmra.mrb[80].mxu0 %vm3306_vm5, %v5087_v6  ;;  %v5434_v63 = vpop.permute.xlu1 %5433 }
0x11e5   : > { %v5084_v38 = vmul.f32 %v14632_v33, %v14624_v30  ;;  %12951 = vmatpush3.bf16.msra.mxu0 %v13697_v32 }
0x11e6   : > { %12952 = vmatprep.subr.bf16.mxu0 %v13701_v55 }
0x11e7   : > { %v5088_v43 = vpack.c.bf16 %v5086_v36, %v5084_v38 }
0x11e9   : > { %12947 = vmatmul.mubr.msk.bf16.vlgmr.msra.gmra.mrb[72].mxu1 %vm3306_vm5, %v5088_v43  ;;  %12953 = vmatpush3.bf16.msra.mxu0 %v13701_v55 }
0x11ea   : > { %5266 = vmatpush1.bf16.msra.mxu1 %v13698_v26  ;;  %12954 = vmatprep.subr.bf16.mxu0 %v13705_v42 }
0x11eb   : > { %5267 = vmatprep.subr.bf16.mxu1 %v13704_v58  ;;  %5297 = vmatprep.mubr.bf16.mxu1 %v15178_v25 }
0x11ed   : > { %12955 = vmatpush3.bf16.msra.mxu0 %v13705_v42 }
0x11ee   : > { %5268 = vmatpush1.bf16.msra.mxu1 %v13702_v62  ;;  %12956 = vmatprep.subr.bf16.mxu0 %v13709_v45 }
0x11ef   : > { %5269 = vmatprep.subr.bf16.mxu1 %v13708_v46 }
0x11f1   : > { %12957 = vmatpush3.bf16.msra.mxu0 %v13709_v45 }
0x11f2   : > { %5270 = vmatpush1.bf16.msra.mxu1 %v13706_v47  ;;  %12962 = vmatprep.subr.bf16.mxu0 %v15179_v51 }
0x11f3   : > { %5271 = vmatprep.subr.bf16.mxu1 %v13712_v52 }
0x11f6   : > { %5272 = vmatpush1.bf16.msra.mxu1 %v13710_v2  ;;  %v13715_v2 = vld [vmem:[%s15806_s5 + $0x1e4] ss:$12 sps:$4 sm:$0xff]  }
0x11f7   : > { %12974 = vmatprep.subr.bf16.mxu1 %v15179_v51 }
0x12b7   : > { %v5126_v3 = vpop.f32.mrb[80].mxu0 }
0x12b8   : > { %v12942_v56 = vpop.f32.mrb[81].mxu0 }
0x12b9   : > { %v5129_v12 = vpop.f32.mrb[82].mxu0 }
0x12ba   : > { %v5177_v57 = vpack.c.bf16 %v5129_v12, %v5126_v3  ;;  %v12943_v24 = vpop.f32.mrb[83].mxu0 }
0x12bb   : > { %v13713_v24 = vld [vmem:[%s15806_s5 + $0x1e0] ss:$12 sps:$4 sm:$0xff]  }
0x12bc   : > { %v5170_v10 = vpop.f32.mrb[72].mxu1  ;;  %11752 = vmatmul.mubr.msk.bf16.vlgmr.msra.gmra.mrb[48].mxu1 %vm3211_vm4, %v5177_v57  ;;  %12958 = vmatprep.mubr.msk.bf16.mxu0 %vm3211_vm4, %v5177_v57  ;;  %v13722_v57 = vld [vmem:[%s15806_s5 + $0x1e8] ss:$12 sps:$4 sm:$0xff]  }
0x12bd   : > { %v12948_v35 = vpop.f32.mrb[73].mxu1  ;;  %5307 = vmatprep.mubr.bf16.mxu1 %v15178_v25 }
0x12be   : > { %v5173_v28 = vpop.f32.mrb[74].mxu1 }
0x12bf   : > { %v5178_v20 = vpack.c.bf16 %v5173_v28, %v5170_v10  ;;  %v12949_v15 = vpop.f32.mrb[75].mxu1  ;;  %v13716_v28 = vld [vmem:[%s15806_s5 + $0x1f8] ss:$12 sps:$4 sm:$0xff]  }
0x12c1   : > { %12959 = vmatmul.mubr.msk.bf16.vlgmr.msra.gmra.mrb[52].mxu0 %vm3211_vm4, %v5178_v20 }
0x12c2   : > { %12963 = vmatpush3.bf16.xpose.msra.mxu0 %v5389_v21  ;;  %12964 = vmatprep.mubr.msk.bf16.mxu0 %vm15180_vm3, %v15179_v51  ;;  %v13719_v21 = vld [vmem:[%s15806_s5 + $0x210] ss:$12 sps:$4 sm:$0xff]  }
0x12c3   : > { %12968 = vmatprep.subr.bf16.mxu0 %v15179_v51 }
0x12c4   : > { %11753 = vmatmul.mubr.msk.bf16.gmra.mrb[52].mxu1 %vm3211_vm4, %v5178_v20  ;;  %v13721_v20 = vld [vmem:[%s15806_s5 + $0x214] ss:$12 sps:$4 sm:$0xff]  }
0x12c5   : > { %12976 = vmatprep.mubr.msk.bf16.mxu1 %vm15180_vm3, %v15179_v51 }
0x12c9   : > { %12965 = vmatmul.mubr.msk.bf16.vlgmr.msra.gmra.mrb[84].mxu0 %vm3211_vm4, %v5381_v54 }
0x12ca   : > { %12969 = vmatpush3.bf16.xpose.msra.mxu0 %v5442_v1  ;;  %12970 = vmatprep.mubr.msk.bf16.mxu0 %vm15180_vm3, %v15179_v51 }
0x12cb   : > { %12980 = vmatprep.subr.bf16.mxu0 %v15179_v51 }
0x12d1   : > { %12971 = vmatmul.mubr.msk.bf16.vlgmr.msra.gmra.mrb[88].mxu0 %vm3211_vm4, %v5434_v63 }
0x12d2   : > { %12982 = vmatprep.mubr.msk.bf16.mxu0 %vm15180_vm3, %v15179_v51 }
0x139c   : > { %v5425_v39 = vpop.f32.mrb[84].mxu0 }
0x139d   : > { %v5426_v59 = vadd.f32 %v16575_v53, %v5425_v39  ;;  %v12966_v60 = vpop.f32.mrb[85].mxu0  ;;  %v13725_v39 = vld [vmem:[%s15806_s5 + $0x22c] ss:$12 sps:$4 sm:$0xff]  }
0x139e   : > { %v5428_v61 = vpop.f32.mrb[86].mxu0  ;;  %v13726_v60 = vld [vmem:[%s15806_s5 + $0x200] ss:$12 sps:$4 sm:$0xff]  }
0x139f   : > { %v5429_v8 = vadd.f32 %v16578_v50, %v5428_v61  ;;  %v12967_v11 = vpop.f32.mrb[87].mxu0  ;;  %v5485_v14 = vsel %vm3306_vm5, %v5426_v59, -inf  ;;  %v13727_v61 = vld [vmem:[%s15806_s5 + $0x218] ss:$12 sps:$4 sm:$0xff]  }
0x13a0   : > { %5486 = vmax.xlane.f32.xlu0 %v5485_v14 }
0x13a1   : > { %v5488_v29 = vsel %vm3306_vm5, %v5429_v8, -inf }
0x13a2   : > { %5489 = vmax.xlane.f32.xlu1 %v5488_v29 }
0x13a4   : > { %v5478_v48 = vpop.f32.mrb[88].mxu0 }
0x13a5   : > { %v5479_v30 = vadd.f32 %v16575_v53, %v5478_v48  ;;  %v12972_v31 = vpop.f32.mrb[89].mxu0 }
0x13a6   : > { %v5481_v49 = vpop.f32.mrb[90].mxu0 }
0x13a7   : > { %v5482_v51 = vadd.f32 %v16578_v50, %v5481_v49  ;;  %v12973_v32 = vpop.f32.mrb[91].mxu0  ;;  %v5491_v23 = vsel %vm3306_vm5, %v5479_v30, -inf }
0x13a8   : > { %5492 = vmax.xlane.f32.xlu0 %v5491_v23 }
0x13a9   : > { %v5494_v19 = vsel %vm3306_vm5, %v5482_v51, -inf }
0x13ac   : > { %5495 = vmax.xlane.f32.xlu0 %v5494_v19 }
0x142d   : > { %v5487_v4 = vpop.xlane.xlu0 %5486 }
0x142e   : > { %v5497_v34 = vsub.f32 %v5426_v59, %v5487_v4  ;;  %v13723_v59 = vld [vmem:[%s15806_s5 + $0x228] ss:$12 sps:$4 sm:$0xff]  }
0x142f   : > { %v5490_v5 = vpop.xlane.xlu1 %5489 }
0x1430   : > { %v5501_v16 = vmul.f32 1.442695, %v5497_v34  ;;  %v5498_v41 = vsub.f32 %v5429_v8, %v5490_v5  ;;  %v13728_v8 = vld [vmem:[%s15806_s5 + $0x230] ss:$12 sps:$4 sm:$0xff]   ;;  %v5841_v34 = vld [vmem:[%s783_s27] sm:$0x7] }
0x1432   : > { %14633 = vpow2.f32 %v5501_v16  ;;  %v5503_v0 = vmul.f32 1.442695, %v5498_v41  ;;  %v14659_v41 = vld [vmem:[#allocation26] sm:$0xff] }
0x1434   : > { %14635 = vpow2.f32 %v5503_v0 }
0x1435   : > { %v5493_v53 = vpop.xlane.xlu0 %5492 }
0x1436   : > { %v5499_v40 = vsub.f32 %v5479_v30, %v5493_v53  ;;  %v5846_v53 = vrot.slane %v5841_v34, %v15991_v22 }
0x1438   : > { %v5505_v6 = vmul.f32 1.442695, %v5499_v40  ;;  %v14660_v40 = vld [vmem:[#allocation26 + $0x8] sm:$0xff] }
0x1439   : > { %v5496_v55 = vpop.xlane.xlu0 %5495 }
0x143a   : > { %14637 = vpow2.f32 %v5505_v6  ;;  %v5500_v50 = vsub.f32 %v5482_v51, %v5496_v55  ;;  %v5850_v55 = vrot.slane %v5841_v34, %v15985_v13 }
0x143c   : > { %v14634_v9 = vpop.eup %14633  ;;  %v5507_v33 = vmul.f32 1.442695, %v5500_v50  ;;  %v14661_v50 = vld [vmem:[#allocation26 + $0x18] sm:$0xff] }
0x143d   : > { %v5509_v36 = vsel %vm3306_vm5, %v14634_v9, 0.0 }
0x143e   : > { %v14636_v38 = vpop.eup %14635  ;;  %14639 = vpow2.f32 %v5507_v33  ;;  %5510 = vadd.xlane.f32.xlu0 %v5509_v36  ;;  %v14662_v33 = vld [vmem:[#allocation26 + $0x20] sm:$0xff] }
0x143f   : > { %v5512_v26 = vsel %vm3306_vm5, %v14636_v38, 0.0 }
0x1440   : > { %5513 = vadd.xlane.f32.xlu1 %v5512_v26 }
0x1444   : > { %v14638_v42 = vpop.eup %14637 }
0x1445   : > { %v5515_v43 = vsel %vm3306_vm5, %v14638_v42, 0.0 }
0x1446   : > { %5516 = vadd.xlane.f32.xlu0 %v5515_v43 }
0x1448   : > { %v14640_v58 = vpop.eup %14639 }
0x1449   : > { %v5518_v62 = vsel %vm3306_vm5, %v14640_v58, 0.0 }
0x144a   : > { %5519 = vadd.xlane.f32.xlu1 %v5518_v62 }
0x145b   : > { %5580 = vrot.lane.b32.xlu1 %v16287_v17, %s15181_s30 }
0x145c   : > { %5532 = vrot.lane.b32.xlu0 %v16289_v44, %s15181_s30 }
0x14cb   : > { %v5511_v45 = vpop.xlane.xlu0 %5510 }
0x14cc   : > { %14641 = vrcp.f32 %v5511_v45 }
0x14cd   : > { %v5514_v46 = vpop.xlane.xlu1 %5513 }
0x14ce   : > { %14643 = vrcp.f32 %v5514_v46  ;;  %v14663_v46 = vld [vmem:[#allocation26 + $0x30] sm:$0xff] }
0x14d3   : > { %v5517_v47 = vpop.xlane.xlu0 %5516 }
0x14d4   : > { %14645 = vrcp.f32 %v5517_v47 }
0x14d6   : > { %v14642_v52 = vpop.eup %14641 }
0x14d7   : > { %v5520_v3 = vpop.xlane.xlu1 %5519  ;;  %v5533_v56 = vpop.permute.xlu0 %5532  ;;  %v5522_v17 = vmul.f32 %v14642_v52, %v14634_v9 }
0x14d8   : > { %v14644_v12 = vpop.eup %14643  ;;  %14647 = vrcp.f32 %v5520_v3  ;;  %12975 = vmatpush3.bf16.msra.mxu1 %v5533_v56  ;;  %v14664_v3 = vld [vmem:[#allocation26 + $0x38] sm:$0xff] }
0x14d9   : > { %v5524_v44 = vmul.f32 %v14644_v12, %v14636_v38  ;;  %5715 = vmatprep.subr.bf16.mxu1 %v13715_v2  ;;  %v14665_v12 = vld [vmem:[#allocation26 + $0x10] sm:$0xff] }
0x14db   : > { %v5529_v10 = vpack.c.bf16 %v5524_v44, %v5522_v17  ;;  %v5581_v35 = vpop.permute.xlu1 %5580 }
0x14dc   : > { %12981 = vmatpush3.bf16.msra.mxu0 %v5581_v35 }
0x14dd   : > { %12977 = vmatmul.mubr.msk.bf16.vlgmr.msra.gmra.mrb[76].mxu1 %vm3306_vm5, %v5529_v10  ;;  %12986 = vmatprep.subr.bf16.mxu0 %v13722_v57  ;;  %v14666_v10 = vld [vmem:[#allocation26 + $0x48] sm:$0xff] }
0x14de   : > { %5716 = vmatpush1.bf16.msra.mxu1 %v13713_v24  ;;  %5747 = vmatprep.mubr.bf16.mxu1 %v15178_v25  ;;  %v14646_v15 = vpop.eup %14645 }
0x14df   : > { %5717 = vmatprep.subr.bf16.mxu1 %v13718_v27  ;;  %v5526_v37 = vmul.f32 %v14646_v15, %v14638_v42  ;;  %v14667_v27 = vld [vmem:[#allocation26 + $0x58] sm:$0xff] }
0x14e2   : > { %v14648_v54 = vpop.eup %14647  ;;  %5718 = vmatpush1.bf16.msra.mxu1 %v13716_v28 }
0x14e3   : > { %v5528_v1 = vmul.f32 %v14648_v54, %v14640_v58  ;;  %5719 = vmatprep.subr.bf16.mxu1 %v13721_v20  ;;  %v5854_v58 = vrot.slane %v5841_v34, %v15988_v18  ;;  %v13731_v34 = vld [vmem:[%s15823_s1 + $0x4] ss:$48 sps:$4 sm:$0xff]  }
0x14e5   : > { %v5530_v63 = vpack.c.bf16 %v5528_v1, %v5526_v37  ;;  %v14668_v1 = vld [vmem:[#allocation26 + $0x50] sm:$0xff] }
0x14e6   : > { %5720 = vmatpush1.bf16.msra.mxu1 %v13719_v21 }
0x14e7   : > { %12983 = vmatmul.mubr.msk.bf16.vlgmr.msra.gmra.mrb[92].mxu0 %vm3306_vm5, %v5530_v63  ;;  %5721 = vmatprep.subr.bf16.mxu1 %v13725_v39  ;;  %v14669_v39 = vld [vmem:[#allocation26 + $0x28] sm:$0xff] }
0x14e8   : > { %12987 = vmatpush3.bf16.msra.mxu0 %v13722_v57 }
0x14e9   : > { %12988 = vmatprep.subr.bf16.mxu0 %v13726_v60 }
0x14ea   : > { %5722 = vmatpush1.bf16.msra.mxu1 %v13723_v59 }
0x14eb   : > { %7810 = vmatprep.subr.bf16.mxu1 %v13731_v34 }
0x14ec   : > { %12989 = vmatpush3.bf16.msra.mxu0 %v13726_v60 }
0x14ed   : > { %12990 = vmatprep.subr.bf16.mxu0 %v13727_v61 }
0x14f0   : > { %12991 = vmatpush3.bf16.msra.mxu0 %v13727_v61 }
0x14f1   : > { %12992 = vmatprep.subr.bf16.mxu0 %v13728_v8 }
0x14f4   : > { %12993 = vmatpush3.bf16.msra.mxu0 %v13728_v8  ;;  %v14670_v8 = vld [vmem:[#allocation26 + $0x40] sm:$0xff] }
0x15b0   : > { %v5572_v11 = vpop.f32.mrb[76].mxu1 }
0x15b1   : > { %v12978_v14 = vpop.f32.mrb[77].mxu1 }
0x15b2   : > { %v5575_v29 = vpop.f32.mrb[78].mxu1 }
0x15b3   : > { %v5627_v48 = vpack.c.bf16 %v5575_v29, %v5572_v11  ;;  %v12979_v30 = vpop.f32.mrb[79].mxu1 }
0x15b5   : > { %11772 = vmatmul.mubr.msk.bf16.vlgmr.msra.gmra.mrb[48].mxu1 %vm3211_vm4, %v5627_v48  ;;  %12994 = vmatprep.mubr.msk.bf16.mxu0 %vm3211_vm4, %v5627_v48 }
0x15b6   : > { %5757 = vmatprep.mubr.bf16.mxu1 %v15178_v25 }
0x15ba   : > { %v5620_v31 = vpop.f32.mrb[92].mxu0 }
0x15bb   : > { %v12984_v49 = vpop.f32.mrb[93].mxu0 }
0x15bc   : > { %v5623_v51 = vpop.f32.mrb[94].mxu0 }
0x15bd   : > { %v5628_v32 = vpack.c.bf16 %v5623_v51, %v5620_v31  ;;  %v12985_v23 = vpop.f32.mrb[95].mxu0 }
0x15bf   : > { %11773 = vmatmul.mubr.msk.bf16.gmra.mrb[52].mxu1 %vm3211_vm4, %v5628_v32  ;;  %12995 = vmatmul.mubr.msk.bf16.vlgmr.msra.gmra.mrb[52].mxu0 %vm3211_vm4, %v5628_v32 }
0x1688   : > { %v5749_v19 = vpop.f32.mrb[48].mxu1 }
0x1689   : > { %v5751_v4 = vpop.f32.mrb[49].mxu1  ;;  %v5829_v0 = vadd.f32 %v14659_v41, %v5749_v19  ;;  %v13737_v41 = vld [vmem:[%s15823_s1 + $0x64] ss:$48 sps:$4 sm:$0xff]  }
0x168a   : > { %v5753_v5 = vpop.f32.mrb[50].mxu1  ;;  %v5830_v6 = vadd.f32 %v14660_v40, %v5751_v4  ;;  %v13729_v4 = vld [vmem:[%s15823_s1] ss:$48 sps:$4 sm:$0xff]   ;;  %v13738_v40 = vld [vmem:[%s15823_s1 + $0x68] ss:$48 sps:$4 sm:$0xff]  }
0x168b   : > { %v5755_v16 = vpop.f32.mrb[51].mxu1  ;;  %v5832_v9 = vadd.f32 %v14661_v50, %v5753_v5  ;;  %v16675_v38 = vadd.f32 %v5846_v53, %v5829_v0  ;;  %v13732_v5 = vld [vmem:[%s15823_s1 + $0x8] ss:$48 sps:$4 sm:$0xff]   ;;  %v13740_v0 = vld [vmem:[%s15823_s1 + $0x6c] ss:$48 sps:$4 sm:$0xff]   ;;  %7811 = vmatpush1.bf16.msra.mxu1 %v13729_v4 }
0x168c   : > { %v5833_v36 = vadd.f32 %v14662_v33, %v5755_v16  ;;  %v16677_v26 = vadd.f32 %v5850_v55, %v5830_v6  ;;  %v13734_v16 = vld [vmem:[%s15823_s1 + $0xc] ss:$48 sps:$4 sm:$0xff]   ;;  %7812 = vmatprep.subr.bf16.mxu1 %v13737_v41  ;;  %v13743_v6 = vld [vmem:[%s15823_s1 + $0xc4] ss:$48 sps:$4 sm:$0xff]   ;;  %v13741_v50 = vld [vmem:[%s15823_s1 + $0xc0] ss:$48 sps:$4 sm:$0xff]  }
0x168d   : > { %v16680_v62 = vadd.f32 %v5846_v53, %v5832_v9  ;;  %7916 = vmatprep.subr.bf16.mxu0 %v13734_v16  ;;  %v13744_v9 = vld [vmem:[%s15823_s1 + $0xc8] ss:$48 sps:$4 sm:$0xff]   ;;  %v13749_v33 = vld [vmem:[%s15823_s1 + $0x124] ss:$48 sps:$4 sm:$0xff]  }
0x168e   : > { %v16682_v45 = vadd.f32 %v5850_v55, %v5833_v36  ;;  %v5872_v54 = vadd.f32 %v16677_v26, %v16675_v38  ;;  %7917 = vmatpush1.bf16.msra.mxu0 %v13732_v5  ;;  %v13752_v36 = vld [vmem:[%s15823_s1 + $0x12c] ss:$48 sps:$4 sm:$0xff]  }
0x168f   : > { %7918 = vmatprep.subr.bf16.mxu0 %v13740_v0 }
0x1690   : > { %v5876_v61 = vadd.f32 %v16682_v45, %v16680_v62 }
0x1692   : > { %v5759_v42 = vpop.f32.mrb[52].mxu1  ;;  %v12996_v43 = vpop.f32.mrb[52].mxu0  ;;  %7919 = vmatpush1.bf16.msra.mxu0 %v13738_v40 }
0x1693   : > { %v5835_v47 = vadd.f32 %v14663_v46, %v5759_v42  ;;  %v5761_v2 = vpop.f32.mrb[53].mxu1  ;;  %v5802_v52 = vpop.f32.mrb[53].mxu0  ;;  %v5837_v11 = vadd.f32 %v14670_v8, %v12996_v43  ;;  %v13747_v42 = vld [vmem:[%s15823_s1 + $0x120] ss:$48 sps:$4 sm:$0xff]   ;;  %v13750_v43 = vld [vmem:[%s15823_s1 + $0x128] ss:$48 sps:$4 sm:$0xff]  }
0x1694   : > { %v5836_v56 = vadd.f32 %v14664_v3, %v5761_v2  ;;  %v5831_v17 = vadd.f32 %v14665_v12, %v5802_v52  ;;  %v5763_v44 = vpop.f32.mrb[54].mxu1  ;;  %v12997_v57 = vpop.f32.mrb[54].mxu0  ;;  %v13758_v46 = vld [vmem:[%s15823_s1 + $0x18c] ss:$48 sps:$4 sm:$0xff]   ;;  %v13756_v2 = vld [vmem:[%s15823_s1 + $0x188] ss:$48 sps:$4 sm:$0xff]  }
0x1695   : > { %v16684_v24 = vadd.f32 %v5846_v53, %v5835_v47  ;;  %v5838_v35 = vadd.f32 %v14666_v10, %v5763_v44  ;;  %v5840_v28 = vadd.f32 %v14667_v27, %v12997_v57  ;;  %v5765_v20 = vpop.f32.mrb[55].mxu1  ;;  %v5805_v15 = vpop.f32.mrb[55].mxu0  ;;  %v16708_v32 = vadd.f32 %v5854_v58, %v5837_v11  ;;  %v13753_v47 = vld [vmem:[%s15823_s1 + $0x180] ss:$48 sps:$4 sm:$0xff]   ;;  %v13761_v52 = vld [vmem:[%s15823_s1 + $0x1e4] ss:$48 sps:$4 sm:$0xff]  }
0x1696   : > { %v16688_v21 = vadd.f32 %v5850_v55, %v5836_v56  ;;  %v16690_v37 = vadd.f32 %v5854_v58, %v5831_v17  ;;  %v5839_v63 = vadd.f32 %v14668_v1, %v5765_v20  ;;  %v5834_v59 = vadd.f32 %v14669_v39, %v5805_v15  ;;  %v13764_v3 = vld [vmem:[%s15823_s1 + $0x1ec] ss:$48 sps:$4 sm:$0xff]   ;;  %v13759_v56 = vld [vmem:[%s15823_s1 + $0x1e0] ss:$48 sps:$4 sm:$0xff]   ;;  %v13762_v12 = vld [vmem:[%s15823_s1 + $0x1e8] ss:$48 sps:$4 sm:$0xff]  }
0x1697   : > { %v16692_v60 = vadd.f32 %v5846_v53, %v5838_v35  ;;  %v16701_v30 = vadd.f32 %v5854_v58, %v5840_v28  ;;  %v13735_v53 = vld [vmem:[%s15823_s1 + $0x60] ss:$48 sps:$4 sm:$0xff]   ;;  %v13767_v17 = vld [vmem:[%s15823_s1 + $0x244] ss:$48 sps:$4 sm:$0xff]   ;;  %v13770_v44 = vld [vmem:[%s15823_s1 + $0x24c] ss:$48 sps:$4 sm:$0xff]  }
0x1698   : > { %v16696_v14 = vadd.f32 %v5850_v55, %v5839_v63  ;;  %v16698_v29 = vadd.f32 %v5854_v58, %v5834_v59  ;;  %v5873_v48 = vadd.f32 %v5872_v54, %v16690_v37  ;;  %v5880_v51 = vadd.f32 %v16688_v21, %v16684_v24  ;;  %v13746_v55 = vld [vmem:[%s15823_s1 + $0xcc] ss:$48 sps:$4 sm:$0xff]   ;;  %7813 = vmatpush1.bf16.msra.mxu1 %v13735_v53  ;;  %v13755_v58 = vld [vmem:[%s15823_s1 + $0x184] ss:$48 sps:$4 sm:$0xff]   ;;  %v13765_v57 = vld [vmem:[%s15823_s1 + $0x240] ss:$48 sps:$4 sm:$0xff]  }
0x1699   : > { %7814 = vmatprep.subr.bf16.mxu1 %v13743_v6  ;;  %7920 = vmatprep.subr.bf16.mxu0 %v13746_v55  ;;  %v13768_v10 = vld [vmem:[%s15823_s1 + $0x248] ss:$48 sps:$4 sm:$0xff]   ;;  %v13773_v35 = vld [vmem:[%s15823_s1 + $0x2a4] ss:$48 sps:$4 sm:$0xff]   ;;  %v13776_v27 = vld [vmem:[%s15823_s1 + $0x2ac] ss:$48 sps:$4 sm:$0xff]  }
0x169a   : > { %5874 = vadd.xlane.f32.xlu1 %v5873_v48  ;;  %v5877_v31 = vadd.f32 %v5876_v61, %v16698_v29  ;;  %v5884_v49 = vadd.f32 %v16696_v14, %v16692_v60  ;;  %v5881_v19 = vadd.f32 %v5880_v51, %v16708_v32  ;;  %7921 = vmatpush1.bf16.msra.mxu0 %v13744_v9  ;;  %v13771_v28 = vld [vmem:[%s15823_s1 + $0x2a0] ss:$48 sps:$4 sm:$0xff]   ;;  %v13774_v20 = vld [vmem:[%s15823_s1 + $0x2a8] ss:$48 sps:$4 sm:$0xff]   ;;  %v13779_v15 = vld [vmem:[%s15823_s1 + $0x304] ss:$48 sps:$4 sm:$0xff]  }
0x169b   : > { %7922 = vmatprep.subr.bf16.mxu0 %v13752_v36  ;;  %v13782_v54 = vld [vmem:[%s15823_s1 + $0x30c] ss:$48 sps:$4 sm:$0xff]   ;;  %v13777_v1 = vld [vmem:[%s15823_s1 + $0x300] ss:$48 sps:$4 sm:$0xff]   ;;  %v13780_v63 = vld [vmem:[%s15823_s1 + $0x308] ss:$48 sps:$4 sm:$0xff]  }
0x169c   : > { %5878 = vadd.xlane.f32.xlu0 %v5877_v31  ;;  %v5885_v23 = vadd.f32 %v5884_v49, %v16701_v30  ;;  %7815 = vmatpush1.bf16.msra.mxu1 %v13741_v50  ;;  %v13785_v39 = vld [vmem:[%s15823_s1 + $0x364] ss:$48 sps:$4 sm:$0xff]   ;;  %v13788_v59 = vld [vmem:[%s15823_s1 + $0x36c] ss:$48 sps:$4 sm:$0xff]   ;;  %v13783_v61 = vld [vmem:[%s15823_s1 + $0x360] ss:$48 sps:$4 sm:$0xff]  }
0x169d   : > { %7816 = vmatprep.subr.bf16.mxu1 %v13749_v33  ;;  %v13786_v8 = vld [vmem:[%s15823_s1 + $0x368] ss:$48 sps:$4 sm:$0xff]  }
0x169e   : > { %5886 = vadd.xlane.f32.xlu1 %v5885_v23  ;;  %7923 = vmatpush1.bf16.msra.mxu0 %v13750_v43 }
0x169f   : > { %7924 = vmatprep.subr.bf16.mxu0 %v13758_v46 }
0x16a0   : > { %5882 = vadd.xlane.f32.xlu0 %v5881_v19  ;;  %7817 = vmatpush1.bf16.msra.mxu1 %v13747_v42 }
0x16a1   : > { %7818 = vmatprep.subr.bf16.mxu1 %v13755_v58 }
0x16a2   : > { %7925 = vmatpush1.bf16.msra.mxu0 %v13756_v2 }
0x16a3   : > { %7926 = vmatprep.subr.bf16.mxu0 %v13764_v3 }
0x16a4   : > { %7819 = vmatpush1.bf16.msra.mxu1 %v13753_v47 }
0x16a5   : > { %7820 = vmatprep.subr.bf16.mxu1 %v13761_v52 }
0x16a6   : > { %7927 = vmatpush1.bf16.msra.mxu0 %v13762_v12 }
0x16a7   : > { %7928 = vmatprep.subr.bf16.mxu0 %v13770_v44 }
0x16a8   : > { %7821 = vmatpush1.bf16.msra.mxu1 %v13759_v56 }
0x16a9   : > { %7822 = vmatprep.subr.bf16.mxu1 %v13767_v17 }
0x16aa   : > { %7929 = vmatpush1.bf16.msra.mxu0 %v13768_v10 }
0x16ab   : > { %7930 = vmatprep.subr.bf16.mxu0 %v13776_v27 }
0x16ac   : > { %7823 = vmatpush1.bf16.msra.mxu1 %v13765_v57 }
0x16ad   : > { %7824 = vmatprep.subr.bf16.mxu1 %v13773_v35 }
0x16ae   : > { %7931 = vmatpush1.bf16.msra.mxu0 %v13774_v20 }
0x16af   : > { %7932 = vmatprep.subr.bf16.mxu0 %v13782_v54  ;;  %v13791_v54 = vld [vmem:[%s15823_s1 + $0x3c4] ss:$48 sps:$4 sm:$0xff]  }
0x16b0   : > { %7825 = vmatpush1.bf16.msra.mxu1 %v13771_v28 }
0x16b1   : > { %7826 = vmatprep.subr.bf16.mxu1 %v13779_v15 }
0x16b2   : > { %7933 = vmatpush1.bf16.msra.mxu0 %v13780_v63  ;;  %v13789_v63 = vld [vmem:[%s15823_s1 + $0x3c0] ss:$48 sps:$4 sm:$0xff]  }
0x16b3   : > { %7934 = vmatprep.subr.bf16.mxu0 %v13788_v59  ;;  %v13797_v59 = vld [vmem:[%s15823_s1 + $0x424] ss:$48 sps:$4 sm:$0xff]  }
0x16b4   : > { %7827 = vmatpush1.bf16.msra.mxu1 %v13777_v1  ;;  %v13794_v1 = vld [vmem:[%s15823_s1 + $0x3cc] ss:$48 sps:$4 sm:$0xff]  }
0x16b5   : > { %7828 = vmatprep.subr.bf16.mxu1 %v13785_v39  ;;  %v13792_v39 = vld [vmem:[%s15823_s1 + $0x3c8] ss:$48 sps:$4 sm:$0xff]  }
0x16b6   : > { %7935 = vmatpush1.bf16.msra.mxu0 %v13786_v8  ;;  %v13795_v8 = vld [vmem:[%s15823_s1 + $0x420] ss:$48 sps:$4 sm:$0xff]  }
0x16b7   : > { %7936 = vmatprep.subr.bf16.mxu0 %v13794_v1 }
0x16b8   : > { %7829 = vmatpush1.bf16.msra.mxu1 %v13783_v61  ;;  %v13800_v61 = vld [vmem:[%s15823_s1 + $0x42c] ss:$48 sps:$4 sm:$0xff]  }
0x16b9   : > { %7830 = vmatprep.subr.bf16.mxu1 %v13791_v54 }
0x16ba   : > { %7937 = vmatpush1.bf16.msra.mxu0 %v13792_v39  ;;  %v16840_v39 = vld [vmem:[%s792_s14] sm:$0x7] }
0x16bb   : > { %7938 = vmatprep.subr.bf16.mxu0 %v13800_v61  ;;  %v5964_v61 = vrot.slane %v16840_v39, %v15985_v13 }
0x16bc   : > { %7831 = vmatpush1.bf16.msra.mxu1 %v13789_v63 }
0x16bd   : > { %7832 = vmatprep.subr.bf16.mxu1 %v13797_v59  ;;  %v16844_v59 = vld [vmem:[%s801_s3] sm:$0x7] }
0x16c0   : > { %7833 = vmatpush1.bf16.msra.mxu1 %v13795_v8  ;;  %v5960_v8 = vrot.slane %v16840_v39, %v15991_v22 }
0x1727   : > { %v5875_v11 = vpop.xlane.xlu1 %5874 }
0x1728   : > { %v5888_v48 = vmul.f32 0.0026041667, %v5875_v11  ;;  %v13798_v11 = vld [vmem:[%s15823_s1 + $0x428] ss:$48 sps:$4 sm:$0xff]  }
0x1729   : > { %v5879_v31 = vpop.xlane.xlu0 %5878  ;;  %7939 = vmatpush1.bf16.msra.mxu0 %v13798_v11 }
0x172a   : > { %v16753_v49 = vsub.f32 %v16675_v38, %v5888_v48  ;;  %v16756_v51 = vsub.f32 %v16677_v26, %v5888_v48  ;;  %v16759_v23 = vsub.f32 %v16690_v37, %v5888_v48  ;;  %v5889_v19 = vmul.f32 0.0026041667, %v5879_v31  ;;  %v13803_v48 = vld [vmem:[%s15823_s1 + $0x484] ss:$48 sps:$4 sm:$0xff]   ;;  %v13806_v31 = vld [vmem:[%s15823_s1 + $0x48c] ss:$48 sps:$4 sm:$0xff]  }
0x172b   : > { %v5887_v4 = vpop.xlane.xlu1 %5886  ;;  %7834 = vmatprep.subr.bf16.mxu1 %v13803_v48  ;;  %7940 = vmatprep.subr.bf16.mxu0 %v13806_v31 }
0x172c   : > { %v16762_v34 = vsub.f32 %v16680_v62, %v5889_v19  ;;  %v16765_v5 = vsub.f32 %v16682_v45, %v5889_v19  ;;  %v5891_v16 = vmul.f32 0.0026041667, %v5887_v4  ;;  %v16768_v41 = vsub.f32 %v16698_v29, %v5889_v19  ;;  %v13801_v19 = vld [vmem:[%s15823_s1 + $0x480] ss:$48 sps:$4 sm:$0xff]   ;;  %v13804_v4 = vld [vmem:[%s15823_s1 + $0x488] ss:$48 sps:$4 sm:$0xff]  }
0x172d   : > { %v5883_v0 = vpop.xlane.xlu0 %5882  ;;  %v5904_v53 = vmul.f32 %v16753_v49, %v16753_v49  ;;  %v5905_v40 = vmul.f32 %v16756_v51, %v16756_v51  ;;  %v5906_v9 = vmul.f32 %v16759_v23, %v16759_v23  ;;  %7835 = vmatpush1.bf16.msra.mxu1 %v13801_v19  ;;  %7941 = vmatpush1.bf16.msra.mxu0 %v13804_v4 }
0x172e   : > { %v16775_v6 = vsub.f32 %v16692_v60, %v5891_v16  ;;  %v16778_v55 = vsub.f32 %v16696_v14, %v5891_v16  ;;  %v5890_v50 = vmul.f32 0.0026041667, %v5883_v0  ;;  %v16783_v33 = vsub.f32 %v16701_v30, %v5891_v16  ;;  %v13807_v16 = vld [vmem:[%s15823_s1 + $0x4e0] ss:$48 sps:$4 sm:$0xff]   ;;  %v13809_v0 = vld [vmem:[%s15823_s1 + $0x4e4] ss:$48 sps:$4 sm:$0xff]  }
0x172f   : > { %v5916_v36 = vadd.f32 %v5905_v40, %v5904_v53  ;;  %v5907_v42 = vmul.f32 %v16762_v34, %v16762_v34  ;;  %v5908_v43 = vmul.f32 %v16765_v5, %v16765_v5  ;;  %v5909_v3 = vmul.f32 %v16768_v41, %v16768_v41  ;;  %v13810_v53 = vld [vmem:[%s15823_s1 + $0x4e8] ss:$48 sps:$4 sm:$0xff]   ;;  %v13812_v40 = vld [vmem:[%s15823_s1 + $0x4ec] ss:$48 sps:$4 sm:$0xff]   ;;  %7836 = vmatprep.subr.bf16.mxu1 %v13809_v0 }
0x1730   : > { %v16790_v58 = vsub.f32 %v16684_v24, %v5890_v50  ;;  %v16793_v46 = vsub.f32 %v16688_v21, %v5890_v50  ;;  %v16796_v47 = vsub.f32 %v16708_v32, %v5890_v50  ;;  %v5913_v2 = vmul.f32 %v16775_v6, %v16775_v6  ;;  %v13815_v50 = vld [vmem:[%s15823_s1 + $0x544] ss:$48 sps:$4 sm:$0xff]   ;;  %7942 = vmatprep.subr.bf16.mxu0 %v13812_v40 }
0x1731   : > { %v5917_v52 = vadd.f32 %v5916_v36, %v5906_v9  ;;  %v5920_v56 = vadd.f32 %v5908_v43, %v5907_v42  ;;  %v5914_v12 = vmul.f32 %v16778_v55, %v16778_v55  ;;  %v5915_v28 = vmul.f32 %v16783_v33, %v16783_v33  ;;  %v13818_v9 = vld [vmem:[%s15823_s1 + $0x54c] ss:$48 sps:$4 sm:$0xff]   ;;  %7837 = vmatpush1.bf16.msra.mxu1 %v13807_v16  ;;  %v13813_v36 = vld [vmem:[%s15823_s1 + $0x540] ss:$48 sps:$4 sm:$0xff]   ;;  %v13816_v42 = vld [vmem:[%s15823_s1 + $0x548] ss:$48 sps:$4 sm:$0xff]  }
0x1732   : > { %v5910_v17 = vmul.f32 %v16790_v58, %v16790_v58  ;;  %v5911_v44 = vmul.f32 %v16793_v46, %v16793_v46  ;;  %v5912_v35 = vmul.f32 %v16796_v47, %v16796_v47  ;;  %7943 = vmatpush1.bf16.msra.mxu0 %v13810_v53  ;;  %7838 = vmatprep.subr.bf16.mxu1 %v13815_v50  ;;  %v13821_v43 = vld [vmem:[%s15823_s1 + $0x5a4] ss:$48 sps:$4 sm:$0xff]  }
0x1733   : > { %5918 = vadd.xlane.f32.xlu0 %v5917_v52  ;;  %v5921_v57 = vadd.f32 %v5920_v56, %v5909_v3  ;;  %v5928_v10 = vadd.f32 %v5914_v12, %v5913_v2  ;;  %7944 = vmatprep.subr.bf16.mxu0 %v13818_v9  ;;  %v13824_v2 = vld [vmem:[%s15823_s1 + $0x5ac] ss:$48 sps:$4 sm:$0xff]   ;;  %v13819_v52 = vld [vmem:[%s15823_s1 + $0x5a0] ss:$48 sps:$4 sm:$0xff]   ;;  %v13822_v3 = vld [vmem:[%s15823_s1 + $0x5a8] ss:$48 sps:$4 sm:$0xff]   ;;  %v5992_v4 = vrot.slane %v16844_v59, %v15985_v13 }
0x1734   : > { %v5924_v27 = vadd.f32 %v5911_v44, %v5910_v17  ;;  %v13827_v56 = vld [vmem:[%s15823_s1 + $0x604] ss:$48 sps:$4 sm:$0xff]   ;;  %v13830_v12 = vld [vmem:[%s15823_s1 + $0x60c] ss:$48 sps:$4 sm:$0xff]   ;;  %v5988_v16 = vrot.slane %v16844_v59, %v15991_v22 }
0x1735   : > { %5922 = vadd.xlane.f32.xlu1 %v5921_v57  ;;  %v5929_v15 = vadd.f32 %v5928_v10, %v5915_v28  ;;  %7839 = vmatpush1.bf16.msra.mxu1 %v13813_v36 }
0x1736   : > { %v5925_v20 = vadd.f32 %v5924_v27, %v5912_v35  ;;  %7945 = vmatpush1.bf16.msra.mxu0 %v13816_v42  ;;  %7840 = vmatprep.subr.bf16.mxu1 %v13821_v43 }
0x1737   : > { %7946 = vmatprep.subr.bf16.mxu0 %v13824_v2 }
0x1738   : > { %5926 = vadd.xlane.f32.xlu0 %v5925_v20 }
0x1739   : > { %5930 = vadd.xlane.f32.xlu1 %v5929_v15  ;;  %7841 = vmatpush1.bf16.msra.mxu1 %v13819_v52 }
0x173a   : > { %7947 = vmatpush1.bf16.msra.mxu0 %v13822_v3  ;;  %7863 = vmatprep.subr.bf16.mxu1 %v13827_v56 }
0x173b   : > { %7969 = vmatprep.subr.bf16.mxu0 %v13830_v12 }
0x17c0   : > { %v5919_v17 = vpop.xlane.xlu0 %5918 }
0x17c1   : > { %v5932_v44 = vmul.f32 0.0026041667, %v5919_v17 }
0x17c2   : > { %v5923_v57 = vpop.xlane.xlu1 %5922 }
0x17c3   : > { %v5936_v10 = vadd.f32 1e-05, %v5932_v44  ;;  %v5933_v35 = vmul.f32 0.0026041667, %v5923_v57  ;;  %v13825_v44 = vld [vmem:[%s15823_s1 + $0x600] ss:$48 sps:$4 sm:$0xff]  }
0x17c4   : > { %v13828_v57 = vld [vmem:[%s15823_s1 + $0x608] ss:$48 sps:$4 sm:$0xff]  }
0x17c5   : > { %14649 = vrsqrt.f32 %v5936_v10  ;;  %v5937_v27 = vadd.f32 1e-05, %v5933_v35  ;;  %v5927_v28 = vpop.xlane.xlu0 %5926 }
0x17c6   : > { %v5931_v20 = vpop.xlane.xlu1 %5930  ;;  %v5934_v15 = vmul.f32 0.0026041667, %v5927_v28 }
0x17c7   : > { %14651 = vrsqrt.f32 %v5937_v27  ;;  %v5935_v54 = vmul.f32 0.0026041667, %v5931_v20  ;;  %v13836_v27 = vld [vmem:[%s15823_s1 + $0x66c] ss:$48 sps:$4 sm:$0xff]  }
0x17c8   : > { %v5938_v1 = vadd.f32 1e-05, %v5934_v15  ;;  %v13831_v15 = vld [vmem:[%s15823_s1 + $0x660] ss:$48 sps:$4 sm:$0xff]  }
0x17c9   : > { %v5939_v63 = vadd.f32 1e-05, %v5935_v54  ;;  %v13834_v54 = vld [vmem:[%s15823_s1 + $0x668] ss:$48 sps:$4 sm:$0xff]  }
0x17ca   : > { %14653 = vrsqrt.f32 %v5938_v1  ;;  %v13839_v1 = vld [vmem:[%s15823_s1 + $0x6c4] ss:$48 sps:$4 sm:$0xff]  }
0x17cb   : > { %14655 = vrsqrt.f32 %v5939_v63  ;;  %v13842_v63 = vld [vmem:[%s15823_s1 + $0x6cc] ss:$48 sps:$4 sm:$0xff]  }
0x17cf   : > { %v16850_v11 = vpop.eup %14649 }
0x17d0   : > { %v5945_v48 = vmul.f32 %v16850_v11, %v16756_v51  ;;  %v5944_v31 = vmul.f32 %v16850_v11, %v16753_v49 }
0x17d1   : > { %v16856_v19 = vpop.eup %14651 }
0x17d2   : > { %v5948_v0 = vmul.f32 %v16856_v19, %v16765_v5  ;;  %v5973_v53 = vmul.f32 %v5964_v61, %v5945_v48  ;;  %v5947_v40 = vmul.f32 %v16856_v19, %v16762_v34  ;;  %v5972_v51 = vmul.f32 %v5960_v8, %v5944_v31  ;;  %v13837_v48 = vld [vmem:[%s15823_s1 + $0x6c0] ss:$48 sps:$4 sm:$0xff]   ;;  %v13840_v31 = vld [vmem:[%s15823_s1 + $0x6c8] ss:$48 sps:$4 sm:$0xff]  }
0x17d4   : > { %v16866_v50 = vpop.eup %14653  ;;  %v5976_v49 = vmul.f32 %v5964_v61, %v5948_v0  ;;  %v5975_v9 = vmul.f32 %v5960_v8, %v5947_v40  ;;  %v6001_v42 = vadd.f32 %v5992_v4, %v5973_v53  ;;  %v6000_v43 = vadd.f32 %v5988_v16, %v5972_v51  ;;  %v13845_v0 = vld [vmem:[%s15823_s1 + $0x724] ss:$48 sps:$4 sm:$0xff]   ;;  %v13848_v53 = vld [vmem:[%s15823_s1 + $0x72c] ss:$48 sps:$4 sm:$0xff]   ;;  %v13846_v40 = vld [vmem:[%s15823_s1 + $0x728] ss:$48 sps:$4 sm:$0xff]  }
0x17d5   : > { %v16868_v36 = vpop.eup %14655  ;;  %v5951_v5 = vmul.f32 %v16866_v50, %v16793_v46  ;;  %v5950_v2 = vmul.f32 %v16866_v50, %v16790_v58  ;;  %v13833_v58 = vld [vmem:[%s15823_s1 + $0x664] ss:$48 sps:$4 sm:$0xff]  }
0x17d6   : > { %v6004_v34 = vadd.f32 %v5992_v4, %v5976_v49  ;;  %v6003_v52 = vadd.f32 %v5988_v16, %v5975_v9  ;;  %v5954_v3 = vmul.f32 %v16868_v36, %v16778_v55  ;;  %v5953_v56 = vmul.f32 %v16868_v36, %v16775_v6  ;;  %v13851_v51 = vld [vmem:[%s15823_s1 + $0x784] ss:$48 sps:$4 sm:$0xff]   ;;  %v13854_v49 = vld [vmem:[%s15823_s1 + $0x78c] ss:$48 sps:$4 sm:$0xff]   ;;  %v13849_v9 = vld [vmem:[%s15823_s1 + $0x780] ss:$48 sps:$4 sm:$0xff]  }
0x17d7   : > { %v5979_v12 = vmul.f32 %v5964_v61, %v5951_v5  ;;  %v5978_v28 = vmul.f32 %v5960_v8, %v5950_v2  ;;  %v13860_v5 = vld [vmem:[%s15823_s1 + $0x7ec] ss:$48 sps:$4 sm:$0xff]   ;;  %v13855_v2 = vld [vmem:[%s15823_s1 + $0x7e0] ss:$48 sps:$4 sm:$0xff]  }
0x17d8   : > { %v16878_v17 = vpack.c.bf16 %v6004_v34, %v6001_v42  ;;  %v16882_v10 = vpack.c.bf16 %v6003_v52, %v6000_v43  ;;  %v5982_v46 = vmul.f32 %v5964_v61, %v5954_v3  ;;  %v5981_v55 = vmul.f32 %v5960_v8, %v5953_v56  ;;  %v13852_v42 = vld [vmem:[%s15823_s1 + $0x788] ss:$48 sps:$4 sm:$0xff]   ;;  %v13857_v43 = vld [vmem:[%s15823_s1 + $0x7e4] ss:$48 sps:$4 sm:$0xff]   ;;  %v13866_v3 = vld [vmem:[%s15823_s1 + $0x84c] ss:$48 sps:$4 sm:$0xff]  }
0x17d9   : > { %v6007_v35 = vadd.f32 %v5992_v4, %v5979_v12  ;;  %v6006_v61 = vadd.f32 %v5988_v16, %v5978_v28  ;;  %v13858_v34 = vld [vmem:[%s15823_s1 + $0x7e8] ss:$48 sps:$4 sm:$0xff]   ;;  %v13863_v52 = vld [vmem:[%s15823_s1 + $0x844] ss:$48 sps:$4 sm:$0xff]   ;;  %v5949_v56 = vmul.f32 %v16856_v19, %v16768_v41  ;;  %v5946_v12 = vmul.f32 %v16850_v11, %v16759_v23 }
0x17da   : > { %7842 = vmatprep.mubr.bf16.mxu1 %v16878_v17  ;;  %7948 = vmatprep.mubr.bf16.mxu0 %v16878_v17  ;;  %v6010_v6 = vadd.f32 %v5992_v4, %v5982_v46  ;;  %v6009_v8 = vadd.f32 %v5988_v16, %v5981_v55  ;;  %v13843_v16 = vld [vmem:[%s15823_s1 + $0x720] ss:$48 sps:$4 sm:$0xff]   ;;  %v13864_v46 = vld [vmem:[%s15823_s1 + $0x848] ss:$48 sps:$4 sm:$0xff]   ;;  %v5996_v23 = vrot.slane %v16844_v59, %v15988_v18  ;;  %v13875_v28 = vld [vmem:[%s15823_s1 + $0x14] ss:$48 sps:$4 sm:$0xff]  }
0x17db   : > { %7843 = vmatmul.mubr.bf16.vlgmr.msra.gmra.mrb[80].mxu1 %v16882_v10  ;;  %7949 = vmatmul.mubr.bf16.vlgmr.msra.gmra.mrb[96].mxu0 %v16882_v10  ;;  %v13870_v11 = vld [vmem:[%s15823_s1 + $0x8a8] ss:$48 sps:$4 sm:$0xff]   ;;  %v13878_v55 = vld [vmem:[%s15823_s1 + $0x1c] ss:$48 sps:$4 sm:$0xff]   ;;  %v13873_v59 = vld [vmem:[%s15823_s1 + $0x10] ss:$48 sps:$4 sm:$0xff]  }
0x17dc   : > { %7864 = vmatpush1.bf16.msra.mxu1 %v13825_v44  ;;  %7970 = vmatpush1.bf16.msra.mxu0 %v13828_v57  ;;  %v16890_v20 = vpack.c.bf16 %v6010_v6, %v6007_v35  ;;  %v16900_v4 = vpack.c.bf16 %v6009_v8, %v6006_v61  ;;  %v5968_v44 = vrot.slane %v16840_v39, %v15988_v18  ;;  %v13861_v57 = vld [vmem:[%s15823_s1 + $0x840] ss:$48 sps:$4 sm:$0xff]   ;;  %v13869_v35 = vld [vmem:[%s15823_s1 + $0x8a4] ss:$48 sps:$4 sm:$0xff]   ;;  %v13884_v8 = vld [vmem:[%s15823_s1 + $0x7c] ss:$48 sps:$4 sm:$0xff]  }
0x17dd   : > { %7865 = vmatprep.subr.bf16.mxu1 %v13833_v58  ;;  %7971 = vmatprep.subr.bf16.mxu0 %v13836_v27  ;;  %v13872_v58 = vld [vmem:[%s15823_s1 + $0x8ac] ss:$48 sps:$4 sm:$0xff]   ;;  %v13867_v39 = vld [vmem:[%s15823_s1 + $0x8a0] ss:$48 sps:$4 sm:$0xff]   ;;  %v5952_v6 = vmul.f32 %v16866_v50, %v16796_v47  ;;  %v13881_v61 = vld [vmem:[%s15823_s1 + $0x74] ss:$48 sps:$4 sm:$0xff]  }
0x17de   : > { %7852 = vmatprep.mubr.bf16.mxu1 %v16890_v20  ;;  %7958 = vmatprep.mubr.bf16.mxu0 %v16890_v20  ;;  %v5977_v27 = vmul.f32 %v5968_v44, %v5949_v56  ;;  %v5974_v41 = vmul.f32 %v5968_v44, %v5946_v12  ;;  %v13882_v50 = vld [vmem:[%s15823_s1 + $0x78] ss:$48 sps:$4 sm:$0xff]   ;;  %v13908_v56 = vld [vmem:[%s15823_s1 + $0x1fc] ss:$48 sps:$4 sm:$0xff]   ;;  %v13903_v12 = vld [vmem:[%s15823_s1 + $0x1f0] ss:$48 sps:$4 sm:$0xff]  }
0x17e0   : > { %7866 = vmatpush1.bf16.msra.mxu1 %v13831_v15  ;;  %7972 = vmatpush1.bf16.msra.mxu0 %v13834_v54  ;;  %v6005_v19 = vadd.f32 %v5996_v23, %v5977_v27  ;;  %v5955_v15 = vmul.f32 %v16868_v36, %v16783_v33  ;;  %v6002_v54 = vadd.f32 %v5996_v23, %v5974_v41  ;;  %v13879_v33 = vld [vmem:[%s15823_s1 + $0x70] ss:$48 sps:$4 sm:$0xff]   ;;  %v13917_v27 = vld [vmem:[%s15823_s1 + $0x2b4] ss:$48 sps:$4 sm:$0xff]   ;;  %v13920_v41 = vld [vmem:[%s15823_s1 + $0x2bc] ss:$48 sps:$4 sm:$0xff]  }
0x17e1   : > { %7867 = vmatprep.subr.bf16.mxu1 %v13839_v1  ;;  %7973 = vmatprep.subr.bf16.mxu0 %v13842_v63  ;;  %v13876_v1 = vld [vmem:[%s15823_s1 + $0x18] ss:$48 sps:$4 sm:$0xff]  }
0x17e2   : > { %v16942_v63 = vpack.c.bf16 %v6005_v19, %v6002_v54  ;;  %v5983_v47 = vmul.f32 %v5968_v44, %v5955_v15  ;;  %v13926_v19 = vld [vmem:[%s15823_s1 + $0x31c] ss:$48 sps:$4 sm:$0xff]   ;;  %v13927_v54 = vld [vmem:[%s15823_s1 + $0x370] ss:$48 sps:$4 sm:$0xff]  }
0x17e3   : > { %7853 = vmatmul.mubr.bf16.gmra.mrb[84].mxu1 %v16900_v4  ;;  %7959 = vmatmul.mubr.bf16.gmra.mrb[100].mxu0 %v16900_v4  ;;  %v13932_v15 = vld [vmem:[%s15823_s1 + $0x37c] ss:$48 sps:$4 sm:$0xff]  }
0x17e4   : > { %7868 = vmatpush1.bf16.msra.mxu1 %v13837_v48  ;;  %7974 = vmatpush1.bf16.msra.mxu0 %v13840_v31  ;;  %v5980_v48 = vmul.f32 %v5968_v44, %v5952_v6  ;;  %v6011_v31 = vadd.f32 %v5996_v23, %v5983_v47  ;;  %v13906_v44 = vld [vmem:[%s15823_s1 + $0x1f8] ss:$48 sps:$4 sm:$0xff]   ;;  %v13929_v6 = vld [vmem:[%s15823_s1 + $0x374] ss:$48 sps:$4 sm:$0xff]  }
0x17e5   : > { %7869 = vmatprep.subr.bf16.mxu1 %v13845_v0  ;;  %7975 = vmatprep.subr.bf16.mxu0 %v13848_v53  ;;  %v13887_v0 = vld [vmem:[%s15823_s1 + $0xd4] ss:$48 sps:$4 sm:$0xff]   ;;  %v13890_v53 = vld [vmem:[%s15823_s1 + $0xdc] ss:$48 sps:$4 sm:$0xff]  }
0x17e6   : > { %7895 = vmatprep.mubr.bf16.mxu1 %v15178_v25  ;;  %8001 = vmatprep.mubr.bf16.mxu0 %v15178_v25  ;;  %v6008_v36 = vadd.f32 %v5996_v23, %v5980_v48  ;;  %v13915_v23 = vld [vmem:[%s15823_s1 + $0x2b0] ss:$48 sps:$4 sm:$0xff]   ;;  %v13936_v48 = vld [vmem:[%s15823_s1 + $0x3d8] ss:$48 sps:$4 sm:$0xff]   ;;  %v13941_v47 = vld [vmem:[%s15823_s1 + $0x434] ss:$48 sps:$4 sm:$0xff]  }
0x17e8   : > { %7870 = vmatpush1.bf16.msra.mxu1 %v13843_v16  ;;  %7976 = vmatpush1.bf16.msra.mxu0 %v13846_v40  ;;  %v13885_v16 = vld [vmem:[%s15823_s1 + $0xd0] ss:$48 sps:$4 sm:$0xff]   ;;  %v16955_v40 = vpack.c.bf16 %v6011_v31, %v6008_v36  ;;  %v13942_v36 = vld [vmem:[%s15823_s1 + $0x438] ss:$48 sps:$4 sm:$0xff]   ;;  %v13947_v31 = vld [vmem:[%s15823_s1 + $0x494] ss:$48 sps:$4 sm:$0xff]  }
0x17e9   : > { %7871 = vmatprep.subr.bf16.mxu1 %v13851_v51  ;;  %7977 = vmatprep.subr.bf16.mxu0 %v13854_v49  ;;  %v13888_v51 = vld [vmem:[%s15823_s1 + $0xd8] ss:$48 sps:$4 sm:$0xff]   ;;  %v13893_v49 = vld [vmem:[%s15823_s1 + $0x134] ss:$48 sps:$4 sm:$0xff]  }
0x17ec   : > { %7872 = vmatpush1.bf16.msra.mxu1 %v13849_v9  ;;  %7978 = vmatpush1.bf16.msra.mxu0 %v13852_v42  ;;  %v13896_v9 = vld [vmem:[%s15823_s1 + $0x13c] ss:$48 sps:$4 sm:$0xff]   ;;  %v13891_v42 = vld [vmem:[%s15823_s1 + $0x130] ss:$48 sps:$4 sm:$0xff]  }
0x17ed   : > { %7873 = vmatprep.subr.bf16.mxu1 %v13857_v43  ;;  %7979 = vmatprep.subr.bf16.mxu0 %v13860_v5  ;;  %v13894_v43 = vld [vmem:[%s15823_s1 + $0x138] ss:$48 sps:$4 sm:$0xff]   ;;  %v13899_v5 = vld [vmem:[%s15823_s1 + $0x194] ss:$48 sps:$4 sm:$0xff]  }
0x17f0   : > { %7874 = vmatpush1.bf16.msra.mxu1 %v13855_v2  ;;  %7980 = vmatpush1.bf16.msra.mxu0 %v13858_v34  ;;  %v13902_v2 = vld [vmem:[%s15823_s1 + $0x19c] ss:$48 sps:$4 sm:$0xff]   ;;  %v13897_v34 = vld [vmem:[%s15823_s1 + $0x190] ss:$48 sps:$4 sm:$0xff]  }
0x17f1   : > { %7875 = vmatprep.subr.bf16.mxu1 %v13863_v52  ;;  %7981 = vmatprep.subr.bf16.mxu0 %v13866_v3  ;;  %v13900_v52 = vld [vmem:[%s15823_s1 + $0x198] ss:$48 sps:$4 sm:$0xff]   ;;  %v13905_v3 = vld [vmem:[%s15823_s1 + $0x1f4] ss:$48 sps:$4 sm:$0xff]  }
0x17f4   : > { %7876 = vmatpush1.bf16.msra.mxu1 %v13861_v57  ;;  %7982 = vmatpush1.bf16.msra.mxu0 %v13864_v46  ;;  %v13911_v57 = vld [vmem:[%s15823_s1 + $0x254] ss:$48 sps:$4 sm:$0xff]   ;;  %v13914_v46 = vld [vmem:[%s15823_s1 + $0x25c] ss:$48 sps:$4 sm:$0xff]  }
0x17f5   : > { %7877 = vmatprep.subr.bf16.mxu1 %v13869_v35  ;;  %7983 = vmatprep.subr.bf16.mxu0 %v13872_v58  ;;  %v13909_v35 = vld [vmem:[%s15823_s1 + $0x250] ss:$48 sps:$4 sm:$0xff]   ;;  %v13912_v58 = vld [vmem:[%s15823_s1 + $0x258] ss:$48 sps:$4 sm:$0xff]  }
0x17f8   : > { %7878 = vmatpush1.bf16.msra.mxu1 %v13867_v39  ;;  %7984 = vmatpush1.bf16.msra.mxu0 %v13870_v11  ;;  %v13918_v39 = vld [vmem:[%s15823_s1 + $0x2b8] ss:$48 sps:$4 sm:$0xff]   ;;  %v13923_v11 = vld [vmem:[%s15823_s1 + $0x314] ss:$48 sps:$4 sm:$0xff]  }
0x17f9   : > { %8022 = vmatprep.subr.bf16.mxu1 %v13875_v28  ;;  %8128 = vmatprep.subr.bf16.mxu0 %v13878_v55  ;;  %v13921_v28 = vld [vmem:[%s15823_s1 + $0x310] ss:$48 sps:$4 sm:$0xff]   ;;  %v13924_v55 = vld [vmem:[%s15823_s1 + $0x318] ss:$48 sps:$4 sm:$0xff]  }
0x17fb   : > { %7896 = vmatmul.mubr.bf16.vlgmr.msra.gmra.mrb[80].mxu1 %v16942_v63  ;;  %8002 = vmatmul.mubr.bf16.vlgmr.msra.gmra.mrb[96].mxu0 %v16942_v63 }
0x17fc   : > { %8023 = vmatpush1.bf16.msra.mxu1 %v13873_v59  ;;  %8129 = vmatpush1.bf16.msra.mxu0 %v13876_v1  ;;  %v13930_v59 = vld [vmem:[%s15823_s1 + $0x378] ss:$48 sps:$4 sm:$0xff]   ;;  %v13935_v1 = vld [vmem:[%s15823_s1 + $0x3d4] ss:$48 sps:$4 sm:$0xff]  }
0x17fd   : > { %8024 = vmatprep.subr.bf16.mxu1 %v13881_v61  ;;  %8130 = vmatprep.subr.bf16.mxu0 %v13884_v8  ;;  %v13938_v61 = vld [vmem:[%s15823_s1 + $0x3dc] ss:$48 sps:$4 sm:$0xff]   ;;  %v13933_v8 = vld [vmem:[%s15823_s1 + $0x3d0] ss:$48 sps:$4 sm:$0xff]  }
0x17fe   : > { %7905 = vmatprep.mubr.bf16.mxu1 %v15178_v25  ;;  %8011 = vmatprep.mubr.bf16.mxu0 %v15178_v25 }
0x1800   : > { %8025 = vmatpush1.bf16.msra.mxu1 %v13879_v33  ;;  %8131 = vmatpush1.bf16.msra.mxu0 %v13882_v50  ;;  %v13944_v33 = vld [vmem:[%s15823_s1 + $0x43c] ss:$48 sps:$4 sm:$0xff]   ;;  %v13939_v50 = vld [vmem:[%s15823_s1 + $0x430] ss:$48 sps:$4 sm:$0xff]  }
0x1801   : > { %8026 = vmatprep.subr.bf16.mxu1 %v13887_v0  ;;  %8132 = vmatprep.subr.bf16.mxu0 %v13890_v53  ;;  %v13950_v0 = vld [vmem:[%s15823_s1 + $0x49c] ss:$48 sps:$4 sm:$0xff]   ;;  %v13945_v53 = vld [vmem:[%s15823_s1 + $0x490] ss:$48 sps:$4 sm:$0xff]  }
0x1803   : > { %7906 = vmatmul.mubr.bf16.gmra.mrb[84].mxu1 %v16955_v40  ;;  %8012 = vmatmul.mubr.bf16.gmra.mrb[100].mxu0 %v16955_v40 }
0x1804   : > { %8027 = vmatpush1.bf16.msra.mxu1 %v13885_v16  ;;  %8054 = vmatprep.mubr.bf16.mxu1 %v16878_v17  ;;  %v13948_v16 = vld [vmem:[%s15823_s1 + $0x498] ss:$48 sps:$4 sm:$0xff]  }
0x1805   : > { %8133 = vmatpush1.bf16.msra.mxu0 %v13888_v51  ;;  %8160 = vmatprep.mubr.bf16.mxu0 %v16878_v17  ;;  %v13953_v51 = vld [vmem:[%s15823_s1 + $0x4f4] ss:$48 sps:$4 sm:$0xff]  }
0x1806   : > { %8028 = vmatprep.subr.bf16.mxu1 %v13893_v49  ;;  %8134 = vmatprep.subr.bf16.mxu0 %v13896_v9  ;;  %v13956_v49 = vld [vmem:[%s15823_s1 + $0x4fc] ss:$48 sps:$4 sm:$0xff]   ;;  %v13951_v9 = vld [vmem:[%s15823_s1 + $0x4f0] ss:$48 sps:$4 sm:$0xff]  }
0x1808   : > { %8029 = vmatpush1.bf16.msra.mxu1 %v13891_v42  ;;  %v13954_v42 = vld [vmem:[%s15823_s1 + $0x4f8] ss:$48 sps:$4 sm:$0xff]  }
0x1809   : > { %8135 = vmatpush1.bf16.msra.mxu0 %v13894_v43  ;;  %8030 = vmatprep.subr.bf16.mxu1 %v13899_v5  ;;  %v13959_v43 = vld [vmem:[%s15823_s1 + $0x554] ss:$48 sps:$4 sm:$0xff]   ;;  %v13962_v5 = vld [vmem:[%s15823_s1 + $0x55c] ss:$48 sps:$4 sm:$0xff]  }
0x180a   : > { %8136 = vmatprep.subr.bf16.mxu0 %v13902_v2  ;;  %v13957_v2 = vld [vmem:[%s15823_s1 + $0x550] ss:$48 sps:$4 sm:$0xff]  }
0x180c   : > { %8031 = vmatpush1.bf16.msra.mxu1 %v13897_v34  ;;  %v13960_v34 = vld [vmem:[%s15823_s1 + $0x558] ss:$48 sps:$4 sm:$0xff]  }
0x180d   : > { %8137 = vmatpush1.bf16.msra.mxu0 %v13900_v52  ;;  %8032 = vmatprep.subr.bf16.mxu1 %v13905_v3  ;;  %v13965_v52 = vld [vmem:[%s15823_s1 + $0x5b4] ss:$48 sps:$4 sm:$0xff]   ;;  %v13968_v3 = vld [vmem:[%s15823_s1 + $0x5bc] ss:$48 sps:$4 sm:$0xff]  }
0x180e   : > { %8138 = vmatprep.subr.bf16.mxu0 %v13908_v56  ;;  %v13963_v56 = vld [vmem:[%s15823_s1 + $0x5b0] ss:$48 sps:$4 sm:$0xff]  }
0x1810   : > { %8033 = vmatpush1.bf16.msra.mxu1 %v13903_v12  ;;  %v13966_v12 = vld [vmem:[%s15823_s1 + $0x5b8] ss:$48 sps:$4 sm:$0xff]  }
0x1811   : > { %8139 = vmatpush1.bf16.msra.mxu0 %v13906_v44  ;;  %8034 = vmatprep.subr.bf16.mxu1 %v13911_v57  ;;  %v13971_v44 = vld [vmem:[%s15823_s1 + $0x614] ss:$48 sps:$4 sm:$0xff]   ;;  %v13974_v57 = vld [vmem:[%s15823_s1 + $0x61c] ss:$48 sps:$4 sm:$0xff]  }
0x1812   : > { %8140 = vmatprep.subr.bf16.mxu0 %v13914_v46  ;;  %v13969_v46 = vld [vmem:[%s15823_s1 + $0x610] ss:$48 sps:$4 sm:$0xff]  }
0x1814   : > { %8035 = vmatpush1.bf16.msra.mxu1 %v13909_v35  ;;  %v13972_v35 = vld [vmem:[%s15823_s1 + $0x618] ss:$48 sps:$4 sm:$0xff]  }
0x1815   : > { %8141 = vmatpush1.bf16.msra.mxu0 %v13912_v58  ;;  %8036 = vmatprep.subr.bf16.mxu1 %v13917_v27  ;;  %v13977_v58 = vld [vmem:[%s15823_s1 + $0x674] ss:$48 sps:$4 sm:$0xff]   ;;  %v13980_v27 = vld [vmem:[%s15823_s1 + $0x67c] ss:$48 sps:$4 sm:$0xff]  }
0x1816   : > { %8142 = vmatprep.subr.bf16.mxu0 %v13920_v41  ;;  %v13975_v41 = vld [vmem:[%s15823_s1 + $0x670] ss:$48 sps:$4 sm:$0xff]  }
0x1818   : > { %8037 = vmatpush1.bf16.msra.mxu1 %v13915_v23  ;;  %v13978_v23 = vld [vmem:[%s15823_s1 + $0x678] ss:$48 sps:$4 sm:$0xff]  }
0x1819   : > { %8143 = vmatpush1.bf16.msra.mxu0 %v13918_v39  ;;  %8038 = vmatprep.subr.bf16.mxu1 %v13923_v11  ;;  %v13983_v39 = vld [vmem:[%s15823_s1 + $0x6d4] ss:$48 sps:$4 sm:$0xff]   ;;  %v13986_v11 = vld [vmem:[%s15823_s1 + $0x6dc] ss:$48 sps:$4 sm:$0xff]  }
0x181a   : > { %8144 = vmatprep.subr.bf16.mxu0 %v13926_v19  ;;  %v13981_v19 = vld [vmem:[%s15823_s1 + $0x6d0] ss:$48 sps:$4 sm:$0xff]  }
0x181c   : > { %8039 = vmatpush1.bf16.msra.mxu1 %v13921_v28  ;;  %v13984_v28 = vld [vmem:[%s15823_s1 + $0x6d8] ss:$48 sps:$4 sm:$0xff]  }
0x181d   : > { %8145 = vmatpush1.bf16.msra.mxu0 %v13924_v55  ;;  %8040 = vmatprep.subr.bf16.mxu1 %v13929_v6  ;;  %v13989_v55 = vld [vmem:[%s15823_s1 + $0x734] ss:$48 sps:$4 sm:$0xff]   ;;  %v13992_v6 = vld [vmem:[%s15823_s1 + $0x73c] ss:$48 sps:$4 sm:$0xff]  }
0x181e   : > { %8146 = vmatprep.subr.bf16.mxu0 %v13932_v15  ;;  %v13987_v15 = vld [vmem:[%s15823_s1 + $0x730] ss:$48 sps:$4 sm:$0xff]  }
0x1820   : > { %8041 = vmatpush1.bf16.msra.mxu1 %v13927_v54  ;;  %v13990_v54 = vld [vmem:[%s15823_s1 + $0x738] ss:$48 sps:$4 sm:$0xff]  }
0x1821   : > { %8147 = vmatpush1.bf16.msra.mxu0 %v13930_v59  ;;  %8042 = vmatprep.subr.bf16.mxu1 %v13935_v1  ;;  %v13995_v59 = vld [vmem:[%s15823_s1 + $0x794] ss:$48 sps:$4 sm:$0xff]   ;;  %v13998_v1 = vld [vmem:[%s15823_s1 + $0x79c] ss:$48 sps:$4 sm:$0xff]  }
0x1822   : > { %8148 = vmatprep.subr.bf16.mxu0 %v13938_v61  ;;  %v13993_v61 = vld [vmem:[%s15823_s1 + $0x790] ss:$48 sps:$4 sm:$0xff]  }
0x1824   : > { %8043 = vmatpush1.bf16.msra.mxu1 %v13933_v8  ;;  %v13996_v8 = vld [vmem:[%s15823_s1 + $0x798] ss:$48 sps:$4 sm:$0xff]  }
0x1825   : > { %8149 = vmatpush1.bf16.msra.mxu0 %v13936_v48  ;;  %8044 = vmatprep.subr.bf16.mxu1 %v13941_v47  ;;  %v14001_v48 = vld [vmem:[%s15823_s1 + $0x7f4] ss:$48 sps:$4 sm:$0xff]   ;;  %v14004_v47 = vld [vmem:[%s15823_s1 + $0x7fc] ss:$48 sps:$4 sm:$0xff]  }
0x1826   : > { %8150 = vmatprep.subr.bf16.mxu0 %v13944_v33  ;;  %v13999_v33 = vld [vmem:[%s15823_s1 + $0x7f0] ss:$48 sps:$4 sm:$0xff]  }
0x1828   : > { %8045 = vmatpush1.bf16.msra.mxu1 %v13939_v50  ;;  %v14002_v50 = vld [vmem:[%s15823_s1 + $0x7f8] ss:$48 sps:$4 sm:$0xff]  }
0x1829   : > { %8151 = vmatpush1.bf16.msra.mxu0 %v13942_v36  ;;  %8046 = vmatprep.subr.bf16.mxu1 %v13947_v31  ;;  %v14007_v36 = vld [vmem:[%s15823_s1 + $0x854] ss:$48 sps:$4 sm:$0xff]   ;;  %v14010_v31 = vld [vmem:[%s15823_s1 + $0x85c] ss:$48 sps:$4 sm:$0xff]  }
0x182a   : > { %8152 = vmatprep.subr.bf16.mxu0 %v13950_v0  ;;  %v14005_v0 = vld [vmem:[%s15823_s1 + $0x850] ss:$48 sps:$4 sm:$0xff]  }
0x182c   : > { %8047 = vmatpush1.bf16.msra.mxu1 %v13945_v53  ;;  %v14008_v53 = vld [vmem:[%s15823_s1 + $0x858] ss:$48 sps:$4 sm:$0xff]  }
0x182d   : > { %8153 = vmatpush1.bf16.msra.mxu0 %v13948_v16  ;;  %8048 = vmatprep.subr.bf16.mxu1 %v13953_v51  ;;  %v14013_v16 = vld [vmem:[%s15823_s1 + $0x8b4] ss:$48 sps:$4 sm:$0xff]   ;;  %v14016_v51 = vld [vmem:[%s15823_s1 + $0x8bc] ss:$48 sps:$4 sm:$0xff]  }
0x182e   : > { %8154 = vmatprep.subr.bf16.mxu0 %v13956_v49  ;;  %v14011_v49 = vld [vmem:[%s15823_s1 + $0x8b0] ss:$48 sps:$4 sm:$0xff]  }
0x1830   : > { %8049 = vmatpush1.bf16.msra.mxu1 %v13951_v9  ;;  %v14014_v9 = vld [vmem:[%s15823_s1 + $0x8b8] ss:$48 sps:$4 sm:$0xff]  }
0x1831   : > { %8155 = vmatpush1.bf16.msra.mxu0 %v13954_v42  ;;  %8050 = vmatprep.subr.bf16.mxu1 %v13959_v43  ;;  %v14019_v42 = vld [vmem:[%s15823_s1 + $0x24] ss:$48 sps:$4 sm:$0xff]   ;;  %v14022_v43 = vld [vmem:[%s15823_s1 + $0x2c] ss:$48 sps:$4 sm:$0xff]  }
0x1832   : > { %8156 = vmatprep.subr.bf16.mxu0 %v13962_v5  ;;  %v14017_v5 = vld [vmem:[%s15823_s1 + $0x20] ss:$48 sps:$4 sm:$0xff]  }
0x1834   : > { %8051 = vmatpush1.bf16.msra.mxu1 %v13957_v2  ;;  %v14020_v2 = vld [vmem:[%s15823_s1 + $0x28] ss:$48 sps:$4 sm:$0xff]  }
0x1835   : > { %8157 = vmatpush1.bf16.msra.mxu0 %v13960_v34  ;;  %8052 = vmatprep.subr.bf16.mxu1 %v13965_v52  ;;  %v14025_v34 = vld [vmem:[%s15823_s1 + $0x84] ss:$48 sps:$4 sm:$0xff]   ;;  %v14028_v52 = vld [vmem:[%s15823_s1 + $0x8c] ss:$48 sps:$4 sm:$0xff]  }
0x1836   : > { %8158 = vmatprep.subr.bf16.mxu0 %v13968_v3  ;;  %v14023_v3 = vld [vmem:[%s15823_s1 + $0x80] ss:$48 sps:$4 sm:$0xff]  }
0x1838   : > { %8053 = vmatpush1.bf16.msra.mxu1 %v13963_v56  ;;  %v14026_v56 = vld [vmem:[%s15823_s1 + $0x88] ss:$48 sps:$4 sm:$0xff]  }
0x1839   : > { %8159 = vmatpush1.bf16.msra.mxu0 %v13966_v12  ;;  %8075 = vmatprep.subr.bf16.mxu1 %v13971_v44  ;;  %v14031_v12 = vld [vmem:[%s15823_s1 + $0xe4] ss:$48 sps:$4 sm:$0xff]   ;;  %v14034_v44 = vld [vmem:[%s15823_s1 + $0xec] ss:$48 sps:$4 sm:$0xff]  }
0x183a   : > { %8181 = vmatprep.subr.bf16.mxu0 %v13974_v57  ;;  %v14029_v57 = vld [vmem:[%s15823_s1 + $0xe0] ss:$48 sps:$4 sm:$0xff]  }
0x183b   : > { %8055 = vmatmul.mubr.bf16.vlgmr.msra.gmra.mrb[88].mxu1 %v16882_v10 }
0x183c   : > { %8161 = vmatmul.mubr.bf16.vlgmr.msra.gmra.mrb[104].mxu0 %v16882_v10  ;;  %8064 = vmatprep.mubr.bf16.mxu1 %v16890_v20 }
0x183d   : > { %8076 = vmatpush1.bf16.msra.mxu1 %v13969_v46  ;;  %8170 = vmatprep.mubr.bf16.mxu0 %v16890_v20  ;;  %v14032_v46 = vld [vmem:[%s15823_s1 + $0xe8] ss:$48 sps:$4 sm:$0xff]  }
0x183e   : > { %8182 = vmatpush1.bf16.msra.mxu0 %v13972_v35  ;;  %8077 = vmatprep.subr.bf16.mxu1 %v13977_v58  ;;  %v14037_v35 = vld [vmem:[%s15823_s1 + $0x144] ss:$48 sps:$4 sm:$0xff]   ;;  %v14040_v58 = vld [vmem:[%s15823_s1 + $0x14c] ss:$48 sps:$4 sm:$0xff]  }
0x183f   : > { %8183 = vmatprep.subr.bf16.mxu0 %v13980_v27  ;;  %v14035_v27 = vld [vmem:[%s15823_s1 + $0x140] ss:$48 sps:$4 sm:$0xff]  }
0x1841   : > { %8078 = vmatpush1.bf16.msra.mxu1 %v13975_v41  ;;  %v14038_v41 = vld [vmem:[%s15823_s1 + $0x148] ss:$48 sps:$4 sm:$0xff]  }
0x1842   : > { %8184 = vmatpush1.bf16.msra.mxu0 %v13978_v23  ;;  %8079 = vmatprep.subr.bf16.mxu1 %v13983_v39  ;;  %v14043_v23 = vld [vmem:[%s15823_s1 + $0x1a4] ss:$48 sps:$4 sm:$0xff]   ;;  %v14046_v39 = vld [vmem:[%s15823_s1 + $0x1ac] ss:$48 sps:$4 sm:$0xff]  }
0x1843   : > { %8065 = vmatmul.mubr.bf16.gmra.mrb[92].mxu1 %v16900_v4  ;;  %8185 = vmatprep.subr.bf16.mxu0 %v13986_v11  ;;  %v14041_v11 = vld [vmem:[%s15823_s1 + $0x1a0] ss:$48 sps:$4 sm:$0xff]  }
0x1844   : > { %8171 = vmatmul.mubr.bf16.gmra.mrb[108].mxu0 %v16900_v4  ;;  %8107 = vmatprep.mubr.bf16.mxu1 %v15178_v25 }
0x1845   : > { %8080 = vmatpush1.bf16.msra.mxu1 %v13981_v19  ;;  %8213 = vmatprep.mubr.bf16.mxu0 %v15178_v25  ;;  %v14044_v19 = vld [vmem:[%s15823_s1 + $0x1a8] ss:$48 sps:$4 sm:$0xff]  }
0x1846   : > { %8186 = vmatpush1.bf16.msra.mxu0 %v13984_v28  ;;  %8081 = vmatprep.subr.bf16.mxu1 %v13989_v55  ;;  %v14049_v28 = vld [vmem:[%s15823_s1 + $0x204] ss:$48 sps:$4 sm:$0xff]   ;;  %v14052_v55 = vld [vmem:[%s15823_s1 + $0x20c] ss:$48 sps:$4 sm:$0xff]  }
0x1847   : > { %8187 = vmatprep.subr.bf16.mxu0 %v13992_v6  ;;  %v14050_v6 = vld [vmem:[%s15823_s1 + $0x208] ss:$48 sps:$4 sm:$0xff]  }
0x1849   : > { %8082 = vmatpush1.bf16.msra.mxu1 %v13987_v15  ;;  %v14055_v15 = vld [vmem:[%s15823_s1 + $0x264] ss:$48 sps:$4 sm:$0xff]  }
0x184a   : > { %8188 = vmatpush1.bf16.msra.mxu0 %v13990_v54  ;;  %8083 = vmatprep.subr.bf16.mxu1 %v13995_v59  ;;  %v14058_v54 = vld [vmem:[%s15823_s1 + $0x26c] ss:$48 sps:$4 sm:$0xff]   ;;  %v14053_v59 = vld [vmem:[%s15823_s1 + $0x260] ss:$48 sps:$4 sm:$0xff]  }
0x184b   : > { %8189 = vmatprep.subr.bf16.mxu0 %v13998_v1  ;;  %v14056_v1 = vld [vmem:[%s15823_s1 + $0x268] ss:$48 sps:$4 sm:$0xff]  }
0x184d   : > { %8084 = vmatpush1.bf16.msra.mxu1 %v13993_v61  ;;  %v14061_v61 = vld [vmem:[%s15823_s1 + $0x2c4] ss:$48 sps:$4 sm:$0xff]  }
0x184e   : > { %8190 = vmatpush1.bf16.msra.mxu0 %v13996_v8  ;;  %8085 = vmatprep.subr.bf16.mxu1 %v14001_v48  ;;  %v14064_v8 = vld [vmem:[%s15823_s1 + $0x2cc] ss:$48 sps:$4 sm:$0xff]   ;;  %v14059_v48 = vld [vmem:[%s15823_s1 + $0x2c0] ss:$48 sps:$4 sm:$0xff]  }
0x184f   : > { %8191 = vmatprep.subr.bf16.mxu0 %v14004_v47  ;;  %v14062_v47 = vld [vmem:[%s15823_s1 + $0x2c8] ss:$48 sps:$4 sm:$0xff]  }
0x1851   : > { %8086 = vmatpush1.bf16.msra.mxu1 %v13999_v33  ;;  %v14067_v33 = vld [vmem:[%s15823_s1 + $0x324] ss:$48 sps:$4 sm:$0xff]  }
0x1852   : > { %8192 = vmatpush1.bf16.msra.mxu0 %v14002_v50  ;;  %8087 = vmatprep.subr.bf16.mxu1 %v14007_v36  ;;  %v14070_v50 = vld [vmem:[%s15823_s1 + $0x32c] ss:$48 sps:$4 sm:$0xff]   ;;  %v14065_v36 = vld [vmem:[%s15823_s1 + $0x320] ss:$48 sps:$4 sm:$0xff]  }
0x1853   : > { %8193 = vmatprep.subr.bf16.mxu0 %v14010_v31  ;;  %v14068_v31 = vld [vmem:[%s15823_s1 + $0x328] ss:$48 sps:$4 sm:$0xff]  }
0x1855   : > { %8088 = vmatpush1.bf16.msra.mxu1 %v14005_v0  ;;  %v14073_v0 = vld [vmem:[%s15823_s1 + $0x384] ss:$48 sps:$4 sm:$0xff]  }
0x1856   : > { %8194 = vmatpush1.bf16.msra.mxu0 %v14008_v53  ;;  %8089 = vmatprep.subr.bf16.mxu1 %v14013_v16  ;;  %v14076_v53 = vld [vmem:[%s15823_s1 + $0x38c] ss:$48 sps:$4 sm:$0xff]   ;;  %v14071_v16 = vld [vmem:[%s15823_s1 + $0x380] ss:$48 sps:$4 sm:$0xff]  }
0x1857   : > { %8195 = vmatprep.subr.bf16.mxu0 %v14016_v51  ;;  %v14074_v51 = vld [vmem:[%s15823_s1 + $0x388] ss:$48 sps:$4 sm:$0xff]  }
0x1859   : > { %8090 = vmatpush1.bf16.msra.mxu1 %v14011_v49  ;;  %v14079_v49 = vld [vmem:[%s15823_s1 + $0x3e4] ss:$48 sps:$4 sm:$0xff]  }
0x185a   : > { %8196 = vmatpush1.bf16.msra.mxu0 %v14014_v9  ;;  %8234 = vmatprep.subr.bf16.mxu1 %v14019_v42  ;;  %v14082_v9 = vld [vmem:[%s15823_s1 + $0x3ec] ss:$48 sps:$4 sm:$0xff]   ;;  %v14077_v42 = vld [vmem:[%s15823_s1 + $0x3e0] ss:$48 sps:$4 sm:$0xff]  }
0x185b   : > { %8340 = vmatprep.subr.bf16.mxu0 %v14022_v43  ;;  %v14080_v43 = vld [vmem:[%s15823_s1 + $0x3e8] ss:$48 sps:$4 sm:$0xff]  }
0x185c   : > { %8108 = vmatmul.mubr.bf16.vlgmr.msra.gmra.mrb[88].mxu1 %v16942_v63 }
0x185d   : > { %8214 = vmatmul.mubr.bf16.vlgmr.msra.gmra.mrb[104].mxu0 %v16942_v63  ;;  %8235 = vmatpush1.bf16.msra.mxu1 %v14017_v5  ;;  %v14085_v5 = vld [vmem:[%s15823_s1 + $0x444] ss:$48 sps:$4 sm:$0xff]  }
0x185e   : > { %8341 = vmatpush1.bf16.msra.mxu0 %v14020_v2  ;;  %8236 = vmatprep.subr.bf16.mxu1 %v14025_v34  ;;  %v14088_v2 = vld [vmem:[%s15823_s1 + $0x44c] ss:$48 sps:$4 sm:$0xff]   ;;  %v14083_v34 = vld [vmem:[%s15823_s1 + $0x440] ss:$48 sps:$4 sm:$0xff]  }
0x185f   : > { %8342 = vmatprep.subr.bf16.mxu0 %v14028_v52  ;;  %8117 = vmatprep.mubr.bf16.mxu1 %v15178_v25  ;;  %v14086_v52 = vld [vmem:[%s15823_s1 + $0x448] ss:$48 sps:$4 sm:$0xff]  }
0x1860   : > { %8223 = vmatprep.mubr.bf16.mxu0 %v15178_v25 }
0x1861   : > { %8237 = vmatpush1.bf16.msra.mxu1 %v14023_v3  ;;  %v14091_v3 = vld [vmem:[%s15823_s1 + $0x4a4] ss:$48 sps:$4 sm:$0xff]  }
0x1862   : > { %8343 = vmatpush1.bf16.msra.mxu0 %v14026_v56  ;;  %8238 = vmatprep.subr.bf16.mxu1 %v14031_v12  ;;  %v14094_v56 = vld [vmem:[%s15823_s1 + $0x4ac] ss:$48 sps:$4 sm:$0xff]   ;;  %v14089_v12 = vld [vmem:[%s15823_s1 + $0x4a0] ss:$48 sps:$4 sm:$0xff]  }
0x1863   : > { %8344 = vmatprep.subr.bf16.mxu0 %v14034_v44  ;;  %v14092_v44 = vld [vmem:[%s15823_s1 + $0x4a8] ss:$48 sps:$4 sm:$0xff]  }
0x1864   : > { %8118 = vmatmul.mubr.bf16.gmra.mrb[92].mxu1 %v16955_v40 }
0x1865   : > { %8224 = vmatmul.mubr.bf16.gmra.mrb[108].mxu0 %v16955_v40  ;;  %8239 = vmatpush1.bf16.msra.mxu1 %v14029_v57  ;;  %v14097_v57 = vld [vmem:[%s15823_s1 + $0x504] ss:$48 sps:$4 sm:$0xff]  }
0x1866   : > { %8266 = vmatprep.mubr.bf16.mxu1 %v16878_v17  ;;  %8345 = vmatpush1.bf16.msra.mxu0 %v14032_v46  ;;  %v14100_v46 = vld [vmem:[%s15823_s1 + $0x50c] ss:$48 sps:$4 sm:$0xff]  }
0x1867   : > { %8372 = vmatprep.mubr.bf16.mxu0 %v16878_v17  ;;  %8240 = vmatprep.subr.bf16.mxu1 %v14037_v35  ;;  %v14047_v17 = vld [vmem:[%s15823_s1 + $0x200] ss:$48 sps:$4 sm:$0xff]  }
0x1868   : > { %8346 = vmatprep.subr.bf16.mxu0 %v14040_v58  ;;  %v14095_v35 = vld [vmem:[%s15823_s1 + $0x500] ss:$48 sps:$4 sm:$0xff]   ;;  %v14098_v58 = vld [vmem:[%s15823_s1 + $0x508] ss:$48 sps:$4 sm:$0xff]  }
0x1869   : > { %8241 = vmatpush1.bf16.msra.mxu1 %v14035_v27  ;;  %v14103_v27 = vld [vmem:[%s15823_s1 + $0x564] ss:$48 sps:$4 sm:$0xff]  }
0x186a   : > { %8347 = vmatpush1.bf16.msra.mxu0 %v14038_v41  ;;  %8242 = vmatprep.subr.bf16.mxu1 %v14043_v23  ;;  %v14106_v41 = vld [vmem:[%s15823_s1 + $0x56c] ss:$48 sps:$4 sm:$0xff]   ;;  %v14101_v23 = vld [vmem:[%s15823_s1 + $0x560] ss:$48 sps:$4 sm:$0xff]  }
0x186b   : > { %8348 = vmatprep.subr.bf16.mxu0 %v14046_v39  ;;  %v14104_v39 = vld [vmem:[%s15823_s1 + $0x568] ss:$48 sps:$4 sm:$0xff]  }
0x186d   : > { %8243 = vmatpush1.bf16.msra.mxu1 %v14041_v11  ;;  %v14109_v11 = vld [vmem:[%s15823_s1 + $0x5c4] ss:$48 sps:$4 sm:$0xff]  }
0x186e   : > { %8349 = vmatpush1.bf16.msra.mxu0 %v14044_v19  ;;  %8244 = vmatprep.subr.bf16.mxu1 %v14049_v28  ;;  %v14112_v19 = vld [vmem:[%s15823_s1 + $0x5cc] ss:$48 sps:$4 sm:$0xff]   ;;  %v14107_v28 = vld [vmem:[%s15823_s1 + $0x5c0] ss:$48 sps:$4 sm:$0xff]  }
0x186f   : > { %8350 = vmatprep.subr.bf16.mxu0 %v14052_v55  ;;  %v14110_v55 = vld [vmem:[%s15823_s1 + $0x5c8] ss:$48 sps:$4 sm:$0xff]  }
0x1871   : > { %8245 = vmatpush1.bf16.msra.mxu1 %v14047_v17  ;;  %v14115_v17 = vld [vmem:[%s15823_s1 + $0x624] ss:$48 sps:$4 sm:$0xff]  }
0x1872   : > { %8351 = vmatpush1.bf16.msra.mxu0 %v14050_v6  ;;  %8246 = vmatprep.subr.bf16.mxu1 %v14055_v15  ;;  %v14118_v6 = vld [vmem:[%s15823_s1 + $0x62c] ss:$48 sps:$4 sm:$0xff]   ;;  %v14113_v15 = vld [vmem:[%s15823_s1 + $0x620] ss:$48 sps:$4 sm:$0xff]  }
0x1873   : > { %8352 = vmatprep.subr.bf16.mxu0 %v14058_v54  ;;  %v14116_v54 = vld [vmem:[%s15823_s1 + $0x628] ss:$48 sps:$4 sm:$0xff]  }
0x1875   : > { %8247 = vmatpush1.bf16.msra.mxu1 %v14053_v59  ;;  %v14121_v59 = vld [vmem:[%s15823_s1 + $0x684] ss:$48 sps:$4 sm:$0xff]  }
0x1876   : > { %8353 = vmatpush1.bf16.msra.mxu0 %v14056_v1  ;;  %8248 = vmatprep.subr.bf16.mxu1 %v14061_v61  ;;  %v14124_v1 = vld [vmem:[%s15823_s1 + $0x68c] ss:$48 sps:$4 sm:$0xff]   ;;  %v14119_v61 = vld [vmem:[%s15823_s1 + $0x680] ss:$48 sps:$4 sm:$0xff]  }
0x1877   : > { %8354 = vmatprep.subr.bf16.mxu0 %v14064_v8  ;;  %v14122_v8 = vld [vmem:[%s15823_s1 + $0x688] ss:$48 sps:$4 sm:$0xff]  }
0x1879   : > { %8249 = vmatpush1.bf16.msra.mxu1 %v14059_v48  ;;  %v14127_v48 = vld [vmem:[%s15823_s1 + $0x6e4] ss:$48 sps:$4 sm:$0xff]  }
0x187a   : > { %8355 = vmatpush1.bf16.msra.mxu0 %v14062_v47  ;;  %8250 = vmatprep.subr.bf16.mxu1 %v14067_v33  ;;  %v14130_v47 = vld [vmem:[%s15823_s1 + $0x6ec] ss:$48 sps:$4 sm:$0xff]   ;;  %v14125_v33 = vld [vmem:[%s15823_s1 + $0x6e0] ss:$48 sps:$4 sm:$0xff]  }
0x187b   : > { %8356 = vmatprep.subr.bf16.mxu0 %v14070_v50  ;;  %v14133_v50 = vld [vmem:[%s15823_s1 + $0x744] ss:$48 sps:$4 sm:$0xff]  }
0x187d   : > { %8251 = vmatpush1.bf16.msra.mxu1 %v14065_v36  ;;  %v14131_v36 = vld [vmem:[%s15823_s1 + $0x740] ss:$48 sps:$4 sm:$0xff]  }
0x187e   : > { %8357 = vmatpush1.bf16.msra.mxu0 %v14068_v31  ;;  %8252 = vmatprep.subr.bf16.mxu1 %v14073_v0  ;;  %v14134_v31 = vld [vmem:[%s15823_s1 + $0x748] ss:$48 sps:$4 sm:$0xff]   ;;  %v14139_v0 = vld [vmem:[%s15823_s1 + $0x7a4] ss:$48 sps:$4 sm:$0xff]  }
0x187f   : > { %8358 = vmatprep.subr.bf16.mxu0 %v14076_v53  ;;  %v14142_v53 = vld [vmem:[%s15823_s1 + $0x7ac] ss:$48 sps:$4 sm:$0xff]  }
0x1881   : > { %8253 = vmatpush1.bf16.msra.mxu1 %v14071_v16  ;;  %v14140_v16 = vld [vmem:[%s15823_s1 + $0x7a8] ss:$48 sps:$4 sm:$0xff]  }
0x1882   : > { %8359 = vmatpush1.bf16.msra.mxu0 %v14074_v51  ;;  %8254 = vmatprep.subr.bf16.mxu1 %v14079_v49  ;;  %v14145_v51 = vld [vmem:[%s15823_s1 + $0x804] ss:$48 sps:$4 sm:$0xff]   ;;  %v14148_v49 = vld [vmem:[%s15823_s1 + $0x80c] ss:$48 sps:$4 sm:$0xff]  }
0x1883   : > { %8360 = vmatprep.subr.bf16.mxu0 %v14082_v9  ;;  %v14143_v9 = vld [vmem:[%s15823_s1 + $0x800] ss:$48 sps:$4 sm:$0xff]  }
0x1885   : > { %8255 = vmatpush1.bf16.msra.mxu1 %v14077_v42  ;;  %v14146_v42 = vld [vmem:[%s15823_s1 + $0x808] ss:$48 sps:$4 sm:$0xff]  }
0x1886   : > { %8361 = vmatpush1.bf16.msra.mxu0 %v14080_v43  ;;  %8256 = vmatprep.subr.bf16.mxu1 %v14085_v5  ;;  %v14151_v43 = vld [vmem:[%s15823_s1 + $0x864] ss:$48 sps:$4 sm:$0xff]   ;;  %v14154_v5 = vld [vmem:[%s15823_s1 + $0x86c] ss:$48 sps:$4 sm:$0xff]  }
0x1887   : > { %8362 = vmatprep.subr.bf16.mxu0 %v14088_v2  ;;  %v14149_v2 = vld [vmem:[%s15823_s1 + $0x860] ss:$48 sps:$4 sm:$0xff]  }
0x1889   : > { %8257 = vmatpush1.bf16.msra.mxu1 %v14083_v34  ;;  %v14152_v34 = vld [vmem:[%s15823_s1 + $0x868] ss:$48 sps:$4 sm:$0xff]  }
0x188a   : > { %8363 = vmatpush1.bf16.msra.mxu0 %v14086_v52  ;;  %8258 = vmatprep.subr.bf16.mxu1 %v14091_v3  ;;  %v14157_v52 = vld [vmem:[%s15823_s1 + $0x8c4] ss:$48 sps:$4 sm:$0xff]   ;;  %v14160_v3 = vld [vmem:[%s15823_s1 + $0x8cc] ss:$48 sps:$4 sm:$0xff]  }
0x188b   : > { %8364 = vmatprep.subr.bf16.mxu0 %v14094_v56  ;;  %v14155_v56 = vld [vmem:[%s15823_s1 + $0x8c0] ss:$48 sps:$4 sm:$0xff]  }
0x188d   : > { %8259 = vmatpush1.bf16.msra.mxu1 %v14089_v12  ;;  %v14158_v12 = vld [vmem:[%s15823_s1 + $0x8c8] ss:$48 sps:$4 sm:$0xff]  }
0x188e   : > { %8365 = vmatpush1.bf16.msra.mxu0 %v14092_v44  ;;  %8260 = vmatprep.subr.bf16.mxu1 %v14097_v57  ;;  %v14163_v44 = vld [vmem:[%s15832_s16 + $0x4] ss:$12 sps:$4 sm:$0xff]   ;;  %v14164_v57 = vld [vmem:[%s15832_s16 + $0xc8] ss:$12 sps:$4 sm:$0xff]  }
0x188f   : > { %8366 = vmatprep.subr.bf16.mxu0 %v14100_v46  ;;  %v14161_v46 = vld [vmem:[%s15832_s16] ss:$12 sps:$4 sm:$0xff]  }
0x1891   : > { %8261 = vmatpush1.bf16.msra.mxu1 %v14095_v35  ;;  %v14165_v35 = vld [vmem:[%s15832_s16 + $0x8] ss:$12 sps:$4 sm:$0xff]  }
0x1892   : > { %8367 = vmatpush1.bf16.msra.mxu0 %v14098_v58  ;;  %8262 = vmatprep.subr.bf16.mxu1 %v14103_v27  ;;  %v14168_v58 = vld [vmem:[%s15832_s16 + $0x1c] ss:$12 sps:$4 sm:$0xff]   ;;  %v14169_v27 = vld [vmem:[%s15832_s16 + $0xe0] ss:$12 sps:$4 sm:$0xff]  }
0x1893   : > { %8368 = vmatprep.subr.bf16.mxu0 %v14106_v41  ;;  %v14166_v41 = vld [vmem:[%s15832_s16 + $0x18] ss:$12 sps:$4 sm:$0xff]  }
0x1895   : > { %8263 = vmatpush1.bf16.msra.mxu1 %v14101_v23  ;;  %v14170_v23 = vld [vmem:[%s15832_s16 + $0x20] ss:$12 sps:$4 sm:$0xff]  }
0x1896   : > { %8369 = vmatpush1.bf16.msra.mxu0 %v14104_v39  ;;  %8264 = vmatprep.subr.bf16.mxu1 %v14109_v11  ;;  %v14173_v39 = vld [vmem:[%s15832_s16 + $0x34] ss:$12 sps:$4 sm:$0xff]   ;;  %v14174_v11 = vld [vmem:[%s15832_s16 + $0xf8] ss:$12 sps:$4 sm:$0xff]  }
0x1897   : > { %8370 = vmatprep.subr.bf16.mxu0 %v14112_v19  ;;  %v14171_v19 = vld [vmem:[%s15832_s16 + $0x30] ss:$12 sps:$4 sm:$0xff]  }
0x1899   : > { %8265 = vmatpush1.bf16.msra.mxu1 %v14107_v28  ;;  %v14178_v28 = vld [vmem:[%s15832_s16 + $0x4c] ss:$12 sps:$4 sm:$0xff]  }
0x189a   : > { %8371 = vmatpush1.bf16.msra.mxu0 %v14110_v55  ;;  %8287 = vmatprep.subr.bf16.mxu1 %v14115_v17  ;;  %v14179_v55 = vld [vmem:[%s15832_s16 + $0x110] ss:$12 sps:$4 sm:$0xff]   ;;  %v14176_v17 = vld [vmem:[%s15832_s16 + $0x48] ss:$12 sps:$4 sm:$0xff]  }
0x189b   : > { %8393 = vmatprep.subr.bf16.mxu0 %v14118_v6  ;;  %v14183_v6 = vld [vmem:[%s15832_s16 + $0x64] ss:$12 sps:$4 sm:$0xff]  }
0x189c   : > { %8267 = vmatmul.mubr.bf16.vlgmr.msra.gmra.mrb[96].mxu1 %v16882_v10 }
0x189d   : > { %8373 = vmatmul.mubr.bf16.vlgmr.msra.gmra.mrb[112].mxu0 %v16882_v10  ;;  %8276 = vmatprep.mubr.bf16.mxu1 %v16890_v20  ;;  %v14128_v10 = vld [vmem:[%s15823_s1 + $0x6e8] ss:$48 sps:$4 sm:$0xff]  }
0x189e   : > { %8288 = vmatpush1.bf16.msra.mxu1 %v14113_v15  ;;  %8382 = vmatprep.mubr.bf16.mxu0 %v16890_v20  ;;  %v14136_v20 = vld [vmem:[%s15823_s1 + $0x74c] ss:$48 sps:$4 sm:$0xff]  }
0x189f   : > { %8394 = vmatpush1.bf16.msra.mxu0 %v14116_v54  ;;  %8289 = vmatprep.subr.bf16.mxu1 %v14121_v59  ;;  %v14184_v15 = vld [vmem:[%s15832_s16 + $0x128] ss:$12 sps:$4 sm:$0xff]   ;;  %v6324_v59 = vsub.s32 3, %v15980_v7 }
0x18a0   : > { %8395 = vmatprep.subr.bf16.mxu0 %v14124_v1  ;;  %v17191_v54 = vld [vmem:[%s15826_s2] sm:$0xff] }
0x18a1   : > { %v14181_v1 = vld [vmem:[%s15832_s16 + $0x60] ss:$12 sps:$4 sm:$0xff]  }
0x18a2   : > { %8290 = vmatpush1.bf16.msra.mxu1 %v14119_v61  ;;  %v17198_v61 = vrot.slane %v17191_v54, %v15991_v22 }
0x18a3   : > { %8396 = vmatpush1.bf16.msra.mxu0 %v14122_v8  ;;  %8291 = vmatprep.subr.bf16.mxu1 %v14127_v48  ;;  %v17202_v8 = vrot.slane %v17191_v54, %v15988_v18  ;;  %v14188_v48 = vld [vmem:[%s15832_s16 + $0x7c] ss:$12 sps:$4 sm:$0xff]  }
0x18a4   : > { %8277 = vmatmul.mubr.bf16.gmra.mrb[100].mxu1 %v16900_v4  ;;  %8397 = vmatprep.subr.bf16.mxu0 %v14130_v47  ;;  %v17207_v47 = vrot.slane %v17191_v54, %v15985_v13 }
0x18a5   : > { %8383 = vmatmul.mubr.bf16.gmra.mrb[116].mxu0 %v16900_v4  ;;  %8319 = vmatprep.mubr.bf16.mxu1 %v15178_v25  ;;  %v14137_v4 = vld [vmem:[%s15823_s1 + $0x7a0] ss:$48 sps:$4 sm:$0xff]  }
0x18a6   : > { %8292 = vmatpush1.bf16.msra.mxu1 %v14125_v33  ;;  %8425 = vmatprep.mubr.bf16.mxu0 %v15178_v25  ;;  %v17212_v33 = vrot.slane %v17191_v54, %v6324_v59 }
0x18a7   : > { %8398 = vmatpush1.bf16.msra.mxu0 %v14128_v10  ;;  %8293 = vmatprep.subr.bf16.mxu1 %v14133_v50  ;;  %v14189_v10 = vld [vmem:[%s15832_s16 + $0x140] ss:$12 sps:$4 sm:$0xff]  }
0x18a8   : > { %8399 = vmatprep.subr.bf16.mxu0 %v14136_v20 }
0x18aa   : > { %8294 = vmatpush1.bf16.msra.mxu1 %v14131_v36  ;;  %v14186_v36 = vld [vmem:[%s15832_s16 + $0x78] ss:$12 sps:$4 sm:$0xff]  }
0x18ab   : > { %8400 = vmatpush1.bf16.msra.mxu0 %v14134_v31  ;;  %8295 = vmatprep.subr.bf16.mxu1 %v14139_v0 }
0x18ac   : > { %8401 = vmatprep.subr.bf16.mxu0 %v14142_v53 }
0x18ae   : > { %8296 = vmatpush1.bf16.msra.mxu1 %v14137_v4 }
0x18af   : > { %8402 = vmatpush1.bf16.msra.mxu0 %v14140_v16  ;;  %8297 = vmatprep.subr.bf16.mxu1 %v14145_v51  ;;  %v14190_v16 = vld [vmem:[%s15832_s16 + $0x80] ss:$12 sps:$4 sm:$0xff]  }
0x18b0   : > { %8403 = vmatprep.subr.bf16.mxu0 %v14148_v49  ;;  %v14193_v51 = vld [vmem:[%s15832_s16 + $0x94] ss:$12 sps:$4 sm:$0xff]  }
0x18b2   : > { %8298 = vmatpush1.bf16.msra.mxu1 %v14143_v9 }
0x18b3   : > { %8404 = vmatpush1.bf16.msra.mxu0 %v14146_v42  ;;  %8299 = vmatprep.subr.bf16.mxu1 %v14151_v43 }
0x18b4   : > { %8405 = vmatprep.subr.bf16.mxu0 %v14154_v5  ;;  %v14194_v5 = vld [vmem:[%s15832_s16 + $0x158] ss:$12 sps:$4 sm:$0xff]  }
0x18b6   : > { %8300 = vmatpush1.bf16.msra.mxu1 %v14149_v2 }
0x18b7   : > { %8406 = vmatpush1.bf16.msra.mxu0 %v14152_v34  ;;  %8301 = vmatprep.subr.bf16.mxu1 %v14157_v52 }
0x18b8   : > { %8407 = vmatprep.subr.bf16.mxu0 %v14160_v3 }
0x18ba   : > { %8302 = vmatpush1.bf16.msra.mxu1 %v14155_v56 }
0x18bb   : > { %8408 = vmatpush1.bf16.msra.mxu0 %v14158_v12  ;;  %10455 = vmatprep.subr.bf16.mxu1 %v14163_v44  ;;  %v14191_v44 = vld [vmem:[%s15832_s16 + $0x90] ss:$12 sps:$4 sm:$0xff]  }
0x18bc   : > { %12554 = vmatprep.subr.bf16.mxu0 %v14164_v57  ;;  %v14195_v57 = vld [vmem:[%s15832_s16 + $0x98] ss:$12 sps:$4 sm:$0xff]  }
0x18bd   : > { %8320 = vmatmul.mubr.bf16.vlgmr.msra.gmra.mrb[96].mxu1 %v16942_v63 }
0x18be   : > { %8426 = vmatmul.mubr.bf16.vlgmr.msra.gmra.mrb[112].mxu0 %v16942_v63  ;;  %10456 = vmatpush1.bf16.msra.mxu1 %v14161_v46  ;;  %v14175_v63 = vld [vmem:[%s15832_s16 + $0x38] ss:$12 sps:$4 sm:$0xff]  }
0x18bf   : > { %12555 = vmatpush3.bf16.msra.mxu0 %v14165_v35  ;;  %10457 = vmatprep.subr.bf16.mxu1 %v14168_v58 }
0x18c0   : > { %12556 = vmatprep.subr.bf16.mxu0 %v14169_v27  ;;  %8329 = vmatprep.mubr.bf16.mxu1 %v15178_v25 }
0x18c1   : > { %8435 = vmatprep.mubr.bf16.mxu0 %v15178_v25  ;;  %v14180_v25 = vld [vmem:[%s15832_s16 + $0x50] ss:$12 sps:$4 sm:$0xff]  }
0x18c2   : > { %10458 = vmatpush1.bf16.msra.mxu1 %v14166_v41  ;;  %v14198_v41 = vld [vmem:[%s15832_s16 + $0xac] ss:$12 sps:$4 sm:$0xff]  }
0x18c3   : > { %12557 = vmatpush3.bf16.msra.mxu0 %v14170_v23  ;;  %10459 = vmatprep.subr.bf16.mxu1 %v14173_v39 }
0x18c4   : > { %12558 = vmatprep.subr.bf16.mxu0 %v14174_v11 }
0x18c5   : > { %8330 = vmatmul.mubr.bf16.gmra.mrb[100].mxu1 %v16955_v40 }
0x18c6   : > { %8436 = vmatmul.mubr.bf16.gmra.mrb[116].mxu0 %v16955_v40  ;;  %10460 = vmatpush1.bf16.msra.mxu1 %v14171_v19  ;;  %v14185_v40 = vld [vmem:[%s15832_s16 + $0x68] ss:$12 sps:$4 sm:$0xff]  }
0x18c7   : > { %12559 = vmatpush3.bf16.msra.mxu0 %v14175_v63  ;;  %10461 = vmatprep.subr.bf16.mxu1 %v14178_v28  ;;  %v14199_v63 = vld [vmem:[%s15832_s16 + $0x170] ss:$12 sps:$4 sm:$0xff]  }
0x18c8   : > { %12560 = vmatprep.subr.bf16.mxu0 %v14179_v55 }
0x18ca   : > { %10462 = vmatpush1.bf16.msra.mxu1 %v14176_v17 }
0x18cb   : > { %12561 = vmatpush3.bf16.msra.mxu0 %v14180_v25  ;;  %10463 = vmatprep.subr.bf16.mxu1 %v14183_v6 }
0x18cc   : > { %12562 = vmatprep.subr.bf16.mxu0 %v14184_v15 }
0x18ce   : > { %10464 = vmatpush1.bf16.msra.mxu1 %v14181_v1  ;;  %v7897_v50 = vpop.f32.mrb[80].mxu1  ;;  %v8003_v20 = vpop.f32.mrb[96].mxu0  ;;  %v14196_v1 = vld [vmem:[%s15832_s16 + $0xa8] ss:$12 sps:$4 sm:$0xff]  }
0x18cf   : > { %12563 = vmatpush3.bf16.msra.mxu0 %v14185_v40  ;;  %v13006_v31 = vadd.f32 %v7897_v50, %v17198_v61  ;;  %v13014_v0 = vadd.f32 %v8003_v20, %v17202_v8  ;;  %v7899_v53 = vpop.f32.mrb[81].mxu1  ;;  %v8005_v4 = vpop.f32.mrb[97].mxu0  ;;  %10465 = vmatprep.subr.bf16.mxu1 %v14188_v48  ;;  %v14200_v20 = vld [vmem:[%s15832_s16 + $0xb0] ss:$12 sps:$4 sm:$0xff]  }
0x18d0   : > { %v13007_v49 = vadd.f32 %v7899_v53, %v17207_v47  ;;  %v13015_v9 = vadd.f32 %v8005_v4, %v17212_v33  ;;  %12564 = vmatprep.subr.bf16.mxu0 %v14189_v10  ;;  %v7901_v42 = vpop.f32.mrb[82].mxu1  ;;  %v8007_v43 = vpop.f32.mrb[98].mxu0 }
0x18d1   : > { %v13008_v2 = vadd.f32 %v7901_v42, %v17198_v61  ;;  %v13016_v34 = vadd.f32 %v8007_v43, %v17202_v8  ;;  %v7903_v52 = vpop.f32.mrb[83].mxu1  ;;  %v8009_v3 = vpop.f32.mrb[99].mxu0  ;;  %v8446_v46 = vmax.f32 %v13006_v31, 0.0  ;;  %v8448_v35 = vmax.f32 %v13014_v0, 0.0 }
0x18d2   : > { %10466 = vmatpush1.bf16.msra.mxu1 %v14186_v36  ;;  %v13009_v56 = vadd.f32 %v7903_v52, %v17207_v47  ;;  %v13017_v12 = vadd.f32 %v8009_v3, %v17212_v33  ;;  %v8447_v23 = vmax.f32 %v13007_v49, 0.0  ;;  %v8449_v39 = vmax.f32 %v13015_v9, 0.0  ;;  %v14203_v36 = vld [vmem:[%s15832_s16 + $0xc4] ss:$12 sps:$4 sm:$0xff]  }
0x18d3   : > { %v8458_v58 = vmax.f32 %v13008_v2, 0.0  ;;  %v8460_v27 = vmax.f32 %v13016_v34, 0.0  ;;  %12565 = vmatpush3.bf16.msra.mxu0 %v14190_v16  ;;  %10467 = vmatprep.subr.bf16.mxu1 %v14193_v51  ;;  %v14204_v16 = vld [vmem:[%s15832_s16 + $0x248] ss:$12 sps:$4 sm:$0xff]   ;;  %v14201_v2 = vld [vmem:[%s15832_s16 + $0xc0] ss:$12 sps:$4 sm:$0xff]  }
0x18d4   : > { %v8459_v11 = vmax.f32 %v13009_v56, 0.0  ;;  %v8461_v19 = vmax.f32 %v13017_v12, 0.0  ;;  %12566 = vmatprep.subr.bf16.mxu0 %v14194_v5  ;;  %v14205_v34 = vld [vmem:[%s15832_s16 + $0x188] ss:$12 sps:$4 sm:$0xff]  }
0x18d5   : > { %v17231_v28 = vpack.c.bf16 %v8458_v58, %v8446_v46  ;;  %v17233_v55 = vpack.c.bf16 %v8460_v27, %v8448_v35 }
0x18d6   : > { %v8495_v17 = vpack.c.bf16 %v8459_v11, %v8447_v23  ;;  %v17235_v25 = vpack.c.bf16 %v8461_v19, %v8449_v39  ;;  %10468 = vmatpush1.bf16.msra.mxu1 %v14191_v44  ;;  %v7907_v6 = vpop.f32.mrb[84].mxu1  ;;  %v8013_v15 = vpop.f32.mrb[100].mxu0  ;;  %v14210_v23 = vld [vmem:[%s15832_s16 + $0x1a0] ss:$12 sps:$4 sm:$0xff]   ;;  %v14214_v11 = vld [vmem:[%s15832_s16 + $0x278] ss:$12 sps:$4 sm:$0xff]  }
0x18d7   : > { %12567 = vmatpush3.bf16.msra.mxu0 %v14195_v57  ;;  %v13010_v40 = vadd.f32 %v7907_v6, %v17198_v61  ;;  %v13018_v48 = vadd.f32 %v8013_v15, %v17202_v8  ;;  %v7909_v10 = vpop.f32.mrb[85].mxu1  ;;  %v8015_v50 = vpop.f32.mrb[101].mxu0  ;;  %10469 = vmatprep.subr.bf16.mxu1 %v14198_v41  ;;  %v14206_v41 = vld [vmem:[%s15832_s16 + $0xd8] ss:$12 sps:$4 sm:$0xff]   ;;  %v14213_v39 = vld [vmem:[%s15832_s16 + $0xf4] ss:$12 sps:$4 sm:$0xff]  }
0x18d8   : > { %v13011_v31 = vadd.f32 %v7909_v10, %v17207_v47  ;;  %v13019_v0 = vadd.f32 %v8015_v50, %v17212_v33  ;;  %12568 = vmatprep.subr.bf16.mxu0 %v14199_v63  ;;  %v7911_v53 = vpop.f32.mrb[86].mxu1  ;;  %v8017_v4 = vpop.f32.mrb[102].mxu0  ;;  %10487 = vmatprep.mubr.bf16.mxu1 %v8495_v17  ;;  %v14211_v19 = vld [vmem:[%s15832_s16 + $0xf0] ss:$12 sps:$4 sm:$0xff]   ;;  %v14215_v63 = vld [vmem:[%s15832_s16 + $0x1b8] ss:$12 sps:$4 sm:$0xff]  }
0x18d9   : > { %v13012_v51 = vadd.f32 %v7911_v53, %v17198_v61  ;;  %v13020_v49 = vadd.f32 %v8017_v4, %v17202_v8  ;;  %10805 = vmatprep.mubr.bf16.mxu0 %v8495_v17  ;;  %v7913_v9 = vpop.f32.mrb[87].mxu1  ;;  %v8019_v42 = vpop.f32.mrb[103].mxu0  ;;  %v8470_v52 = vmax.f32 %v13010_v40, 0.0  ;;  %v8472_v3 = vmax.f32 %v13018_v48, 0.0  ;;  %v14208_v61 = vld [vmem:[%s15832_s16 + $0xdc] ss:$12 sps:$4 sm:$0xff]  }
0x18da   : > { %10470 = vmatpush1.bf16.msra.mxu1 %v14196_v1  ;;  %v13013_v43 = vadd.f32 %v7913_v9, %v17207_v47  ;;  %v13021_v5 = vadd.f32 %v8019_v42, %v17212_v33  ;;  %v8471_v8 = vmax.f32 %v13011_v31, 0.0  ;;  %v8473_v44 = vmax.f32 %v13019_v0, 0.0  ;;  %v14209_v47 = vld [vmem:[%s15832_s16 + $0x260] ss:$12 sps:$4 sm:$0xff]   ;;  %v14219_v6 = vld [vmem:[%s15832_s16 + $0x290] ss:$12 sps:$4 sm:$0xff]  }
0x18db   : > { %v8482_v56 = vmax.f32 %v13012_v51, 0.0  ;;  %v8484_v12 = vmax.f32 %v13020_v49, 0.0  ;;  %12569 = vmatpush3.bf16.msra.mxu0 %v14200_v20  ;;  %10471 = vmatprep.subr.bf16.mxu1 %v14203_v36  ;;  %v14218_v17 = vld [vmem:[%s15832_s16 + $0x10c] ss:$12 sps:$4 sm:$0xff]   ;;  %v14216_v15 = vld [vmem:[%s15832_s16 + $0x108] ss:$12 sps:$4 sm:$0xff]  }
0x18dc   : > { %v8483_v57 = vmax.f32 %v13013_v43, 0.0  ;;  %v8485_v46 = vmax.f32 %v13021_v5, 0.0  ;;  %12582 = vmatprep.subr.bf16.mxu0 %v14204_v16  ;;  %v14220_v1 = vld [vmem:[%s15832_s16 + $0x1d0] ss:$12 sps:$4 sm:$0xff]   ;;  %v14224_v48 = vld [vmem:[%s15832_s16 + $0x2a8] ss:$12 sps:$4 sm:$0xff]  }
0x18dd   : > { %v17253_v33 = vpack.c.bf16 %v8482_v56, %v8470_v52  ;;  %v17255_v35 = vpack.c.bf16 %v8484_v12, %v8472_v3  ;;  %v14223_v40 = vld [vmem:[%s15832_s16 + $0x124] ss:$12 sps:$4 sm:$0xff]   ;;  %v14221_v10 = vld [vmem:[%s15832_s16 + $0x120] ss:$12 sps:$4 sm:$0xff]   ;;  %v14225_v50 = vld [vmem:[%s15832_s16 + $0x1e8] ss:$12 sps:$4 sm:$0xff]  }
0x18de   : > { %v17257_v58 = vpack.c.bf16 %v8483_v57, %v8471_v8  ;;  %v17259_v27 = vpack.c.bf16 %v8485_v46, %v8473_v44  ;;  %10806 = vmatmul.mubr.bf16.vlgmr.msra.gmra.mrb[120].mxu0 %v17231_v28  ;;  %10472 = vmatpush1.bf16.msra.mxu1 %v14201_v2  ;;  %v14228_v20 = vld [vmem:[%s15832_s16 + $0x13c] ss:$12 sps:$4 sm:$0xff]   ;;  %v14229_v36 = vld [vmem:[%s15832_s16 + $0x2c0] ss:$12 sps:$4 sm:$0xff]   ;;  %v14226_v31 = vld [vmem:[%s15832_s16 + $0x138] ss:$12 sps:$4 sm:$0xff]  }
0x18df   : > { %12583 = vmatpush3.bf16.msra.mxu0 %v14205_v34  ;;  %10473 = vmatprep.subr.bf16.mxu1 %v14208_v61  ;;  %v14230_v0 = vld [vmem:[%s15832_s16 + $0x200] ss:$12 sps:$4 sm:$0xff]   ;;  %v14234_v4 = vld [vmem:[%s15832_s16 + $0x2d8] ss:$12 sps:$4 sm:$0xff]   ;;  %v14231_v16 = vld [vmem:[%s15832_s16 + $0x150] ss:$12 sps:$4 sm:$0xff]  }
0x18e0   : > { %12584 = vmatprep.subr.bf16.mxu0 %v14209_v47  ;;  %10813 = vmatprep.mubr.bf16.mxu0 %v17257_v58  ;;  %v14233_v53 = vld [vmem:[%s15832_s16 + $0x154] ss:$12 sps:$4 sm:$0xff]   ;;  %v14235_v51 = vld [vmem:[%s15832_s16 + $0x218] ss:$12 sps:$4 sm:$0xff]   ;;  %v14239_v9 = vld [vmem:[%s15832_s16 + $0x2f0] ss:$12 sps:$4 sm:$0xff]  }
0x18e1   : > { %v14238_v49 = vld [vmem:[%s15832_s16 + $0x16c] ss:$12 sps:$4 sm:$0xff]   ;;  %v14236_v42 = vld [vmem:[%s15832_s16 + $0x168] ss:$12 sps:$4 sm:$0xff]   ;;  %v14240_v43 = vld [vmem:[%s15832_s16 + $0x230] ss:$12 sps:$4 sm:$0xff]  }
0x18e2   : > { %10474 = vmatpush1.bf16.msra.mxu1 %v14206_v41  ;;  %v14243_v5 = vld [vmem:[%s15832_s16 + $0x184] ss:$12 sps:$4 sm:$0xff]   ;;  %v14265_v2 = vld [vmem:[%s15832_s16 + $0x3c8] ss:$12 sps:$4 sm:$0xff]   ;;  %v14241_v34 = vld [vmem:[%s15832_s16 + $0x180] ss:$12 sps:$4 sm:$0xff]  }
0x18e3   : > { %12585 = vmatpush3.bf16.msra.mxu0 %v14210_v23  ;;  %10475 = vmatprep.subr.bf16.mxu1 %v14213_v39  ;;  %v14246_v52 = vld [vmem:[%s15832_s16 + $0x19c] ss:$12 sps:$4 sm:$0xff]   ;;  %v14270_v56 = vld [vmem:[%s15832_s16 + $0x3e0] ss:$12 sps:$4 sm:$0xff]   ;;  %v14244_v12 = vld [vmem:[%s15832_s16 + $0x198] ss:$12 sps:$4 sm:$0xff]  }
0x18e4   : > { %12586 = vmatprep.subr.bf16.mxu0 %v14214_v11  ;;  %v14266_v3 = vld [vmem:[%s15832_s16 + $0x308] ss:$12 sps:$4 sm:$0xff]   ;;  %v14271_v8 = vld [vmem:[%s15832_s16 + $0x320] ss:$12 sps:$4 sm:$0xff]   ;;  %v14247_v44 = vld [vmem:[%s15832_s16 + $0x1b0] ss:$12 sps:$4 sm:$0xff]  }
0x18e5   : > { %v14249_v61 = vld [vmem:[%s15832_s16 + $0x1b4] ss:$12 sps:$4 sm:$0xff]   ;;  %v14252_v57 = vld [vmem:[%s15832_s16 + $0x1cc] ss:$12 sps:$4 sm:$0xff]   ;;  %v14280_v47 = vld [vmem:[%s15832_s16 + $0x410] ss:$12 sps:$4 sm:$0xff]  }
0x18e6   : > { %10814 = vmatmul.mubr.bf16.gmra.mrb[124].mxu0 %v17253_v33  ;;  %10476 = vmatpush1.bf16.msra.mxu1 %v14211_v19  ;;  %v14276_v46 = vld [vmem:[%s15832_s16 + $0x338] ss:$12 sps:$4 sm:$0xff]   ;;  %v14281_v23 = vld [vmem:[%s15832_s16 + $0x350] ss:$12 sps:$4 sm:$0xff]   ;;  %v14253_v39 = vld [vmem:[%s15832_s16 + $0x1e0] ss:$12 sps:$4 sm:$0xff]  }
0x18e7   : > { %12587 = vmatpush3.bf16.msra.mxu0 %v14215_v63  ;;  %10854 = vmatprep.mubr.bf16.mxu0 %v17235_v25  ;;  %v14255_v41 = vld [vmem:[%s15832_s16 + $0x1e4] ss:$12 sps:$4 sm:$0xff]   ;;  %v14258_v11 = vld [vmem:[%s15832_s16 + $0x1fc] ss:$12 sps:$4 sm:$0xff]   ;;  %v14290_v19 = vld [vmem:[%s15832_s16 + $0x440] ss:$12 sps:$4 sm:$0xff]  }
0x18e8   : > { %10477 = vmatprep.subr.bf16.mxu1 %v14218_v17  ;;  %12588 = vmatprep.subr.bf16.mxu0 %v14219_v6  ;;  %v14256_v63 = vld [vmem:[%s15832_s16 + $0x1f8] ss:$12 sps:$4 sm:$0xff]   ;;  %v14261_v17 = vld [vmem:[%s15832_s16 + $0x214] ss:$12 sps:$4 sm:$0xff]  }
0x18e9   : > { %v14291_v6 = vld [vmem:[%s15832_s16 + $0x380] ss:$12 sps:$4 sm:$0xff]  }
0x18ea   : > { %10478 = vmatpush1.bf16.msra.mxu1 %v14216_v15  ;;  %v14295_v15 = vld [vmem:[%s15832_s16 + $0x458] ss:$12 sps:$4 sm:$0xff]  }
0x18eb   : > { %12589 = vmatpush3.bf16.msra.mxu0 %v14220_v1  ;;  %10479 = vmatprep.subr.bf16.mxu1 %v14223_v40  ;;  %v14259_v1 = vld [vmem:[%s15832_s16 + $0x210] ss:$12 sps:$4 sm:$0xff]   ;;  %v14264_v40 = vld [vmem:[%s15832_s16 + $0x22c] ss:$12 sps:$4 sm:$0xff]  }
0x18ec   : > { %12590 = vmatprep.subr.bf16.mxu0 %v14224_v48  ;;  %v14296_v48 = vld [vmem:[%s15832_s16 + $0x398] ss:$12 sps:$4 sm:$0xff]  }
0x18ee   : > { %10480 = vmatpush1.bf16.msra.mxu1 %v14221_v10  ;;  %v14300_v10 = vld [vmem:[%s15832_s16 + $0x470] ss:$12 sps:$4 sm:$0xff]  }
0x18ef   : > { %12591 = vmatpush3.bf16.msra.mxu0 %v14225_v50  ;;  %10481 = vmatprep.subr.bf16.mxu1 %v14228_v20  ;;  %v14262_v50 = vld [vmem:[%s15832_s16 + $0x228] ss:$12 sps:$4 sm:$0xff]   ;;  %v14269_v20 = vld [vmem:[%s15832_s16 + $0x244] ss:$12 sps:$4 sm:$0xff]  }
0x18f0   : > { %12592 = vmatprep.subr.bf16.mxu0 %v14229_v36  ;;  %v14301_v36 = vld [vmem:[%s15832_s16 + $0x3b0] ss:$12 sps:$4 sm:$0xff]  }
0x18f2   : > { %10482 = vmatpush1.bf16.msra.mxu1 %v14226_v31  ;;  %v14305_v31 = vld [vmem:[%s15832_s16 + $0x548] ss:$12 sps:$4 sm:$0xff]  }
0x18f3   : > { %12593 = vmatpush3.bf16.msra.mxu0 %v14230_v0  ;;  %10483 = vmatprep.subr.bf16.mxu1 %v14233_v53  ;;  %v14267_v0 = vld [vmem:[%s15832_s16 + $0x240] ss:$12 sps:$4 sm:$0xff]   ;;  %v14274_v53 = vld [vmem:[%s15832_s16 + $0x25c] ss:$12 sps:$4 sm:$0xff]  }
0x18f4   : > { %12594 = vmatprep.subr.bf16.mxu0 %v14234_v4  ;;  %v14272_v4 = vld [vmem:[%s15832_s16 + $0x258] ss:$12 sps:$4 sm:$0xff]  }
0x18f6   : > { %10484 = vmatpush1.bf16.msra.mxu1 %v14231_v16  ;;  %v14279_v16 = vld [vmem:[%s15832_s16 + $0x274] ss:$12 sps:$4 sm:$0xff]  }
0x18f7   : > { %12595 = vmatpush3.bf16.msra.mxu0 %v14235_v51  ;;  %10485 = vmatprep.subr.bf16.mxu1 %v14238_v49  ;;  %v14277_v51 = vld [vmem:[%s15832_s16 + $0x270] ss:$12 sps:$4 sm:$0xff]   ;;  %v14284_v49 = vld [vmem:[%s15832_s16 + $0x28c] ss:$12 sps:$4 sm:$0xff]  }
0x18f8   : > { %12596 = vmatprep.subr.bf16.mxu0 %v14239_v9  ;;  %v14282_v9 = vld [vmem:[%s15832_s16 + $0x288] ss:$12 sps:$4 sm:$0xff]  }
0x18fa   : > { %10486 = vmatpush1.bf16.msra.mxu1 %v14236_v42  ;;  %v14289_v42 = vld [vmem:[%s15832_s16 + $0x2a4] ss:$12 sps:$4 sm:$0xff]  }
0x18fb   : > { %12597 = vmatpush3.bf16.msra.mxu0 %v14240_v43  ;;  %10508 = vmatprep.subr.bf16.mxu1 %v14243_v5  ;;  %v6328_v43 = vsub.s32 4, %v15980_v7  ;;  %v6336_v5 = vsub.s32 6, %v15980_v7 }
0x18fc   : > { %12610 = vmatprep.subr.bf16.mxu0 %v14265_v2  ;;  %v6332_v2 = vsub.s32 5, %v15980_v7 }
0x18fd   : > { %10488 = vmatmul.mubr.bf16.vlgmr.msra.gmra.mrb[104].mxu1 %v17231_v28  ;;  %v14275_v28 = vld [vmem:[%s15832_s16 + $0x3f8] ss:$12 sps:$4 sm:$0xff]  }
0x18fe   : > { %10855 = vmatmul.mubr.bf16.vlgmr.msra.gmra.mrb[128].mxu0 %v17233_v55  ;;  %10497 = vmatprep.mubr.bf16.mxu1 %v17257_v58  ;;  %v14250_v58 = vld [vmem:[%s15832_s16 + $0x1c8] ss:$12 sps:$4 sm:$0xff]  }
0x18ff   : > { %10509 = vmatpush1.bf16.msra.mxu1 %v14241_v34  ;;  %10862 = vmatprep.mubr.bf16.mxu0 %v17259_v27  ;;  %v6340_v34 = vsub.s32 7, %v15980_v7 }
0x1900   : > { %10510 = vmatprep.subr.bf16.mxu1 %v14246_v52  ;;  %12611 = vmatpush3.bf16.msra.mxu0 %v14266_v3  ;;  %v14287_v52 = vld [vmem:[%s15832_s16 + $0x2a0] ss:$12 sps:$4 sm:$0xff]   ;;  %v6329_v3 = vrot.slane %v17191_v54, %v6328_v43 }
0x1901   : > { %12612 = vmatprep.subr.bf16.mxu0 %v14270_v56  ;;  %v14294_v56 = vld [vmem:[%s15832_s16 + $0x2bc] ss:$12 sps:$4 sm:$0xff]  }
0x1903   : > { %10511 = vmatpush1.bf16.msra.mxu1 %v14244_v12  ;;  %v6337_v12 = vrot.slane %v17191_v54, %v6336_v5 }
0x1904   : > { %10512 = vmatprep.subr.bf16.mxu1 %v14249_v61  ;;  %12613 = vmatpush3.bf16.msra.mxu0 %v14271_v8  ;;  %v6333_v61 = vrot.slane %v17191_v54, %v6332_v2  ;;  %v17350_v8 = vrot.slane %v17191_v54, %v6340_v34 }
0x1905   : > { %10498 = vmatmul.mubr.bf16.gmra.mrb[108].mxu1 %v17253_v33  ;;  %12614 = vmatprep.subr.bf16.mxu0 %v14275_v28  ;;  %v14285_v33 = vld [vmem:[%s15832_s16 + $0x428] ss:$12 sps:$4 sm:$0xff]  }
0x1906   : > { %10863 = vmatmul.mubr.bf16.gmra.mrb[132].mxu0 %v17255_v35  ;;  %10540 = vmatprep.mubr.bf16.mxu1 %v17235_v25  ;;  %v14286_v25 = vld [vmem:[%s15832_s16 + $0x368] ss:$12 sps:$4 sm:$0xff]  }
0x1907   : > { %10513 = vmatpush1.bf16.msra.mxu1 %v14247_v44  ;;  %v14292_v44 = vld [vmem:[%s15832_s16 + $0x2b8] ss:$12 sps:$4 sm:$0xff]  }
0x1908   : > { %10514 = vmatprep.subr.bf16.mxu1 %v14252_v57  ;;  %12615 = vmatpush3.bf16.msra.mxu0 %v14276_v46 }
0x1909   : > { %12616 = vmatprep.subr.bf16.mxu0 %v14280_v47 }
0x190b   : > { %10515 = vmatpush1.bf16.msra.mxu1 %v14250_v58  ;;  %v14299_v58 = vld [vmem:[%s15832_s16 + $0x2d4] ss:$12 sps:$4 sm:$0xff]  }
0x190c   : > { %10516 = vmatprep.subr.bf16.mxu1 %v14255_v41  ;;  %12617 = vmatpush3.bf16.msra.mxu0 %v14281_v23 }
0x190d   : > { %12618 = vmatprep.subr.bf16.mxu0 %v14285_v33 }
0x190f   : > { %10517 = vmatpush1.bf16.msra.mxu1 %v14253_v39 }
0x1910   : > { %10518 = vmatprep.subr.bf16.mxu1 %v14258_v11  ;;  %12619 = vmatpush3.bf16.msra.mxu0 %v14286_v25 }
0x1911   : > { %12620 = vmatprep.subr.bf16.mxu0 %v14290_v19 }
0x1913   : > { %10519 = vmatpush1.bf16.msra.mxu1 %v14256_v63 }
0x1914   : > { %10520 = vmatprep.subr.bf16.mxu1 %v14261_v17  ;;  %12621 = vmatpush3.bf16.msra.mxu0 %v14291_v6 }
0x1915   : > { %12622 = vmatprep.subr.bf16.mxu0 %v14295_v15  ;;  %v14297_v15 = vld [vmem:[%s15832_s16 + $0x2d0] ss:$12 sps:$4 sm:$0xff]  }
0x1917   : > { %10521 = vmatpush1.bf16.msra.mxu1 %v14259_v1 }
0x1918   : > { %10522 = vmatprep.subr.bf16.mxu1 %v14264_v40  ;;  %12623 = vmatpush3.bf16.msra.mxu0 %v14296_v48 }
0x1919   : > { %12624 = vmatprep.subr.bf16.mxu0 %v14300_v10  ;;  %v14304_v10 = vld [vmem:[%s15832_s16 + $0x2ec] ss:$12 sps:$4 sm:$0xff]  }
0x191b   : > { %10523 = vmatpush1.bf16.msra.mxu1 %v14262_v50 }
0x191c   : > { %10524 = vmatprep.subr.bf16.mxu1 %v14269_v20  ;;  %12625 = vmatpush3.bf16.msra.mxu0 %v14301_v36 }
0x191d   : > { %12638 = vmatprep.subr.bf16.mxu0 %v14305_v31 }
0x191f   : > { %10525 = vmatpush1.bf16.msra.mxu1 %v14267_v0 }
0x1920   : > { %10526 = vmatprep.subr.bf16.mxu1 %v14274_v53 }
0x1923   : > { %10527 = vmatpush1.bf16.msra.mxu1 %v14272_v4 }
0x1924   : > { %10528 = vmatprep.subr.bf16.mxu1 %v14279_v16 }
0x1927   : > { %10529 = vmatpush1.bf16.msra.mxu1 %v14277_v51 }
0x1928   : > { %10530 = vmatprep.subr.bf16.mxu1 %v14284_v49 }
0x192b   : > { %10531 = vmatpush1.bf16.msra.mxu1 %v14282_v9  ;;  %v14302_v9 = vld [vmem:[%s15832_s16 + $0x2e8] ss:$12 sps:$4 sm:$0xff]  }
0x192c   : > { %10532 = vmatprep.subr.bf16.mxu1 %v14289_v42  ;;  %v14306_v42 = vld [vmem:[%s15832_s16 + $0x488] ss:$12 sps:$4 sm:$0xff]  }
0x192f   : > { %10533 = vmatpush1.bf16.msra.mxu1 %v14287_v52  ;;  %v8109_v28 = vpop.f32.mrb[88].mxu1  ;;  %v14309_v52 = vld [vmem:[%s15832_s16 + $0x304] ss:$12 sps:$4 sm:$0xff]  }
0x1930   : > { %v13022_v57 = vadd.f32 %v8109_v28, %v6329_v3  ;;  %v8215_v46 = vpop.f32.mrb[104].mxu0  ;;  %v8111_v47 = vpop.f32.mrb[89].mxu1  ;;  %10534 = vmatprep.subr.bf16.mxu1 %v14294_v56  ;;  %v14310_v56 = vld [vmem:[%s15832_s16 + $0x560] ss:$12 sps:$4 sm:$0xff]  }
0x1931   : > { %v13030_v41 = vadd.f32 %v8215_v46, %v6337_v12  ;;  %v13023_v23 = vadd.f32 %v8111_v47, %v6333_v61  ;;  %v8217_v33 = vpop.f32.mrb[105].mxu0  ;;  %v8113_v39 = vpop.f32.mrb[90].mxu1 }
0x1932   : > { %v13031_v11 = vadd.f32 %v8217_v33, %v17350_v8  ;;  %v13024_v25 = vadd.f32 %v8113_v39, %v6329_v3  ;;  %v8219_v19 = vpop.f32.mrb[106].mxu0  ;;  %v8115_v54 = vpop.f32.mrb[91].mxu1  ;;  %v8450_v1 = vmax.f32 %v13022_v57, 0.0 }
0x1933   : > { %v13032_v63 = vadd.f32 %v8219_v19, %v6337_v12  ;;  %10535 = vmatpush1.bf16.msra.mxu1 %v14292_v44  ;;  %v13025_v17 = vadd.f32 %v8115_v54, %v6333_v61  ;;  %v8221_v6 = vpop.f32.mrb[107].mxu0  ;;  %v8452_v50 = vmax.f32 %v13030_v41, 0.0  ;;  %v8451_v20 = vmax.f32 %v13023_v23, 0.0 }
0x1934   : > { %v8462_v40 = vmax.f32 %v13024_v25, 0.0  ;;  %v13033_v48 = vadd.f32 %v8221_v6, %v17350_v8  ;;  %10536 = vmatprep.subr.bf16.mxu1 %v14299_v58  ;;  %v8453_v0 = vmax.f32 %v13031_v11, 0.0  ;;  %v14307_v25 = vld [vmem:[%s15832_s16 + $0x300] ss:$12 sps:$4 sm:$0xff]  }
0x1935   : > { %v8464_v36 = vmax.f32 %v13032_v63, 0.0  ;;  %v8463_v31 = vmax.f32 %v13025_v17, 0.0  ;;  %v14314_v17 = vld [vmem:[%s15832_s16 + $0x31c] ss:$12 sps:$4 sm:$0xff]  }
0x1936   : > { %v17358_v53 = vpack.c.bf16 %v8462_v40, %v8450_v1  ;;  %v8465_v4 = vmax.f32 %v13033_v48, 0.0  ;;  %v14315_v40 = vld [vmem:[%s15832_s16 + $0x578] ss:$12 sps:$4 sm:$0xff]  }
0x1937   : > { %v17360_v16 = vpack.c.bf16 %v8464_v36, %v8452_v50  ;;  %v17362_v51 = vpack.c.bf16 %v8463_v31, %v8451_v20  ;;  %10537 = vmatpush1.bf16.msra.mxu1 %v14297_v15  ;;  %v8119_v49 = vpop.f32.mrb[92].mxu1  ;;  %v14312_v20 = vld [vmem:[%s15832_s16 + $0x318] ss:$12 sps:$4 sm:$0xff]  }
0x1938   : > { %v17366_v43 = vpack.c.bf16 %v8465_v4, %v8453_v0  ;;  %v13026_v5 = vadd.f32 %v8119_v49, %v6329_v3  ;;  %v8225_v2 = vpop.f32.mrb[108].mxu0  ;;  %v8121_v34 = vpop.f32.mrb[93].mxu1  ;;  %10538 = vmatprep.subr.bf16.mxu1 %v14304_v10  ;;  %v14316_v31 = vld [vmem:[%s15832_s16 + $0x4b8] ss:$12 sps:$4 sm:$0xff]   ;;  %v14319_v0 = vld [vmem:[%s15832_s16 + $0x334] ss:$12 sps:$4 sm:$0xff]  }
0x1939   : > { %v13034_v28 = vadd.f32 %v8225_v2, %v6337_v12  ;;  %v13027_v44 = vadd.f32 %v8121_v34, %v6333_v61  ;;  %v8227_v57 = vpop.f32.mrb[109].mxu0  ;;  %v8123_v46 = vpop.f32.mrb[94].mxu1  ;;  %10903 = vmatprep.mubr.bf16.mxu0 %v17362_v51  ;;  %v14321_v4 = vld [vmem:[%s15832_s16 + $0x4d0] ss:$12 sps:$4 sm:$0xff]   ;;  %v14324_v49 = vld [vmem:[%s15832_s16 + $0x34c] ss:$12 sps:$4 sm:$0xff]  }
0x193a   : > { %v13035_v47 = vadd.f32 %v8227_v57, %v17350_v8  ;;  %v13028_v58 = vadd.f32 %v8123_v46, %v6329_v3  ;;  %v8229_v41 = vpop.f32.mrb[110].mxu0  ;;  %v8125_v23 = vpop.f32.mrb[95].mxu1  ;;  %10904 = vmatmul.mubr.bf16.vlgmr.msra.gmra.mrb[136].mxu0 %v17358_v53  ;;  %v8474_v19 = vmax.f32 %v13026_v5, 0.0  ;;  %v14311_v3 = vld [vmem:[%s15832_s16 + $0x4a0] ss:$12 sps:$4 sm:$0xff]  }
0x193b   : > { %v13036_v33 = vadd.f32 %v8229_v41, %v6337_v12  ;;  %10539 = vmatpush1.bf16.msra.mxu1 %v14302_v9  ;;  %v13029_v39 = vadd.f32 %v8125_v23, %v6333_v61  ;;  %v8231_v11 = vpop.f32.mrb[111].mxu0  ;;  %12639 = vmatpush3.bf16.msra.mxu0 %v14306_v42  ;;  %v8476_v6 = vmax.f32 %v13034_v28, 0.0  ;;  %v8475_v15 = vmax.f32 %v13027_v44, 0.0  ;;  %v14325_v9 = vld [vmem:[%s15832_s16 + $0x5a8] ss:$12 sps:$4 sm:$0xff]  }
0x193c   : > { %v8486_v54 = vmax.f32 %v13028_v58, 0.0  ;;  %v13037_v63 = vadd.f32 %v8231_v11, %v17350_v8  ;;  %10561 = vmatprep.subr.bf16.mxu1 %v14309_v52  ;;  %12640 = vmatprep.subr.bf16.mxu0 %v14310_v56  ;;  %v8477_v61 = vmax.f32 %v13035_v47, 0.0  ;;  %v14322_v42 = vld [vmem:[%s15832_s16 + $0x348] ss:$12 sps:$4 sm:$0xff]   ;;  %v14329_v2 = vld [vmem:[%s15832_s16 + $0x364] ss:$12 sps:$4 sm:$0xff]  }
0x193d   : > { %v8488_v1 = vmax.f32 %v13036_v33, 0.0  ;;  %v8487_v12 = vmax.f32 %v13029_v39, 0.0  ;;  %v14326_v5 = vld [vmem:[%s15832_s16 + $0x4e8] ss:$12 sps:$4 sm:$0xff]   ;;  %v14330_v34 = vld [vmem:[%s15832_s16 + $0x5c0] ss:$12 sps:$4 sm:$0xff]  }
0x193e   : > { %v17378_v48 = vpack.c.bf16 %v8486_v54, %v8474_v19  ;;  %v8489_v10 = vmax.f32 %v13037_v63, 0.0  ;;  %10541 = vmatmul.mubr.bf16.vlgmr.msra.gmra.mrb[104].mxu1 %v17233_v55  ;;  %v14320_v55 = vld [vmem:[%s15832_s16 + $0x590] ss:$12 sps:$4 sm:$0xff]   ;;  %v14327_v52 = vld [vmem:[%s15832_s16 + $0x360] ss:$12 sps:$4 sm:$0xff]  }
0x193f   : > { %v17381_v8 = vpack.c.bf16 %v8488_v1, %v8476_v6  ;;  %v17383_v50 = vpack.c.bf16 %v8487_v12, %v8475_v15  ;;  %10550 = vmatprep.mubr.bf16.mxu1 %v17259_v27  ;;  %10562 = vmatpush1.bf16.msra.mxu1 %v14307_v25  ;;  %v14317_v27 = vld [vmem:[%s15832_s16 + $0x330] ss:$12 sps:$4 sm:$0xff]   ;;  %v14332_v28 = vld [vmem:[%s15832_s16 + $0x378] ss:$12 sps:$4 sm:$0xff]   ;;  %v14339_v57 = vld [vmem:[%s15832_s16 + $0x394] ss:$12 sps:$4 sm:$0xff]  }
0x1940   : > { %v17387_v36 = vpack.c.bf16 %v8489_v10, %v8477_v61  ;;  %12641 = vmatpush3.bf16.msra.mxu0 %v14311_v3  ;;  %10563 = vmatprep.subr.bf16.mxu1 %v14314_v17  ;;  %v14334_v56 = vld [vmem:[%s15832_s16 + $0x37c] ss:$12 sps:$4 sm:$0xff]   ;;  %v14336_v44 = vld [vmem:[%s15832_s16 + $0x518] ss:$12 sps:$4 sm:$0xff]   ;;  %v14374_v25 = vld [vmem:[%s15832_s16 + $0x6e0] ss:$12 sps:$4 sm:$0xff]  }
0x1941   : > { %10911 = vmatprep.mubr.bf16.mxu0 %v17383_v50  ;;  %12642 = vmatprep.subr.bf16.mxu0 %v14315_v40  ;;  %v14340_v46 = vld [vmem:[%s15832_s16 + $0x5f0] ss:$12 sps:$4 sm:$0xff]   ;;  %v14344_v41 = vld [vmem:[%s15832_s16 + $0x3ac] ss:$12 sps:$4 sm:$0xff]   ;;  %v14369_v23 = vld [vmem:[%s15832_s16 + $0x6c8] ss:$12 sps:$4 sm:$0xff]  }
0x1942   : > { %10912 = vmatmul.mubr.bf16.gmra.mrb[140].mxu0 %v17378_v48  ;;  %v14337_v47 = vld [vmem:[%s15832_s16 + $0x390] ss:$12 sps:$4 sm:$0xff]   ;;  %v14342_v33 = vld [vmem:[%s15832_s16 + $0x3a8] ss:$12 sps:$4 sm:$0xff]   ;;  %v14345_v19 = vld [vmem:[%s15832_s16 + $0x3c0] ss:$12 sps:$4 sm:$0xff]  }
0x1943   : > { %10564 = vmatpush1.bf16.msra.mxu1 %v14312_v20  ;;  %10952 = vmatprep.mubr.bf16.mxu0 %v17366_v43  ;;  %v14341_v58 = vld [vmem:[%s15832_s16 + $0x530] ss:$12 sps:$4 sm:$0xff]   ;;  %v14370_v11 = vld [vmem:[%s15832_s16 + $0x608] ss:$12 sps:$4 sm:$0xff]   ;;  %v14375_v63 = vld [vmem:[%s15832_s16 + $0x620] ss:$12 sps:$4 sm:$0xff]  }
0x1944   : > { %12643 = vmatpush3.bf16.msra.mxu0 %v14316_v31  ;;  %10565 = vmatprep.subr.bf16.mxu1 %v14319_v0  ;;  %v14347_v39 = vld [vmem:[%s15832_s16 + $0x3c4] ss:$12 sps:$4 sm:$0xff]   ;;  %v14350_v54 = vld [vmem:[%s15832_s16 + $0x3dc] ss:$12 sps:$4 sm:$0xff]   ;;  %v14353_v6 = vld [vmem:[%s15832_s16 + $0x3f4] ss:$12 sps:$4 sm:$0xff]  }
0x1945   : > { %12644 = vmatprep.subr.bf16.mxu0 %v14320_v55  ;;  %v14379_v3 = vld [vmem:[%s15832_s16 + $0x6f8] ss:$12 sps:$4 sm:$0xff]   ;;  %v14384_v1 = vld [vmem:[%s15832_s16 + $0x710] ss:$12 sps:$4 sm:$0xff]   ;;  %v14389_v10 = vld [vmem:[%s15832_s16 + $0x728] ss:$12 sps:$4 sm:$0xff]  }
0x1946   : > { %10551 = vmatmul.mubr.bf16.gmra.mrb[108].mxu1 %v17255_v35  ;;  %v14331_v35 = vld [vmem:[%s15832_s16 + $0x500] ss:$12 sps:$4 sm:$0xff]   ;;  %v14348_v17 = vld [vmem:[%s15832_s16 + $0x3d8] ss:$12 sps:$4 sm:$0xff]   ;;  %v14351_v12 = vld [vmem:[%s15832_s16 + $0x3f0] ss:$12 sps:$4 sm:$0xff]  }
0x1947   : > { %10566 = vmatpush1.bf16.msra.mxu1 %v14317_v27  ;;  %10593 = vmatprep.mubr.bf16.mxu1 %v17362_v51  ;;  %v14335_v51 = vld [vmem:[%s15832_s16 + $0x5d8] ss:$12 sps:$4 sm:$0xff]   ;;  %v14385_v61 = vld [vmem:[%s15832_s16 + $0x650] ss:$12 sps:$4 sm:$0xff]   ;;  %v14354_v20 = vld [vmem:[%s15832_s16 + $0x408] ss:$12 sps:$4 sm:$0xff]  }
0x1948   : > { %12645 = vmatpush3.bf16.msra.mxu0 %v14321_v4  ;;  %10567 = vmatprep.subr.bf16.mxu1 %v14324_v49  ;;  %v14380_v15 = vld [vmem:[%s15832_s16 + $0x638] ss:$12 sps:$4 sm:$0xff]   ;;  %v14390_v0 = vld [vmem:[%s15832_s16 + $0x668] ss:$12 sps:$4 sm:$0xff]   ;;  %v14394_v55 = vld [vmem:[%s15832_s16 + $0x740] ss:$12 sps:$4 sm:$0xff]  }
0x1949   : > { %12646 = vmatprep.subr.bf16.mxu0 %v14325_v9  ;;  %v14356_v40 = vld [vmem:[%s15832_s16 + $0x40c] ss:$12 sps:$4 sm:$0xff]   ;;  %v14359_v31 = vld [vmem:[%s15832_s16 + $0x424] ss:$12 sps:$4 sm:$0xff]   ;;  %v14362_v4 = vld [vmem:[%s15832_s16 + $0x43c] ss:$12 sps:$4 sm:$0xff]  }
0x194a   : > { %v14357_v27 = vld [vmem:[%s15832_s16 + $0x420] ss:$12 sps:$4 sm:$0xff]   ;;  %v14399_v9 = vld [vmem:[%s15832_s16 + $0x758] ss:$12 sps:$4 sm:$0xff]  }
0x194b   : > { %10568 = vmatpush1.bf16.msra.mxu1 %v14322_v42  ;;  %v14395_v49 = vld [vmem:[%s15832_s16 + $0x680] ss:$12 sps:$4 sm:$0xff]   ;;  %v14360_v42 = vld [vmem:[%s15832_s16 + $0x438] ss:$12 sps:$4 sm:$0xff]  }
0x194c   : > { %12647 = vmatpush3.bf16.msra.mxu0 %v14326_v5  ;;  %10569 = vmatprep.subr.bf16.mxu1 %v14329_v2  ;;  %v14365_v5 = vld [vmem:[%s15832_s16 + $0x454] ss:$12 sps:$4 sm:$0xff]   ;;  %v14400_v2 = vld [vmem:[%s15832_s16 + $0x698] ss:$12 sps:$4 sm:$0xff]  }
0x194d   : > { %12648 = vmatprep.subr.bf16.mxu0 %v14330_v34  ;;  %v14404_v34 = vld [vmem:[%s15832_s16 + $0x770] ss:$12 sps:$4 sm:$0xff]  }
0x194f   : > { %10570 = vmatpush1.bf16.msra.mxu1 %v14327_v52  ;;  %v14363_v52 = vld [vmem:[%s15832_s16 + $0x450] ss:$12 sps:$4 sm:$0xff]  }
0x1950   : > { %12649 = vmatpush3.bf16.msra.mxu0 %v14331_v35  ;;  %10571 = vmatprep.subr.bf16.mxu1 %v14334_v56  ;;  %v14368_v35 = vld [vmem:[%s15832_s16 + $0x46c] ss:$12 sps:$4 sm:$0xff]   ;;  %v14405_v56 = vld [vmem:[%s15832_s16 + $0x6b0] ss:$12 sps:$4 sm:$0xff]  }
0x1951   : > { %12650 = vmatprep.subr.bf16.mxu0 %v14335_v51  ;;  %v14409_v51 = vld [vmem:[%s15832_s16 + $0x848] ss:$12 sps:$4 sm:$0xff]  }
0x1953   : > { %10572 = vmatpush1.bf16.msra.mxu1 %v14332_v28  ;;  %v14366_v28 = vld [vmem:[%s15832_s16 + $0x468] ss:$12 sps:$4 sm:$0xff]  }
0x1954   : > { %12651 = vmatpush3.bf16.msra.mxu0 %v14336_v44  ;;  %10573 = vmatprep.subr.bf16.mxu1 %v14339_v57  ;;  %v14373_v44 = vld [vmem:[%s15832_s16 + $0x484] ss:$12 sps:$4 sm:$0xff]   ;;  %v14371_v57 = vld [vmem:[%s15832_s16 + $0x480] ss:$12 sps:$4 sm:$0xff]  }
0x1955   : > { %12652 = vmatprep.subr.bf16.mxu0 %v14340_v46  ;;  %v14378_v46 = vld [vmem:[%s15832_s16 + $0x49c] ss:$12 sps:$4 sm:$0xff]  }
0x1957   : > { %10574 = vmatpush1.bf16.msra.mxu1 %v14337_v47  ;;  %v14376_v47 = vld [vmem:[%s15832_s16 + $0x498] ss:$12 sps:$4 sm:$0xff]  }
0x1958   : > { %12653 = vmatpush3.bf16.msra.mxu0 %v14341_v58  ;;  %10575 = vmatprep.subr.bf16.mxu1 %v14344_v41  ;;  %v14383_v58 = vld [vmem:[%s15832_s16 + $0x4b4] ss:$12 sps:$4 sm:$0xff]   ;;  %v14381_v41 = vld [vmem:[%s15832_s16 + $0x4b0] ss:$12 sps:$4 sm:$0xff]  }
0x1959   : > { %12666 = vmatprep.subr.bf16.mxu0 %v14369_v23  ;;  %v14388_v23 = vld [vmem:[%s15832_s16 + $0x4cc] ss:$12 sps:$4 sm:$0xff]  }
0x195b   : > { %10576 = vmatpush1.bf16.msra.mxu1 %v14342_v33  ;;  %10953 = vmatmul.mubr.bf16.vlgmr.msra.gmra.mrb[144].mxu0 %v17360_v16  ;;  %v6307_v33 = vld [vmem:[%s15826_s2 + $0x8] sm:$0xf] }
0x195c   : > { %10960 = vmatprep.mubr.bf16.mxu0 %v17387_v36  ;;  %10577 = vmatprep.subr.bf16.mxu1 %v14347_v39  ;;  %v14391_v39 = vld [vmem:[%s15832_s16 + $0x4e0] ss:$12 sps:$4 sm:$0xff]  }
0x195d   : > { %12667 = vmatpush3.bf16.msra.mxu0 %v14370_v11  ;;  %v14398_v11 = vld [vmem:[%s15832_s16 + $0x4fc] ss:$12 sps:$4 sm:$0xff]  }
0x195e   : > { %12668 = vmatprep.subr.bf16.mxu0 %v14374_v25  ;;  %v6345_v25 = vrot.slane %v6307_v33, %v15991_v22 }
0x195f   : > { %10578 = vmatpush1.bf16.msra.mxu1 %v14345_v19  ;;  %v6353_v19 = vrot.slane %v6307_v33, %v15988_v18 }
0x1960   : > { %10579 = vmatprep.subr.bf16.mxu1 %v14350_v54  ;;  %v6349_v54 = vrot.slane %v6307_v33, %v15985_v13 }
0x1961   : > { %12669 = vmatpush3.bf16.msra.mxu0 %v14375_v63 }
0x1962   : > { %12670 = vmatprep.subr.bf16.mxu0 %v14379_v3  ;;  %v14403_v3 = vld [vmem:[%s15832_s16 + $0x514] ss:$12 sps:$4 sm:$0xff]  }
0x1963   : > { %10580 = vmatpush1.bf16.msra.mxu1 %v14348_v17  ;;  %10961 = vmatmul.mubr.bf16.gmra.mrb[148].mxu0 %v17381_v8 }
0x1964   : > { %10581 = vmatprep.subr.bf16.mxu1 %v14353_v6 }
0x1965   : > { %12671 = vmatpush3.bf16.msra.mxu0 %v14380_v15 }
0x1966   : > { %12672 = vmatprep.subr.bf16.mxu0 %v14384_v1 }
0x1967   : > { %10582 = vmatpush1.bf16.msra.mxu1 %v14351_v12 }
0x1968   : > { %10583 = vmatprep.subr.bf16.mxu1 %v14356_v40 }
0x1969   : > { %12673 = vmatpush3.bf16.msra.mxu0 %v14385_v61 }
0x196a   : > { %12674 = vmatprep.subr.bf16.mxu0 %v14389_v10 }
0x196b   : > { %10584 = vmatpush1.bf16.msra.mxu1 %v14354_v20 }
0x196c   : > { %10585 = vmatprep.subr.bf16.mxu1 %v14359_v31 }
0x196d   : > { %12675 = vmatpush3.bf16.msra.mxu0 %v14390_v0 }
0x196e   : > { %12676 = vmatprep.subr.bf16.mxu0 %v14394_v55 }
0x196f   : > { %10586 = vmatpush1.bf16.msra.mxu1 %v14357_v27 }
0x1970   : > { %10587 = vmatprep.subr.bf16.mxu1 %v14362_v4  ;;  %v14408_v4 = vld [vmem:[%s15832_s16 + $0x52c] ss:$12 sps:$4 sm:$0xff]  }
0x1971   : > { %12677 = vmatpush3.bf16.msra.mxu0 %v14395_v49 }
0x1972   : > { %12678 = vmatprep.subr.bf16.mxu0 %v14399_v9 }
0x1973   : > { %10588 = vmatpush1.bf16.msra.mxu1 %v14360_v42 }
0x1974   : > { %10589 = vmatprep.subr.bf16.mxu1 %v14365_v5 }
0x1975   : > { %12679 = vmatpush3.bf16.msra.mxu0 %v14400_v2 }
0x1976   : > { %12680 = vmatprep.subr.bf16.mxu0 %v14404_v34 }
0x1977   : > { %10590 = vmatpush1.bf16.msra.mxu1 %v14363_v52 }
0x1978   : > { %10591 = vmatprep.subr.bf16.mxu1 %v14368_v35 }
0x1979   : > { %12681 = vmatpush3.bf16.msra.mxu0 %v14405_v56 }
0x197a   : > { %12694 = vmatprep.subr.bf16.mxu0 %v14409_v51 }
0x197b   : > { %10592 = vmatpush1.bf16.msra.mxu1 %v14366_v28  ;;  %v14406_v28 = vld [vmem:[%s15832_s16 + $0x528] ss:$12 sps:$4 sm:$0xff]  }
0x197c   : > { %10614 = vmatprep.subr.bf16.mxu1 %v14373_v44 }
0x197e   : > { %10594 = vmatmul.mubr.bf16.vlgmr.msra.gmra.mrb[104].mxu1 %v17358_v53  ;;  %v14386_v53 = vld [vmem:[%s15832_s16 + $0x4c8] ss:$12 sps:$4 sm:$0xff]  }
0x197f   : > { %10603 = vmatprep.mubr.bf16.mxu1 %v17383_v50  ;;  %10615 = vmatpush1.bf16.msra.mxu1 %v14371_v57  ;;  %v14393_v50 = vld [vmem:[%s15832_s16 + $0x4e4] ss:$12 sps:$4 sm:$0xff]  }
0x1980   : > { %10616 = vmatprep.subr.bf16.mxu1 %v14378_v46 }
0x1983   : > { %10617 = vmatpush1.bf16.msra.mxu1 %v14376_v47  ;;  %v14410_v47 = vld [vmem:[%s15832_s16 + $0x788] ss:$12 sps:$4 sm:$0xff]  }
0x1984   : > { %10618 = vmatprep.subr.bf16.mxu1 %v14383_v58  ;;  %v14413_v58 = vld [vmem:[%s15832_s16 + $0x544] ss:$12 sps:$4 sm:$0xff]  }
0x1986   : > { %10604 = vmatmul.mubr.bf16.gmra.mrb[108].mxu1 %v17378_v48  ;;  %v17474_v48 = vrot.slane %v6307_v33, %v6324_v59  ;;  %v14401_v59 = vld [vmem:[%s15832_s16 + $0x510] ss:$12 sps:$4 sm:$0xff]   ;;  %v14414_v33 = vld [vmem:[%s15832_s16 + $0x860] ss:$12 sps:$4 sm:$0xff]  }
0x1987   : > { %10619 = vmatpush1.bf16.msra.mxu1 %v14381_v41  ;;  %10646 = vmatprep.mubr.bf16.mxu1 %v17366_v43  ;;  %v14396_v43 = vld [vmem:[%s15832_s16 + $0x4f8] ss:$12 sps:$4 sm:$0xff]  }
0x1988   : > { %10620 = vmatprep.subr.bf16.mxu1 %v14388_v23 }
0x198b   : > { %10621 = vmatpush1.bf16.msra.mxu1 %v14386_v53 }
0x198c   : > { %10622 = vmatprep.subr.bf16.mxu1 %v14393_v50 }
0x198f   : > { %10623 = vmatpush1.bf16.msra.mxu1 %v14391_v39 }
0x1990   : > { %v8321_v63 = vpop.f32.mrb[96].mxu1  ;;  %10624 = vmatprep.subr.bf16.mxu1 %v14398_v11 }
0x1991   : > { %v13038_v17 = vadd.f32 %v8321_v63, %v6345_v25  ;;  %v8427_v6 = vpop.f32.mrb[112].mxu0  ;;  %v8323_v15 = vpop.f32.mrb[97].mxu1 }
0x1992   : > { %v13046_v1 = vadd.f32 %v8427_v6, %v6353_v19  ;;  %v13039_v12 = vadd.f32 %v8323_v15, %v6349_v54  ;;  %v8429_v40 = vpop.f32.mrb[113].mxu0  ;;  %v8325_v61 = vpop.f32.mrb[98].mxu1 }
0x1993   : > { %v13047_v10 = vadd.f32 %v8429_v40, %v17474_v48  ;;  %v13040_v20 = vadd.f32 %v8325_v61, %v6345_v25  ;;  %v8431_v31 = vpop.f32.mrb[114].mxu0  ;;  %10625 = vmatpush1.bf16.msra.mxu1 %v14396_v43  ;;  %v8327_v7 = vpop.f32.mrb[99].mxu1  ;;  %v8454_v49 = vmax.f32 %v13038_v17, 0.0 }
0x1994   : > { %v13048_v0 = vadd.f32 %v8431_v31, %v6353_v19  ;;  %v13041_v55 = vadd.f32 %v8327_v7, %v6349_v54  ;;  %v8433_v27 = vpop.f32.mrb[115].mxu0  ;;  %10626 = vmatprep.subr.bf16.mxu1 %v14403_v3  ;;  %v8456_v5 = vmax.f32 %v13046_v1, 0.0  ;;  %v8455_v2 = vmax.f32 %v13039_v12, 0.0  ;;  %v14411_v1 = vld [vmem:[%s15832_s16 + $0x540] ss:$12 sps:$4 sm:$0xff]  }
0x1995   : > { %v8466_v9 = vmax.f32 %v13040_v20, 0.0  ;;  %v13049_v42 = vadd.f32 %v8433_v27, %v17474_v48  ;;  %v8457_v35 = vmax.f32 %v13047_v10, 0.0  ;;  %v14415_v10 = vld [vmem:[%s15832_s16 + $0x7a0] ss:$12 sps:$4 sm:$0xff]   ;;  %v14418_v20 = vld [vmem:[%s15832_s16 + $0x55c] ss:$12 sps:$4 sm:$0xff]  }
0x1996   : > { %v8468_v34 = vmax.f32 %v13048_v0, 0.0  ;;  %v8467_v52 = vmax.f32 %v13041_v55, 0.0 }
0x1997   : > { %v17482_v56 = vpack.c.bf16 %v8466_v9, %v8454_v49  ;;  %v8469_v51 = vmax.f32 %v13049_v42, 0.0  ;;  %10627 = vmatpush1.bf16.msra.mxu1 %v14401_v59  ;;  %v14416_v9 = vld [vmem:[%s15832_s16 + $0x558] ss:$12 sps:$4 sm:$0xff]  }
0x1998   : > { %v17485_v44 = vpack.c.bf16 %v8468_v34, %v8456_v5  ;;  %v17487_v57 = vpack.c.bf16 %v8467_v52, %v8455_v2  ;;  %v8331_v46 = vpop.f32.mrb[100].mxu1  ;;  %10628 = vmatprep.subr.bf16.mxu1 %v14408_v4  ;;  %v14420_v5 = vld [vmem:[%s15832_s16 + $0x7b8] ss:$12 sps:$4 sm:$0xff]   ;;  %v14423_v34 = vld [vmem:[%s15832_s16 + $0x574] ss:$12 sps:$4 sm:$0xff]  }
0x1999   : > { %v17491_v41 = vpack.c.bf16 %v8469_v51, %v8457_v35  ;;  %v13042_v23 = vadd.f32 %v8331_v46, %v6345_v25  ;;  %v8437_v53 = vpop.f32.mrb[116].mxu0  ;;  %v8333_v50 = vpop.f32.mrb[101].mxu1  ;;  %v14424_v52 = vld [vmem:[%s15832_s16 + $0x890] ss:$12 sps:$4 sm:$0xff]   ;;  %v14429_v46 = vld [vmem:[%s15832_s16 + $0x8a8] ss:$12 sps:$4 sm:$0xff]  }
0x199a   : > { %v13050_v39 = vadd.f32 %v8437_v53, %v6353_v19  ;;  %v13043_v11 = vadd.f32 %v8333_v50, %v6349_v54  ;;  %v8439_v43 = vpop.f32.mrb[117].mxu0  ;;  %v8335_v63 = vpop.f32.mrb[102].mxu1  ;;  %11001 = vmatprep.mubr.bf16.mxu0 %v17487_v57  ;;  %v14421_v35 = vld [vmem:[%s15832_s16 + $0x570] ss:$12 sps:$4 sm:$0xff]   ;;  %v14434_v53 = vld [vmem:[%s15832_s16 + $0x8c0] ss:$12 sps:$4 sm:$0xff]  }
0x199b   : > { %v13051_v3 = vadd.f32 %v8439_v43, %v17474_v48  ;;  %v13044_v17 = vadd.f32 %v8335_v63, %v6345_v25  ;;  %v8441_v6 = vpop.f32.mrb[118].mxu0  ;;  %10629 = vmatpush1.bf16.msra.mxu1 %v14406_v28  ;;  %v8337_v15 = vpop.f32.mrb[103].mxu1  ;;  %11002 = vmatmul.mubr.bf16.vlgmr.msra.gmra.mrb[152].mxu0 %v17482_v56  ;;  %v8478_v31 = vmax.f32 %v13042_v23, 0.0  ;;  %v14419_v25 = vld [vmem:[%s15832_s16 + $0x878] ss:$12 sps:$4 sm:$0xff]  }
0x199c   : > { %v13052_v12 = vadd.f32 %v8441_v6, %v6353_v19  ;;  %v13045_v40 = vadd.f32 %v8337_v15, %v6349_v54  ;;  %v8443_v61 = vpop.f32.mrb[119].mxu0  ;;  %12695 = vmatpush3.bf16.msra.mxu0 %v14410_v47  ;;  %10630 = vmatprep.subr.bf16.mxu1 %v14413_v58  ;;  %v8480_v0 = vmax.f32 %v13050_v39, 0.0  ;;  %v8479_v55 = vmax.f32 %v13043_v11, 0.0  ;;  %v14425_v51 = vld [vmem:[%s15832_s16 + $0x7d0] ss:$12 sps:$4 sm:$0xff]  }
0x199d   : > { %v8490_v7 = vmax.f32 %v13044_v17, 0.0  ;;  %v13053_v59 = vadd.f32 %v8443_v61, %v17474_v48  ;;  %12696 = vmatprep.subr.bf16.mxu0 %v14414_v33  ;;  %v8481_v54 = vmax.f32 %v13051_v3, 0.0  ;;  %v14428_v28 = vld [vmem:[%s15832_s16 + $0x58c] ss:$12 sps:$4 sm:$0xff]   ;;  %v14426_v47 = vld [vmem:[%s15832_s16 + $0x588] ss:$12 sps:$4 sm:$0xff]  }
0x199e   : > { %v8492_v27 = vmax.f32 %v13052_v12, 0.0  ;;  %v8491_v19 = vmax.f32 %v13045_v40, 0.0  ;;  %v14430_v58 = vld [vmem:[%s15832_s16 + $0x7e8] ss:$12 sps:$4 sm:$0xff]   ;;  %v14433_v23 = vld [vmem:[%s15832_s16 + $0x5a4] ss:$12 sps:$4 sm:$0xff]  }
0x199f   : > { %v17502_v4 = vpack.c.bf16 %v8490_v7, %v8478_v31  ;;  %v8493_v49 = vmax.f32 %v13053_v59, 0.0  ;;  %10631 = vmatpush1.bf16.msra.mxu1 %v14411_v1  ;;  %v14431_v50 = vld [vmem:[%s15832_s16 + $0x5a0] ss:$12 sps:$4 sm:$0xff]   ;;  %v14438_v39 = vld [vmem:[%s15832_s16 + $0x5bc] ss:$12 sps:$4 sm:$0xff]  }
0x19a0   : > { %v17505_v42 = vpack.c.bf16 %v8492_v27, %v8480_v0  ;;  %v17507_v48 = vpack.c.bf16 %v8491_v19, %v8479_v55  ;;  %12697 = vmatpush3.bf16.msra.mxu0 %v14415_v10  ;;  %10632 = vmatprep.subr.bf16.mxu1 %v14418_v20  ;;  %v14435_v33 = vld [vmem:[%s15832_s16 + $0x800] ss:$12 sps:$4 sm:$0xff]   ;;  %v14439_v11 = vld [vmem:[%s15832_s16 + $0x8d8] ss:$12 sps:$4 sm:$0xff]   ;;  %v14444_v6 = vld [vmem:[%s15832_s16 + $0x8f0] ss:$12 sps:$4 sm:$0xff]  }
0x19a1   : > { %v17510_v2 = vpack.c.bf16 %v8493_v49, %v8481_v54  ;;  %12698 = vmatprep.subr.bf16.mxu0 %v14419_v25  ;;  %v14436_v43 = vld [vmem:[%s15832_s16 + $0x5b8] ss:$12 sps:$4 sm:$0xff]   ;;  %v14443_v3 = vld [vmem:[%s15832_s16 + $0x5d4] ss:$12 sps:$4 sm:$0xff]   ;;  %v14441_v40 = vld [vmem:[%s15832_s16 + $0x5d0] ss:$12 sps:$4 sm:$0xff]  }
0x19a2   : > { %11009 = vmatprep.mubr.bf16.mxu0 %v17507_v48  ;;  %v14440_v63 = vld [vmem:[%s15832_s16 + $0x818] ss:$12 sps:$4 sm:$0xff]   ;;  %v14445_v10 = vld [vmem:[%s15832_s16 + $0x830] ss:$12 sps:$4 sm:$0xff]   ;;  %v14446_v7 = vld [vmem:[%s15832_s16 + $0x5e8] ss:$12 sps:$4 sm:$0xff]  }
0x19a3   : > { %10633 = vmatpush1.bf16.msra.mxu1 %v14416_v9  ;;  %11010 = vmatmul.mubr.bf16.gmra.mrb[156].mxu0 %v17502_v4  ;;  %v14448_v20 = vld [vmem:[%s15832_s16 + $0x5ec] ss:$12 sps:$4 sm:$0xff]   ;;  %v14451_v59 = vld [vmem:[%s15832_s16 + $0x604] ss:$12 sps:$4 sm:$0xff]   ;;  %v14454_v49 = vld [vmem:[%s15832_s16 + $0x61c] ss:$12 sps:$4 sm:$0xff]  }
0x19a4   : > { %12699 = vmatpush3.bf16.msra.mxu0 %v14420_v5  ;;  %11050 = vmatprep.mubr.bf16.mxu0 %v17491_v41  ;;  %v14449_v19 = vld [vmem:[%s15832_s16 + $0x600] ss:$12 sps:$4 sm:$0xff]   ;;  %v14452_v5 = vld [vmem:[%s15832_s16 + $0x618] ss:$12 sps:$4 sm:$0xff]  }
0x19a5   : > { %10634 = vmatprep.subr.bf16.mxu1 %v14423_v34  ;;  %12700 = vmatprep.subr.bf16.mxu0 %v14424_v52  ;;  %v14457_v34 = vld [vmem:[%s15832_s16 + $0x634] ss:$12 sps:$4 sm:$0xff]   ;;  %v14455_v52 = vld [vmem:[%s15832_s16 + $0x630] ss:$12 sps:$4 sm:$0xff]  }
0x19a7   : > { %10635 = vmatpush1.bf16.msra.mxu1 %v14421_v35  ;;  %v14460_v35 = vld [vmem:[%s15832_s16 + $0x64c] ss:$12 sps:$4 sm:$0xff]  }
0x19a8   : > { %12701 = vmatpush3.bf16.msra.mxu0 %v14425_v51  ;;  %10636 = vmatprep.subr.bf16.mxu1 %v14428_v28  ;;  %v14461_v51 = vld [vmem:[%s15832_s16 + $0x660] ss:$12 sps:$4 sm:$0xff]  }
0x19a9   : > { %12702 = vmatprep.subr.bf16.mxu0 %v14429_v46  ;;  %v17556_v28 = vld [vmem:[%s837_s0] sm:$0x7]  ;;  %v14466_v46 = vld [vmem:[%s15832_s16 + $0x67c] ss:$12 sps:$4 sm:$0xff]  }
0x19ab   : > { %10637 = vmatpush1.bf16.msra.mxu1 %v14426_v47  ;;  %v8915_v47 = vrot.slane %v17556_v28, %v15988_v18 }
0x19ac   : > { %12703 = vmatpush3.bf16.msra.mxu0 %v14430_v58  ;;  %10638 = vmatprep.subr.bf16.mxu1 %v14433_v23  ;;  %v14469_v58 = vld [vmem:[%s15832_s16 + $0x694] ss:$12 sps:$4 sm:$0xff]  }
0x19ad   : > { %12704 = vmatprep.subr.bf16.mxu0 %v14434_v53 }
0x19af   : > { %10639 = vmatpush1.bf16.msra.mxu1 %v14431_v50 }
0x19b0   : > { %12705 = vmatpush3.bf16.msra.mxu0 %v14435_v33  ;;  %10640 = vmatprep.subr.bf16.mxu1 %v14438_v39  ;;  %v14467_v39 = vld [vmem:[%s15832_s16 + $0x690] ss:$12 sps:$4 sm:$0xff]  }
0x19b1   : > { %v12570_v17 = vpop.f32.mrb[120].mxu0  ;;  %12706 = vmatprep.subr.bf16.mxu0 %v14439_v11 }
0x19b2   : > { %v12571_v15 = vpop.f32.mrb[121].mxu0 }
0x19b3   : > { %v12572_v1 = vadd.f32 %v12571_v15, %v12570_v17  ;;  %10641 = vmatpush1.bf16.msra.mxu1 %v14436_v43  ;;  %v12573_v12 = vpop.f32.mrb[122].mxu0  ;;  %v14472_v43 = vld [vmem:[%s15832_s16 + $0x6ac] ss:$12 sps:$4 sm:$0xff]   ;;  %v14475_v15 = vld [vmem:[%s15832_s16 + $0x6c4] ss:$12 sps:$4 sm:$0xff]  }
0x19b4   : > { %v12574_v61 = vpop.f32.mrb[123].mxu0  ;;  %12707 = vmatpush3.bf16.msra.mxu0 %v14440_v63  ;;  %10642 = vmatprep.subr.bf16.mxu1 %v14443_v3 }
0x19b5   : > { %v12575_v31 = vadd.f32 %v12574_v61, %v12573_v12  ;;  %12708 = vmatprep.subr.bf16.mxu0 %v14444_v6  ;;  %v10808_v53 = vadd.f32 %v12572_v1, %v8915_v47  ;;  %v14470_v6 = vld [vmem:[%s15832_s16 + $0x6a8] ss:$12 sps:$4 sm:$0xff]  }
0x19b7   : > { %10643 = vmatpush1.bf16.msra.mxu1 %v14441_v40  ;;  %v10811_v63 = vadd.f32 %v12575_v31, %v8915_v47 }
0x19b8   : > { %12709 = vmatpush3.bf16.msra.mxu0 %v14445_v10  ;;  %10644 = vmatprep.subr.bf16.mxu1 %v14448_v20  ;;  %v14473_v20 = vld [vmem:[%s15832_s16 + $0x6c0] ss:$12 sps:$4 sm:$0xff]  }
0x19b9   : > { %v12576_v25 = vpop.f32.mrb[124].mxu0 }
0x19ba   : > { %v12577_v0 = vpop.f32.mrb[125].mxu0 }
0x19bb   : > { %v12578_v55 = vadd.f32 %v12577_v0, %v12576_v25  ;;  %10645 = vmatpush1.bf16.msra.mxu1 %v14446_v7  ;;  %v12579_v27 = vpop.f32.mrb[126].mxu0  ;;  %11051 = vmatmul.mubr.bf16.vlgmr.msra.gmra.mrb[160].mxu0 %v17485_v44  ;;  %v14478_v7 = vld [vmem:[%s15832_s16 + $0x6dc] ss:$12 sps:$4 sm:$0xff]  }
0x19bc   : > { %v12580_v54 = vpop.f32.mrb[127].mxu0  ;;  %11058 = vmatprep.mubr.bf16.mxu0 %v17510_v2  ;;  %10667 = vmatprep.subr.bf16.mxu1 %v14451_v59 }
0x19bd   : > { %v12581_v9 = vadd.f32 %v12580_v54, %v12579_v27  ;;  %v10816_v40 = vadd.f32 %v12578_v55, %v8915_v47  ;;  %v14476_v55 = vld [vmem:[%s15832_s16 + $0x6d8] ss:$12 sps:$4 sm:$0xff]   ;;  %v14479_v54 = vld [vmem:[%s15832_s16 + $0x6f0] ss:$12 sps:$4 sm:$0xff]  }
0x19be   : > { %10647 = vmatmul.mubr.bf16.vlgmr.msra.gmra.mrb[104].mxu1 %v17360_v16  ;;  %v14458_v16 = vld [vmem:[%s15832_s16 + $0x648] ss:$12 sps:$4 sm:$0xff]  }
0x19bf   : > { %10656 = vmatprep.mubr.bf16.mxu1 %v17387_v36  ;;  %10668 = vmatpush1.bf16.msra.mxu1 %v14449_v19  ;;  %v14463_v36 = vld [vmem:[%s15832_s16 + $0x664] ss:$12 sps:$4 sm:$0xff]   ;;  %v10819_v59 = vadd.f32 %v12581_v9, %v8915_v47  ;;  %v14481_v19 = vld [vmem:[%s15832_s16 + $0x6f4] ss:$12 sps:$4 sm:$0xff]  }
0x19c0   : > { %10669 = vmatprep.subr.bf16.mxu1 %v14454_v49  ;;  %v14484_v49 = vld [vmem:[%s15832_s16 + $0x70c] ss:$12 sps:$4 sm:$0xff]   ;;  %v14482_v9 = vld [vmem:[%s15832_s16 + $0x708] ss:$12 sps:$4 sm:$0xff]   ;;  %v14499_v47 = vld [vmem:[%s15832_s16 + $0x784] ss:$12 sps:$4 sm:$0xff]  }
0x19c3   : > { %10670 = vmatpush1.bf16.msra.mxu1 %v14452_v5  ;;  %11059 = vmatmul.mubr.bf16.gmra.mrb[164].mxu0 %v17505_v42  ;;  %v14487_v5 = vld [vmem:[%s15832_s16 + $0x724] ss:$12 sps:$4 sm:$0xff]  }
0x19c4   : > { %10671 = vmatprep.subr.bf16.mxu1 %v14457_v34  ;;  %v14485_v34 = vld [vmem:[%s15832_s16 + $0x720] ss:$12 sps:$4 sm:$0xff]  }
0x19c6   : > { %10657 = vmatmul.mubr.bf16.gmra.mrb[108].mxu1 %v17381_v8  ;;  %v14464_v8 = vld [vmem:[%s15832_s16 + $0x678] ss:$12 sps:$4 sm:$0xff]  }
0x19c7   : > { %10672 = vmatpush1.bf16.msra.mxu1 %v14455_v52  ;;  %10699 = vmatprep.mubr.bf16.mxu1 %v17487_v57  ;;  %v14490_v52 = vld [vmem:[%s15832_s16 + $0x73c] ss:$12 sps:$4 sm:$0xff]  }
0x19c8   : > { %10673 = vmatprep.subr.bf16.mxu1 %v14460_v35  ;;  %v14488_v35 = vld [vmem:[%s15832_s16 + $0x738] ss:$12 sps:$4 sm:$0xff]  }
0x19cb   : > { %10674 = vmatpush1.bf16.msra.mxu1 %v14458_v16  ;;  %v14493_v16 = vld [vmem:[%s15832_s16 + $0x754] ss:$12 sps:$4 sm:$0xff]  }
0x19cc   : > { %10675 = vmatprep.subr.bf16.mxu1 %v14463_v36  ;;  %v14491_v36 = vld [vmem:[%s15832_s16 + $0x750] ss:$12 sps:$4 sm:$0xff]  }
0x19cf   : > { %10676 = vmatpush1.bf16.msra.mxu1 %v14461_v51  ;;  %v14496_v51 = vld [vmem:[%s15832_s16 + $0x76c] ss:$12 sps:$4 sm:$0xff]  }
0x19d0   : > { %10677 = vmatprep.subr.bf16.mxu1 %v14466_v46  ;;  %v14494_v46 = vld [vmem:[%s15832_s16 + $0x768] ss:$12 sps:$4 sm:$0xff]  }
0x19d1   : > { %v12598_v57 = vpop.f32.mrb[128].mxu0 }
0x19d2   : > { %v12599_v23 = vpop.f32.mrb[129].mxu0 }
0x19d3   : > { %v12600_v50 = vadd.f32 %v12599_v23, %v12598_v57  ;;  %10678 = vmatpush1.bf16.msra.mxu1 %v14464_v8  ;;  %v12601_v33 = vpop.f32.mrb[130].mxu0  ;;  %v14497_v8 = vld [vmem:[%s15832_s16 + $0x780] ss:$12 sps:$4 sm:$0xff]   ;;  %v14500_v57 = vld [vmem:[%s15832_s16 + $0x798] ss:$12 sps:$4 sm:$0xff]  }
0x19d4   : > { %v12602_v11 = vpop.f32.mrb[131].mxu0  ;;  %10679 = vmatprep.subr.bf16.mxu1 %v14469_v58  ;;  %v14502_v58 = vld [vmem:[%s15832_s16 + $0x79c] ss:$12 sps:$4 sm:$0xff]   ;;  %v14505_v23 = vld [vmem:[%s15832_s16 + $0x7b4] ss:$12 sps:$4 sm:$0xff]  }
0x19d5   : > { %v17565_v3 = vadd.f32 %v12600_v50, %v10808_v53  ;;  %v12603_v18 = vadd.f32 %v12602_v11, %v12601_v33  ;;  %v14503_v53 = vld [vmem:[%s15832_s16 + $0x7b0] ss:$12 sps:$4 sm:$0xff]   ;;  %v14508_v50 = vld [vmem:[%s15832_s16 + $0x7cc] ss:$12 sps:$4 sm:$0xff]  }
0x19d6   : > { %v14509_v33 = vld [vmem:[%s15832_s16 + $0x7e0] ss:$12 sps:$4 sm:$0xff]  }
0x19d7   : > { %v17567_v17 = vadd.f32 %v12603_v18, %v10811_v63  ;;  %10680 = vmatpush1.bf16.msra.mxu1 %v14467_v39  ;;  %v14514_v39 = vld [vmem:[%s15832_s16 + $0x7fc] ss:$12 sps:$4 sm:$0xff]  }
0x19d8   : > { %10681 = vmatprep.subr.bf16.mxu1 %v14472_v43 }
0x19d9   : > { %v12604_v1 = vpop.f32.mrb[132].mxu0 }
0x19da   : > { %v12605_v12 = vpop.f32.mrb[133].mxu0 }
0x19db   : > { %v12606_v61 = vadd.f32 %v12605_v12, %v12604_v1  ;;  %10682 = vmatpush1.bf16.msra.mxu1 %v14470_v6  ;;  %v12607_v10 = vpop.f32.mrb[134].mxu0  ;;  %v14512_v6 = vld [vmem:[%s15832_s16 + $0x7f8] ss:$12 sps:$4 sm:$0xff]  }
0x19dc   : > { %v12608_v31 = vpop.f32.mrb[135].mxu0  ;;  %10683 = vmatprep.subr.bf16.mxu1 %v14475_v15 }
0x19dd   : > { %v17573_v25 = vadd.f32 %v12606_v61, %v10816_v40  ;;  %v12609_v0 = vadd.f32 %v12608_v31, %v12607_v10  ;;  %v14515_v40 = vld [vmem:[%s15832_s16 + $0x810] ss:$12 sps:$4 sm:$0xff]   ;;  %v14520_v61 = vld [vmem:[%s15832_s16 + $0x82c] ss:$12 sps:$4 sm:$0xff]  }
0x19df   : > { %v17575_v27 = vadd.f32 %v12609_v0, %v10819_v59  ;;  %10684 = vmatpush1.bf16.msra.mxu1 %v14473_v20  ;;  %v14518_v59 = vld [vmem:[%s15832_s16 + $0x828] ss:$12 sps:$4 sm:$0xff]   ;;  %v14523_v0 = vld [vmem:[%s15832_s16 + $0x844] ss:$12 sps:$4 sm:$0xff]  }
0x19e0   : > { %10685 = vmatprep.subr.bf16.mxu1 %v14478_v7 }
0x19e3   : > { %10686 = vmatpush1.bf16.msra.mxu1 %v14476_v55 }
0x19e4   : > { %10687 = vmatprep.subr.bf16.mxu1 %v14481_v19 }
0x19e7   : > { %10688 = vmatpush1.bf16.msra.mxu1 %v14479_v54  ;;  %v14521_v54 = vld [vmem:[%s15832_s16 + $0x840] ss:$12 sps:$4 sm:$0xff]  }
0x19e8   : > { %10689 = vmatprep.subr.bf16.mxu1 %v14484_v49  ;;  %v14526_v49 = vld [vmem:[%s15832_s16 + $0x85c] ss:$12 sps:$4 sm:$0xff]  }
0x19eb   : > { %10690 = vmatpush1.bf16.msra.mxu1 %v14482_v9  ;;  %v14524_v9 = vld [vmem:[%s15832_s16 + $0x858] ss:$12 sps:$4 sm:$0xff]  }
0x19ec   : > { %10691 = vmatprep.subr.bf16.mxu1 %v14487_v5  ;;  %v14529_v5 = vld [vmem:[%s15832_s16 + $0x874] ss:$12 sps:$4 sm:$0xff]  }
0x19ef   : > { %10692 = vmatpush1.bf16.msra.mxu1 %v14485_v34  ;;  %v14527_v34 = vld [vmem:[%s15832_s16 + $0x870] ss:$12 sps:$4 sm:$0xff]  }
0x19f0   : > { %10693 = vmatprep.subr.bf16.mxu1 %v14490_v52  ;;  %v14530_v52 = vld [vmem:[%s15832_s16 + $0x888] ss:$12 sps:$4 sm:$0xff]  }
0x19f3   : > { %10694 = vmatpush1.bf16.msra.mxu1 %v14488_v35  ;;  %v14533_v35 = vld [vmem:[%s15832_s16 + $0x8a0] ss:$12 sps:$4 sm:$0xff]  }
0x19f4   : > { %10695 = vmatprep.subr.bf16.mxu1 %v14493_v16  ;;  %v14538_v16 = vld [vmem:[%s15832_s16 + $0x8bc] ss:$12 sps:$4 sm:$0xff]  }
0x19f7   : > { %10696 = vmatpush1.bf16.msra.mxu1 %v14491_v36 }
0x19f8   : > { %10697 = vmatprep.subr.bf16.mxu1 %v14496_v51 }
0x19fb   : > { %10698 = vmatpush1.bf16.msra.mxu1 %v14494_v46  ;;  %v14536_v46 = vld [vmem:[%s15832_s16 + $0x8b8] ss:$12 sps:$4 sm:$0xff]  }
0x19fc   : > { %10720 = vmatprep.subr.bf16.mxu1 %v14499_v47 }
0x19fe   : > { %10700 = vmatmul.mubr.bf16.vlgmr.msra.gmra.mrb[104].mxu1 %v17482_v56  ;;  %v14506_v56 = vld [vmem:[%s15832_s16 + $0x7c8] ss:$12 sps:$4 sm:$0xff]  }
0x19ff   : > { %10709 = vmatprep.mubr.bf16.mxu1 %v17507_v48  ;;  %10721 = vmatpush1.bf16.msra.mxu1 %v14497_v8  ;;  %v14511_v48 = vld [vmem:[%s15832_s16 + $0x7e4] ss:$12 sps:$4 sm:$0xff]  }
0x1a00   : > { %10722 = vmatprep.subr.bf16.mxu1 %v14502_v58  ;;  %v14541_v58 = vld [vmem:[%s15832_s16 + $0x8d4] ss:$12 sps:$4 sm:$0xff]  }
0x1a03   : > { %10723 = vmatpush1.bf16.msra.mxu1 %v14500_v57 }
0x1a04   : > { %10724 = vmatprep.subr.bf16.mxu1 %v14505_v23 }
0x1a06   : > { %10710 = vmatmul.mubr.bf16.gmra.mrb[108].mxu1 %v17502_v4 }
0x1a07   : > { %10725 = vmatpush1.bf16.msra.mxu1 %v14503_v53  ;;  %10752 = vmatprep.mubr.bf16.mxu1 %v17491_v41  ;;  %v14517_v41 = vld [vmem:[%s15832_s16 + $0x814] ss:$12 sps:$4 sm:$0xff]  }
0x1a08   : > { %10726 = vmatprep.subr.bf16.mxu1 %v14508_v50  ;;  %v14539_v50 = vld [vmem:[%s15832_s16 + $0x8d0] ss:$12 sps:$4 sm:$0xff]  }
0x1a0b   : > { %10727 = vmatpush1.bf16.msra.mxu1 %v14506_v56 }
0x1a0c   : > { %10728 = vmatprep.subr.bf16.mxu1 %v14511_v48  ;;  %v14544_v48 = vld [vmem:[%s15832_s16 + $0x8ec] ss:$12 sps:$4 sm:$0xff]  }
0x1a0d   : > { %v12626_v11 = vpop.f32.mrb[136].mxu0 }
0x1a0e   : > { %v12627_v43 = vpop.f32.mrb[137].mxu0 }
0x1a0f   : > { %10729 = vmatpush1.bf16.msra.mxu1 %v14509_v33  ;;  %v12628_v63 = vadd.f32 %v12627_v43, %v12626_v11  ;;  %v12629_v18 = vpop.f32.mrb[138].mxu0  ;;  %v14542_v11 = vld [vmem:[%s15832_s16 + $0x8e8] ss:$12 sps:$4 sm:$0xff]  }
0x1a10   : > { %10730 = vmatprep.subr.bf16.mxu1 %v14514_v39  ;;  %v12630_v4 = vpop.f32.mrb[139].mxu0 }
0x1a11   : > { %v10906_v15 = vadd.f32 %v12628_v63, %v17565_v3  ;;  %v12631_v1 = vadd.f32 %v12630_v4, %v12629_v18 }
0x1a13   : > { %v10909_v12 = vadd.f32 %v12631_v1, %v17567_v17  ;;  %10731 = vmatpush1.bf16.msra.mxu1 %v14512_v6 }
0x1a14   : > { %10732 = vmatprep.subr.bf16.mxu1 %v14517_v41 }
0x1a15   : > { %v12632_v10 = vpop.f32.mrb[140].mxu0 }
0x1a16   : > { %v12633_v20 = vpop.f32.mrb[141].mxu0 }
0x1a17   : > { %10733 = vmatpush1.bf16.msra.mxu1 %v14515_v40  ;;  %v12634_v31 = vadd.f32 %v12633_v20, %v12632_v10  ;;  %v12635_v7 = vpop.f32.mrb[142].mxu0 }
0x1a18   : > { %10734 = vmatprep.subr.bf16.mxu1 %v14520_v61  ;;  %v12636_v3 = vpop.f32.mrb[143].mxu0 }
0x1a19   : > { %v10914_v17 = vadd.f32 %v12634_v31, %v17573_v25  ;;  %v12637_v55 = vadd.f32 %v12636_v3, %v12635_v7  ;;  %v14532_v25 = vld [vmem:[%s15832_s16 + $0x88c] ss:$12 sps:$4 sm:$0xff]  }
0x1a1b   : > { %v10917_v19 = vadd.f32 %v12637_v55, %v17575_v27  ;;  %10735 = vmatpush1.bf16.msra.mxu1 %v14518_v59  ;;  %v14535_v27 = vld [vmem:[%s15832_s16 + $0x8a4] ss:$12 sps:$4 sm:$0xff]  }
0x1a1c   : > { %10736 = vmatprep.subr.bf16.mxu1 %v14523_v0 }
0x1a1f   : > { %10737 = vmatpush1.bf16.msra.mxu1 %v14521_v54 }
0x1a20   : > { %10738 = vmatprep.subr.bf16.mxu1 %v14526_v49 }
0x1a23   : > { %10739 = vmatpush1.bf16.msra.mxu1 %v14524_v9 }
0x1a24   : > { %10740 = vmatprep.subr.bf16.mxu1 %v14529_v5 }
0x1a27   : > { %10741 = vmatpush1.bf16.msra.mxu1 %v14527_v34 }
0x1a28   : > { %10742 = vmatprep.subr.bf16.mxu1 %v14532_v25 }
0x1a2b   : > { %10743 = vmatpush1.bf16.msra.mxu1 %v14530_v52 }
0x1a2c   : > { %10744 = vmatprep.subr.bf16.mxu1 %v14535_v27 }
0x1a2e   : > { %v12654_v36 = vpop.f32.mrb[144].mxu0 }
0x1a2f   : > { %10745 = vmatpush1.bf16.msra.mxu1 %v14533_v35  ;;  %v12655_v51 = vpop.f32.mrb[145].mxu0 }
0x1a30   : > { %v12656_v47 = vadd.f32 %v12655_v51, %v12654_v36  ;;  %v12657_v8 = vpop.f32.mrb[146].mxu0  ;;  %10746 = vmatprep.subr.bf16.mxu1 %v14538_v16 }
0x1a31   : > { %v12658_v57 = vpop.f32.mrb[147].mxu0 }
0x1a32   : > { %v10955_v23 = vadd.f32 %v12656_v47, %v10906_v15  ;;  %v12659_v53 = vadd.f32 %v12658_v57, %v12657_v8 }
0x1a33   : > { %10747 = vmatpush1.bf16.msra.mxu1 %v14536_v46 }
0x1a34   : > { %v10958_v56 = vadd.f32 %v12659_v53, %v10909_v12  ;;  %10748 = vmatprep.subr.bf16.mxu1 %v14541_v58 }
0x1a36   : > { %v12660_v33 = vpop.f32.mrb[148].mxu0 }
0x1a37   : > { %10749 = vmatpush1.bf16.msra.mxu1 %v14539_v50  ;;  %v12661_v39 = vpop.f32.mrb[149].mxu0 }
0x1a38   : > { %v12662_v43 = vadd.f32 %v12661_v39, %v12660_v33  ;;  %v12663_v63 = vpop.f32.mrb[150].mxu0  ;;  %10750 = vmatprep.subr.bf16.mxu1 %v14544_v48 }
0x1a39   : > { %v12664_v18 = vpop.f32.mrb[151].mxu0 }
0x1a3a   : > { %v10963_v6 = vadd.f32 %v12662_v43, %v10914_v17  ;;  %v12665_v4 = vadd.f32 %v12664_v18, %v12663_v63 }
0x1a3b   : > { %10751 = vmatpush1.bf16.msra.mxu1 %v14542_v11 }
0x1a3c   : > { %v10966_v41 = vadd.f32 %v12665_v4, %v10917_v19 }
0x1a3e   : > { %10753 = vmatmul.mubr.bf16.vlgmr.msra.gmra.mrb[104].mxu1 %v17485_v44 }
0x1a3f   : > { %10762 = vmatprep.mubr.bf16.mxu1 %v17510_v2 }
0x1a46   : > { %10763 = vmatmul.mubr.bf16.gmra.mrb[108].mxu1 %v17505_v42 }
0x1a6e   : > { %v12682_v15 = vpop.f32.mrb[152].mxu0 }
0x1a6f   : > { %v12683_v1 = vpop.f32.mrb[153].mxu0 }
0x1a70   : > { %v12684_v12 = vadd.f32 %v12683_v1, %v12682_v15  ;;  %v12685_v40 = vpop.f32.mrb[154].mxu0 }
0x1a71   : > { %v12686_v61 = vpop.f32.mrb[155].mxu0 }
0x1a72   : > { %v11004_v10 = vadd.f32 %v12684_v12, %v10955_v23  ;;  %v12687_v20 = vadd.f32 %v12686_v61, %v12685_v40 }
0x1a74   : > { %v11007_v31 = vadd.f32 %v12687_v20, %v10958_v56 }
0x1a76   : > { %v12688_v7 = vpop.f32.mrb[156].mxu0 }
0x1a77   : > { %v12689_v59 = vpop.f32.mrb[157].mxu0 }
0x1a78   : > { %v12690_v3 = vadd.f32 %v12689_v59, %v12688_v7  ;;  %v12691_v0 = vpop.f32.mrb[158].mxu0 }
0x1a79   : > { %v12692_v17 = vpop.f32.mrb[159].mxu0 }
0x1a7a   : > { %v11012_v55 = vadd.f32 %v12690_v3, %v10963_v6  ;;  %v12693_v19 = vadd.f32 %v12692_v17, %v12691_v0 }
0x1a7c   : > { %v11015_v44 = vadd.f32 %v12693_v19, %v10966_v41 }
0x1a8e   : > { %v12710_v54 = vpop.f32.mrb[160].mxu0 }
0x1a8f   : > { %v12711_v2 = vpop.f32.mrb[161].mxu0 }
0x1a90   : > { %v12712_v49 = vadd.f32 %v12711_v2, %v12710_v54  ;;  %v12713_v42 = vpop.f32.mrb[162].mxu0 }
0x1a91   : > { %v12714_v9 = vpop.f32.mrb[163].mxu0 }
0x1a92   : > { %v11053_v5 = vadd.f32 %v12712_v49, %v11004_v10  ;;  %v12715_v34 = vadd.f32 %v12714_v9, %v12713_v42 }
0x1a94   : > { %v11069_v25 = vadd.f32 %v11053_v5, %v16690_v37  ;;  %v11056_v52 = vadd.f32 %v12715_v34, %v11007_v31  ;;  %v8907_v37 = vrot.slane %v17556_v28, %v15991_v22 }
0x1a96   : > { %11081 = vst [vmem:[#allocation26 + $0x10] sm:$0xff] %v11069_v25  ;;  %v11072_v27 = vadd.f32 %v11056_v52, %v16698_v29  ;;  %v12716_v35 = vpop.f32.mrb[164].mxu0  ;;  %v8911_v29 = vrot.slane %v17556_v28, %v15985_v13 }
0x1a97   : > { %v12717_v16 = vpop.f32.mrb[165].mxu0 }
0x1a98   : > { %11084 = vst [vmem:[#allocation26 + $0x28] sm:$0xff] %v11072_v27  ;;  %v12718_v36 = vadd.f32 %v12717_v16, %v12716_v35  ;;  %v12719_v51 = vpop.f32.mrb[166].mxu0 }
0x1a99   : > { %v12720_v46 = vpop.f32.mrb[167].mxu0 }
0x1a9a   : > { %v11061_v47 = vadd.f32 %v12718_v36, %v11012_v55  ;;  %v12721_v8 = vadd.f32 %v12720_v46, %v12719_v51 }
0x1a9c   : > { %v11075_v58 = vadd.f32 %v11061_v47, %v16708_v32  ;;  %v11064_v57 = vadd.f32 %v12721_v8, %v11015_v44 }
0x1a9e   : > { %11087 = vst [vmem:[#allocation26 + $0x40] sm:$0xff] %v11075_v58  ;;  %v11078_v23 = vadd.f32 %v11064_v57, %v16701_v30 }
0x1aa0   : > { %11090 = vst [vmem:[#allocation26 + $0x58] sm:$0xff] %v11078_v23 }
0x1b11   : > { %v10754_v53 = vpop.f32.mrb[104].mxu1 }
0x1b12   : > { %v13054_v50 = vadd.f32 %v10754_v53, %v8907_v37  ;;  %v10756_v56 = vpop.f32.mrb[105].mxu1 }
0x1b13   : > { %v13055_v48 = vadd.f32 %v10756_v56, %v8911_v29  ;;  %v10758_v33 = vpop.f32.mrb[106].mxu1 }
0x1b14   : > { %v11067_v39 = vadd.f32 %v13054_v50, %v16675_v38  ;;  %v13056_v11 = vadd.f32 %v10758_v33, %v8907_v37  ;;  %v10760_v32 = vpop.f32.mrb[107].mxu1 }
0x1b15   : > { %v11068_v43 = vadd.f32 %v13055_v48, %v16677_v26  ;;  %v13057_v63 = vadd.f32 %v10760_v32, %v8911_v29 }
0x1b16   : > { %11079 = vst [vmem:[#allocation26] sm:$0xff] %v11067_v39  ;;  %v11070_v30 = vadd.f32 %v13056_v11, %v16680_v62 }
0x1b17   : > { %11080 = vst [vmem:[#allocation26 + $0x8] sm:$0xff] %v11068_v43  ;;  %v11071_v22 = vadd.f32 %v13057_v63, %v16682_v45 }
0x1b18   : > { %11082 = vst [vmem:[#allocation26 + $0x18] sm:$0xff] %v11070_v30 }
0x1b19   : > { %11083 = vst [vmem:[#allocation26 + $0x20] sm:$0xff] %v11071_v22  ;;  %v10764_v13 = vpop.f32.mrb[108].mxu1 }
0x1b1a   : > { %v13058_v28 = vadd.f32 %v10764_v13, %v8907_v37  ;;  %v10766_v18 = vpop.f32.mrb[109].mxu1 }
0x1b1b   : > { %v13059_v6 = vadd.f32 %v10766_v18, %v8911_v29  ;;  %v10768_v4 = vpop.f32.mrb[110].mxu1 }
0x1b1c   : > { %v11073_v38 = vadd.f32 %v13058_v28, %v16684_v24  ;;  %v13060_v26 = vadd.f32 %v10768_v4, %v8907_v37  ;;  %v10770_v41 = vpop.f32.mrb[111].mxu1 }
0x1b1d   : > { %v11074_v62 = vadd.f32 %v13059_v6, %v16688_v21  ;;  %v13061_v15 = vadd.f32 %v10770_v41, %v8911_v29 }
0x1b1e   : > { %11085 = vst [vmem:[#allocation26 + $0x30] sm:$0xff] %v11073_v38  ;;  %v11076_v45 = vadd.f32 %v13060_v26, %v16692_v60 }
0x1b1f   : > { %11086 = vst [vmem:[#allocation26 + $0x38] sm:$0xff] %v11074_v62  ;;  %v11077_v1 = vadd.f32 %v13061_v15, %v16696_v14 }
0x1b20   : > { %11088 = vst [vmem:[#allocation26 + $0x48] sm:$0xff] %v11076_v45 }
0x1b21   : > { %11089 = vst [vmem:[#allocation26 + $0x50] sm:$0xff] %v11077_v1 }
0x1b22   : > { %15076 = shalt.err (!%p15073_p7)
}
0x1b23   : > { %s17768_s18 = sld [smem:[#allocation49_spill]] }
0x1b29   : > { %s15077_s25 = scalar_lea.hbm %s17768_s18, 1536 }
0x1b2a   : > { %p15078_p9 = scmp.ne.s32.totalorder %s17768_s18, %s15077_s25  ;;  %p15083_p8 = scmp.lt.u32.totalorder %s15077_s25, %s17768_s18 }
0x1b2c   : > { %p15079_p11 = pnand %p15078_p9, %p13296_p10 }
0x1b2e   : > { %p15080_p13 = pneg %p15079_p11 }
0x1b30   : > { %p15085_p5 = pnand %p15083_p8, %p15080_p13 }
0x1b32   : > { %15088 = shalt.err (!%p15085_p5)
}
0x1b33   : > { %s15183_s19 = smov 384   ;;  %s15184_s3 = smov 24  }
0x1b34   : > { %13287 = dma.vmem_to_hbm [thread:$0]  (%p13296_p10), %s11098_s7, 1536, %s17768_s18, [#allocation5], %s15183_s19, %s15183_s19, %s15184_s3  }
0x1b35   : > { %15138 = dma.done.wait (%p13296_p10), [#allocation5], 1536  }
0x1b36   : > { %15140 = vsyncadd (%p13296_p10), [#allocation5], 4294965760 }
0x1b37 PF: > { %s17769_s16 = sld [smem:[#allocation39_spill]]  ;;  %s17770_s29 = sld [smem:[#allocation36_spill]] }
0x1b38   : > { %s17771_s30 = sld [smem:[#allocation37_spill]]  ;;  %s17772_s15 = sld [smem:[#allocation40_spill]] }
0x1b3d   : > { %p44_p1 = scmp.ge.s32.totalorder %s17769_s16, 8  }
0x1b3f   :  { %46 = sbr.rel (!%p44_p1) target bundleno = 25 (0x19), region = 266 }
0x1b46   :  { %11113 = vsyncpa [#allocation4], 1 }
0x1b47   :  { %11115 = vsyncpa [#allocation4 + $0x1], 1 }
0x1b48   :  { %11116 = vsyncpa [#allocation7], 1 }
0x1b49   :  { %11118 = vsyncpa [#allocation7 + $0x1], 1 }
0x1b4a   :  { %11119 = vsyncpa [#allocation10], 1 }
0x1b4b   :  { %11121 = vsyncpa [#allocation10 + $0x1], 1 }
0x1b4c   :  { %11122 = vsyncpa [#allocation13], 1 }
0x1b4d   :  { %11124 = vsyncpa [#allocation13 + $0x1], 1 }
0x1b4e   :  { %11125 = vsyncpa [#allocation16], 1 }
0x1b4f   :  { %11127 = vsyncpa [#allocation16 + $0x1], 1 }
0x1b50   :  { %11128 = vsyncpa [#allocation19], 1 }
0x1b51   :  { %11130 = vsyncpa [#allocation19 + $0x1], 1 }
0x1b52   :  { %11131 = vsyncpa [#allocation22], 1 }
0x1b53   :  { %11133 = vsyncpa [#allocation22 + $0x1], 1 }
0x1b54   :  { %11134 = vsyncpa [#allocation25], 1 }
0x1b55   :  { %11136 = vsyncpa [#allocation25 + $0x1], 1 }
0x1b56   :  { %11137 = vsyncpa [#allocation5], 1 }
0x1b57   :  { %11139 = vsyncpa [#allocation5 + $0x1], 1 }

</bundles_post_ra>
